<compile_context>
chip_gen: v6e
topology: v6e:2x2x1
jax: 0.10.0
libtpu: 0.0.40
codegen_flags: <defaults>
</compile_context>

<pallas_src>
import functools
import math

import jax
import jax.numpy as jnp
from jax.experimental import pallas as pl
from jax.experimental.pallas import tpu as pltpu

# ---- small-model config (consistent with the module; shrunk for the demo) ----
IMG_CHANNELS = 3
IMG_SIZE = 32          # -> attention embed dim (IMG_SIZE // 16)**2 = 4
EMBED_DIM = 8
TEMB_DIM = 4
HIDDEN_DIM = 16
DEPTH = 2
BATCH = 2

LANE = 128             # lane-dense output padding target


# ================================ Pallas kernels ================================

def _down_gemm_kernel(cols_ref, w_ref, b_ref, o_ref):
    # Conv2d-as-GEMM (bf16 operands, f32 acc) + bias + BatchNorm2d
    # (training-mode batch stats over all rows, gamma=1, beta=0, eps=1e-5)
    # + LeakyReLU(0.2).  Columns beyond Cout are zero padding (lane density).
    # TODO(synk): trained / eval-mode BN (running stats, affine params) not modeled.
    acc = jnp.dot(cols_ref[...], w_ref[...],
                  preferred_element_type=jnp.float32) + b_ref[...]
    mu = jnp.mean(acc, axis=0, keepdims=True)
    var = jnp.mean(jnp.square(acc - mu), axis=0, keepdims=True)
    xhat = (acc - mu) * jax.lax.rsqrt(var + 1e-5)
    o_ref[...] = jnp.where(xhat > 0, xhat, 0.2 * xhat)


def _up_gemm_kernel(cols_ref, w_ref, b_ref, o_ref, *, relu):
    # ConvTranspose2d stride-phase GEMM (bf16 operands, f32 acc) + bias (+ ReLU).
    acc = jnp.dot(cols_ref[...], w_ref[...],
                  preferred_element_type=jnp.float32) + b_ref[...]
    if relu:
        acc = jnp.maximum(acc, 0.0)
    o_ref[...] = acc


def _attn_stage_kernel(t_ref, w1_ref, b1_ref, w2_ref, b2_ref, x4_ref,
                       wq_ref, wk_ref, wv_ref, wo_ref,
                       bq_ref, bk_ref, bv_ref, bo_ref, o_ref, *, depth, scale):
    # Fused: temb MLP (Linear -> SiLU -> Linear), token concat, and `depth`
    # single-head attention layers (num_heads=1, dropout=0, batch_first) with
    # residual adds — one pallas_call for the whole bottleneck stage.
    h = jnp.dot(t_ref[...], w1_ref[...],
                preferred_element_type=jnp.float32) + b1_ref[...]
    h = h * jax.nn.sigmoid(h)                                   # SiLU
    temb = jnp.dot(h, w2_ref[...],
                   preferred_element_type=jnp.float32) + b2_ref[...]   # (B, Ce)

    B, C4, E = x4_ref.shape
    Ce = temb.shape[1]
    L = C4 + Ce
    t_tok = jnp.broadcast_to(temb[:, :, None], (B, Ce, E))      # (B, Ce, E)

    # Build the token matrix for all batches: rows = [x4_b0 | temb_b0 | x4_b1 | ...]
    pieces = []
    for bi in range(B):
        pieces.append(x4_ref[bi])        # (C4, E)
        pieces.append(t_tok[bi])         # (Ce, E)
    xf = jnp.concatenate(pieces, axis=0)                        # (B*L, E)

    for d in range(depth):               # static unroll over attention layers
        q = jnp.dot(xf, wq_ref[d], preferred_element_type=jnp.float32) + bq_ref[d]
        k = jnp.dot(xf, wk_ref[d], preferred_element_type=jnp.float32) + bk_ref[d]
        v = jnp.dot(xf, wv_ref[d], preferred_element_type=jnp.float32) + bv_ref[d]
        ctx = []
        for bi in range(B):              # static unroll over (tiny) batch
            sl = slice(bi * L, (bi + 1) * L)
            s = jax.lax.dot_general(q[sl], k[sl], (((1,), (1,)), ((), ())),
                                    preferred_element_type=jnp.float32) * scale
            p = jax.nn.softmax(s, axis=-1)
            ctx.append(jnp.dot(p, v[sl], preferred_element_type=jnp.float32))
        a = jnp.concatenate(ctx, axis=0)                        # (B*L, E)
        xf = xf + jnp.dot(a, wo_ref[d],
                          preferred_element_type=jnp.float32) + bo_ref[d]

    for bi in range(B):
        o_ref[bi] = xf[bi * L:(bi + 1) * L]


# ================================ glue / wrappers ================================

def _pad_cols_2d(a, n_to):
    return jnp.pad(a, ((0, 0), (0, n_to - a.shape[1])))


def down_block(x_nhwc, w, b):
    """Conv2d(k=3,s=2,p=1) + BatchNorm2d (training batch stats) + LeakyReLU(0.2).
    Dropout(p=0.0) is identity.  BN stats require full-M, so grid=(1,) on M."""
    B, H, W, Cin = x_nhwc.shape
    Cout = w.shape[0]
    Ho, Wo = H // 2, W // 2
    xp = jnp.pad(x_nhwc, ((0, 0), (1, 1), (1, 1), (0, 0)))
    # NHWC im2col: channel-last contiguous gather, columns ordered (kh, kw, ci).
    # TODO(synk): move patch extraction in-kernel (shifted loads) for large images.
    patches = [xp[:, kh:kh + 2 * Ho:2, kw:kw + 2 * Wo:2, :]
               for kh in range(3) for kw in range(3)]
    cols = jnp.concatenate(patches, axis=-1).reshape(B * Ho * Wo, 9 * Cin)
    wmat = jnp.transpose(w, (2, 3, 1, 0)).reshape(9 * Cin, Cout)
    wpad = _pad_cols_2d(wmat, LANE).astype(jnp.bfloat16)
    bpad = _pad_cols_2d(b[None, :].astype(jnp.float32), LANE)

    M, K = cols.shape
    out = pl.pallas_call(
        _down_gemm_kernel,
        out_shape=jax.ShapeDtypeStruct((M, LANE), jnp.float32),
        grid=(1,),
        in_specs=[pl.BlockSpec((M, K), lambda i: (0, 0)),
                  pl.BlockSpec((K, LANE), lambda i: (0, 0)),
                  pl.BlockSpec((1, LANE), lambda i: (0, 0))],
        out_specs=pl.BlockSpec((M, LANE), lambda i: (0, 0)),
        compiler_params=pltpu.CompilerParams(dimension_semantics=("arbitrary",)),
        cost_estimate=pl.CostEstimate(
            flops=2 * M * K * LANE, transcendentals=0,
            bytes_accessed=2 * M * K + 2 * K * LANE + 4 * M * LANE),
    )(cols.astype(jnp.bfloat16), wpad, bpad)
    return out[:, :Cout].reshape(B, Ho, Wo, Cout)


def up_block(x_nhwc, wt, b, relu):
    """ConvTranspose2d(k=3,s=2,p=1,output_padding=1) (+ ReLU unless final) via a
    stride-phase GEMM: 2x2 forward-shift window (K=4*Cin) -> four output parity
    phases (N=4*Cout).  No zero-dilated input is materialized."""
    B, H, W, Cin = x_nhwc.shape
    Cout = wt.shape[1]

    # Forward-shift taps: s00=in[a,b], s01=in[a,b+1], s10=in[a+1,b], s11=in[a+1,b+1]
    s00 = x_nhwc
    s01 = jnp.pad(x_nhwc[:, :, 1:, :], ((0, 0), (0, 0), (0, 1), (0, 0)))
    s10 = jnp.pad(x_nhwc[:, 1:, :, :], ((0, 0), (0, 1), (0, 0), (0, 0)))
    s11 = jnp.pad(x_nhwc[:, 1:, 1:, :], ((0, 0), (0, 1), (0, 1), (0, 0)))
    cols = jnp.concatenate([s00, s01, s10, s11], axis=-1).reshape(B * H * W, 4 * Cin)

    # Phase weight matrix (4*Cin, 4*Cout); column blocks = phases (ee, eo, oe, oo).
    Z = jnp.zeros((Cin, Cout), wt.dtype)
    tap = lambda kh, kw: wt[:, :, kh, kw]
    w_ee = jnp.concatenate([tap(1, 1), Z, Z, Z], axis=0)
    w_eo = jnp.concatenate([tap(1, 2), tap(1, 0), Z, Z], axis=0)
    w_oe = jnp.concatenate([tap(2, 1), Z, tap(0, 1), Z], axis=0)
    w_oo = jnp.concatenate([tap(2, 2), tap(2, 0), tap(0, 2), tap(0, 0)], axis=0)
    wbig = jnp.concatenate([w_ee, w_eo, w_oe, w_oo], axis=1)      # (4*Cin, 4*Cout)
    bias4 = jnp.tile(b, 4)[None, :].astype(jnp.float32)

    Nout = 4 * Cout
    Np = max(LANE, ((Nout + LANE - 1) // LANE) * LANE)
    wpad = _pad_cols_2d(wbig, Np).astype(jnp.bfloat16)
    bpad = _pad_cols_2d(bias4, Np)

    M, K = cols.shape
    tm = 256 if (M > 256 and M % 256 == 0) else M                 # M-tiling (v7x cores)
    kern = functools.partial(_up_gemm_kernel, relu=relu)
    out = pl.pallas_call(
        kern,
        out_shape=jax.ShapeDtypeStruct((M, Np), jnp.float32),
        grid=(M // tm,),
        in_specs=[pl.BlockSpec((tm, K), lambda i: (i, 0)),
                  pl.BlockSpec((K, Np), lambda i: (0, 0)),
                  pl.BlockSpec((1, Np), lambda i: (0, 0))],
        out_specs=pl.BlockSpec((tm, Np), lambda i: (i, 0)),
        compiler_params=pltpu.CompilerParams(dimension_semantics=("parallel",)),
        cost_estimate=pl.CostEstimate(
            flops=2 * M * K * Np, transcendentals=0,
            bytes_accessed=2 * M * K + 2 * K * Np + 4 * M * Np),
    )(cols.astype(jnp.bfloat16), wpad, bpad)

    # Interleave the four phases back into (B, 2H, 2W, Cout).
    out = out[:, :Nout].reshape(B, H, W, 2, 2, Cout)
    out = out.transpose(0, 1, 3, 2, 4, 5).reshape(B, 2 * H, 2 * W, Cout)
    return out


def attention_stage(x4_nhwc, t_raw, temb_params, attn_params):
    """One fused pallas_call: temb MLP + token concat + DEPTH attention layers."""
    B, Hs, Ws, C4 = x4_nhwc.shape
    S = Hs * Ws
    E = S
    x4_tok = jnp.transpose(x4_nhwc, (0, 3, 1, 2)).reshape(B, C4, S)   # tokens = channels
    w1, b1, w2, b2 = temb_params
    Ce = w2.shape[0]
    L = C4 + Ce
    D = len(attn_params)

    wq = jnp.stack([p[0][:E, :].T for p in attn_params])
    wk = jnp.stack([p[0][E:2 * E, :].T for p in attn_params])
    wv = jnp.stack([p[0][2 * E:, :].T for p in attn_params])
    bq = jnp.stack([p[1][:E][None, :] for p in attn_params])
    bk = jnp.stack([p[1][E:2 * E][None, :] for p in attn_params])
    bv = jnp.stack([p[1][2 * E:][None, :] for p in attn_params])
    wo = jnp.stack([p[2].T for p in attn_params])
    bo = jnp.stack([p[3][None, :] for p in attn_params])

    def fs(shape):
        return pl.BlockSpec(shape, lambda i, _r=len(shape): (0,) * _r)

    kern = functools.partial(_attn_stage_kernel, depth=D, scale=1.0 / math.sqrt(E))
    return pl.pallas_call(
        kern,
        out_shape=jax.ShapeDtypeStruct((B, L, E), jnp.float32),
        grid=(1,),
        in_specs=[fs(t_raw.shape), fs((TEMB_DIM, HIDDEN_DIM)), fs((1, HIDDEN_DIM)),
                  fs((HIDDEN_DIM, Ce)), fs((1, Ce)), fs((B, C4, S)),
                  fs((D, E, E)), fs((D, E, E)), fs((D, E, E)), fs((D, E, E)),
                  fs((D, 1, E)), fs((D, 1, E)), fs((D, 1, E)), fs((D, 1, E))],
        out_specs=fs((B, L, E)),
        compiler_params=pltpu.CompilerParams(dimension_semantics=("arbitrary",)),
    )(t_raw, w1.T, b1[None, :], w2.T, b2[None, :], x4_tok,
      wq, wk, wv, wo, bq, bk, bv, bo)


def get_time_embedding(timesteps, embedding_dim):
    half = embedding_dim // 2
    fac = math.log(10000.0) / (half - 1)
    freqs = jnp.exp(jnp.arange(half, dtype=jnp.float32) * -fac)
    args = timesteps.astype(jnp.float32)[:, None] * freqs[None, :]
    emb = jnp.concatenate([jnp.sin(args), jnp.cos(args)], axis=-1)
    # TODO(synk): odd embedding_dim would need an F.pad — not hit with temb_dim=4.
    return emb


# ================================ full forward ================================

def diffusion_forward(params, x, t):
    # NCHW -> NHWC once at the boundary; NHWC end-to-end internally.
    xh = jnp.transpose(x, (0, 2, 3, 1))

    x1 = down_block(xh, *params["down1"])
    x2 = down_block(x1, *params["down2"])
    x3 = down_block(x2, *params["down3"])
    x4 = down_block(x3, *params["down4"])

    t_raw = get_time_embedding(t, TEMB_DIM)
    xa = attention_stage(x4, t_raw, params["temb"], params["attn"])   # (B, L, S)

    B = x.shape[0]
    S = xa.shape[2]
    h = int(math.sqrt(S))
    # torch: x4.transpose(1,2).reshape(B, -1, h, h)  (channel/spatial shuffle kept)
    x4r = jnp.transpose(xa, (0, 2, 1)).reshape(B, -1, h, h)           # NCHW, returned
    x4r_nhwc = jnp.transpose(x4r, (0, 2, 3, 1))

    u = up_block(x4r_nhwc, *params["up1"], relu=True)
    u = jnp.concatenate([u, x3], axis=-1)
    u = up_block(u, *params["up2"], relu=True)
    u = jnp.concatenate([u, x2], axis=-1)
    u = up_block(u, *params["up3"], relu=True)
    u = jnp.concatenate([u, x1], axis=-1)
    u = up_block(u, *params["up4"], relu=False)

    out = jnp.transpose(u, (0, 3, 1, 2))                              # back to NCHW
    return x4r, out


# ================================ parameter init ================================

def init_params(seed=0):
    keys = iter(jax.random.split(jax.random.PRNGKey(seed), 64))

    def nrm(shape, scale):
        return jax.random.normal(next(keys), shape, jnp.float32) * scale

    def conv(cout, cin, k=3):         # nn.Conv2d weight layout (Cout, Cin, k, k)
        return nrm((cout, cin, k, k), 1.0 / math.sqrt(cin * k * k)), nrm((cout,), 0.01)

    def convT(cin, cout, k=3):        # nn.ConvTranspose2d weight layout (Cin, Cout, k, k)
        return nrm((cin, cout, k, k), 1.0 / math.sqrt(cin * k * k)), nrm((cout,), 0.01)

    def linear(out_f, in_f):          # nn.Linear weight layout (out, in)
        return nrm((out_f, in_f), 1.0 / math.sqrt(in_f)), nrm((out_f,), 0.01)

    E = EMBED_DIM
    Ea = (IMG_SIZE // 16) ** 2
    p = {}
    p["down1"] = conv(E, IMG_CHANNELS)
    p["down2"] = conv(2 * E, E)
    p["down3"] = conv(4 * E, 2 * E)
    p["down4"] = conv(8 * E, 4 * E)
    p["up1"] = convT(8 * E + E, 4 * E)
    p["up2"] = convT(8 * E, 2 * E)
    p["up3"] = convT(4 * E, E)
    p["up4"] = convT(2 * E, IMG_CHANNELS)
    w1, b1 = linear(HIDDEN_DIM, TEMB_DIM)
    w2, b2 = linear(E, HIDDEN_DIM)
    p["temb"] = (w1, b1, w2, b2)
    attn = []
    for _ in range(DEPTH):
        in_w, in_b = linear(3 * Ea, Ea)       # nn.MultiheadAttention in_proj
        out_w, out_b = linear(Ea, Ea)         # out_proj
        attn.append((in_w, in_b, out_w, out_b))
    p["attn"] = attn
    return p


if __name__ == "__main__":
    params = init_params(0)
    kx, kt = jax.random.split(jax.random.PRNGKey(0))
    x = jax.random.normal(kx, (BATCH, IMG_CHANNELS, IMG_SIZE, IMG_SIZE), jnp.float32)
    t = jax.random.randint(kt, (BATCH,), 0, 1000)

    x4_feats, out = jax.jit(diffusion_forward)(params, x, t)
    jax.block_until_ready((x4_feats, out))

    assert x4_feats.shape == (BATCH, 8 * EMBED_DIM + EMBED_DIM,
                              IMG_SIZE // 16, IMG_SIZE // 16)
    assert out.shape == (BATCH, IMG_CHANNELS, IMG_SIZE, IMG_SIZE)
    assert bool(jnp.all(jnp.isfinite(out)))
    print("KERNEL_OK")
</pallas_src>

<mosaic_0001>
module attributes {stable_mosaic.version = 11 : i64} {
  func.func @_down_gemm_kernel(%arg0: i32, %arg1: memref<512x27xbf16, #tpu.memory_space<vmem>>, %arg2: memref<27x128xbf16, #tpu.memory_space<vmem>>, %arg3: memref<1x128xf32, #tpu.memory_space<vmem>>, %arg4: memref<512x128xf32, #tpu.memory_space<vmem>>) attributes {dimension_semantics = [#tpu.dimension_semantics<arbitrary>], iteration_bounds = array<i64: 1>, scalar_prefetch = 0 : i64, scratch_operands = 0 : i64, tpu.core_type = #tpu.core_type<tc>, window_params = [{pipeline_mode = #tpu.pipeline_mode<synchronous>, transform_indices = @transform_0, window_bounds = array<i64: 512, 27>}, {pipeline_mode = #tpu.pipeline_mode<synchronous>, transform_indices = @transform_1, window_bounds = array<i64: 27, 128>}, {pipeline_mode = #tpu.pipeline_mode<synchronous>, transform_indices = @transform_2, window_bounds = array<i64: 1, 128>}, {pipeline_mode = #tpu.pipeline_mode<synchronous>, transform_indices = @transform_3, window_bounds = array<i64: 512, 128>}]} {
    %c0 = arith.constant 0 : index
    %c0_0 = arith.constant 0 : index
    %0 = vector.load %arg1[%c0, %c0_0] : memref<512x27xbf16, #tpu.memory_space<vmem>>, vector<512x27xbf16>
    %c0_1 = arith.constant 0 : index
    %c0_2 = arith.constant 0 : index
    %1 = vector.load %arg2[%c0_1, %c0_2] : memref<27x128xbf16, #tpu.memory_space<vmem>>, vector<27x128xbf16>
    %cst = arith.constant dense<0.000000e+00> : vector<512x128xf32>
    %2 = tpu.matmul %0, %1, %cst {dimension_numbers = #tpu.dot_dimension_numbers<[1], [0], [0], [1], [0, 0, 1, 1], [], []>} : vector<512x27xbf16>, vector<27x128xbf16>, vector<512x128xf32> -> vector<512x128xf32>
    %c0_3 = arith.constant 0 : index
    %c0_4 = arith.constant 0 : index
    %3 = vector.load %arg3[%c0_3, %c0_4] : memref<1x128xf32, #tpu.memory_space<vmem>>, vector<1x128xf32>
    %4 = vector.broadcast %3 : vector<1x128xf32> to vector<512x128xf32>
    %5 = arith.addf %2, %4 : vector<512x128xf32>
    %cst_5 = arith.constant dense<0.000000e+00> : vector<128xf32>
    %6 = vector.multi_reduction <add>, %5, %cst_5 [0] : vector<512x128xf32> to vector<128xf32>
    %7 = vector.shape_cast %6 : vector<128xf32> to vector<1x128xf32>
    %cst_6 = arith.constant 5.120000e+02 : f32
    %8 = vector.broadcast %cst_6 : f32 to vector<1x128xf32>
    %9 = arith.divf %7, %8 : vector<1x128xf32>
    %10 = vector.broadcast %9 : vector<1x128xf32> to vector<512x128xf32>
    %11 = arith.subf %5, %10 : vector<512x128xf32>
    %12 = arith.mulf %11, %11 : vector<512x128xf32>
    %cst_7 = arith.constant dense<0.000000e+00> : vector<128xf32>
    %13 = vector.multi_reduction <add>, %12, %cst_7 [0] : vector<512x128xf32> to vector<128xf32>
    %14 = vector.shape_cast %13 : vector<128xf32> to vector<1x128xf32>
    %cst_8 = arith.constant 5.120000e+02 : f32
    %15 = vector.broadcast %cst_8 : f32 to vector<1x128xf32>
    %16 = arith.divf %14, %15 : vector<1x128xf32>
    %17 = vector.broadcast %9 : vector<1x128xf32> to vector<512x128xf32>
    %18 = arith.subf %5, %17 : vector<512x128xf32>
    %cst_9 = arith.constant 9.99999974E-6 : f32
    %19 = vector.broadcast %cst_9 : f32 to vector<1x128xf32>
    %20 = arith.addf %16, %19 : vector<1x128xf32>
    %21 = math.rsqrt %20 : vector<1x128xf32>
    %22 = vector.broadcast %21 : vector<1x128xf32> to vector<512x128xf32>
    %23 = arith.mulf %18, %22 : vector<512x128xf32>
    %cst_10 = arith.constant 0.000000e+00 : f32
    %24 = vector.broadcast %cst_10 : f32 to vector<512x128xf32>
    %25 = arith.cmpf ogt, %23, %24 : vector<512x128xf32>
    %cst_11 = arith.constant 2.000000e-01 : f32
    %26 = vector.broadcast %cst_11 : f32 to vector<512x128xf32>
    %27 = arith.mulf %26, %23 : vector<512x128xf32>
    %28 = arith.select %25, %23, %27 : vector<512x128xi1>, vector<512x128xf32>
    %c0_12 = arith.constant 0 : index
    %c0_13 = arith.constant 0 : index
    %29 = vector.load %arg4[%c0_12, %c0_13] : memref<512x128xf32, #tpu.memory_space<vmem>>, vector<512x128xf32>
    tpu.vector_store %arg4[%c0_12, %c0_13], %28 {strides = array<i32>} : memref<512x128xf32, #tpu.memory_space<vmem>>, vector<512x128xf32>,
    return
  }
  func.func @transform_0(%arg0: i32) -> (i32, i32) {
    %c0_i32 = arith.constant 0 : i32
    %c0_i32_0 = arith.constant 0 : i32
    %c0_i32_1 = arith.constant 0 : i32
    return %c0_i32, %c0_i32_0 : i32, i32
  }
  func.func @transform_1(%arg0: i32) -> (i32, i32) {
    %c0_i32 = arith.constant 0 : i32
    %c0_i32_0 = arith.constant 0 : i32
    %c0_i32_1 = arith.constant 0 : i32
    return %c0_i32, %c0_i32_0 : i32, i32
  }
  func.func @transform_2(%arg0: i32) -> (i32, i32) {
    %c0_i32 = arith.constant 0 : i32
    %c0_i32_0 = arith.constant 0 : i32
    %c0_i32_1 = arith.constant 0 : i32
    return %c0_i32, %c0_i32_0 : i32, i32
  }
  func.func @transform_3(%arg0: i32) -> (i32, i32) {
    %c0_i32 = arith.constant 0 : i32
    %c0_i32_0 = arith.constant 0 : i32
    %c0_i32_1 = arith.constant 0 : i32
    return %c0_i32, %c0_i32_0 : i32, i32
  }
}

module attributes {stable_mosaic.version = 11 : i64} {
  func.func @_down_gemm_kernel(%arg0: i32, %arg1: memref<128x72xbf16, #tpu.memory_space<vmem>>, %arg2: memref<72x128xbf16, #tpu.memory_space<vmem>>, %arg3: memref<1x128xf32, #tpu.memory_space<vmem>>, %arg4: memref<128x128xf32, #tpu.memory_space<vmem>>) attributes {dimension_semantics = [#tpu.dimension_semantics<arbitrary>], iteration_bounds = array<i64: 1>, scalar_prefetch = 0 : i64, scratch_operands = 0 : i64, tpu.core_type = #tpu.core_type<tc>, window_params = [{pipeline_mode = #tpu.pipeline_mode<synchronous>, transform_indices = @transform_0, window_bounds = array<i64: 128, 72>}, {pipeline_mode = #tpu.pipeline_mode<synchronous>, transform_indices = @transform_1, window_bounds = array<i64: 72, 128>}, {pipeline_mode = #tpu.pipeline_mode<synchronous>, transform_indices = @transform_2, window_bounds = array<i64: 1, 128>}, {pipeline_mode = #tpu.pipeline_mode<synchronous>, transform_indices = @transform_3, window_bounds = array<i64: 128, 128>}]} {
    %c0 = arith.constant 0 : index
    %c0_0 = arith.constant 0 : index
    %0 = vector.load %arg1[%c0, %c0_0] : memref<128x72xbf16, #tpu.memory_space<vmem>>, vector<128x72xbf16>
    %c0_1 = arith.constant 0 : index
    %c0_2 = arith.constant 0 : index
    %1 = vector.load %arg2[%c0_1, %c0_2] : memref<72x128xbf16, #tpu.memory_space<vmem>>, vector<72x128xbf16>
    %cst = arith.constant dense<0.000000e+00> : vector<128x128xf32>
    %2 = tpu.matmul %0, %1, %cst {dimension_numbers = #tpu.dot_dimension_numbers<[1], [0], [0], [1], [0, 0, 1, 1], [], []>} : vector<128x72xbf16>, vector<72x128xbf16>, vector<128x128xf32> -> vector<128x128xf32>
    %c0_3 = arith.constant 0 : index
    %c0_4 = arith.constant 0 : index
    %3 = vector.load %arg3[%c0_3, %c0_4] : memref<1x128xf32, #tpu.memory_space<vmem>>, vector<1x128xf32>
    %4 = vector.broadcast %3 : vector<1x128xf32> to vector<128x128xf32>
    %5 = arith.addf %2, %4 : vector<128x128xf32>
    %cst_5 = arith.constant dense<0.000000e+00> : vector<128xf32>
    %6 = vector.multi_reduction <add>, %5, %cst_5 [0] : vector<128x128xf32> to vector<128xf32>
    %7 = vector.shape_cast %6 : vector<128xf32> to vector<1x128xf32>
    %cst_6 = arith.constant 1.280000e+02 : f32
    %8 = vector.broadcast %cst_6 : f32 to vector<1x128xf32>
    %9 = arith.divf %7, %8 : vector<1x128xf32>
    %10 = vector.broadcast %9 : vector<1x128xf32> to vector<128x128xf32>
    %11 = arith.subf %5, %10 : vector<128x128xf32>
    %12 = arith.mulf %11, %11 : vector<128x128xf32>
    %cst_7 = arith.constant dense<0.000000e+00> : vector<128xf32>
    %13 = vector.multi_reduction <add>, %12, %cst_7 [0] : vector<128x128xf32> to vector<128xf32>
    %14 = vector.shape_cast %13 : vector<128xf32> to vector<1x128xf32>
    %cst_8 = arith.constant 1.280000e+02 : f32
    %15 = vector.broadcast %cst_8 : f32 to vector<1x128xf32>
    %16 = arith.divf %14, %15 : vector<1x128xf32>
    %17 = vector.broadcast %9 : vector<1x128xf32> to vector<128x128xf32>
    %18 = arith.subf %5, %17 : vector<128x128xf32>
    %cst_9 = arith.constant 9.99999974E-6 : f32
    %19 = vector.broadcast %cst_9 : f32 to vector<1x128xf32>
    %20 = arith.addf %16, %19 : vector<1x128xf32>
    %21 = math.rsqrt %20 : vector<1x128xf32>
    %22 = vector.broadcast %21 : vector<1x128xf32> to vector<128x128xf32>
    %23 = arith.mulf %18, %22 : vector<128x128xf32>
    %cst_10 = arith.constant 0.000000e+00 : f32
    %24 = vector.broadcast %cst_10 : f32 to vector<128x128xf32>
    %25 = arith.cmpf ogt, %23, %24 : vector<128x128xf32>
    %cst_11 = arith.constant 2.000000e-01 : f32
    %26 = vector.broadcast %cst_11 : f32 to vector<128x128xf32>
    %27 = arith.mulf %26, %23 : vector<128x128xf32>
    %28 = arith.select %25, %23, %27 : vector<128x128xi1>, vector<128x128xf32>
    %c0_12 = arith.constant 0 : index
    %c0_13 = arith.constant 0 : index
    %29 = vector.load %arg4[%c0_12, %c0_13] : memref<128x128xf32, #tpu.memory_space<vmem>>, vector<128x128xf32>
    tpu.vector_store %arg4[%c0_12, %c0_13], %28 {strides = array<i32>} : memref<128x128xf32, #tpu.memory_space<vmem>>, vector<128x128xf32>,
    return
  }
  func.func @transform_0(%arg0: i32) -> (i32, i32) {
    %c0_i32 = arith.constant 0 : i32
    %c0_i32_0 = arith.constant 0 : i32
    %c0_i32_1 = arith.constant 0 : i32
    return %c0_i32, %c0_i32_0 : i32, i32
  }
  func.func @transform_1(%arg0: i32) -> (i32, i32) {
    %c0_i32 = arith.constant 0 : i32
    %c0_i32_0 = arith.constant 0 : i32
    %c0_i32_1 = arith.constant 0 : i32
    return %c0_i32, %c0_i32_0 : i32, i32
  }
  func.func @transform_2(%arg0: i32) -> (i32, i32) {
    %c0_i32 = arith.constant 0 : i32
    %c0_i32_0 = arith.constant 0 : i32
    %c0_i32_1 = arith.constant 0 : i32
    return %c0_i32, %c0_i32_0 : i32, i32
  }
  func.func @transform_3(%arg0: i32) -> (i32, i32) {
    %c0_i32 = arith.constant 0 : i32
    %c0_i32_0 = arith.constant 0 : i32
    %c0_i32_1 = arith.constant 0 : i32
    return %c0_i32, %c0_i32_0 : i32, i32
  }
}

module attributes {stable_mosaic.version = 11 : i64} {
  func.func @_down_gemm_kernel(%arg0: i32, %arg1: memref<32x144xbf16, #tpu.memory_space<vmem>>, %arg2: memref<144x128xbf16, #tpu.memory_space<vmem>>, %arg3: memref<1x128xf32, #tpu.memory_space<vmem>>, %arg4: memref<32x128xf32, #tpu.memory_space<vmem>>) attributes {dimension_semantics = [#tpu.dimension_semantics<arbitrary>], iteration_bounds = array<i64: 1>, scalar_prefetch = 0 : i64, scratch_operands = 0 : i64, tpu.core_type = #tpu.core_type<tc>, window_params = [{pipeline_mode = #tpu.pipeline_mode<synchronous>, transform_indices = @transform_0, window_bounds = array<i64: 32, 144>}, {pipeline_mode = #tpu.pipeline_mode<synchronous>, transform_indices = @transform_1, window_bounds = array<i64: 144, 128>}, {pipeline_mode = #tpu.pipeline_mode<synchronous>, transform_indices = @transform_2, window_bounds = array<i64: 1, 128>}, {pipeline_mode = #tpu.pipeline_mode<synchronous>, transform_indices = @transform_3, window_bounds = array<i64: 32, 128>}]} {
    %c0 = arith.constant 0 : index
    %c0_0 = arith.constant 0 : index
    %0 = vector.load %arg1[%c0, %c0_0] : memref<32x144xbf16, #tpu.memory_space<vmem>>, vector<32x144xbf16>
    %c0_1 = arith.constant 0 : index
    %c0_2 = arith.constant 0 : index
    %1 = vector.load %arg2[%c0_1, %c0_2] : memref<144x128xbf16, #tpu.memory_space<vmem>>, vector<144x128xbf16>
    %cst = arith.constant dense<0.000000e+00> : vector<32x128xf32>
    %2 = tpu.matmul %0, %1, %cst {dimension_numbers = #tpu.dot_dimension_numbers<[1], [0], [0], [1], [0, 0, 1, 1], [], []>} : vector<32x144xbf16>, vector<144x128xbf16>, vector<32x128xf32> -> vector<32x128xf32>
    %c0_3 = arith.constant 0 : index
    %c0_4 = arith.constant 0 : index
    %3 = vector.load %arg3[%c0_3, %c0_4] : memref<1x128xf32, #tpu.memory_space<vmem>>, vector<1x128xf32>
    %4 = vector.broadcast %3 : vector<1x128xf32> to vector<32x128xf32>
    %5 = arith.addf %2, %4 : vector<32x128xf32>
    %cst_5 = arith.constant dense<0.000000e+00> : vector<128xf32>
    %6 = vector.multi_reduction <add>, %5, %cst_5 [0] : vector<32x128xf32> to vector<128xf32>
    %7 = vector.shape_cast %6 : vector<128xf32> to vector<1x128xf32>
    %cst_6 = arith.constant 3.200000e+01 : f32
    %8 = vector.broadcast %cst_6 : f32 to vector<1x128xf32>
    %9 = arith.divf %7, %8 : vector<1x128xf32>
    %10 = vector.broadcast %9 : vector<1x128xf32> to vector<32x128xf32>
    %11 = arith.subf %5, %10 : vector<32x128xf32>
    %12 = arith.mulf %11, %11 : vector<32x128xf32>
    %cst_7 = arith.constant dense<0.000000e+00> : vector<128xf32>
    %13 = vector.multi_reduction <add>, %12, %cst_7 [0] : vector<32x128xf32> to vector<128xf32>
    %14 = vector.shape_cast %13 : vector<128xf32> to vector<1x128xf32>
    %cst_8 = arith.constant 3.200000e+01 : f32
    %15 = vector.broadcast %cst_8 : f32 to vector<1x128xf32>
    %16 = arith.divf %14, %15 : vector<1x128xf32>
    %17 = vector.broadcast %9 : vector<1x128xf32> to vector<32x128xf32>
    %18 = arith.subf %5, %17 : vector<32x128xf32>
    %cst_9 = arith.constant 9.99999974E-6 : f32
    %19 = vector.broadcast %cst_9 : f32 to vector<1x128xf32>
    %20 = arith.addf %16, %19 : vector<1x128xf32>
    %21 = math.rsqrt %20 : vector<1x128xf32>
    %22 = vector.broadcast %21 : vector<1x128xf32> to vector<32x128xf32>
    %23 = arith.mulf %18, %22 : vector<32x128xf32>
    %cst_10 = arith.constant 0.000000e+00 : f32
    %24 = vector.broadcast %cst_10 : f32 to vector<32x128xf32>
    %25 = arith.cmpf ogt, %23, %24 : vector<32x128xf32>
    %cst_11 = arith.constant 2.000000e-01 : f32
    %26 = vector.broadcast %cst_11 : f32 to vector<32x128xf32>
    %27 = arith.mulf %26, %23 : vector<32x128xf32>
    %28 = arith.select %25, %23, %27 : vector<32x128xi1>, vector<32x128xf32>
    %c0_12 = arith.constant 0 : index
    %c0_13 = arith.constant 0 : index
    %29 = vector.load %arg4[%c0_12, %c0_13] : memref<32x128xf32, #tpu.memory_space<vmem>>, vector<32x128xf32>
    tpu.vector_store %arg4[%c0_12, %c0_13], %28 {strides = array<i32>} : memref<32x128xf32, #tpu.memory_space<vmem>>, vector<32x128xf32>,
    return
  }
  func.func @transform_0(%arg0: i32) -> (i32, i32) {
    %c0_i32 = arith.constant 0 : i32
    %c0_i32_0 = arith.constant 0 : i32
    %c0_i32_1 = arith.constant 0 : i32
    return %c0_i32, %c0_i32_0 : i32, i32
  }
  func.func @transform_1(%arg0: i32) -> (i32, i32) {
    %c0_i32 = arith.constant 0 : i32
    %c0_i32_0 = arith.constant 0 : i32
    %c0_i32_1 = arith.constant 0 : i32
    return %c0_i32, %c0_i32_0 : i32, i32
  }
  func.func @transform_2(%arg0: i32) -> (i32, i32) {
    %c0_i32 = arith.constant 0 : i32
    %c0_i32_0 = arith.constant 0 : i32
    %c0_i32_1 = arith.constant 0 : i32
    return %c0_i32, %c0_i32_0 : i32, i32
  }
  func.func @transform_3(%arg0: i32) -> (i32, i32) {
    %c0_i32 = arith.constant 0 : i32
    %c0_i32_0 = arith.constant 0 : i32
    %c0_i32_1 = arith.constant 0 : i32
    return %c0_i32, %c0_i32_0 : i32, i32
  }
}

module attributes {stable_mosaic.version = 11 : i64} {
  func.func @_down_gemm_kernel(%arg0: i32, %arg1: memref<8x288xbf16, #tpu.memory_space<vmem>>, %arg2: memref<288x128xbf16, #tpu.memory_space<vmem>>, %arg3: memref<1x128xf32, #tpu.memory_space<vmem>>, %arg4: memref<8x128xf32, #tpu.memory_space<vmem>>) attributes {dimension_semantics = [#tpu.dimension_semantics<arbitrary>], iteration_bounds = array<i64: 1>, scalar_prefetch = 0 : i64, scratch_operands = 0 : i64, tpu.core_type = #tpu.core_type<tc>, window_params = [{pipeline_mode = #tpu.pipeline_mode<synchronous>, transform_indices = @transform_0, window_bounds = array<i64: 8, 288>}, {pipeline_mode = #tpu.pipeline_mode<synchronous>, transform_indices = @transform_1, window_bounds = array<i64: 288, 128>}, {pipeline_mode = #tpu.pipeline_mode<synchronous>, transform_indices = @transform_2, window_bounds = array<i64: 1, 128>}, {pipeline_mode = #tpu.pipeline_mode<synchronous>, transform_indices = @transform_3, window_bounds = array<i64: 8, 128>}]} {
    %c0 = arith.constant 0 : index
    %c0_0 = arith.constant 0 : index
    %0 = vector.load %arg1[%c0, %c0_0] : memref<8x288xbf16, #tpu.memory_space<vmem>>, vector<8x288xbf16>
    %c0_1 = arith.constant 0 : index
    %c0_2 = arith.constant 0 : index
    %1 = vector.load %arg2[%c0_1, %c0_2] : memref<288x128xbf16, #tpu.memory_space<vmem>>, vector<288x128xbf16>
    %cst = arith.constant dense<0.000000e+00> : vector<8x128xf32>
    %2 = tpu.matmul %0, %1, %cst {dimension_numbers = #tpu.dot_dimension_numbers<[1], [0], [0], [1], [0, 0, 1, 1], [], []>} : vector<8x288xbf16>, vector<288x128xbf16>, vector<8x128xf32> -> vector<8x128xf32>
    %c0_3 = arith.constant 0 : index
    %c0_4 = arith.constant 0 : index
    %3 = vector.load %arg3[%c0_3, %c0_4] : memref<1x128xf32, #tpu.memory_space<vmem>>, vector<1x128xf32>
    %4 = vector.broadcast %3 : vector<1x128xf32> to vector<8x128xf32>
    %5 = arith.addf %2, %4 : vector<8x128xf32>
    %cst_5 = arith.constant dense<0.000000e+00> : vector<128xf32>
    %6 = vector.multi_reduction <add>, %5, %cst_5 [0] : vector<8x128xf32> to vector<128xf32>
    %7 = vector.shape_cast %6 : vector<128xf32> to vector<1x128xf32>
    %cst_6 = arith.constant 8.000000e+00 : f32
    %8 = vector.broadcast %cst_6 : f32 to vector<1x128xf32>
    %9 = arith.divf %7, %8 : vector<1x128xf32>
    %10 = vector.broadcast %9 : vector<1x128xf32> to vector<8x128xf32>
    %11 = arith.subf %5, %10 : vector<8x128xf32>
    %12 = arith.mulf %11, %11 : vector<8x128xf32>
    %cst_7 = arith.constant dense<0.000000e+00> : vector<128xf32>
    %13 = vector.multi_reduction <add>, %12, %cst_7 [0] : vector<8x128xf32> to vector<128xf32>
    %14 = vector.shape_cast %13 : vector<128xf32> to vector<1x128xf32>
    %cst_8 = arith.constant 8.000000e+00 : f32
    %15 = vector.broadcast %cst_8 : f32 to vector<1x128xf32>
    %16 = arith.divf %14, %15 : vector<1x128xf32>
    %17 = vector.broadcast %9 : vector<1x128xf32> to vector<8x128xf32>
    %18 = arith.subf %5, %17 : vector<8x128xf32>
    %cst_9 = arith.constant 9.99999974E-6 : f32
    %19 = vector.broadcast %cst_9 : f32 to vector<1x128xf32>
    %20 = arith.addf %16, %19 : vector<1x128xf32>
    %21 = math.rsqrt %20 : vector<1x128xf32>
    %22 = vector.broadcast %21 : vector<1x128xf32> to vector<8x128xf32>
    %23 = arith.mulf %18, %22 : vector<8x128xf32>
    %cst_10 = arith.constant 0.000000e+00 : f32
    %24 = vector.broadcast %cst_10 : f32 to vector<8x128xf32>
    %25 = arith.cmpf ogt, %23, %24 : vector<8x128xf32>
    %cst_11 = arith.constant 2.000000e-01 : f32
    %26 = vector.broadcast %cst_11 : f32 to vector<8x128xf32>
    %27 = arith.mulf %26, %23 : vector<8x128xf32>
    %28 = arith.select %25, %23, %27 : vector<8x128xi1>, vector<8x128xf32>
    %c0_12 = arith.constant 0 : index
    %c0_13 = arith.constant 0 : index
    %29 = vector.load %arg4[%c0_12, %c0_13] : memref<8x128xf32, #tpu.memory_space<vmem>>, vector<8x128xf32>
    tpu.vector_store %arg4[%c0_12, %c0_13], %28 {strides = array<i32>} : memref<8x128xf32, #tpu.memory_space<vmem>>, vector<8x128xf32>,
    return
  }
  func.func @transform_0(%arg0: i32) -> (i32, i32) {
    %c0_i32 = arith.constant 0 : i32
    %c0_i32_0 = arith.constant 0 : i32
    %c0_i32_1 = arith.constant 0 : i32
    return %c0_i32, %c0_i32_0 : i32, i32
  }
  func.func @transform_1(%arg0: i32) -> (i32, i32) {
    %c0_i32 = arith.constant 0 : i32
    %c0_i32_0 = arith.constant 0 : i32
    %c0_i32_1 = arith.constant 0 : i32
    return %c0_i32, %c0_i32_0 : i32, i32
  }
  func.func @transform_2(%arg0: i32) -> (i32, i32) {
    %c0_i32 = arith.constant 0 : i32
    %c0_i32_0 = arith.constant 0 : i32
    %c0_i32_1 = arith.constant 0 : i32
    return %c0_i32, %c0_i32_0 : i32, i32
  }
  func.func @transform_3(%arg0: i32) -> (i32, i32) {
    %c0_i32 = arith.constant 0 : i32
    %c0_i32_0 = arith.constant 0 : i32
    %c0_i32_1 = arith.constant 0 : i32
    return %c0_i32, %c0_i32_0 : i32, i32
  }
}

module attributes {stable_mosaic.version = 11 : i64} {
  func.func @_attn_stage_kernel(%arg0: i32, %arg1: memref<2x4xf32, #tpu.memory_space<vmem>>, %arg2: memref<4x16xf32, #tpu.memory_space<vmem>>, %arg3: memref<1x16xf32, #tpu.memory_space<vmem>>, %arg4: memref<16x8xf32, #tpu.memory_space<vmem>>, %arg5: memref<1x8xf32, #tpu.memory_space<vmem>>, %arg6: memref<2x64x4xf32, #tpu.memory_space<vmem>>, %arg7: memref<2x4x4xf32, #tpu.memory_space<vmem>>, %arg8: memref<2x4x4xf32, #tpu.memory_space<vmem>>, %arg9: memref<2x4x4xf32, #tpu.memory_space<vmem>>, %arg10: memref<2x4x4xf32, #tpu.memory_space<vmem>>, %arg11: memref<2x1x4xf32, #tpu.memory_space<vmem>>, %arg12: memref<2x1x4xf32, #tpu.memory_space<vmem>>, %arg13: memref<2x1x4xf32, #tpu.memory_space<vmem>>, %arg14: memref<2x1x4xf32, #tpu.memory_space<vmem>>, %arg15: memref<2x72x4xf32, #tpu.memory_space<vmem>>) attributes {dimension_semantics = [#tpu.dimension_semantics<arbitrary>], iteration_bounds = array<i64: 1>, scalar_prefetch = 0 : i64, scratch_operands = 0 : i64, tpu.core_type = #tpu.core_type<tc>, window_params = [{pipeline_mode = #tpu.pipeline_mode<synchronous>, transform_indices = @transform_0, window_bounds = array<i64: 2, 4>}, {pipeline_mode = #tpu.pipeline_mode<synchronous>, transform_indices = @transform_1, window_bounds = array<i64: 4, 16>}, {pipeline_mode = #tpu.pipeline_mode<synchronous>, transform_indices = @transform_2, window_bounds = array<i64: 1, 16>}, {pipeline_mode = #tpu.pipeline_mode<synchronous>, transform_indices = @transform_3, window_bounds = array<i64: 16, 8>}, {pipeline_mode = #tpu.pipeline_mode<synchronous>, transform_indices = @transform_4, window_bounds = array<i64: 1, 8>}, {pipeline_mode = #tpu.pipeline_mode<synchronous>, transform_indices = @transform_5, window_bounds = array<i64: 2, 64, 4>}, {pipeline_mode = #tpu.pipeline_mode<synchronous>, transform_indices = @transform_6, window_bounds = array<i64: 2, 4, 4>}, {pipeline_mode = #tpu.pipeline_mode<synchronous>, transform_indices = @transform_7, window_bounds = array<i64: 2, 4, 4>}, {pipeline_mode = #tpu.pipeline_mode<synchronous>, transform_indices = @transform_8, window_bounds = array<i64: 2, 4, 4>}, {pipeline_mode = #tpu.pipeline_mode<synchronous>, transform_indices = @transform_9, window_bounds = array<i64: 2, 4, 4>}, {pipeline_mode = #tpu.pipeline_mode<synchronous>, transform_indices = @transform_10, window_bounds = array<i64: 2, 1, 4>}, {pipeline_mode = #tpu.pipeline_mode<synchronous>, transform_indices = @transform_11, window_bounds = array<i64: 2, 1, 4>}, {pipeline_mode = #tpu.pipeline_mode<synchronous>, transform_indices = @transform_12, window_bounds = array<i64: 2, 1, 4>}, {pipeline_mode = #tpu.pipeline_mode<synchronous>, transform_indices = @transform_13, window_bounds = array<i64: 2, 1, 4>}, {pipeline_mode = #tpu.pipeline_mode<synchronous>, transform_indices = @transform_14, window_bounds = array<i64: 2, 72, 4>}]} {
    %c0 = arith.constant 0 : index
    %c0_0 = arith.constant 0 : index
    %0 = vector.load %arg1[%c0, %c0_0] : memref<2x4xf32, #tpu.memory_space<vmem>>, vector<2x4xf32>
    %c0_1 = arith.constant 0 : index
    %c0_2 = arith.constant 0 : index
    %1 = vector.load %arg2[%c0_1, %c0_2] : memref<4x16xf32, #tpu.memory_space<vmem>>, vector<4x16xf32>
    %cst = arith.constant dense<0.000000e+00> : vector<2x16xf32>
    %2 = tpu.matmul %0, %1, %cst {dimension_numbers = #tpu.dot_dimension_numbers<[1], [0], [0], [1], [0, 0, 1, 1], [], []>} : vector<2x4xf32>, vector<4x16xf32>, vector<2x16xf32> -> vector<2x16xf32>
    %c0_3 = arith.constant 0 : index
    %c0_4 = arith.constant 0 : index
    %3 = vector.load %arg3[%c0_3, %c0_4] : memref<1x16xf32, #tpu.memory_space<vmem>>, vector<1x16xf32>
    %4 = vector.broadcast %3 : vector<1x16xf32> to vector<2x16xf32>
    %5 = arith.addf %2, %4 : vector<2x16xf32>
    %6 = arith.negf %5 : vector<2x16xf32>
    %7 = math.exp %6 : vector<2x16xf32>
    %cst_5 = arith.constant 1.000000e+00 : f32
    %8 = vector.broadcast %cst_5 : f32 to vector<2x16xf32>
    %9 = arith.addf %8, %7 : vector<2x16xf32>
    %10 = arith.divf %8, %9 : vector<2x16xf32>
    %11 = arith.mulf %5, %10 : vector<2x16xf32>
    %c0_6 = arith.constant 0 : index
    %c0_7 = arith.constant 0 : index
    %12 = vector.load %arg4[%c0_6, %c0_7] : memref<16x8xf32, #tpu.memory_space<vmem>>, vector<16x8xf32>
    %cst_8 = arith.constant dense<0.000000e+00> : vector<2x8xf32>
    %13 = tpu.matmul %11, %12, %cst_8 {dimension_numbers = #tpu.dot_dimension_numbers<[1], [0], [0], [1], [0, 0, 1, 1], [], []>} : vector<2x16xf32>, vector<16x8xf32>, vector<2x8xf32> -> vector<2x8xf32>
    %c0_9 = arith.constant 0 : index
    %c0_10 = arith.constant 0 : index
    %14 = vector.load %arg5[%c0_9, %c0_10] : memref<1x8xf32, #tpu.memory_space<vmem>>, vector<1x8xf32>
    %15 = vector.broadcast %14 : vector<1x8xf32> to vector<2x8xf32>
    %16 = arith.addf %13, %15 : vector<2x8xf32>
    %17 = vector.shape_cast %16 : vector<2x8xf32> to vector<2x8x1xf32>
    %18 = vector.shape_cast %17 : vector<2x8x1xf32> to vector<2x8x1xf32>
    %19 = vector.broadcast %18 : vector<2x8x1xf32> to vector<2x8x4xf32>
    %c0_11 = arith.constant 0 : index
    %c0_12 = arith.constant 0 : index
    %c0_13 = arith.constant 0 : index
    %20 = vector.load %arg6[%c0_11, %c0_12, %c0_13] : memref<2x64x4xf32, #tpu.memory_space<vmem>>, vector<1x64x4xf32>
    %21 = vector.shape_cast %20 : vector<1x64x4xf32> to vector<64x4xf32>
    %22 = vector.extract_strided_slice %19 {offsets = [0, 0, 0], sizes = [1, 8, 4], strides = [1, 1, 1]} : vector<2x8x4xf32> to vector<1x8x4xf32>
    %23 = vector.shape_cast %22 : vector<1x8x4xf32> to vector<8x4xf32>
    %c1 = arith.constant 1 : index
    %c0_14 = arith.constant 0 : index
    %c0_15 = arith.constant 0 : index
    %24 = vector.load %arg6[%c1, %c0_14, %c0_15] : memref<2x64x4xf32, #tpu.memory_space<vmem>>, vector<1x64x4xf32>
    %25 = vector.shape_cast %24 : vector<1x64x4xf32> to vector<64x4xf32>
    %26 = vector.extract_strided_slice %19 {offsets = [1, 0, 0], sizes = [1, 8, 4], strides = [1, 1, 1]} : vector<2x8x4xf32> to vector<1x8x4xf32>
    %27 = vector.shape_cast %26 : vector<1x8x4xf32> to vector<8x4xf32>
    %28 = tpu.concatenate %21, %23, %25, %27 in 0 : vector<64x4xf32>, vector<8x4xf32>, vector<64x4xf32>, vector<8x4xf32> -> vector<144x4xf32>
    %c0_16 = arith.constant 0 : index
    %c0_17 = arith.constant 0 : index
    %c0_18 = arith.constant 0 : index
    %29 = vector.load %arg7[%c0_16, %c0_17, %c0_18] : memref<2x4x4xf32, #tpu.memory_space<vmem>>, vector<1x4x4xf32>
    %30 = vector.shape_cast %29 : vector<1x4x4xf32> to vector<4x4xf32>
    %cst_19 = arith.constant dense<0.000000e+00> : vector<144x4xf32>
    %31 = tpu.matmul %28, %30, %cst_19 {dimension_numbers = #tpu.dot_dimension_numbers<[1], [0], [0], [1], [0, 0, 1, 1], [], []>} : vector<144x4xf32>, vector<4x4xf32>, vector<144x4xf32> -> vector<144x4xf32>
    %c0_20 = arith.constant 0 : index
    %c0_21 = arith.constant 0 : index
    %c0_22 = arith.constant 0 : index
    %32 = vector.load %arg11[%c0_20, %c0_21, %c0_22] : memref<2x1x4xf32, #tpu.memory_space<vmem>>, vector<1x1x4xf32>
    %33 = vector.shape_cast %32 : vector<1x1x4xf32> to vector<1x4xf32>
    %34 = vector.broadcast %33 : vector<1x4xf32> to vector<144x4xf32>
    %35 = arith.addf %31, %34 : vector<144x4xf32>
    %c0_23 = arith.constant 0 : index
    %c0_24 = arith.constant 0 : index
    %c0_25 = arith.constant 0 : index
    %36 = vector.load %arg8[%c0_23, %c0_24, %c0_25] : memref<2x4x4xf32, #tpu.memory_space<vmem>>, vector<1x4x4xf32>
    %37 = vector.shape_cast %36 : vector<1x4x4xf32> to vector<4x4xf32>
    %cst_26 = arith.constant dense<0.000000e+00> : vector<144x4xf32>
    %38 = tpu.matmul %28, %37, %cst_26 {dimension_numbers = #tpu.dot_dimension_numbers<[1], [0], [0], [1], [0, 0, 1, 1], [], []>} : vector<144x4xf32>, vector<4x4xf32>, vector<144x4xf32> -> vector<144x4xf32>
    %c0_27 = arith.constant 0 : index
    %c0_28 = arith.constant 0 : index
    %c0_29 = arith.constant 0 : index
    %39 = vector.load %arg12[%c0_27, %c0_28, %c0_29] : memref<2x1x4xf32, #tpu.memory_space<vmem>>, vector<1x1x4xf32>
    %40 = vector.shape_cast %39 : vector<1x1x4xf32> to vector<1x4xf32>
    %41 = vector.broadcast %40 : vector<1x4xf32> to vector<144x4xf32>
    %42 = arith.addf %38, %41 : vector<144x4xf32>
    %c0_30 = arith.constant 0 : index
    %c0_31 = arith.constant 0 : index
    %c0_32 = arith.constant 0 : index
    %43 = vector.load %arg9[%c0_30, %c0_31, %c0_32] : memref<2x4x4xf32, #tpu.memory_space<vmem>>, vector<1x4x4xf32>
    %44 = vector.shape_cast %43 : vector<1x4x4xf32> to vector<4x4xf32>
    %cst_33 = arith.constant dense<0.000000e+00> : vector<144x4xf32>
    %45 = tpu.matmul %28, %44, %cst_33 {dimension_numbers = #tpu.dot_dimension_numbers<[1], [0], [0], [1], [0, 0, 1, 1], [], []>} : vector<144x4xf32>, vector<4x4xf32>, vector<144x4xf32> -> vector<144x4xf32>
    %c0_34 = arith.constant 0 : index
    %c0_35 = arith.constant 0 : index
    %c0_36 = arith.constant 0 : index
    %46 = vector.load %arg13[%c0_34, %c0_35, %c0_36] : memref<2x1x4xf32, #tpu.memory_space<vmem>>, vector<1x1x4xf32>
    %47 = vector.shape_cast %46 : vector<1x1x4xf32> to vector<1x4xf32>
    %48 = vector.broadcast %47 : vector<1x4xf32> to vector<144x4xf32>
    %49 = arith.addf %45, %48 : vector<144x4xf32>
    %50 = vector.extract_strided_slice %35 {offsets = [0, 0], sizes = [72, 4], strides = [1, 1]} : vector<144x4xf32> to vector<72x4xf32>
    %51 = vector.extract_strided_slice %42 {offsets = [0, 0], sizes = [72, 4], strides = [1, 1]} : vector<144x4xf32> to vector<72x4xf32>
    %cst_37 = arith.constant dense<0.000000e+00> : vector<72x72xf32>
    %52 = tpu.matmul %50, %51, %cst_37 {dimension_numbers = #tpu.dot_dimension_numbers<[1], [1], [0], [0], [0, 0, 1, 0], [], []>} : vector<72x4xf32>, vector<72x4xf32>, vector<72x72xf32> -> vector<72x72xf32>
    %cst_38 = arith.constant 5.000000e-01 : f32
    %53 = vector.broadcast %cst_38 : f32 to vector<72x72xf32>
    %54 = arith.mulf %52, %53 : vector<72x72xf32>
    %cst_39 = arith.constant dense<0xFF800000> : vector<72xf32>
    %55 = vector.multi_reduction <maximumf>, %54, %cst_39 [1] : vector<72x72xf32> to vector<72xf32>
    %cst_40 = arith.constant 0xFF800000 : f32
    %56 = vector.broadcast %cst_40 : f32 to vector<72xf32>
    %57 = arith.maximumf %56, %55 : vector<72xf32>
    %58 = vector.shape_cast %57 : vector<72xf32> to vector<72x1xf32>
    %59 = vector.broadcast %58 : vector<72x1xf32> to vector<72x72xf32>
    %60 = arith.subf %54, %59 : vector<72x72xf32>
    %61 = math.exp %60 : vector<72x72xf32>
    %cst_41 = arith.constant dense<0.000000e+00> : vector<72xf32>
    %62 = vector.multi_reduction <add>, %61, %cst_41 [1] : vector<72x72xf32> to vector<72xf32>
    %63 = vector.shape_cast %62 : vector<72xf32> to vector<72x1xf32>
    %64 = vector.broadcast %63 : vector<72x1xf32> to vector<72x72xf32>
    %65 = arith.divf %61, %64 : vector<72x72xf32>
    %66 = vector.extract_strided_slice %49 {offsets = [0, 0], sizes = [72, 4], strides = [1, 1]} : vector<144x4xf32> to vector<72x4xf32>
    %cst_42 = arith.constant dense<0.000000e+00> : vector<72x4xf32>
    %67 = tpu.matmul %65, %66, %cst_42 {dimension_numbers = #tpu.dot_dimension_numbers<[1], [0], [0], [1], [0, 0, 1, 1], [], []>} : vector<72x72xf32>, vector<72x4xf32>, vector<72x4xf32> -> vector<72x4xf32>
    %68 = vector.extract_strided_slice %35 {offsets = [72, 0], sizes = [72, 4], strides = [1, 1]} : vector<144x4xf32> to vector<72x4xf32>
    %69 = vector.extract_strided_slice %42 {offsets = [72, 0], sizes = [72, 4], strides = [1, 1]} : vector<144x4xf32> to vector<72x4xf32>
    %cst_43 = arith.constant dense<0.000000e+00> : vector<72x72xf32>
    %70 = tpu.matmul %68, %69, %cst_43 {dimension_numbers = #tpu.dot_dimension_numbers<[1], [1], [0], [0], [0, 0, 1, 0], [], []>} : vector<72x4xf32>, vector<72x4xf32>, vector<72x72xf32> -> vector<72x72xf32>
    %cst_44 = arith.constant 5.000000e-01 : f32
    %71 = vector.broadcast %cst_44 : f32 to vector<72x72xf32>
    %72 = arith.mulf %70, %71 : vector<72x72xf32>
    %cst_45 = arith.constant dense<0xFF800000> : vector<72xf32>
    %73 = vector.multi_reduction <maximumf>, %72, %cst_45 [1] : vector<72x72xf32> to vector<72xf32>
    %cst_46 = arith.constant 0xFF800000 : f32
    %74 = vector.broadcast %cst_46 : f32 to vector<72xf32>
    %75 = arith.maximumf %74, %73 : vector<72xf32>
    %76 = vector.shape_cast %75 : vector<72xf32> to vector<72x1xf32>
    %77 = vector.broadcast %76 : vector<72x1xf32> to vector<72x72xf32>
    %78 = arith.subf %72, %77 : vector<72x72xf32>
    %79 = math.exp %78 : vector<72x72xf32>
    %cst_47 = arith.constant dense<0.000000e+00> : vector<72xf32>
    %80 = vector.multi_reduction <add>, %79, %cst_47 [1] : vector<72x72xf32> to vector<72xf32>
    %81 = vector.shape_cast %80 : vector<72xf32> to vector<72x1xf32>
    %82 = vector.broadcast %81 : vector<72x1xf32> to vector<72x72xf32>
    %83 = arith.divf %79, %82 : vector<72x72xf32>
    %84 = vector.extract_strided_slice %49 {offsets = [72, 0], sizes = [72, 4], strides = [1, 1]} : vector<144x4xf32> to vector<72x4xf32>
    %cst_48 = arith.constant dense<0.000000e+00> : vector<72x4xf32>
    %85 = tpu.matmul %83, %84, %cst_48 {dimension_numbers = #tpu.dot_dimension_numbers<[1], [0], [0], [1], [0, 0, 1, 1], [], []>} : vector<72x72xf32>, vector<72x4xf32>, vector<72x4xf32> -> vector<72x4xf32>
    %86 = tpu.concatenate %67, %85 in 0 : vector<72x4xf32>, vector<72x4xf32> -> vector<144x4xf32>
    %c0_49 = arith.constant 0 : index
    %c0_50 = arith.constant 0 : index
    %c0_51 = arith.constant 0 : index
    %87 = vector.load %arg10[%c0_49, %c0_50, %c0_51] : memref<2x4x4xf32, #tpu.memory_space<vmem>>, vector<1x4x4xf32>
    %88 = vector.shape_cast %87 : vector<1x4x4xf32> to vector<4x4xf32>
    %cst_52 = arith.constant dense<0.000000e+00> : vector<144x4xf32>
    %89 = tpu.matmul %86, %88, %cst_52 {dimension_numbers = #tpu.dot_dimension_numbers<[1], [0], [0], [1], [0, 0, 1, 1], [], []>} : vector<144x4xf32>, vector<4x4xf32>, vector<144x4xf32> -> vector<144x4xf32>
    %90 = arith.addf %28, %89 : vector<144x4xf32>
    %c0_53 = arith.constant 0 : index
    %c0_54 = arith.constant 0 : index
    %c0_55 = arith.constant 0 : index
    %91 = vector.load %arg14[%c0_53, %c0_54, %c0_55] : memref<2x1x4xf32, #tpu.memory_space<vmem>>, vector<1x1x4xf32>
    %92 = vector.shape_cast %91 : vector<1x1x4xf32> to vector<1x4xf32>
    %93 = vector.broadcast %92 : vector<1x4xf32> to vector<144x4xf32>
    %94 = arith.addf %90, %93 : vector<144x4xf32>
    %c1_56 = arith.constant 1 : index
    %c0_57 = arith.constant 0 : index
    %c0_58 = arith.constant 0 : index
    %95 = vector.load %arg7[%c1_56, %c0_57, %c0_58] : memref<2x4x4xf32, #tpu.memory_space<vmem>>, vector<1x4x4xf32>
    %96 = vector.shape_cast %95 : vector<1x4x4xf32> to vector<4x4xf32>
    %cst_59 = arith.constant dense<0.000000e+00> : vector<144x4xf32>
    %97 = tpu.matmul %94, %96, %cst_59 {dimension_numbers = #tpu.dot_dimension_numbers<[1], [0], [0], [1], [0, 0, 1, 1], [], []>} : vector<144x4xf32>, vector<4x4xf32>, vector<144x4xf32> -> vector<144x4xf32>
    %c1_60 = arith.constant 1 : index
    %c0_61 = arith.constant 0 : index
    %c0_62 = arith.constant 0 : index
    %98 = vector.load %arg11[%c1_60, %c0_61, %c0_62] : memref<2x1x4xf32, #tpu.memory_space<vmem>>, vector<1x1x4xf32>
    %99 = vector.shape_cast %98 : vector<1x1x4xf32> to vector<1x4xf32>
    %100 = vector.broadcast %99 : vector<1x4xf32> to vector<144x4xf32>
    %101 = arith.addf %97, %100 : vector<144x4xf32>
    %c1_63 = arith.constant 1 : index
    %c0_64 = arith.constant 0 : index
    %c0_65 = arith.constant 0 : index
    %102 = vector.load %arg8[%c1_63, %c0_64, %c0_65] : memref<2x4x4xf32, #tpu.memory_space<vmem>>, vector<1x4x4xf32>
    %103 = vector.shape_cast %102 : vector<1x4x4xf32> to vector<4x4xf32>
    %cst_66 = arith.constant dense<0.000000e+00> : vector<144x4xf32>
    %104 = tpu.matmul %94, %103, %cst_66 {dimension_numbers = #tpu.dot_dimension_numbers<[1], [0], [0], [1], [0, 0, 1, 1], [], []>} : vector<144x4xf32>, vector<4x4xf32>, vector<144x4xf32> -> vector<144x4xf32>
    %c1_67 = arith.constant 1 : index
    %c0_68 = arith.constant 0 : index
    %c0_69 = arith.constant 0 : index
    %105 = vector.load %arg12[%c1_67, %c0_68, %c0_69] : memref<2x1x4xf32, #tpu.memory_space<vmem>>, vector<1x1x4xf32>
    %106 = vector.shape_cast %105 : vector<1x1x4xf32> to vector<1x4xf32>
    %107 = vector.broadcast %106 : vector<1x4xf32> to vector<144x4xf32>
    %108 = arith.addf %104, %107 : vector<144x4xf32>
    %c1_70 = arith.constant 1 : index
    %c0_71 = arith.constant 0 : index
    %c0_72 = arith.constant 0 : index
    %109 = vector.load %arg9[%c1_70, %c0_71, %c0_72] : memref<2x4x4xf32, #tpu.memory_space<vmem>>, vector<1x4x4xf32>
    %110 = vector.shape_cast %109 : vector<1x4x4xf32> to vector<4x4xf32>
    %cst_73 = arith.constant dense<0.000000e+00> : vector<144x4xf32>
    %111 = tpu.matmul %94, %110, %cst_73 {dimension_numbers = #tpu.dot_dimension_numbers<[1], [0], [0], [1], [0, 0, 1, 1], [], []>} : vector<144x4xf32>, vector<4x4xf32>, vector<144x4xf32> -> vector<144x4xf32>
    %c1_74 = arith.constant 1 : index
    %c0_75 = arith.constant 0 : index
    %c0_76 = arith.constant 0 : index
    %112 = vector.load %arg13[%c1_74, %c0_75, %c0_76] : memref<2x1x4xf32, #tpu.memory_space<vmem>>, vector<1x1x4xf32>
    %113 = vector.shape_cast %112 : vector<1x1x4xf32> to vector<1x4xf32>
    %114 = vector.broadcast %113 : vector<1x4xf32> to vector<144x4xf32>
    %115 = arith.addf %111, %114 : vector<144x4xf32>
    %116 = vector.extract_strided_slice %101 {offsets = [0, 0], sizes = [72, 4], strides = [1, 1]} : vector<144x4xf32> to vector<72x4xf32>
    %117 = vector.extract_strided_slice %108 {offsets = [0, 0], sizes = [72, 4], strides = [1, 1]} : vector<144x4xf32> to vector<72x4xf32>
    %cst_77 = arith.constant dense<0.000000e+00> : vector<72x72xf32>
    %118 = tpu.matmul %116, %117, %cst_77 {dimension_numbers = #tpu.dot_dimension_numbers<[1], [1], [0], [0], [0, 0, 1, 0], [], []>} : vector<72x4xf32>, vector<72x4xf32>, vector<72x72xf32> -> vector<72x72xf32>
    %cst_78 = arith.constant 5.000000e-01 : f32
    %119 = vector.broadcast %cst_78 : f32 to vector<72x72xf32>
    %120 = arith.mulf %118, %119 : vector<72x72xf32>
    %cst_79 = arith.constant dense<0xFF800000> : vector<72xf32>
    %121 = vector.multi_reduction <maximumf>, %120, %cst_79 [1] : vector<72x72xf32> to vector<72xf32>
    %cst_80 = arith.constant 0xFF800000 : f32
    %122 = vector.broadcast %cst_80 : f32 to vector<72xf32>
    %123 = arith.maximumf %122, %121 : vector<72xf32>
    %124 = vector.shape_cast %123 : vector<72xf32> to vector<72x1xf32>
    %125 = vector.broadcast %124 : vector<72x1xf32> to vector<72x72xf32>
    %126 = arith.subf %120, %125 : vector<72x72xf32>
    %127 = math.exp %126 : vector<72x72xf32>
    %cst_81 = arith.constant dense<0.000000e+00> : vector<72xf32>
    %128 = vector.multi_reduction <add>, %127, %cst_81 [1] : vector<72x72xf32> to vector<72xf32>
    %129 = vector.shape_cast %128 : vector<72xf32> to vector<72x1xf32>
    %130 = vector.broadcast %129 : vector<72x1xf32> to vector<72x72xf32>
    %131 = arith.divf %127, %130 : vector<72x72xf32>
    %132 = vector.extract_strided_slice %115 {offsets = [0, 0], sizes = [72, 4], strides = [1, 1]} : vector<144x4xf32> to vector<72x4xf32>
    %cst_82 = arith.constant dense<0.000000e+00> : vector<72x4xf32>
    %133 = tpu.matmul %131, %132, %cst_82 {dimension_numbers = #tpu.dot_dimension_numbers<[1], [0], [0], [1], [0, 0, 1, 1], [], []>} : vector<72x72xf32>, vector<72x4xf32>, vector<72x4xf32> -> vector<72x4xf32>
    %134 = vector.extract_strided_slice %101 {offsets = [72, 0], sizes = [72, 4], strides = [1, 1]} : vector<144x4xf32> to vector<72x4xf32>
    %135 = vector.extract_strided_slice %108 {offsets = [72, 0], sizes = [72, 4], strides = [1, 1]} : vector<144x4xf32> to vector<72x4xf32>
    %cst_83 = arith.constant dense<0.000000e+00> : vector<72x72xf32>
    %136 = tpu.matmul %134, %135, %cst_83 {dimension_numbers = #tpu.dot_dimension_numbers<[1], [1], [0], [0], [0, 0, 1, 0], [], []>} : vector<72x4xf32>, vector<72x4xf32>, vector<72x72xf32> -> vector<72x72xf32>
    %cst_84 = arith.constant 5.000000e-01 : f32
    %137 = vector.broadcast %cst_84 : f32 to vector<72x72xf32>
    %138 = arith.mulf %136, %137 : vector<72x72xf32>
    %cst_85 = arith.constant dense<0xFF800000> : vector<72xf32>
    %139 = vector.multi_reduction <maximumf>, %138, %cst_85 [1] : vector<72x72xf32> to vector<72xf32>
    %cst_86 = arith.constant 0xFF800000 : f32
    %140 = vector.broadcast %cst_86 : f32 to vector<72xf32>
    %141 = arith.maximumf %140, %139 : vector<72xf32>
    %142 = vector.shape_cast %141 : vector<72xf32> to vector<72x1xf32>
    %143 = vector.broadcast %142 : vector<72x1xf32> to vector<72x72xf32>
    %144 = arith.subf %138, %143 : vector<72x72xf32>
    %145 = math.exp %144 : vector<72x72xf32>
    %cst_87 = arith.constant dense<0.000000e+00> : vector<72xf32>
    %146 = vector.multi_reduction <add>, %145, %cst_87 [1] : vector<72x72xf32> to vector<72xf32>
    %147 = vector.shape_cast %146 : vector<72xf32> to vector<72x1xf32>
    %148 = vector.broadcast %147 : vector<72x1xf32> to vector<72x72xf32>
    %149 = arith.divf %145, %148 : vector<72x72xf32>
    %150 = vector.extract_strided_slice %115 {offsets = [72, 0], sizes = [72, 4], strides = [1, 1]} : vector<144x4xf32> to vector<72x4xf32>
    %cst_88 = arith.constant dense<0.000000e+00> : vector<72x4xf32>
    %151 = tpu.matmul %149, %150, %cst_88 {dimension_numbers = #tpu.dot_dimension_numbers<[1], [0], [0], [1], [0, 0, 1, 1], [], []>} : vector<72x72xf32>, vector<72x4xf32>, vector<72x4xf32> -> vector<72x4xf32>
    %152 = tpu.concatenate %133, %151 in 0 : vector<72x4xf32>, vector<72x4xf32> -> vector<144x4xf32>
    %c1_89 = arith.constant 1 : index
    %c0_90 = arith.constant 0 : index
    %c0_91 = arith.constant 0 : index
    %153 = vector.load %arg10[%c1_89, %c0_90, %c0_91] : memref<2x4x4xf32, #tpu.memory_space<vmem>>, vector<1x4x4xf32>
    %154 = vector.shape_cast %153 : vector<1x4x4xf32> to vector<4x4xf32>
    %cst_92 = arith.constant dense<0.000000e+00> : vector<144x4xf32>
    %155 = tpu.matmul %152, %154, %cst_92 {dimension_numbers = #tpu.dot_dimension_numbers<[1], [0], [0], [1], [0, 0, 1, 1], [], []>} : vector<144x4xf32>, vector<4x4xf32>, vector<144x4xf32> -> vector<144x4xf32>
    %156 = arith.addf %94, %155 : vector<144x4xf32>
    %c1_93 = arith.constant 1 : index
    %c0_94 = arith.constant 0 : index
    %c0_95 = arith.constant 0 : index
    %157 = vector.load %arg14[%c1_93, %c0_94, %c0_95] : memref<2x1x4xf32, #tpu.memory_space<vmem>>, vector<1x1x4xf32>
    %158 = vector.shape_cast %157 : vector<1x1x4xf32> to vector<1x4xf32>
    %159 = vector.broadcast %158 : vector<1x4xf32> to vector<144x4xf32>
    %160 = arith.addf %156, %159 : vector<144x4xf32>
    %161 = vector.extract_strided_slice %160 {offsets = [0, 0], sizes = [72, 4], strides = [1, 1]} : vector<144x4xf32> to vector<72x4xf32>
    %c0_96 = arith.constant 0 : index
    %c0_97 = arith.constant 0 : index
    %c0_98 = arith.constant 0 : index
    %162 = vector.load %arg15[%c0_96, %c0_97, %c0_98] : memref<2x72x4xf32, #tpu.memory_space<vmem>>, vector<1x72x4xf32>
    %163 = vector.shape_cast %162 : vector<1x72x4xf32> to vector<72x4xf32>
    %164 = vector.shape_cast %161 : vector<72x4xf32> to vector<1x72x4xf32>
    tpu.vector_store %arg15[%c0_96, %c0_97, %c0_98], %164 {strides = array<i32>} : memref<2x72x4xf32, #tpu.memory_space<vmem>>, vector<1x72x4xf32>,
    %165 = vector.extract_strided_slice %160 {offsets = [72, 0], sizes = [72, 4], strides = [1, 1]} : vector<144x4xf32> to vector<72x4xf32>
    %c1_99 = arith.constant 1 : index
    %c0_100 = arith.constant 0 : index
    %c0_101 = arith.constant 0 : index
    %166 = vector.load %arg15[%c1_99, %c0_100, %c0_101] : memref<2x72x4xf32, #tpu.memory_space<vmem>>, vector<1x72x4xf32>
    %167 = vector.shape_cast %166 : vector<1x72x4xf32> to vector<72x4xf32>
    %168 = vector.shape_cast %165 : vector<72x4xf32> to vector<1x72x4xf32>
    tpu.vector_store %arg15[%c1_99, %c0_100, %c0_101], %168 {strides = array<i32>} : memref<2x72x4xf32, #tpu.memory_space<vmem>>, vector<1x72x4xf32>,
    return
  }
  func.func @transform_0(%arg0: i32) -> (i32, i32) {
    %c0_i32 = arith.constant 0 : i32
    %c0_i32_0 = arith.constant 0 : i32
    %c0_i32_1 = arith.constant 0 : i32
    return %c0_i32, %c0_i32_0 : i32, i32
  }
  func.func @transform_1(%arg0: i32) -> (i32, i32) {
    %c0_i32 = arith.constant 0 : i32
    %c0_i32_0 = arith.constant 0 : i32
    %c0_i32_1 = arith.constant 0 : i32
    return %c0_i32, %c0_i32_0 : i32, i32
  }
  func.func @transform_2(%arg0: i32) -> (i32, i32) {
    %c0_i32 = arith.constant 0 : i32
    %c0_i32_0 = arith.constant 0 : i32
    %c0_i32_1 = arith.constant 0 : i32
    return %c0_i32, %c0_i32_0 : i32, i32
  }
  func.func @transform_3(%arg0: i32) -> (i32, i32) {
    %c0_i32 = arith.constant 0 : i32
    %c0_i32_0 = arith.constant 0 : i32
    %c0_i32_1 = arith.constant 0 : i32
    return %c0_i32, %c0_i32_0 : i32, i32
  }
  func.func @transform_4(%arg0: i32) -> (i32, i32) {
    %c0_i32 = arith.constant 0 : i32
    %c0_i32_0 = arith.constant 0 : i32
    %c0_i32_1 = arith.constant 0 : i32
    return %c0_i32, %c0_i32_0 : i32, i32
  }
  func.func @transform_5(%arg0: i32) -> (i32, i32, i32) {
    %c0_i32 = arith.constant 0 : i32
    %c0_i32_0 = arith.constant 0 : i32
    %c0_i32_1 = arith.constant 0 : i32
    %c0_i32_2 = arith.constant 0 : i32
    return %c0_i32, %c0_i32_0, %c0_i32_1 : i32, i32, i32
  }
  func.func @transform_6(%arg0: i32) -> (i32, i32, i32) {
    %c0_i32 = arith.constant 0 : i32
    %c0_i32_0 = arith.constant 0 : i32
    %c0_i32_1 = arith.constant 0 : i32
    %c0_i32_2 = arith.constant 0 : i32
    return %c0_i32, %c0_i32_0, %c0_i32_1 : i32, i32, i32
  }
  func.func @transform_7(%arg0: i32) -> (i32, i32, i32) {
    %c0_i32 = arith.constant 0 : i32
    %c0_i32_0 = arith.constant 0 : i32
    %c0_i32_1 = arith.constant 0 : i32
    %c0_i32_2 = arith.constant 0 : i32
    return %c0_i32, %c0_i32_0, %c0_i32_1 : i32, i32, i32
  }
  func.func @transform_8(%arg0: i32) -> (i32, i32, i32) {
    %c0_i32 = arith.constant 0 : i32
    %c0_i32_0 = arith.constant 0 : i32
    %c0_i32_1 = arith.constant 0 : i32
    %c0_i32_2 = arith.constant 0 : i32
    return %c0_i32, %c0_i32_0, %c0_i32_1 : i32, i32, i32
  }
  func.func @transform_9(%arg0: i32) -> (i32, i32, i32) {
    %c0_i32 = arith.constant 0 : i32
    %c0_i32_0 = arith.constant 0 : i32
    %c0_i32_1 = arith.constant 0 : i32
    %c0_i32_2 = arith.constant 0 : i32
    return %c0_i32, %c0_i32_0, %c0_i32_1 : i32, i32, i32
  }
  func.func @transform_10(%arg0: i32) -> (i32, i32, i32) {
    %c0_i32 = arith.constant 0 : i32
    %c0_i32_0 = arith.constant 0 : i32
    %c0_i32_1 = arith.constant 0 : i32
    %c0_i32_2 = arith.constant 0 : i32
    return %c0_i32, %c0_i32_0, %c0_i32_1 : i32, i32, i32
  }
  func.func @transform_11(%arg0: i32) -> (i32, i32, i32) {
    %c0_i32 = arith.constant 0 : i32
    %c0_i32_0 = arith.constant 0 : i32
    %c0_i32_1 = arith.constant 0 : i32
    %c0_i32_2 = arith.constant 0 : i32
    return %c0_i32, %c0_i32_0, %c0_i32_1 : i32, i32, i32
  }
  func.func @transform_12(%arg0: i32) -> (i32, i32, i32) {
    %c0_i32 = arith.constant 0 : i32
    %c0_i32_0 = arith.constant 0 : i32
    %c0_i32_1 = arith.constant 0 : i32
    %c0_i32_2 = arith.constant 0 : i32
    return %c0_i32, %c0_i32_0, %c0_i32_1 : i32, i32, i32
  }
  func.func @transform_13(%arg0: i32) -> (i32, i32, i32) {
    %c0_i32 = arith.constant 0 : i32
    %c0_i32_0 = arith.constant 0 : i32
    %c0_i32_1 = arith.constant 0 : i32
    %c0_i32_2 = arith.constant 0 : i32
    return %c0_i32, %c0_i32_0, %c0_i32_1 : i32, i32, i32
  }
  func.func @transform_14(%arg0: i32) -> (i32, i32, i32) {
    %c0_i32 = arith.constant 0 : i32
    %c0_i32_0 = arith.constant 0 : i32
    %c0_i32_1 = arith.constant 0 : i32
    %c0_i32_2 = arith.constant 0 : i32
    return %c0_i32, %c0_i32_0, %c0_i32_1 : i32, i32, i32
  }
}

module attributes {stable_mosaic.version = 11 : i64} {
  func.func @_up_gemm_kernel(%arg0: i32, %arg1: memref<8x288xbf16, #tpu.memory_space<vmem>>, %arg2: memref<288x128xbf16, #tpu.memory_space<vmem>>, %arg3: memref<1x128xf32, #tpu.memory_space<vmem>>, %arg4: memref<8x128xf32, #tpu.memory_space<vmem>>) attributes {dimension_semantics = [#tpu.dimension_semantics<parallel>], iteration_bounds = array<i64: 1>, scalar_prefetch = 0 : i64, scratch_operands = 0 : i64, tpu.core_type = #tpu.core_type<tc>, window_params = [{transform_indices = @transform_0, window_bounds = array<i64: 8, 288>}, {pipeline_mode = #tpu.pipeline_mode<synchronous>, transform_indices = @transform_1, window_bounds = array<i64: 288, 128>}, {pipeline_mode = #tpu.pipeline_mode<synchronous>, transform_indices = @transform_2, window_bounds = array<i64: 1, 128>}, {transform_indices = @transform_3, window_bounds = array<i64: 8, 128>}]} {
    %c0 = arith.constant 0 : index
    %c0_0 = arith.constant 0 : index
    %0 = vector.load %arg1[%c0, %c0_0] : memref<8x288xbf16, #tpu.memory_space<vmem>>, vector<8x288xbf16>
    %c0_1 = arith.constant 0 : index
    %c0_2 = arith.constant 0 : index
    %1 = vector.load %arg2[%c0_1, %c0_2] : memref<288x128xbf16, #tpu.memory_space<vmem>>, vector<288x128xbf16>
    %cst = arith.constant dense<0.000000e+00> : vector<8x128xf32>
    %2 = tpu.matmul %0, %1, %cst {dimension_numbers = #tpu.dot_dimension_numbers<[1], [0], [0], [1], [0, 0, 1, 1], [], []>} : vector<8x288xbf16>, vector<288x128xbf16>, vector<8x128xf32> -> vector<8x128xf32>
    %c0_3 = arith.constant 0 : index
    %c0_4 = arith.constant 0 : index
    %3 = vector.load %arg3[%c0_3, %c0_4] : memref<1x128xf32, #tpu.memory_space<vmem>>, vector<1x128xf32>
    %4 = vector.broadcast %3 : vector<1x128xf32> to vector<8x128xf32>
    %5 = arith.addf %2, %4 : vector<8x128xf32>
    %cst_5 = arith.constant 0.000000e+00 : f32
    %6 = vector.broadcast %cst_5 : f32 to vector<8x128xf32>
    %7 = arith.maximumf %5, %6 : vector<8x128xf32>
    %c0_6 = arith.constant 0 : index
    %c0_7 = arith.constant 0 : index
    %8 = vector.load %arg4[%c0_6, %c0_7] : memref<8x128xf32, #tpu.memory_space<vmem>>, vector<8x128xf32>
    tpu.vector_store %arg4[%c0_6, %c0_7], %7 {strides = array<i32>} : memref<8x128xf32, #tpu.memory_space<vmem>>, vector<8x128xf32>,
    return
  }
  func.func @transform_0(%arg0: i32) -> (i32, i32) {
    %c0_i32 = arith.constant 0 : i32
    %c0_i32_0 = arith.constant 0 : i32
    return %arg0, %c0_i32 : i32, i32
  }
  func.func @transform_1(%arg0: i32) -> (i32, i32) {
    %c0_i32 = arith.constant 0 : i32
    %c0_i32_0 = arith.constant 0 : i32
    %c0_i32_1 = arith.constant 0 : i32
    return %c0_i32, %c0_i32_0 : i32, i32
  }
  func.func @transform_2(%arg0: i32) -> (i32, i32) {
    %c0_i32 = arith.constant 0 : i32
    %c0_i32_0 = arith.constant 0 : i32
    %c0_i32_1 = arith.constant 0 : i32
    return %c0_i32, %c0_i32_0 : i32, i32
  }
  func.func @transform_3(%arg0: i32) -> (i32, i32) {
    %c0_i32 = arith.constant 0 : i32
    %c0_i32_0 = arith.constant 0 : i32
    return %arg0, %c0_i32 : i32, i32
  }
}

module attributes {stable_mosaic.version = 11 : i64} {
  func.func @_up_gemm_kernel(%arg0: i32, %arg1: memref<32x256xbf16, #tpu.memory_space<vmem>>, %arg2: memref<256x128xbf16, #tpu.memory_space<vmem>>, %arg3: memref<1x128xf32, #tpu.memory_space<vmem>>, %arg4: memref<32x128xf32, #tpu.memory_space<vmem>>) attributes {dimension_semantics = [#tpu.dimension_semantics<parallel>], iteration_bounds = array<i64: 1>, scalar_prefetch = 0 : i64, scratch_operands = 0 : i64, tpu.core_type = #tpu.core_type<tc>, window_params = [{transform_indices = @transform_0, window_bounds = array<i64: 32, 256>}, {pipeline_mode = #tpu.pipeline_mode<synchronous>, transform_indices = @transform_1, window_bounds = array<i64: 256, 128>}, {pipeline_mode = #tpu.pipeline_mode<synchronous>, transform_indices = @transform_2, window_bounds = array<i64: 1, 128>}, {transform_indices = @transform_3, window_bounds = array<i64: 32, 128>}]} {
    %c0 = arith.constant 0 : index
    %c0_0 = arith.constant 0 : index
    %0 = vector.load %arg1[%c0, %c0_0] : memref<32x256xbf16, #tpu.memory_space<vmem>>, vector<32x256xbf16>
    %c0_1 = arith.constant 0 : index
    %c0_2 = arith.constant 0 : index
    %1 = vector.load %arg2[%c0_1, %c0_2] : memref<256x128xbf16, #tpu.memory_space<vmem>>, vector<256x128xbf16>
    %cst = arith.constant dense<0.000000e+00> : vector<32x128xf32>
    %2 = tpu.matmul %0, %1, %cst {dimension_numbers = #tpu.dot_dimension_numbers<[1], [0], [0], [1], [0, 0, 1, 1], [], []>} : vector<32x256xbf16>, vector<256x128xbf16>, vector<32x128xf32> -> vector<32x128xf32>
    %c0_3 = arith.constant 0 : index
    %c0_4 = arith.constant 0 : index
    %3 = vector.load %arg3[%c0_3, %c0_4] : memref<1x128xf32, #tpu.memory_space<vmem>>, vector<1x128xf32>
    %4 = vector.broadcast %3 : vector<1x128xf32> to vector<32x128xf32>
    %5 = arith.addf %2, %4 : vector<32x128xf32>
    %cst_5 = arith.constant 0.000000e+00 : f32
    %6 = vector.broadcast %cst_5 : f32 to vector<32x128xf32>
    %7 = arith.maximumf %5, %6 : vector<32x128xf32>
    %c0_6 = arith.constant 0 : index
    %c0_7 = arith.constant 0 : index
    %8 = vector.load %arg4[%c0_6, %c0_7] : memref<32x128xf32, #tpu.memory_space<vmem>>, vector<32x128xf32>
    tpu.vector_store %arg4[%c0_6, %c0_7], %7 {strides = array<i32>} : memref<32x128xf32, #tpu.memory_space<vmem>>, vector<32x128xf32>,
    return
  }
  func.func @transform_0(%arg0: i32) -> (i32, i32) {
    %c0_i32 = arith.constant 0 : i32
    %c0_i32_0 = arith.constant 0 : i32
    return %arg0, %c0_i32 : i32, i32
  }
  func.func @transform_1(%arg0: i32) -> (i32, i32) {
    %c0_i32 = arith.constant 0 : i32
    %c0_i32_0 = arith.constant 0 : i32
    %c0_i32_1 = arith.constant 0 : i32
    return %c0_i32, %c0_i32_0 : i32, i32
  }
  func.func @transform_2(%arg0: i32) -> (i32, i32) {
    %c0_i32 = arith.constant 0 : i32
    %c0_i32_0 = arith.constant 0 : i32
    %c0_i32_1 = arith.constant 0 : i32
    return %c0_i32, %c0_i32_0 : i32, i32
  }
  func.func @transform_3(%arg0: i32) -> (i32, i32) {
    %c0_i32 = arith.constant 0 : i32
    %c0_i32_0 = arith.constant 0 : i32
    return %arg0, %c0_i32 : i32, i32
  }
}

module attributes {stable_mosaic.version = 11 : i64} {
  func.func @_up_gemm_kernel(%arg0: i32, %arg1: memref<128x128xbf16, #tpu.memory_space<vmem>>, %arg2: memref<128x128xbf16, #tpu.memory_space<vmem>>, %arg3: memref<1x128xf32, #tpu.memory_space<vmem>>, %arg4: memref<128x128xf32, #tpu.memory_space<vmem>>) attributes {dimension_semantics = [#tpu.dimension_semantics<parallel>], iteration_bounds = array<i64: 1>, scalar_prefetch = 0 : i64, scratch_operands = 0 : i64, tpu.core_type = #tpu.core_type<tc>, window_params = [{transform_indices = @transform_0, window_bounds = array<i64: 128, 128>}, {pipeline_mode = #tpu.pipeline_mode<synchronous>, transform_indices = @transform_1, window_bounds = array<i64: 128, 128>}, {pipeline_mode = #tpu.pipeline_mode<synchronous>, transform_indices = @transform_2, window_bounds = array<i64: 1, 128>}, {transform_indices = @transform_3, window_bounds = array<i64: 128, 128>}]} {
    %c0 = arith.constant 0 : index
    %c0_0 = arith.constant 0 : index
    %0 = vector.load %arg1[%c0, %c0_0] : memref<128x128xbf16, #tpu.memory_space<vmem>>, vector<128x128xbf16>
    %c0_1 = arith.constant 0 : index
    %c0_2 = arith.constant 0 : index
    %1 = vector.load %arg2[%c0_1, %c0_2] : memref<128x128xbf16, #tpu.memory_space<vmem>>, vector<128x128xbf16>
    %cst = arith.constant dense<0.000000e+00> : vector<128x128xf32>
    %2 = tpu.matmul %0, %1, %cst {dimension_numbers = #tpu.dot_dimension_numbers<[1], [0], [0], [1], [0, 0, 1, 1], [], []>} : vector<128x128xbf16>, vector<128x128xbf16>, vector<128x128xf32> -> vector<128x128xf32>
    %c0_3 = arith.constant 0 : index
    %c0_4 = arith.constant 0 : index
    %3 = vector.load %arg3[%c0_3, %c0_4] : memref<1x128xf32, #tpu.memory_space<vmem>>, vector<1x128xf32>
    %4 = vector.broadcast %3 : vector<1x128xf32> to vector<128x128xf32>
    %5 = arith.addf %2, %4 : vector<128x128xf32>
    %cst_5 = arith.constant 0.000000e+00 : f32
    %6 = vector.broadcast %cst_5 : f32 to vector<128x128xf32>
    %7 = arith.maximumf %5, %6 : vector<128x128xf32>
    %c0_6 = arith.constant 0 : index
    %c0_7 = arith.constant 0 : index
    %8 = vector.load %arg4[%c0_6, %c0_7] : memref<128x128xf32, #tpu.memory_space<vmem>>, vector<128x128xf32>
    tpu.vector_store %arg4[%c0_6, %c0_7], %7 {strides = array<i32>} : memref<128x128xf32, #tpu.memory_space<vmem>>, vector<128x128xf32>,
    return
  }
  func.func @transform_0(%arg0: i32) -> (i32, i32) {
    %c0_i32 = arith.constant 0 : i32
    %c0_i32_0 = arith.constant 0 : i32
    return %arg0, %c0_i32 : i32, i32
  }
  func.func @transform_1(%arg0: i32) -> (i32, i32) {
    %c0_i32 = arith.constant 0 : i32
    %c0_i32_0 = arith.constant 0 : i32
    %c0_i32_1 = arith.constant 0 : i32
    return %c0_i32, %c0_i32_0 : i32, i32
  }
  func.func @transform_2(%arg0: i32) -> (i32, i32) {
    %c0_i32 = arith.constant 0 : i32
    %c0_i32_0 = arith.constant 0 : i32
    %c0_i32_1 = arith.constant 0 : i32
    return %c0_i32, %c0_i32_0 : i32, i32
  }
  func.func @transform_3(%arg0: i32) -> (i32, i32) {
    %c0_i32 = arith.constant 0 : i32
    %c0_i32_0 = arith.constant 0 : i32
    return %arg0, %c0_i32 : i32, i32
  }
}

module attributes {stable_mosaic.version = 11 : i64} {
  func.func @_up_gemm_kernel(%arg0: i32, %arg1: memref<256x64xbf16, #tpu.memory_space<vmem>>, %arg2: memref<64x128xbf16, #tpu.memory_space<vmem>>, %arg3: memref<1x128xf32, #tpu.memory_space<vmem>>, %arg4: memref<256x128xf32, #tpu.memory_space<vmem>>) attributes {dimension_semantics = [#tpu.dimension_semantics<parallel>], iteration_bounds = array<i64: 2>, scalar_prefetch = 0 : i64, scratch_operands = 0 : i64, tpu.core_type = #tpu.core_type<tc>, window_params = [{transform_indices = @transform_0, window_bounds = array<i64: 256, 64>}, {pipeline_mode = #tpu.pipeline_mode<synchronous>, transform_indices = @transform_1, window_bounds = array<i64: 64, 128>}, {pipeline_mode = #tpu.pipeline_mode<synchronous>, transform_indices = @transform_2, window_bounds = array<i64: 1, 128>}, {transform_indices = @transform_3, window_bounds = array<i64: 256, 128>}]} {
    %c0 = arith.constant 0 : index
    %c0_0 = arith.constant 0 : index
    %0 = vector.load %arg1[%c0, %c0_0] : memref<256x64xbf16, #tpu.memory_space<vmem>>, vector<256x64xbf16>
    %c0_1 = arith.constant 0 : index
    %c0_2 = arith.constant 0 : index
    %1 = vector.load %arg2[%c0_1, %c0_2] : memref<64x128xbf16, #tpu.memory_space<vmem>>, vector<64x128xbf16>
    %cst = arith.constant dense<0.000000e+00> : vector<256x128xf32>
    %2 = tpu.matmul %0, %1, %cst {dimension_numbers = #tpu.dot_dimension_numbers<[1], [0], [0], [1], [0, 0, 1, 1], [], []>} : vector<256x64xbf16>, vector<64x128xbf16>, vector<256x128xf32> -> vector<256x128xf32>
    %c0_3 = arith.constant 0 : index
    %c0_4 = arith.constant 0 : index
    %3 = vector.load %arg3[%c0_3, %c0_4] : memref<1x128xf32, #tpu.memory_space<vmem>>, vector<1x128xf32>
    %4 = vector.broadcast %3 : vector<1x128xf32> to vector<256x128xf32>
    %5 = arith.addf %2, %4 : vector<256x128xf32>
    %c0_5 = arith.constant 0 : index
    %c0_6 = arith.constant 0 : index
    %6 = vector.load %arg4[%c0_5, %c0_6] : memref<256x128xf32, #tpu.memory_space<vmem>>, vector<256x128xf32>
    tpu.vector_store %arg4[%c0_5, %c0_6], %5 {strides = array<i32>} : memref<256x128xf32, #tpu.memory_space<vmem>>, vector<256x128xf32>,
    return
  }
  func.func @transform_0(%arg0: i32) -> (i32, i32) {
    %c0_i32 = arith.constant 0 : i32
    %c0_i32_0 = arith.constant 0 : i32
    return %arg0, %c0_i32 : i32, i32
  }
  func.func @transform_1(%arg0: i32) -> (i32, i32) {
    %c0_i32 = arith.constant 0 : i32
    %c0_i32_0 = arith.constant 0 : i32
    %c0_i32_1 = arith.constant 0 : i32
    return %c0_i32, %c0_i32_0 : i32, i32
  }
  func.func @transform_2(%arg0: i32) -> (i32, i32) {
    %c0_i32 = arith.constant 0 : i32
    %c0_i32_0 = arith.constant 0 : i32
    %c0_i32_1 = arith.constant 0 : i32
    return %c0_i32, %c0_i32_0 : i32, i32
  }
  func.func @transform_3(%arg0: i32) -> (i32, i32) {
    %c0_i32 = arith.constant 0 : i32
    %c0_i32_0 = arith.constant 0 : i32
    return %arg0, %c0_i32 : i32, i32
  }
}

</mosaic_0001>

<bundles_post_ra>
// kernel: tile.23
= control target key start
LH: loop header
LB: loop body
LE: loop exit
PB: predicated region body
PF: predicated region fallthrough
CT: control target
= control target key end

     0   :  { %2 = vsyncpa [#allocation1], 0  ;;  %s42_s6 = smov [#allocation0]   ;;  %s59_s0 = inlined_call_operand.hbm [shape: f32[32], index: 0, kind: input, shape index: {}]   ;;  %s60_s1 = inlined_call_operand.vmem [shape: f32[4,32], index: 1, kind: output, shape index: {}]  }
   0x1   :  { %s9_s7 = sshll.u32 %s42_s6, 4  ;;  %s10_s7 = int_to_ptr.vmem [resolvable:$true] %s9_s7 }
   0x2   :  { %s28_s8 = scalar_lea.vmem %s10_s7, 16  ;;  %s32_s9 = scalar_lea.vmem %s10_s7, 32 }
   0x3   :  { %p29_p0 = scmp.ne.s32.totalorder %s10_s7, %s28_s8  ;;  %p33_p1 = scmp.lt.s32.totalorder %s10_s7, %s10_s7 }
   0x4   :  { %p34_p2 = scmp.lt.s32.totalorder %s32_s9, %s28_s8 }
   0x6   :  { %p35_p3 = por %p34_p2, %p33_p1 }
   0x8   :  { %p36_p4 = pnand %p35_p3, %p29_p0 }
   0xa   :  { %39 = shalt.err (!%p36_p4)
}
   0xb   :  { %12 = dma.hbm_to_vmem [thread:$0]  %s59_s0, 16, %s10_s7, [#allocation1]  }
   0xc   :  { %40 = dma.done.wait [#allocation1], 16  }
   0xd   :  { %41 = vsyncadd [#allocation1], 4294967280  ;;  %v16_v0 = vld [vmem:[#allocation0] ss:$0 sm:$0xff] }
   0xe   :  { %17 = vst [vmem:[%s60_s1] sm:$0xf] %v16_v0 }
   0xf   :  { %18 = vsyncpa [#allocation1], 1 }

// kernel: tile.24
= control target key start
LH: loop header
LB: loop body
LE: loop exit
PB: predicated region body
PF: predicated region fallthrough
CT: control target
= control target key end

     0   :  { %vm8_vm0 = vcmask 261120   ;;  %s40_s8 = smov 32   ;;  %s41_s9 = smov 64   ;;  %vm14_vm1 = vcmask 1048320   ;;  %vm20_vm2 = vcmask 785920   ;;  %vm26_vm3 = vcmask 523520   ;;  %s58_s0 = inlined_call_operand.vmem [shape: f32[4,32], index: 0, kind: input, shape index: {}]   ;;  %s59_s1 = inlined_call_operand.vmem [shape: f32[1,128], index: 1, kind: output, shape index: {}]  }
   0x1   :  { %v5_v0 = vld [vmem:[%s58_s0] sm:$0xf]  ;;  %s39_s0 = smov 96  }
   0x2   :  { %6 = vst [vmem:[#allocation1] sm:$0xf] %v5_v0 }
   0x9   :  { %v11_v1 = vld [vmem:[#allocation1 + $0x3] sm:$0x1]   ;;  %v23_v2 = vld [vmem:[#allocation1 + $0x1] sm:$0x1]   ;;  %v7_v3 = vld [vmem:[#allocation1] sm:$0x1]  }
   0xa   :  { %12 = vrot.lane.b32.xlu0 %v11_v1, %s39_s0  ;;  %24 = vrot.lane.b32.xlu1 %v23_v2, %s40_s8  ;;  %v17_v4 = vld [vmem:[#allocation1 + $0x2] sm:$0x1]   ;;  %9 = vst.msk [vmem:[#allocation0] sm:$0x1] %vm8_vm0, %v7_v3  }
   0xe   :  { %18 = vrot.lane.b32.xlu0 %v17_v4, %s41_s9 }
  0x7c   :  { %v13_v5 = vpop.permute.xlu0 %12   ;;  %v25_v6 = vpop.permute.xlu1 %24  }
  0x7d   :  { %15 = vst.msk [vmem:[#allocation0] sm:$0x1] %vm14_vm1, %v13_v5  }
  0x80   :  { %v19_v7 = vpop.permute.xlu0 %18  }
  0x81   :  { %21 = vst.msk [vmem:[#allocation0] sm:$0x1] %vm20_vm2, %v19_v7  }
  0x82   :  { %27 = vst.msk [vmem:[#allocation0] sm:$0x1] %vm26_vm3, %v25_v6  }
  0x89   :  { %v32_v8 = vld [vmem:[#allocation0] sm:$0x1] }
  0x8a   :  { %35 = vst [vmem:[%s59_s1] sm:$0x1] %v32_v8 }

// kernel: tile.28
= control target key start
LH: loop header
LB: loop body
LE: loop exit
PB: predicated region body
PF: predicated region fallthrough
CT: control target
= control target key end

     0   :  { %2 = vsyncpa [#allocation1], 0  ;;  %s42_s6 = smov [#allocation0]   ;;  %s59_s0 = inlined_call_operand.hbm [shape: f32[16], index: 0, kind: input, shape index: {}]   ;;  %s60_s1 = inlined_call_operand.vmem [shape: f32[4,16], index: 1, kind: output, shape index: {}]  }
   0x1   :  { %s9_s7 = sshll.u32 %s42_s6, 4  ;;  %s10_s7 = int_to_ptr.vmem [resolvable:$true] %s9_s7 }
   0x2   :  { %s28_s8 = scalar_lea.vmem %s10_s7, 16  ;;  %s32_s9 = scalar_lea.vmem %s10_s7, 32 }
   0x3   :  { %p29_p0 = scmp.ne.s32.totalorder %s10_s7, %s28_s8  ;;  %p33_p1 = scmp.lt.s32.totalorder %s10_s7, %s10_s7 }
   0x4   :  { %p34_p2 = scmp.lt.s32.totalorder %s32_s9, %s28_s8 }
   0x6   :  { %p35_p3 = por %p34_p2, %p33_p1 }
   0x8   :  { %p36_p4 = pnand %p35_p3, %p29_p0 }
   0xa   :  { %39 = shalt.err (!%p36_p4)
}
   0xb   :  { %12 = dma.hbm_to_vmem [thread:$0]  %s59_s0, 16, %s10_s7, [#allocation1]  }
   0xc   :  { %40 = dma.done.wait [#allocation1], 16  }
   0xd   :  { %41 = vsyncadd [#allocation1], 4294967280  ;;  %v16_v0 = vld [vmem:[#allocation0] ss:$0 sm:$0xff] }
   0xe   :  { %17 = vst [vmem:[%s60_s1] sm:$0xf] %v16_v0 }
   0xf   :  { %18 = vsyncpa [#allocation1], 1 }

// kernel: tile.29
= control target key start
LH: loop header
LB: loop body
LE: loop exit
PB: predicated region body
PF: predicated region fallthrough
CT: control target
= control target key end

     0   :  { %vm8_vm0 = vcmask 130048   ;;  %s40_s8 = smov 16   ;;  %s41_s9 = smov 32   ;;  %vm14_vm1 = vcmask 523648   ;;  %vm20_vm2 = vcmask 392448   ;;  %vm26_vm3 = vcmask 261248   ;;  %s58_s0 = inlined_call_operand.vmem [shape: f32[4,16], index: 0, kind: input, shape index: {}]   ;;  %s59_s1 = inlined_call_operand.vmem [shape: f32[1,64], index: 1, kind: output, shape index: {}]  }
   0x1   :  { %v5_v0 = vld [vmem:[%s58_s0] sm:$0xf]  ;;  %s39_s0 = smov 48  }
   0x2   :  { %6 = vst [vmem:[#allocation1] sm:$0xf] %v5_v0 }
   0x9   :  { %v11_v1 = vld [vmem:[#allocation1 + $0x3] sm:$0x1]   ;;  %v23_v2 = vld [vmem:[#allocation1 + $0x1] sm:$0x1]   ;;  %v7_v3 = vld [vmem:[#allocation1] sm:$0x1]  }
   0xa   :  { %12 = vrot.lane.b32.xlu0 %v11_v1, %s39_s0  ;;  %24 = vrot.lane.b32.xlu1 %v23_v2, %s40_s8  ;;  %v17_v4 = vld [vmem:[#allocation1 + $0x2] sm:$0x1]   ;;  %9 = vst.msk [vmem:[#allocation0] sm:$0x1] %vm8_vm0, %v7_v3  }
   0xe   :  { %18 = vrot.lane.b32.xlu0 %v17_v4, %s41_s9 }
  0x7c   :  { %v13_v5 = vpop.permute.xlu0 %12   ;;  %v25_v6 = vpop.permute.xlu1 %24  }
  0x7d   :  { %15 = vst.msk [vmem:[#allocation0] sm:$0x1] %vm14_vm1, %v13_v5  }
  0x80   :  { %v19_v7 = vpop.permute.xlu0 %18  }
  0x81   :  { %21 = vst.msk [vmem:[#allocation0] sm:$0x1] %vm20_vm2, %v19_v7  }
  0x82   :  { %27 = vst.msk [vmem:[#allocation0] sm:$0x1] %vm26_vm3, %v25_v6  }
  0x89   :  { %v32_v8 = vld [vmem:[#allocation0] sm:$0x1] }
  0x8a   :  { %35 = vst [vmem:[%s59_s1] sm:$0x1] %v32_v8 }

// kernel: tile.33
= control target key start
LH: loop header
LB: loop body
LE: loop exit
PB: predicated region body
PF: predicated region fallthrough
CT: control target
= control target key end

     0   :  { %2 = vsyncpa [#allocation1], 0  ;;  %s42_s6 = smov [#allocation0]   ;;  %s59_s0 = inlined_call_operand.hbm [shape: f32[8], index: 0, kind: input, shape index: {}]   ;;  %s60_s1 = inlined_call_operand.vmem [shape: f32[4,8], index: 1, kind: output, shape index: {}]  }
   0x1   :  { %s9_s7 = sshll.u32 %s42_s6, 4  ;;  %s10_s7 = int_to_ptr.vmem [resolvable:$true] %s9_s7 }
   0x2   :  { %s28_s8 = scalar_lea.vmem %s10_s7, 16  ;;  %s32_s9 = scalar_lea.vmem %s10_s7, 32 }
   0x3   :  { %p29_p0 = scmp.ne.s32.totalorder %s10_s7, %s28_s8  ;;  %p33_p1 = scmp.lt.s32.totalorder %s10_s7, %s10_s7 }
   0x4   :  { %p34_p2 = scmp.lt.s32.totalorder %s32_s9, %s28_s8 }
   0x6   :  { %p35_p3 = por %p34_p2, %p33_p1 }
   0x8   :  { %p36_p4 = pnand %p35_p3, %p29_p0 }
   0xa   :  { %39 = shalt.err (!%p36_p4)
}
   0xb   :  { %12 = dma.hbm_to_vmem [thread:$0]  %s59_s0, 16, %s10_s7, [#allocation1]  }
   0xc   :  { %40 = dma.done.wait [#allocation1], 16  }
   0xd   :  { %41 = vsyncadd [#allocation1], 4294967280  ;;  %v16_v0 = vld [vmem:[#allocation0] ss:$0 sm:$0xff] }
   0xe   :  { %17 = vst [vmem:[%s60_s1] sm:$0xf] %v16_v0 }
   0xf   :  { %18 = vsyncpa [#allocation1], 1 }

// kernel: tile.34
= control target key start
LH: loop header
LB: loop body
LE: loop exit
PB: predicated region body
PF: predicated region fallthrough
CT: control target
= control target key end

     0   :  { %vm8_vm0 = vcmask 64512   ;;  %s40_s8 = smov 8   ;;  %s41_s9 = smov 16   ;;  %vm14_vm1 = vcmask 261312   ;;  %vm20_vm2 = vcmask 195712   ;;  %vm26_vm3 = vcmask 130112   ;;  %s58_s0 = inlined_call_operand.vmem [shape: f32[4,8], index: 0, kind: input, shape index: {}]   ;;  %s59_s1 = inlined_call_operand.vmem [shape: f32[1,32], index: 1, kind: output, shape index: {}]  }
   0x1   :  { %v5_v0 = vld [vmem:[%s58_s0] sm:$0xf]  ;;  %s39_s0 = smov 24  }
   0x2   :  { %6 = vst [vmem:[#allocation1] sm:$0xf] %v5_v0 }
   0x9   :  { %v11_v1 = vld [vmem:[#allocation1 + $0x3] sm:$0x1]   ;;  %v23_v2 = vld [vmem:[#allocation1 + $0x1] sm:$0x1]   ;;  %v7_v3 = vld [vmem:[#allocation1] sm:$0x1]  }
   0xa   :  { %12 = vrot.lane.b32.xlu0 %v11_v1, %s39_s0  ;;  %24 = vrot.lane.b32.xlu1 %v23_v2, %s40_s8  ;;  %v17_v4 = vld [vmem:[#allocation1 + $0x2] sm:$0x1]   ;;  %9 = vst.msk [vmem:[#allocation0] sm:$0x1] %vm8_vm0, %v7_v3  }
   0xe   :  { %18 = vrot.lane.b32.xlu0 %v17_v4, %s41_s9 }
  0x7c   :  { %v13_v5 = vpop.permute.xlu0 %12   ;;  %v25_v6 = vpop.permute.xlu1 %24  }
  0x7d   :  { %15 = vst.msk [vmem:[#allocation0] sm:$0x1] %vm14_vm1, %v13_v5  }
  0x80   :  { %v19_v7 = vpop.permute.xlu0 %18  }
  0x81   :  { %21 = vst.msk [vmem:[#allocation0] sm:$0x1] %vm20_vm2, %v19_v7  }
  0x82   :  { %27 = vst.msk [vmem:[#allocation0] sm:$0x1] %vm26_vm3, %v25_v6  }
  0x89   :  { %v32_v8 = vld [vmem:[#allocation0] sm:$0x1] }
  0x8a   :  { %35 = vst [vmem:[%s59_s1] sm:$0x1] %v32_v8 }

// kernel: tile.38
= control target key start
LH: loop header
LB: loop body
LE: loop exit
PB: predicated region body
PF: predicated region fallthrough
CT: control target
= control target key end

     0   :  { %2 = vsyncpa [#allocation1], 0  ;;  %s42_s6 = smov [#allocation0]   ;;  %s59_s0 = inlined_call_operand.hbm [shape: f32[3], index: 0, kind: input, shape index: {}]   ;;  %s60_s1 = inlined_call_operand.vmem [shape: f32[4,3], index: 1, kind: output, shape index: {}]  }
   0x1   :  { %s9_s7 = sshll.u32 %s42_s6, 4  ;;  %s10_s7 = int_to_ptr.vmem [resolvable:$true] %s9_s7 }
   0x2   :  { %s28_s8 = scalar_lea.vmem %s10_s7, 16  ;;  %s32_s9 = scalar_lea.vmem %s10_s7, 32 }
   0x3   :  { %p29_p0 = scmp.ne.s32.totalorder %s10_s7, %s28_s8  ;;  %p33_p1 = scmp.lt.s32.totalorder %s10_s7, %s10_s7 }
   0x4   :  { %p34_p2 = scmp.lt.s32.totalorder %s32_s9, %s28_s8 }
   0x6   :  { %p35_p3 = por %p34_p2, %p33_p1 }
   0x8   :  { %p36_p4 = pnand %p35_p3, %p29_p0 }
   0xa   :  { %39 = shalt.err (!%p36_p4)
}
   0xb   :  { %12 = dma.hbm_to_vmem [thread:$0]  %s59_s0, 16, %s10_s7, [#allocation1]  }
   0xc   :  { %40 = dma.done.wait [#allocation1], 16  }
   0xd   :  { %41 = vsyncadd [#allocation1], 4294967280  ;;  %v16_v0 = vld [vmem:[#allocation0] ss:$0 sm:$0xff] }
   0xe   :  { %17 = vst [vmem:[%s60_s1] sm:$0xf] %v16_v0 }
   0xf   :  { %18 = vsyncpa [#allocation1], 1 }

// kernel: tile.39
= control target key start
LH: loop header
LB: loop body
LE: loop exit
PB: predicated region body
PF: predicated region fallthrough
CT: control target
= control target key end

     0   :  { %vm8_vm0 = vcmask 23552   ;;  %s40_s8 = smov 3   ;;  %s41_s9 = smov 6   ;;  %vm14_vm1 = vcmask 97352   ;;  %vm20_vm2 = vcmask 72752   ;;  %vm26_vm3 = vcmask 48152   ;;  %s58_s0 = inlined_call_operand.vmem [shape: f32[4,3], index: 0, kind: input, shape index: {}]   ;;  %s59_s1 = inlined_call_operand.vmem [shape: f32[1,12], index: 1, kind: output, shape index: {}]  }
   0x1   :  { %v5_v0 = vld [vmem:[%s58_s0] sm:$0xf]  ;;  %s39_s0 = smov 9  }
   0x2   :  { %6 = vst [vmem:[#allocation1] sm:$0xf] %v5_v0 }
   0x9   :  { %v11_v1 = vld [vmem:[#allocation1 + $0x3] sm:$0x1]   ;;  %v23_v2 = vld [vmem:[#allocation1 + $0x1] sm:$0x1]   ;;  %v7_v3 = vld [vmem:[#allocation1] sm:$0x1]  }
   0xa   :  { %12 = vrot.lane.b32.xlu0 %v11_v1, %s39_s0  ;;  %24 = vrot.lane.b32.xlu1 %v23_v2, %s40_s8  ;;  %v17_v4 = vld [vmem:[#allocation1 + $0x2] sm:$0x1]   ;;  %9 = vst.msk [vmem:[#allocation0] sm:$0x1] %vm8_vm0, %v7_v3  }
   0xe   :  { %18 = vrot.lane.b32.xlu0 %v17_v4, %s41_s9 }
  0x7c   :  { %v13_v5 = vpop.permute.xlu0 %12   ;;  %v25_v6 = vpop.permute.xlu1 %24  }
  0x7d   :  { %15 = vst.msk [vmem:[#allocation0] sm:$0x1] %vm14_vm1, %v13_v5  }
  0x80   :  { %v19_v7 = vpop.permute.xlu0 %18  }
  0x81   :  { %21 = vst.msk [vmem:[#allocation0] sm:$0x1] %vm20_vm2, %v19_v7  }
  0x82   :  { %27 = vst.msk [vmem:[#allocation0] sm:$0x1] %vm26_vm3, %v25_v6  }
  0x89   :  { %v32_v8 = vld [vmem:[#allocation0] sm:$0x1] }
  0x8a   :  { %35 = vst [vmem:[%s59_s1] sm:$0x1] %v32_v8 }

// kernel: diffusion_forward.9
= control target key start
LH: loop header
LB: loop body
LE: loop exit
PB: predicated region body
PF: predicated region fallthrough
CT: control target
= control target key end

     0   :  { %vm358_vm0 = vcmask 1044480   ;;  %vm359_vm1 = vcmask 1045504   ;;  %v1459_v1 = vmov 65535   ;;  %vm261_vm2 = vcmask 220160   ;;  %s3156_s1 = inlined_call_operand.vmem [shape: bf16[27,128], index: 1, kind: input, shape index: {}]   ;;  %s3157_s0 = inlined_call_operand.vmem [shape: bf16[512,27], index: 0, kind: input, shape index: {}]   ;;  %s3158_s2 = inlined_call_operand.vmem [shape: f32[1,128], index: 2, kind: input, shape index: {}]   ;;  %s3159_s3 = inlined_call_operand.vmem [shape: f32[512,128], index: 3, kind: output, shape index: {}]  }
   0x1   :  { %v1423_v0 = vld [vmem:[%s3156_s1 + $0x8] sm:$0x3f]   ;;  %v360_v2 = vsel %vm358_vm0, 4294967295, %v1459_v1  ;;  %v1425_v4 = vld [vmem:[%s3157_s0] sm:$0xff]   ;;  %v1427_v8 = vld [vmem:[%s3157_s0 + $0x10] sm:$0xff]  }
   0x2   :  { %v361_v3 = vsel %vm359_vm1, %v360_v2, 0  ;;  %v1424_v6 = vld [vmem:[%s3156_s1] sm:$0xff]   ;;  %1354 = vmatprep.mubr.msk.bf16.mxu0 %vm261_vm2, %v1425_v4  ;;  %v1426_v7 = vld [vmem:[%s3157_s0 + $0x8] sm:$0xff]   ;;  %v1428_v9 = vld [vmem:[%s3157_s0 + $0x18] sm:$0xff]  }
   0x3   :  { %v363_v5 = vand.u32 %v1423_v0, %v361_v3  ;;  %v1429_v10 = vld [vmem:[%s3157_s0 + $0x20] sm:$0xff]   ;;  %v1442_v12 = vld [vmem:[%s3157_s0 + $0x88] sm:$0xff]   ;;  %v1443_v13 = vld [vmem:[%s3157_s0 + $0x90] sm:$0xff]  }
   0x4   :  { %v1441_v11 = vld [vmem:[%s3157_s0 + $0x80] sm:$0xff]   ;;  %v1430_v14 = vld [vmem:[%s3157_s0 + $0x28] sm:$0xff]   ;;  %v1431_v15 = vld [vmem:[%s3157_s0 + $0x30] sm:$0xff]  }
   0x5   :  { %1350 = vmatprep.subr.bf16.mxu0 %v363_v5  ;;  %1418 = vmatprep.subr.bf16.mxu1 %v363_v5  ;;  %v1444_v16 = vld [vmem:[%s3157_s0 + $0x98] sm:$0xff]   ;;  %v1445_v17 = vld [vmem:[%s3157_s0 + $0xa0] sm:$0xff]   ;;  %v1446_v19 = vld [vmem:[%s3157_s0 + $0xa8] sm:$0xff]  }
   0x6   :  { %1351 = vmatpush3.bf16.msra.mxu0 %v363_v5  ;;  %1420 = vmatpush3.bf16.msra.mxu1 %v363_v5  ;;  %v1432_v18 = vld [vmem:[%s3157_s0 + $0x38] sm:$0xff]   ;;  %v1433_v20 = vld [vmem:[%s3157_s0 + $0x40] sm:$0xff]   ;;  %v1447_v21 = vld [vmem:[%s3157_s0 + $0xb0] sm:$0xff]  }
   0x7   :  { %1352 = vmatprep.subr.bf16.mxu0 %v1424_v6  ;;  %1419 = vmatprep.subr.bf16.mxu1 %v1424_v6  ;;  %v1434_v22 = vld [vmem:[%s3157_s0 + $0x48] sm:$0xff]   ;;  %v1448_v23 = vld [vmem:[%s3157_s0 + $0xb8] sm:$0xff]   ;;  %v1435_v24 = vld [vmem:[%s3157_s0 + $0x50] sm:$0xff]  }
   0x8   :  { %1386 = vmatprep.mubr.msk.bf16.mxu1 %vm261_vm2, %v1441_v11  ;;  %v1449_v25 = vld [vmem:[%s3157_s0 + $0xc0] sm:$0xff]   ;;  %v1436_v26 = vld [vmem:[%s3157_s0 + $0x58] sm:$0xff]   ;;  %v1450_v27 = vld [vmem:[%s3157_s0 + $0xc8] sm:$0xff]  }
   0x9   :  { %v1437_v28 = vld [vmem:[%s3157_s0 + $0x60] sm:$0xff]   ;;  %v1451_v29 = vld [vmem:[%s3157_s0 + $0xd0] sm:$0xff]   ;;  %v1438_v30 = vld [vmem:[%s3157_s0 + $0x68] sm:$0xff]  }
   0xa   :  { %1353 = vmatpush3.bf16.msra.mxu0 %v1424_v6  ;;  %1421 = vmatpush3.bf16.msra.mxu1 %v1424_v6  ;;  %v1452_v31 = vld [vmem:[%s3157_s0 + $0xd8] sm:$0xff]   ;;  %v1439_v32 = vld [vmem:[%s3157_s0 + $0x70] sm:$0xff]   ;;  %v1453_v33 = vld [vmem:[%s3157_s0 + $0xe0] sm:$0xff]  }
   0xb   :  { %v1440_v34 = vld [vmem:[%s3157_s0 + $0x78] sm:$0xff]   ;;  %v1454_v35 = vld [vmem:[%s3157_s0 + $0xe8] sm:$0xff]   ;;  %v1455_v36 = vld [vmem:[%s3157_s0 + $0xf0] sm:$0xff]  }
   0xc   :  { %v1456_v37 = vld [vmem:[%s3157_s0 + $0xf8] sm:$0xff]   ;;  %v1617_v41 = vld [vmem:[%s3158_s2] ss:$0 sm:$0xff] }
   0xd   :  { %1355 = vmatmul.mubr.msk.bf16.vlgmr.msra.gmra.mxu0 %vm261_vm2, %v1426_v7  ;;  %1387 = vmatmul.mubr.msk.bf16.vlgmr.msra.gmra.mxu1 %vm261_vm2, %v1442_v12 }
   0xe   :  { %1358 = vmatprep.mubr.msk.bf16.mxu0 %vm261_vm2, %v1427_v8  ;;  %1390 = vmatprep.mubr.msk.bf16.mxu1 %vm261_vm2, %v1443_v13 }
  0x15   :  { %1359 = vmatmul.mubr.msk.bf16.gmra.mxu0 %vm261_vm2, %v1428_v9  ;;  %1391 = vmatmul.mubr.msk.bf16.gmra.mxu1 %vm261_vm2, %v1444_v16 }
  0x16   :  { %1362 = vmatprep.mubr.msk.bf16.mxu0 %vm261_vm2, %v1429_v10  ;;  %1394 = vmatprep.mubr.msk.bf16.mxu1 %vm261_vm2, %v1445_v17 }
  0x1d   :  { %1363 = vmatmul.mubr.msk.bf16.gmra.mxu0 %vm261_vm2, %v1430_v14  ;;  %1395 = vmatmul.mubr.msk.bf16.gmra.mxu1 %vm261_vm2, %v1446_v19 }
  0x1e   :  { %1366 = vmatprep.mubr.msk.bf16.mxu0 %vm261_vm2, %v1431_v15  ;;  %1398 = vmatprep.mubr.msk.bf16.mxu1 %vm261_vm2, %v1447_v21 }
  0x25   :  { %1367 = vmatmul.mubr.msk.bf16.gmra.mxu0 %vm261_vm2, %v1432_v18  ;;  %1399 = vmatmul.mubr.msk.bf16.gmra.mxu1 %vm261_vm2, %v1448_v23 }
  0x26   :  { %1370 = vmatprep.mubr.msk.bf16.mxu0 %vm261_vm2, %v1433_v20  ;;  %1402 = vmatprep.mubr.msk.bf16.mxu1 %vm261_vm2, %v1449_v25 }
  0x2d   :  { %1371 = vmatmul.mubr.msk.bf16.gmra.mxu0 %vm261_vm2, %v1434_v22  ;;  %1403 = vmatmul.mubr.msk.bf16.gmra.mxu1 %vm261_vm2, %v1450_v27 }
  0x2e   :  { %1374 = vmatprep.mubr.msk.bf16.mxu0 %vm261_vm2, %v1435_v24  ;;  %1406 = vmatprep.mubr.msk.bf16.mxu1 %vm261_vm2, %v1451_v29 }
  0x35   :  { %1375 = vmatmul.mubr.msk.bf16.gmra.mxu0 %vm261_vm2, %v1436_v26  ;;  %1407 = vmatmul.mubr.msk.bf16.gmra.mxu1 %vm261_vm2, %v1452_v31 }
  0x36   :  { %1378 = vmatprep.mubr.msk.bf16.mxu0 %vm261_vm2, %v1437_v28  ;;  %1410 = vmatprep.mubr.msk.bf16.mxu1 %vm261_vm2, %v1453_v33 }
  0x3d   :  { %1379 = vmatmul.mubr.msk.bf16.gmra.mxu0 %vm261_vm2, %v1438_v30  ;;  %1411 = vmatmul.mubr.msk.bf16.gmra.mxu1 %vm261_vm2, %v1454_v35 }
  0x3e   :  { %1382 = vmatprep.mubr.msk.bf16.mxu0 %vm261_vm2, %v1439_v32  ;;  %1414 = vmatprep.mubr.msk.bf16.mxu1 %vm261_vm2, %v1455_v36 }
  0x45   :  { %1383 = vmatmul.mubr.msk.bf16.gmra.mxu0 %vm261_vm2, %v1440_v34  ;;  %1415 = vmatmul.mubr.msk.bf16.gmra.mxu1 %vm261_vm2, %v1456_v37 }
  0xcd   :  { %v1356_v38 = vpop.f32.mrf.mxu0  ;;  %v1625_v46 = vpop.f32.mrf.mxu1 }
  0xce   :  { %v1628_v47 = vadd.f32 %v1356_v38, %v1617_v41 }
  0xcf   :  { %v399_v39 = vpop.f32.mrf.mxu0  ;;  %v1632_v50 = vpop.f32.mrf.mxu1 }
  0xd0   :  { %v1620_v43 = vadd.f32 %v1617_v41, %v399_v39 }
  0xd1   :  { %v1357_v40 = vpop.f32.mrf.mxu0  ;;  %v1638_v54 = vpop.f32.mrf.mxu1 }
  0xd2   :  { %v1635_v51 = vadd.f32 %v1357_v40, %v1617_v41 }
  0xd3   :  { %v402_v42 = vpop.f32.mrf.mxu0  ;;  %v1644_v58 = vpop.f32.mrf.mxu1 }
  0xd4   :  { %v1623_v44 = vadd.f32 %v1617_v41, %v402_v42 }
  0xd5   :  { %v1360_v45 = vpop.f32.mrf.mxu0  ;;  %v1650_v62 = vpop.f32.mrf.mxu1 }
  0xd6   :  { %v654_v48 = vadd.f32 %v1623_v44, %v1620_v43  ;;  %v1653_v63 = vadd.f32 %v1360_v45, %v1617_v41 }
  0xd7   :  { %v415_v49 = vpop.f32.mrf.mxu0  ;;  %v1660_v5 = vpop.f32.mrf.mxu1 }
  0xd8   :  { %v655_v52 = vadd.f32 %v654_v48, %v1628_v47  ;;  %v1641_v55 = vadd.f32 %v1617_v41, %v415_v49 }
  0xd9   :  { %v1361_v53 = vpop.f32.mrf.mxu0  ;;  %v1670_v12 = vpop.f32.mrf.mxu1 }
  0xda   :  { %v656_v56 = vadd.f32 %v655_v52, %v1635_v51  ;;  %v1657_v2 = vadd.f32 %v1361_v53, %v1617_v41 }
  0xdb   :  { %v418_v57 = vpop.f32.mrf.mxu0  ;;  %v1680_v19 = vpop.f32.mrf.mxu1 }
  0xdc   :  { %v657_v59 = vadd.f32 %v656_v56, %v1641_v55  ;;  %v1648_v60 = vadd.f32 %v1617_v41, %v418_v57 }
  0xdd   :  { %v1364_v61 = vpop.f32.mrf.mxu0  ;;  %v1690_v26 = vpop.f32.mrf.mxu1 }
  0xde   :  { %v658_v0 = vadd.f32 %v657_v59, %v1648_v60  ;;  %v1673_v13 = vadd.f32 %v1364_v61, %v1617_v41 }
  0xdf   :  { %v431_v1 = vpop.f32.mrf.mxu0  ;;  %v1700_v33 = vpop.f32.mrf.mxu1 }
  0xe0   :  { %v659_v3 = vadd.f32 %v658_v0, %v1653_v63  ;;  %v1663_v6 = vadd.f32 %v1617_v41, %v431_v1 }
  0xe1   :  { %v1365_v4 = vpop.f32.mrf.mxu0  ;;  %v1710_v40 = vpop.f32.mrf.mxu1 }
  0xe2   :  { %v660_v7 = vadd.f32 %v659_v3, %v1657_v2  ;;  %v1677_v16 = vadd.f32 %v1365_v4, %v1617_v41 }
  0xe3   :  { %v434_v8 = vpop.f32.mrf.mxu0  ;;  %v1720_v56 = vpop.f32.mrf.mxu1 }
  0xe4   :  { %v661_v9 = vadd.f32 %v660_v7, %v1663_v6  ;;  %v1668_v10 = vadd.f32 %v1617_v41, %v434_v8 }
  0xe5   :  { %v1368_v11 = vpop.f32.mrf.mxu0  ;;  %v1730_v4 = vpop.f32.mrf.mxu1 }
  0xe6   :  { %v662_v14 = vadd.f32 %v661_v9, %v1668_v10  ;;  %v1693_v27 = vadd.f32 %v1368_v11, %v1617_v41 }
  0xe7   :  { %v447_v15 = vpop.f32.mrf.mxu0 }
  0xe8   :  { %v663_v17 = vadd.f32 %v662_v14, %v1673_v13  ;;  %v1683_v20 = vadd.f32 %v1617_v41, %v447_v15 }
  0xe9   :  { %v1369_v18 = vpop.f32.mrf.mxu0 }
  0xea   :  { %v664_v21 = vadd.f32 %v663_v17, %v1677_v16  ;;  %v1697_v30 = vadd.f32 %v1369_v18, %v1617_v41  ;;  %v575_v17 = vpop.f32.mrf.mxu1 }
  0xeb   :  { %v450_v22 = vpop.f32.mrf.mxu0 }
  0xec   :  { %v665_v23 = vadd.f32 %v664_v21, %v1683_v20  ;;  %v1688_v24 = vadd.f32 %v1617_v41, %v450_v22 }
  0xed   :  { %v1372_v25 = vpop.f32.mrf.mxu0 }
  0xee   :  { %v666_v28 = vadd.f32 %v665_v23, %v1688_v24  ;;  %v1713_v42 = vadd.f32 %v1372_v25, %v1617_v41 }
  0xef   :  { %v463_v29 = vpop.f32.mrf.mxu0 }
  0xf0   :  { %v667_v31 = vadd.f32 %v666_v28, %v1693_v27  ;;  %v1703_v34 = vadd.f32 %v1617_v41, %v463_v29  ;;  %v1401_v29 = vpop.f32.mrf.mxu1 }
  0xf1   :  { %v1373_v32 = vpop.f32.mrf.mxu0 }
  0xf2   :  { %v668_v35 = vadd.f32 %v667_v31, %v1697_v30  ;;  %v1717_v49 = vadd.f32 %v1373_v32, %v1617_v41 }
  0xf3   :  { %v466_v36 = vpop.f32.mrf.mxu0 }
  0xf4   :  { %v669_v37 = vadd.f32 %v668_v35, %v1703_v34  ;;  %v1708_v38 = vadd.f32 %v1617_v41, %v466_v36 }
  0xf5   :  { %v1376_v39 = vpop.f32.mrf.mxu0 }
  0xf6   :  { %v670_v45 = vadd.f32 %v669_v37, %v1708_v38  ;;  %v1733_v7 = vadd.f32 %v1376_v39, %v1617_v41 }
  0xf7   :  { %v479_v48 = vpop.f32.mrf.mxu0 }
  0xf8   :  { %v671_v52 = vadd.f32 %v670_v45, %v1713_v42  ;;  %v1723_v57 = vadd.f32 %v1617_v41, %v479_v48  ;;  %v578_v45 = vpop.f32.mrf.mxu1 }
  0xf9   :  { %v1377_v53 = vpop.f32.mrf.mxu0 }
  0xfa   :  { %v672_v59 = vadd.f32 %v671_v52, %v1717_v49  ;;  %v1737_v11 = vadd.f32 %v1377_v53, %v1617_v41 }
  0xfb   :  { %v482_v61 = vpop.f32.mrf.mxu0 }
  0xfc   :  { %v673_v0 = vadd.f32 %v672_v59, %v1723_v57  ;;  %v1728_v1 = vadd.f32 %v1617_v41, %v482_v61 }
  0xfd   :  { %v1380_v3 = vpop.f32.mrf.mxu0 }
  0xfe   :  { %v674_v8 = vadd.f32 %v673_v0, %v1728_v1  ;;  %v1749_v31 = vadd.f32 %v1380_v3, %v1617_v41  ;;  %v1404_v0 = vpop.f32.mrf.mxu1 }
  0xff   :  { %v495_v9 = vpop.f32.mrf.mxu0 }
 0x100   :  { %v675_v14 = vadd.f32 %v674_v8, %v1733_v7  ;;  %v1741_v18 = vadd.f32 %v1617_v41, %v495_v9 }
 0x101   :  { %v1381_v15 = vpop.f32.mrf.mxu0 }
 0x102   :  { %v676_v21 = vadd.f32 %v675_v14, %v1737_v11  ;;  %v1753_v36 = vadd.f32 %v1381_v15, %v1617_v41  ;;  %v591_v15 = vpop.f32.mrf.mxu1 }
 0x103   :  { %v498_v22 = vpop.f32.mrf.mxu0 }
 0x104   :  { %v677_v23 = vadd.f32 %v676_v21, %v1741_v18  ;;  %v1746_v25 = vadd.f32 %v1617_v41, %v498_v22  ;;  %3222 = vst [vmem:[#allocation2_spill] sm:$0xff] %v1753_v36  ;;  %v1774_v21 = vadd.f32 %v1617_v41, %v1632_v50 }
 0x105   :  { %v1384_v28 = vpop.f32.mrf.mxu0 }
 0x106   :  { %v678_v32 = vadd.f32 %v677_v23, %v1746_v25  ;;  %v1765_v3 = vadd.f32 %v1384_v28, %v1617_v41  ;;  %3227 = vst [vmem:[#allocation7_spill] sm:$0xff] %v1774_v21  ;;  %v1779_v23 = vadd.f32 %v1617_v41, %v1644_v58  ;;  %v1794_v58 = vadd.f32 %v1617_v41, %v1660_v5 }
 0x107   :  { %v511_v35 = vpop.f32.mrf.mxu0 }
 0x108   :  { %v679_v37 = vadd.f32 %v678_v32, %v1749_v31  ;;  %v1757_v48 = vadd.f32 %v1617_v41, %v511_v35  ;;  %3225 = vst [vmem:[#allocation5_spill] sm:$0xff] %v1765_v3  ;;  %3228 = vst [vmem:[#allocation8_spill] sm:$0xff] %v1779_v23  ;;  %v1405_v32 = vpop.f32.mrf.mxu1  ;;  %v1784_v35 = vadd.f32 %v1625_v46, %v1617_v41 }
 0x109   :  { %v1385_v39 = vpop.f32.mrf.mxu0  ;;  %3231 = vst [vmem:[#allocation11_spill] sm:$0xff] %v1794_v58  ;;  %v1800_v46 = vadd.f32 %v1617_v41, %v1680_v19 }
 0x10a   :  { %3223 = vst [vmem:[#allocation3_spill] sm:$0xff] %v1757_v48  ;;  %v680_v52 = vadd.f32 %v679_v37, %v1753_v36  ;;  %v1769_v9 = vadd.f32 %v1385_v39, %v1617_v41  ;;  %3229 = vst [vmem:[#allocation9_spill] sm:$0xff] %v1784_v35  ;;  %v1789_v39 = vadd.f32 %v1638_v54, %v1617_v41 }
 0x10b   :  { %v514_v53 = vpop.f32.mrf.mxu0  ;;  %3232 = vst [vmem:[#allocation12_spill] sm:$0xff] %v1800_v46  ;;  %v1804_v54 = vadd.f32 %v1650_v62, %v1617_v41  ;;  %v1820_v62 = vadd.f32 %v1617_v41, %v1720_v56 }
 0x10c   :  { %v681_v59 = vadd.f32 %v680_v52, %v1757_v48  ;;  %v1762_v61 = vadd.f32 %v1617_v41, %v514_v53  ;;  %3226 = vst [vmem:[#allocation6_spill] sm:$0xff] %v1769_v9  ;;  %3230 = vst [vmem:[#allocation10_spill] sm:$0xff] %v1789_v39  ;;  %v594_v52 = vpop.f32.mrf.mxu1 }
 0x10d   :  { %3233 = vst [vmem:[#allocation13_spill] sm:$0xff] %v1804_v54  ;;  %3236 = vst [vmem:[#allocation16_spill] sm:$0xff] %v1820_v62 }
 0x10e   :  { %3224 = vst [vmem:[#allocation4_spill] sm:$0xff] %v1762_v61  ;;  %v682_v8 = vadd.f32 %v681_v59, %v1762_v61 }
 0x110   :  { %v683_v14 = vadd.f32 %v682_v8, %v1765_v3  ;;  %v1408_v8 = vpop.f32.mrf.mxu1 }
 0x112   :  { %v684_v22 = vadd.f32 %v683_v14, %v1769_v9 }
 0x114   :  { %v685_v28 = vadd.f32 %v684_v22, %v1774_v21  ;;  %v1809_v22 = vadd.f32 %v1670_v12, %v1617_v41  ;;  %v1824_v12 = vadd.f32 %v1690_v26, %v1617_v41 }
 0x116   :  { %v686_v37 = vadd.f32 %v685_v28, %v1779_v23  ;;  %3234 = vst [vmem:[#allocation14_spill] sm:$0xff] %v1809_v22  ;;  %v607_v28 = vpop.f32.mrf.mxu1  ;;  %3237 = vst [vmem:[#allocation17_spill] sm:$0xff] %v1824_v12 }
 0x118   :  { %v687_v50 = vadd.f32 %v686_v37, %v1784_v35  ;;  %v1814_v37 = vadd.f32 %v1617_v41, %v1700_v33 }
 0x11a   :  { %v688_v53 = vadd.f32 %v687_v50, %v1789_v39  ;;  %3235 = vst [vmem:[#allocation15_spill] sm:$0xff] %v1814_v37 }
 0x11c   :  { %v689_v59 = vadd.f32 %v688_v53, %v1794_v58  ;;  %v1409_v53 = vpop.f32.mrf.mxu1  ;;  %v595_v58 = vadd.f32 %v1617_v41, %v594_v52 }
 0x11d   :  { %v619_v52 = vadd.f32 %v1409_v53, %v1617_v41 }
 0x11e   :  { %v690_v14 = vadd.f32 %v689_v59, %v1800_v46 }
 0x120   :  { %v691_v5 = vadd.f32 %v690_v14, %v1804_v54  ;;  %v1829_v14 = vadd.f32 %v1710_v40, %v1617_v41  ;;  %v587_v40 = vadd.f32 %v1401_v29, %v1617_v41 }
 0x122   :  { %v692_v19 = vadd.f32 %v691_v5, %v1809_v22  ;;  %3238 = vst [vmem:[#allocation18_spill] sm:$0xff] %v1829_v14  ;;  %v610_v5 = vpop.f32.mrf.mxu1  ;;  %v579_v22 = vadd.f32 %v1617_v41, %v578_v45  ;;  %v603_v45 = vadd.f32 %v1405_v32, %v1617_v41 }
 0x124   :  { %v693_v50 = vadd.f32 %v692_v19, %v1814_v37  ;;  %v1833_v19 = vadd.f32 %v1617_v41, %v575_v17  ;;  %v1412_v26 = vpop.f32.mrf.mxu1 }
 0x126   :  { %v694_v59 = vadd.f32 %v693_v50, %v1820_v62  ;;  %3239 = vst [vmem:[#allocation19_spill] sm:$0xff] %v1833_v19  ;;  %v584_v50 = vadd.f32 %v1730_v4, %v1617_v41  ;;  %v623_v46 = vpop.f32.mrf.mxu1  ;;  %v608_v4 = vadd.f32 %v1617_v41, %v607_v28  ;;  %v632_v28 = vadd.f32 %v1412_v26, %v1617_v41 }
 0x128   :  { %v695_v33 = vadd.f32 %v694_v59, %v1824_v12  ;;  %v592_v59 = vadd.f32 %v1617_v41, %v591_v15  ;;  %v616_v15 = vadd.f32 %v1408_v8, %v1617_v41 }
 0x12a   :  { %v696_v56 = vadd.f32 %v695_v33, %v1829_v14  ;;  %v1413_v33 = vpop.f32.mrf.mxu1 }
 0x12c   :  { %v697_v37 = vadd.f32 %v696_v56, %v1833_v19  ;;  %v600_v56 = vadd.f32 %v1404_v0, %v1617_v41  ;;  %v626_v39 = vpop.f32.mrf.mxu1  ;;  %v624_v0 = vadd.f32 %v1617_v41, %v623_v46 }
 0x12e   :  { %v698_v62 = vadd.f32 %v697_v37, %v579_v22  ;;  %v1416_v35 = vpop.f32.mrf.mxu1 }
 0x12f   :  { %v648_v46 = vadd.f32 %v1416_v35, %v1617_v41 }
 0x130   :  { %v699_v54 = vadd.f32 %v698_v62, %v584_v50  ;;  %v611_v62 = vadd.f32 %v1617_v41, %v610_v5  ;;  %v639_v23 = vpop.f32.mrf.mxu1  ;;  %v635_v5 = vadd.f32 %v1413_v33, %v1617_v41 }
 0x131   :  { %v640_v8 = vadd.f32 %v1617_v41, %v639_v23 }
 0x132   :  { %v700_v12 = vadd.f32 %v699_v54, %v587_v40  ;;  %v1417_v21 = vpop.f32.mrf.mxu1 }
 0x134   :  { %v701_v17 = vadd.f32 %v700_v12, %v592_v59  ;;  %v642_v9 = vpop.f32.mrf.mxu1 }
 0x136   :  { %v702_v19 = vadd.f32 %v701_v17, %v595_v58 }
 0x138   :  { %v703_v14 = vadd.f32 %v702_v19, %v600_v56  ;;  %v627_v19 = vadd.f32 %v1617_v41, %v626_v39 }
 0x13a   :  { %v704_v37 = vadd.f32 %v703_v14, %v603_v45 }
 0x13c   :  { %v705_v29 = vadd.f32 %v704_v37, %v608_v4 }
 0x13e   :  { %v706_v54 = vadd.f32 %v705_v29, %v611_v62 }
 0x140   :  { %v707_v12 = vadd.f32 %v706_v54, %v616_v15  ;;  %v643_v54 = vadd.f32 %v1617_v41, %v642_v9 }
 0x142   :  { %v708_v17 = vadd.f32 %v707_v12, %v619_v52 }
 0x144   :  { %v709_v32 = vadd.f32 %v708_v17, %v624_v0  ;;  %v651_v17 = vadd.f32 %v1417_v21, %v1617_v41 }
 0x146   :  { %v710_v14 = vadd.f32 %v709_v32, %v627_v19 }
 0x148   :  { %v711_v37 = vadd.f32 %v710_v14, %v632_v28 }
 0x14a   :  { %v712_v29 = vadd.f32 %v711_v37, %v635_v5 }
 0x14c   :  { %v713_v53 = vadd.f32 %v712_v29, %v640_v8 }
 0x14e   :  { %v714_v12 = vadd.f32 %v713_v53, %v643_v54 }
 0x150   :  { %v715_v39 = vadd.f32 %v714_v12, %v648_v46 }
 0x152   :  { %v716_v3 = vadd.f32 %v715_v39, %v651_v17 }
 0x154   :  { %v717_v61 = vrot.slane %v716_v3, 4 }
 0x156   :  { %v718_v26 = vadd.f32 %v717_v61, %v716_v3 }
 0x158   :  { %v719_v32 = vrot.slane %v718_v26, 2 }
 0x15a   :  { %v720_v48 = vadd.f32 %v719_v32, %v718_v26 }
 0x15c   :  { %v721_v33 = vrot.slane %v720_v48, 1 }
 0x15e   :  { %v722_v14 = vadd.f32 %v721_v33, %v720_v48 }
 0x160   :  { %v1857_v36 = vmul.f32 0.001953125, %v722_v14 }
 0x162   :  { %v1860_v23 = vsub.f32 %v579_v22, %v1857_v36  ;;  %v1863_v9 = vsub.f32 %v584_v50, %v1857_v36  ;;  %v1866_v35 = vsub.f32 %v587_v40, %v1857_v36  ;;  %v1869_v41 = vsub.f32 %v592_v59, %v1857_v36 }
 0x163   :  { %v1872_v61 = vsub.f32 %v595_v58, %v1857_v36  ;;  %v1875_v3 = vsub.f32 %v600_v56, %v1857_v36  ;;  %v1878_v48 = vsub.f32 %v603_v45, %v1857_v36  ;;  %v1881_v21 = vsub.f32 %v608_v4, %v1857_v36 }
 0x164   :  { %v1884_v22 = vsub.f32 %v611_v62, %v1857_v36  ;;  %v1887_v50 = vsub.f32 %v616_v15, %v1857_v36  ;;  %v1890_v40 = vsub.f32 %v619_v52, %v1857_v36  ;;  %v1893_v58 = vsub.f32 %v624_v0, %v1857_v36 }
 0x165   :  { %v1896_v59 = vsub.f32 %v627_v19, %v1857_v36  ;;  %v1899_v56 = vsub.f32 %v632_v28, %v1857_v36  ;;  %v1902_v45 = vsub.f32 %v635_v5, %v1857_v36  ;;  %v1905_v4 = vsub.f32 %v640_v8, %v1857_v36 }
 0x166   :  { %v1908_v62 = vsub.f32 %v643_v54, %v1857_v36  ;;  %v1911_v15 = vsub.f32 %v648_v46, %v1857_v36  ;;  %v1914_v52 = vsub.f32 %v651_v17, %v1857_v36  ;;  %v1918_v0 = vsub.f32 %v1620_v43, %v1857_v36 }
 0x167   :  { %3240 = vst [vmem:[#allocation20_spill] sm:$0xff] %v1896_v59  ;;  %3241 = vst [vmem:[#allocation21_spill] sm:$0xff] %v1899_v56  ;;  %v1922_v19 = vsub.f32 %v1623_v44, %v1857_v36  ;;  %v1926_v28 = vsub.f32 %v1628_v47, %v1857_v36  ;;  %v1934_v8 = vsub.f32 %v1635_v51, %v1857_v36 }
 0x168   :  { %3242 = vst [vmem:[#allocation22_spill] sm:$0xff] %v1902_v45  ;;  %3243 = vst [vmem:[#allocation23_spill] sm:$0xff] %v1905_v4  ;;  %v789_v5 = vmul.f32 %v1918_v0, %v1918_v0  ;;  %v1938_v43 = vsub.f32 %v1641_v55, %v1857_v36  ;;  %v1944_v47 = vsub.f32 %v1648_v60, %v1857_v36 }
 0x169   :  { %3244 = vst [vmem:[#allocation24_spill] sm:$0xff] %v1908_v62  ;;  %v790_v37 = vmul.f32 %v1922_v19, %v1922_v19  ;;  %v791_v44 = vmul.f32 %v1926_v28, %v1926_v28  ;;  %v792_v53 = vmul.f32 %v1934_v8, %v1934_v8  ;;  %v1950_v51 = vsub.f32 %v1653_v63, %v1857_v36 }
 0x16a   :  { %v793_v55 = vmul.f32 %v1938_v43, %v1938_v43  ;;  %v1956_v12 = vsub.f32 %v1657_v2, %v1857_v36  ;;  %v794_v60 = vmul.f32 %v1944_v47, %v1944_v47  ;;  %v1962_v39 = vsub.f32 %v1663_v6, %v1857_v36 }
 0x16b   :  { %v853_v29 = vadd.f32 %v790_v37, %v789_v5  ;;  %v795_v63 = vmul.f32 %v1950_v51, %v1950_v51  ;;  %v1968_v32 = vsub.f32 %v1668_v10, %v1857_v36  ;;  %v1974_v14 = vsub.f32 %v1673_v13, %v1857_v36 }
 0x16c   :  { %v796_v2 = vmul.f32 %v1956_v12, %v1956_v12  ;;  %v797_v6 = vmul.f32 %v1962_v39, %v1962_v39  ;;  %v1980_v37 = vsub.f32 %v1677_v16, %v1857_v36 }
 0x16d   :  { %v854_v54 = vadd.f32 %v853_v29, %v791_v44  ;;  %v798_v10 = vmul.f32 %v1968_v32, %v1968_v32  ;;  %v1986_v29 = vsub.f32 %v1683_v20, %v1857_v36  ;;  %v799_v13 = vmul.f32 %v1974_v14, %v1974_v14 }
 0x16e   :  { %v800_v16 = vmul.f32 %v1980_v37, %v1980_v37 }
 0x16f   :  { %v855_v46 = vadd.f32 %v854_v54, %v792_v53  ;;  %v1992_v54 = vsub.f32 %v1688_v24, %v1857_v36  ;;  %v801_v20 = vmul.f32 %v1986_v29, %v1986_v29 }
 0x171   :  { %v856_v17 = vadd.f32 %v855_v46, %v793_v55  ;;  %v1998_v46 = vsub.f32 %v1693_v27, %v1857_v36  ;;  %v802_v24 = vmul.f32 %v1992_v54, %v1992_v54 }
 0x173   :  { %v857_v26 = vadd.f32 %v856_v17, %v794_v60  ;;  %v2004_v17 = vsub.f32 %v1697_v30, %v1857_v36  ;;  %v803_v27 = vmul.f32 %v1998_v46, %v1998_v46 }
 0x175   :  { %v858_v33 = vadd.f32 %v857_v26, %v795_v63  ;;  %v2010_v26 = vsub.f32 %v1703_v34, %v1857_v36  ;;  %v804_v30 = vmul.f32 %v2004_v17, %v2004_v17 }
 0x177   :  { %v859_v5 = vadd.f32 %v858_v33, %v796_v2  ;;  %v2016_v33 = vsub.f32 %v1708_v38, %v1857_v36  ;;  %v805_v34 = vmul.f32 %v2010_v26, %v2010_v26 }
 0x179   :  { %v860_v44 = vadd.f32 %v859_v5, %v797_v6  ;;  %v2022_v5 = vsub.f32 %v1713_v42, %v1857_v36  ;;  %v806_v38 = vmul.f32 %v2016_v33, %v2016_v33 }
 0x17b   :  { %v861_v53 = vadd.f32 %v860_v44, %v798_v10  ;;  %v2028_v44 = vsub.f32 %v1717_v49, %v1857_v36  ;;  %v807_v42 = vmul.f32 %v2022_v5, %v2022_v5 }
 0x17d   :  { %v862_v55 = vadd.f32 %v861_v53, %v799_v13  ;;  %v2034_v53 = vsub.f32 %v1723_v57, %v1857_v36  ;;  %v808_v49 = vmul.f32 %v2028_v44, %v2028_v44 }
 0x17f   :  { %v863_v60 = vadd.f32 %v862_v55, %v800_v16  ;;  %v2040_v55 = vsub.f32 %v1728_v1, %v1857_v36  ;;  %v809_v57 = vmul.f32 %v2034_v53, %v2034_v53 }
 0x181   :  { %v864_v63 = vadd.f32 %v863_v60, %v801_v20  ;;  %v2046_v60 = vsub.f32 %v1733_v7, %v1857_v36  ;;  %v810_v1 = vmul.f32 %v2040_v55, %v2040_v55 }
 0x183   :  { %v865_v2 = vadd.f32 %v864_v63, %v802_v24  ;;  %v2052_v63 = vsub.f32 %v1737_v11, %v1857_v36  ;;  %v811_v7 = vmul.f32 %v2046_v60, %v2046_v60 }
 0x185   :  { %v866_v6 = vadd.f32 %v865_v2, %v803_v27  ;;  %v2058_v2 = vsub.f32 %v1741_v18, %v1857_v36  ;;  %v812_v11 = vmul.f32 %v2052_v63, %v2052_v63 }
 0x187   :  { %v867_v10 = vadd.f32 %v866_v6, %v804_v30  ;;  %v2064_v6 = vsub.f32 %v1746_v25, %v1857_v36  ;;  %v813_v18 = vmul.f32 %v2058_v2, %v2058_v2 }
 0x189   :  { %v868_v13 = vadd.f32 %v867_v10, %v805_v34  ;;  %v2070_v10 = vsub.f32 %v1749_v31, %v1857_v36  ;;  %v814_v25 = vmul.f32 %v2064_v6, %v2064_v6 }
 0x18b   :  { %v869_v16 = vadd.f32 %v868_v13, %v806_v38  ;;  %v3245_v13 = vld [vmem:[#allocation2_spill] sm:$0xff]  ;;  %v815_v31 = vmul.f32 %v2070_v10, %v2070_v10 }
 0x18d   :  { %v870_v20 = vadd.f32 %v869_v16, %v807_v42  ;;  %v2076_v42 = vsub.f32 %v3245_v13, %v1857_v36 }
 0x18f   :  { %v871_v24 = vadd.f32 %v870_v20, %v808_v49  ;;  %v3246_v49 = vld [vmem:[#allocation3_spill] sm:$0xff] }
 0x190   :  { %v2082_v20 = vsub.f32 %v3246_v49, %v1857_v36  ;;  %v3254_v49 = vld [vmem:[#allocation7_spill] sm:$0xff] }
 0x191   :  { %v872_v27 = vadd.f32 %v871_v24, %v809_v57  ;;  %v3248_v24 = vld [vmem:[#allocation4_spill] sm:$0xff] }
 0x192   :  { %3247 = vst [vmem:[#allocation2_spill] sm:$0xff] %v2082_v20 }
 0x193   :  { %v873_v30 = vadd.f32 %v872_v27, %v810_v1  ;;  %v2088_v1 = vsub.f32 %v3248_v24, %v1857_v36  ;;  %v816_v27 = vmul.f32 %v2076_v42, %v2076_v42  ;;  %v2106_v24 = vsub.f32 %v3254_v49, %v1857_v36  ;;  %v3260_v49 = vld [vmem:[#allocation10_spill] sm:$0xff] }
 0x195   :  { %v874_v34 = vadd.f32 %v873_v30, %v811_v7  ;;  %3249 = vst [vmem:[#allocation3_spill] sm:$0xff] %v2088_v1  ;;  %v3250_v30 = vld [vmem:[#allocation5_spill] sm:$0xff] }
 0x197   :  { %v875_v38 = vadd.f32 %v874_v34, %v812_v11  ;;  %v2094_v11 = vsub.f32 %v3250_v30, %v1857_v36  ;;  %v817_v34 = vmul.f32 %v2082_v20, %v2082_v20  ;;  %v3256_v30 = vld [vmem:[#allocation8_spill] sm:$0xff] }
 0x198   :  { %v2112_v20 = vsub.f32 %v3256_v30, %v1857_v36  ;;  %v3262_v30 = vld [vmem:[#allocation11_spill] sm:$0xff] }
 0x199   :  { %v876_v16 = vadd.f32 %v875_v38, %v813_v18  ;;  %3251 = vst [vmem:[#allocation4_spill] sm:$0xff] %v2094_v11  ;;  %v3252_v38 = vld [vmem:[#allocation6_spill] sm:$0xff] }
 0x19a   :  { %v2100_v13 = vsub.f32 %v3252_v38, %v1857_v36  ;;  %3255 = vst [vmem:[#allocation6_spill] sm:$0xff] %v2106_v24  ;;  %3257 = vst [vmem:[#allocation7_spill] sm:$0xff] %v2112_v20  ;;  %v3258_v38 = vld [vmem:[#allocation9_spill] sm:$0xff] }
 0x19b   :  { %v877_v57 = vadd.f32 %v876_v16, %v814_v25  ;;  %v818_v25 = vmul.f32 %v2088_v1, %v2088_v1  ;;  %v2118_v1 = vsub.f32 %v3258_v38, %v1857_v36  ;;  %v3264_v38 = vld [vmem:[#allocation12_spill] sm:$0xff] }
 0x19c   :  { %3253 = vst [vmem:[#allocation5_spill] sm:$0xff] %v2100_v13 }
 0x19d   :  { %v878_v7 = vadd.f32 %v877_v57, %v815_v31  ;;  %v819_v31 = vmul.f32 %v2094_v11, %v2094_v11  ;;  %3259 = vst [vmem:[#allocation8_spill] sm:$0xff] %v2118_v1  ;;  %v2124_v11 = vsub.f32 %v3260_v49, %v1857_v36  ;;  %v3266_v49 = vld [vmem:[#allocation13_spill] sm:$0xff] }
 0x19f   :  { %v879_v18 = vadd.f32 %v878_v7, %v816_v27  ;;  %v820_v27 = vmul.f32 %v2100_v13, %v2100_v13  ;;  %3261 = vst [vmem:[#allocation9_spill] sm:$0xff] %v2124_v11  ;;  %v2130_v13 = vsub.f32 %v3262_v30, %v1857_v36  ;;  %v3268_v30 = vld [vmem:[#allocation14_spill] sm:$0xff] }
 0x1a1   :  { %v880_v16 = vadd.f32 %v879_v18, %v817_v34  ;;  %v821_v34 = vmul.f32 %v2106_v24, %v2106_v24  ;;  %3263 = vst [vmem:[#allocation10_spill] sm:$0xff] %v2130_v13  ;;  %v2136_v24 = vsub.f32 %v3264_v38, %v1857_v36  ;;  %v3270_v38 = vld [vmem:[#allocation15_spill] sm:$0xff] }
 0x1a3   :  { %v881_v57 = vadd.f32 %v880_v16, %v818_v25  ;;  %v822_v25 = vmul.f32 %v2112_v20, %v2112_v20  ;;  %3265 = vst [vmem:[#allocation11_spill] sm:$0xff] %v2136_v24  ;;  %v2142_v20 = vsub.f32 %v3266_v49, %v1857_v36  ;;  %v3271_v49 = vld [vmem:[#allocation16_spill] sm:$0xff] }
 0x1a5   :  { %v882_v7 = vadd.f32 %v881_v57, %v819_v31  ;;  %v823_v31 = vmul.f32 %v2118_v1, %v2118_v1  ;;  %3267 = vst [vmem:[#allocation12_spill] sm:$0xff] %v2142_v20  ;;  %v2148_v1 = vsub.f32 %v3268_v30, %v1857_v36  ;;  %v3273_v30 = vld [vmem:[#allocation17_spill] sm:$0xff] }
 0x1a7   :  { %v883_v18 = vadd.f32 %v882_v7, %v820_v27  ;;  %v824_v27 = vmul.f32 %v2124_v11, %v2124_v11  ;;  %3269 = vst [vmem:[#allocation13_spill] sm:$0xff] %v2148_v1  ;;  %v2154_v11 = vsub.f32 %v3270_v38, %v1857_v36  ;;  %v3274_v38 = vld [vmem:[#allocation18_spill] sm:$0xff] }
 0x1a9   :  { %v884_v16 = vadd.f32 %v883_v18, %v821_v34  ;;  %v825_v34 = vmul.f32 %v2130_v13, %v2130_v13  ;;  %v2160_v13 = vsub.f32 %v3271_v49, %v1857_v36  ;;  %v3275_v49 = vld [vmem:[#allocation19_spill] sm:$0xff] }
 0x1ab   :  { %v885_v57 = vadd.f32 %v884_v16, %v822_v25  ;;  %v826_v25 = vmul.f32 %v2136_v24, %v2136_v24  ;;  %3272 = vst [vmem:[#allocation14_spill] sm:$0xff] %v2160_v13  ;;  %v2166_v24 = vsub.f32 %v3273_v30, %v1857_v36 }
 0x1ad   :  { %v886_v7 = vadd.f32 %v885_v57, %v823_v31  ;;  %v827_v31 = vmul.f32 %v2142_v20, %v2142_v20  ;;  %v2172_v20 = vsub.f32 %v3274_v38, %v1857_v36 }
 0x1af   :  { %v887_v18 = vadd.f32 %v886_v7, %v824_v27  ;;  %v828_v27 = vmul.f32 %v2148_v1, %v2148_v1  ;;  %v2178_v1 = vsub.f32 %v3275_v49, %v1857_v36  ;;  %v832_v30 = vmul.f32 %v2172_v20, %v2172_v20 }
 0x1b0   :  { %v835_v36 = vmul.f32 %v1863_v9, %v1863_v9  ;;  %v836_v49 = vmul.f32 %v1866_v35, %v1866_v35 }
 0x1b1   :  { %v888_v16 = vadd.f32 %v887_v18, %v825_v34  ;;  %v829_v34 = vmul.f32 %v2154_v11, %v2154_v11 }
 0x1b3   :  { %v889_v57 = vadd.f32 %v888_v16, %v826_v25  ;;  %v830_v25 = vmul.f32 %v2160_v13, %v2160_v13  ;;  %v834_v13 = vmul.f32 %v1860_v23, %v1860_v23 }
 0x1b5   :  { %v890_v7 = vadd.f32 %v889_v57, %v827_v31  ;;  %v831_v31 = vmul.f32 %v2166_v24, %v2166_v24 }
 0x1b7   :  { %v891_v18 = vadd.f32 %v890_v7, %v828_v27  ;;  %v833_v7 = vmul.f32 %v2178_v1, %v2178_v1 }
 0x1b9   :  { %v892_v16 = vadd.f32 %v891_v18, %v829_v34 }
 0x1bb   :  { %v893_v57 = vadd.f32 %v892_v16, %v830_v25  ;;  %v837_v16 = vmul.f32 %v1869_v41, %v1869_v41 }
 0x1bd   :  { %v894_v27 = vadd.f32 %v893_v57, %v831_v31  ;;  %v838_v57 = vmul.f32 %v1872_v61, %v1872_v61 }
 0x1bf   :  { %v895_v38 = vadd.f32 %v894_v27, %v832_v30  ;;  %v839_v27 = vmul.f32 %v1875_v3, %v1875_v3 }
 0x1c1   :  { %v896_v34 = vadd.f32 %v895_v38, %v833_v7  ;;  %v840_v38 = vmul.f32 %v1878_v48, %v1878_v48 }
 0x1c3   :  { %v897_v18 = vadd.f32 %v896_v34, %v834_v13  ;;  %v841_v34 = vmul.f32 %v1881_v21, %v1881_v21 }
 0x1c5   :  { %v898_v25 = vadd.f32 %v897_v18, %v835_v36  ;;  %v842_v18 = vmul.f32 %v1884_v22, %v1884_v22 }
 0x1c7   :  { %v899_v31 = vadd.f32 %v898_v25, %v836_v49  ;;  %v843_v25 = vmul.f32 %v1887_v50, %v1887_v50 }
 0x1c9   :  { %v900_v30 = vadd.f32 %v899_v31, %v837_v16  ;;  %v844_v31 = vmul.f32 %v1890_v40, %v1890_v40 }
 0x1cb   :  { %v901_v7 = vadd.f32 %v900_v30, %v838_v57  ;;  %v845_v30 = vmul.f32 %v1893_v58, %v1893_v58 }
 0x1cd   :  { %v902_v13 = vadd.f32 %v901_v7, %v839_v27  ;;  %v846_v7 = vmul.f32 %v1896_v59, %v1896_v59 }
 0x1cf   :  { %v903_v36 = vadd.f32 %v902_v13, %v840_v38  ;;  %v847_v13 = vmul.f32 %v1899_v56, %v1899_v56 }
 0x1d1   :  { %v904_v49 = vadd.f32 %v903_v36, %v841_v34  ;;  %v848_v36 = vmul.f32 %v1902_v45, %v1902_v45 }
 0x1d3   :  { %v905_v16 = vadd.f32 %v904_v49, %v842_v18  ;;  %v849_v49 = vmul.f32 %v1905_v4, %v1905_v4 }
 0x1d5   :  { %v906_v57 = vadd.f32 %v905_v16, %v843_v25  ;;  %v850_v16 = vmul.f32 %v1908_v62, %v1908_v62 }
 0x1d7   :  { %v907_v27 = vadd.f32 %v906_v57, %v844_v31  ;;  %v851_v57 = vmul.f32 %v1911_v15, %v1911_v15 }
 0x1d9   :  { %v908_v38 = vadd.f32 %v907_v27, %v845_v30  ;;  %v852_v27 = vmul.f32 %v1914_v52, %v1914_v52 }
 0x1db   :  { %v909_v34 = vadd.f32 %v908_v38, %v846_v7 }
 0x1dd   :  { %v910_v18 = vadd.f32 %v909_v34, %v847_v13 }
 0x1df   :  { %v911_v25 = vadd.f32 %v910_v18, %v848_v36 }
 0x1e1   :  { %v912_v31 = vadd.f32 %v911_v25, %v849_v49 }
 0x1e3   :  { %v913_v30 = vadd.f32 %v912_v31, %v850_v16  ;;  %v3277_v16 = vld [vmem:[#allocation3_spill] sm:$0xff]  ;;  %v3278_v31 = vld [vmem:[#allocation4_spill] sm:$0xff] }
 0x1e5   :  { %v914_v7 = vadd.f32 %v913_v30, %v851_v57  ;;  %v3279_v57 = vld [vmem:[#allocation5_spill] sm:$0xff]  ;;  %v3280_v30 = vld [vmem:[#allocation6_spill] sm:$0xff] }
 0x1e7   :  { %v915_v38 = vadd.f32 %v914_v7, %v852_v27  ;;  %v3281_v27 = vld [vmem:[#allocation7_spill] sm:$0xff] }
 0x1e9   :  { %v916_v56 = vrot.slane %v915_v38, 4 }
 0x1eb   :  { %v917_v45 = vadd.f32 %v916_v56, %v915_v38  ;;  %v3282_v38 = vld [vmem:[#allocation8_spill] sm:$0xff] }
 0x1ed   :  { %v918_v13 = vrot.slane %v917_v45, 2 }
 0x1ef   :  { %v919_v34 = vadd.f32 %v918_v13, %v917_v45 }
 0x1f1   :  { %v920_v59 = vrot.slane %v919_v34, 1 }
 0x1f3   :  { %v921_v4 = vadd.f32 %v920_v59, %v919_v34  ;;  %v3283_v34 = vld [vmem:[#allocation9_spill] sm:$0xff] }
 0x1f5   :  { %v922_v36 = vmul.f32 0.001953125, %v921_v4 }
 0x1f7   :  { %v923_v18 = vadd.f32 1e-05, %v922_v36 }
 0x1f9   :  { %1457 = vrsqrt.f32 %v923_v18  ;;  %v3285_v18 = vld [vmem:[#allocation10_spill] sm:$0xff] }
 0x206   :  { %v2224_v62 = vpop.eup %1457 }
 0x207   :  { %v2228_v49 = vmul.f32 %v2224_v62, %v1918_v0  ;;  %v2232_v25 = vmul.f32 %v2224_v62, %v1922_v19  ;;  %v2236_v56 = vmul.f32 %v2224_v62, %v1926_v28  ;;  %v2240_v59 = vmul.f32 %v2224_v62, %v1934_v8 }
 0x208   :  { %v2244_v45 = vmul.f32 %v2224_v62, %v1938_v43  ;;  %v2248_v4 = vmul.f32 %v2224_v62, %v1944_v47  ;;  %v2252_v0 = vmul.f32 %v2224_v62, %v1950_v51  ;;  %v2256_v19 = vmul.f32 %v2224_v62, %v1956_v12 }
 0x209   :  { %v2260_v28 = vmul.f32 %v2224_v62, %v1962_v39  ;;  %v2264_v8 = vmul.f32 %v2224_v62, %v1968_v32  ;;  %v2268_v43 = vmul.f32 %v2224_v62, %v1974_v14  ;;  %v2272_v47 = vmul.f32 %v2224_v62, %v1980_v37 }
 0x20a   :  { %v2276_v51 = vmul.f32 %v2224_v62, %v1986_v29  ;;  %v2280_v12 = vmul.f32 %v2224_v62, %v1992_v54  ;;  %v2284_v39 = vmul.f32 %v2224_v62, %v1998_v46  ;;  %v2288_v32 = vmul.f32 %v2224_v62, %v2004_v17 }
 0x20b   :  { %v2292_v14 = vmul.f32 %v2224_v62, %v2010_v26  ;;  %v2296_v37 = vmul.f32 %v2224_v62, %v2016_v33  ;;  %v2300_v29 = vmul.f32 %v2224_v62, %v2022_v5  ;;  %v2304_v54 = vmul.f32 %v2224_v62, %v2028_v44 }
 0x20c   :  { %v2308_v46 = vmul.f32 %v2224_v62, %v2034_v53  ;;  %v2312_v17 = vmul.f32 %v2224_v62, %v2040_v55  ;;  %v2316_v26 = vmul.f32 %v2224_v62, %v2046_v60  ;;  %v2320_v33 = vmul.f32 %v2224_v62, %v2052_v63  ;;  %v3276_v60 = vld [vmem:[#allocation2_spill] sm:$0xff] }
 0x20d   :  { %v2324_v5 = vmul.f32 %v2224_v62, %v2058_v2  ;;  %v2328_v44 = vmul.f32 %v2224_v62, %v2064_v6  ;;  %v2332_v53 = vmul.f32 %v2224_v62, %v2070_v10  ;;  %v2336_v55 = vmul.f32 %v2224_v62, %v2076_v42 }
 0x20e   :  { %v2340_v63 = vmul.f32 %v2224_v62, %v3276_v60  ;;  %v2344_v2 = vmul.f32 %v2224_v62, %v3277_v16  ;;  %v2348_v6 = vmul.f32 %v2224_v62, %v3278_v31  ;;  %v2352_v10 = vmul.f32 %v2224_v62, %v3279_v57  ;;  %v3286_v16 = vld [vmem:[#allocation11_spill] sm:$0xff]  ;;  %v3287_v57 = vld [vmem:[#allocation12_spill] sm:$0xff] }
 0x20f   :  { %v2356_v42 = vmul.f32 %v2224_v62, %v3280_v30  ;;  %v2360_v7 = vmul.f32 %v2224_v62, %v3281_v27  ;;  %v2364_v13 = vmul.f32 %v2224_v62, %v3282_v38  ;;  %v2368_v36 = vmul.f32 %v2224_v62, %v3283_v34  ;;  %v3288_v27 = vld [vmem:[#allocation13_spill] sm:$0xff] }
 0x210   :  { %v2372_v60 = vmul.f32 %v2224_v62, %v3285_v18  ;;  %v2376_v31 = vmul.f32 %v2224_v62, %v3286_v16  ;;  %v2380_v30 = vmul.f32 %v2224_v62, %v3287_v57  ;;  %v2384_v38 = vmul.f32 %v2224_v62, %v3288_v27 }
 0x211   :  { %3284 = vst [vmem:[#allocation15_spill] sm:$0xff] %v2368_v36  ;;  %v2388_v34 = vmul.f32 %v2224_v62, %v2154_v11  ;;  %v3289_v36 = vld [vmem:[#allocation14_spill] sm:$0xff]  ;;  %v2396_v16 = vmul.f32 %v2224_v62, %v2166_v24  ;;  %v2400_v57 = vmul.f32 %v2224_v62, %v2172_v20  ;;  %v2404_v27 = vmul.f32 %v2224_v62, %v2178_v1 }
 0x212   :  { %v2392_v18 = vmul.f32 %v2224_v62, %v3289_v36  ;;  %v2408_v11 = vmul.f32 %v2224_v62, %v1860_v23  ;;  %v2412_v36 = vmul.f32 %v2224_v62, %v1863_v9  ;;  %v2416_v24 = vmul.f32 %v2224_v62, %v1866_v35 }
 0x213   :  { %3290 = vst [vmem:[#allocation16_spill] sm:$0xff] %v2404_v27  ;;  %v2420_v20 = vmul.f32 %v2224_v62, %v1869_v41  ;;  %v2424_v1 = vmul.f32 %v2224_v62, %v1872_v61  ;;  %v2428_v23 = vmul.f32 %v2224_v62, %v1875_v3  ;;  %v2432_v9 = vmul.f32 %v2224_v62, %v1878_v48 }
 0x214   :  { %3291 = vst [vmem:[#allocation17_spill] sm:$0xff] %v2408_v11  ;;  %v2436_v35 = vmul.f32 %v2224_v62, %v1881_v21  ;;  %v2440_v41 = vmul.f32 %v2224_v62, %v1884_v22  ;;  %v2444_v61 = vmul.f32 %v2224_v62, %v1887_v50  ;;  %v2448_v3 = vmul.f32 %v2224_v62, %v1890_v40 }
 0x215   :  { %3292 = vst [vmem:[#allocation18_spill] sm:$0xff] %v2424_v1  ;;  %3293 = vst [vmem:[#allocation19_spill] sm:$0xff] %v2428_v23  ;;  %v2452_v48 = vmul.f32 %v2224_v62, %v1893_v58  ;;  %vm989_vm3 = vcmp.gt.f32.partialorder %v2228_v49, 0.0  ;;  %vm990_vm4 = vcmp.gt.f32.partialorder %v2232_v25, 0.0  ;;  %vm991_vm5 = vcmp.gt.f32.partialorder %v2236_v56, 0.0 }
 0x216   :  { %3294 = vst [vmem:[#allocation2_spill] sm:$0xff] %v2432_v9  ;;  %3295 = vst [vmem:[#allocation3_spill] sm:$0xff] %v2436_v35  ;;  %v3300_v9 = vld [vmem:[#allocation20_spill] sm:$0xff]  ;;  %v3302_v35 = vld [vmem:[#allocation21_spill] sm:$0xff]  ;;  %vm992_vm6 = vcmp.gt.f32.partialorder %v2240_v59, 0.0  ;;  %vm993_vm7 = vcmp.gt.f32.partialorder %v2244_v45, 0.0 }
 0x217   :  { %3296 = vst [vmem:[#allocation4_spill] sm:$0xff] %v2440_v41  ;;  %3297 = vst [vmem:[#allocation5_spill] sm:$0xff] %v2444_v61  ;;  %v2456_v21 = vmul.f32 %v2224_v62, %v3300_v9  ;;  %v2460_v22 = vmul.f32 %v2224_v62, %v3302_v35  ;;  %v3304_v41 = vld [vmem:[#allocation22_spill] sm:$0xff]  ;;  %v3306_v61 = vld [vmem:[#allocation23_spill] sm:$0xff]  ;;  %vm994_vm8 = vcmp.gt.f32.partialorder %v2248_v4, 0.0  ;;  %vm995_vm9 = vcmp.gt.f32.partialorder %v2252_v0, 0.0 }
 0x218   :  { %3298 = vst [vmem:[#allocation6_spill] sm:$0xff] %v2448_v3  ;;  %3299 = vst [vmem:[#allocation7_spill] sm:$0xff] %v2452_v48  ;;  %v2464_v50 = vmul.f32 %v2224_v62, %v3304_v41  ;;  %v2468_v40 = vmul.f32 %v2224_v62, %v3306_v61  ;;  %v3308_v3 = vld [vmem:[#allocation24_spill] sm:$0xff]  ;;  %vm996_vm10 = vcmp.gt.f32.partialorder %v2256_v19, 0.0  ;;  %vm997_vm11 = vcmp.gt.f32.partialorder %v2260_v28, 0.0 }
 0x219   :  { %3301 = vst [vmem:[#allocation8_spill] sm:$0xff] %v2456_v21  ;;  %3303 = vst [vmem:[#allocation9_spill] sm:$0xff] %v2460_v22  ;;  %v2472_v58 = vmul.f32 %v2224_v62, %v3308_v3  ;;  %v2485_v9 = vmul.f32 %v2224_v62, %v1911_v15  ;;  %vm998_vm12 = vcmp.gt.f32.partialorder %v2264_v8, 0.0  ;;  %v1053_v35 = vmul.f32 0.2, %v2228_v49 }
 0x21a   :  { %3305 = vst [vmem:[#allocation10_spill] sm:$0xff] %v2464_v50  ;;  %3307 = vst [vmem:[#allocation11_spill] sm:$0xff] %v2468_v40  ;;  %v1054_v41 = vmul.f32 0.2, %v2232_v25  ;;  %v1055_v61 = vmul.f32 0.2, %v2236_v56  ;;  %v2493_v3 = vmul.f32 %v2224_v62, %v1914_v52 }
 0x21b   :  { %3309 = vst [vmem:[#allocation12_spill] sm:$0xff] %v2472_v58  ;;  %3310 = vst [vmem:[#allocation13_spill] sm:$0xff] %v2485_v9  ;;  %vm999_vm13 = vcmp.gt.f32.partialorder %v2268_v43, 0.0  ;;  %v1056_v58 = vmul.f32 0.2, %v2240_v59  ;;  %vm1000_vm14 = vcmp.gt.f32.partialorder %v2272_v47, 0.0  ;;  %v1117_v62 = vsel %vm989_vm3, %v2228_v49, %v1053_v35 }
 0x21c   :  { %3311 = vst [vmem:[#allocation14_spill] sm:$0xff] %v2493_v3  ;;  %v1057_v40 = vmul.f32 0.2, %v2244_v45  ;;  %v1058_v15 = vmul.f32 0.2, %v2248_v4  ;;  %vm1001_vm15 = vcmp.gt.f32.partialorder %v2276_v51, 0.0  ;;  %v1118_v48 = vsel %vm990_vm4, %v2232_v25, %v1054_v41  ;;  %1181 = vst [vmem:[%s3159_s3] sm:$0xff] %v1117_v62 }
 0x21d   :  { %v1059_v9 = vmul.f32 0.2, %v2252_v0  ;;  %v1060_v50 = vmul.f32 0.2, %v2256_v19  ;;  %v1061_v22 = vmul.f32 0.2, %v2260_v28  ;;  %v1119_v1 = vsel %vm991_vm5, %v2236_v56, %v1055_v61 }
 0x21e   :  { %v1062_v52 = vmul.f32 0.2, %v2264_v8  ;;  %v2509_v3 = vmul.f32 0.2, %v2268_v43  ;;  %v2512_v21 = vmul.f32 0.2, %v2272_v47 }
 0x21f   :  { %vm1002_vm0 = vcmp.gt.f32.partialorder %v2280_v12, 0.0  ;;  %v2522_v49 = vmul.f32 0.2, %v2276_v51  ;;  %v2525_v35 = vmul.f32 0.2, %v2280_v12  ;;  %1182 = vst [vmem:[%s3159_s3 + $0x8] sm:$0xff] %v1118_v48 }
 0x220   :  { %v2528_v23 = vmul.f32 0.2, %v2284_v39  ;;  %vm1003_vm1 = vcmp.gt.f32.partialorder %v2284_v39, 0.0  ;;  %v2538_v25 = vmul.f32 0.2, %v2288_v32  ;;  %1183 = vst [vmem:[%s3159_s3 + $0x10] sm:$0xff] %v1119_v1 }
 0x221   :  { %v2541_v41 = vmul.f32 0.2, %v2292_v14  ;;  %v2544_v62 = vmul.f32 0.2, %v2296_v37  ;;  %vm1004_vm2 = vcmp.gt.f32.partialorder %v2288_v32, 0.0  ;;  %vm1005_vm3 = vcmp.gt.f32.partialorder %v2292_v14, 0.0 }
 0x222   :  { %3312 = vst [vmem:[#allocation20_spill] sm:$0xff] %v2528_v23  ;;  %v1120_v23 = vsel %vm992_vm6, %v2240_v59, %v1056_v58  ;;  %v2554_v56 = vmul.f32 0.2, %v2300_v29  ;;  %v2557_v48 = vmul.f32 0.2, %v2304_v54  ;;  %vm1006_vm4 = vcmp.gt.f32.partialorder %v2296_v37, 0.0 }
 0x223   :  { %3313 = vst [vmem:[#allocation21_spill] sm:$0xff] %v2544_v62  ;;  %v2560_v61 = vmul.f32 0.2, %v2308_v46  ;;  %v1121_v62 = vsel %vm993_vm7, %v2244_v45, %v1057_v40  ;;  %1184 = vst [vmem:[%s3159_s3 + $0x18] sm:$0xff] %v1120_v23  ;;  %v2570_v59 = vmul.f32 0.2, %v2312_v17 }
 0x224   :  { %v2573_v1 = vmul.f32 0.2, %v2316_v26  ;;  %v2576_v58 = vmul.f32 0.2, %v2320_v33  ;;  %1185 = vst [vmem:[%s3159_s3 + $0x20] sm:$0xff] %v1121_v62  ;;  %vm1007_vm5 = vcmp.gt.f32.partialorder %v2300_v29, 0.0 }
 0x225   :  { %3314 = vst [vmem:[#allocation22_spill] sm:$0xff] %v2560_v61  ;;  %v1122_v61 = vsel %vm994_vm8, %v2248_v4, %v1058_v15  ;;  %v2586_v45 = vmul.f32 0.2, %v2324_v5  ;;  %v2589_v23 = vmul.f32 0.2, %v2328_v44  ;;  %vm1008_vm6 = vcmp.gt.f32.partialorder %v2304_v54, 0.0 }
 0x226   :  { %3315 = vst [vmem:[#allocation23_spill] sm:$0xff] %v2576_v58  ;;  %v2592_v40 = vmul.f32 0.2, %v2332_v53  ;;  %v1123_v58 = vsel %vm995_vm9, %v2252_v0, %v1059_v9  ;;  %1186 = vst [vmem:[%s3159_s3 + $0x28] sm:$0xff] %v1122_v61  ;;  %v2602_v4 = vmul.f32 0.2, %v2336_v55 }
 0x227   :  { %v2605_v15 = vmul.f32 0.2, %v2340_v63  ;;  %v2608_v62 = vmul.f32 0.2, %v2344_v2  ;;  %1187 = vst [vmem:[%s3159_s3 + $0x30] sm:$0xff] %v1123_v58  ;;  %vm1011_vm9 = vcmp.gt.f32.partialorder %v2316_v26, 0.0 }
 0x228   :  { %3316 = vst [vmem:[#allocation24_spill] sm:$0xff] %v2592_v40  ;;  %v1124_v40 = vsel %vm996_vm10, %v2256_v19, %v1060_v50  ;;  %v2620_v0 = vmul.f32 0.2, %v2348_v6  ;;  %v2623_v9 = vmul.f32 0.2, %v2352_v10  ;;  %v1125_v19 = vsel %vm997_vm11, %v2260_v28, %v1061_v22 }
 0x229   :  { %v2626_v61 = vmul.f32 0.2, %v2356_v42  ;;  %1188 = vst [vmem:[%s3159_s3 + $0x38] sm:$0xff] %v1124_v40  ;;  %v2639_v50 = vmul.f32 0.2, %v2360_v7  ;;  %v1126_v22 = vsel %vm998_vm12, %v2264_v8, %v1062_v52  ;;  %1189 = vst [vmem:[%s3159_s3 + $0x40] sm:$0xff] %v1125_v19  ;;  %v1127_v52 = vsel %vm999_vm13, %v2268_v43, %v2509_v3 }
 0x22a   :  { %v2642_v58 = vmul.f32 0.2, %v2364_v13  ;;  %vm1015_vm11 = vcmp.gt.f32.partialorder %v2332_v53, 0.0  ;;  %v2658_v40 = vmul.f32 0.2, %v2372_v60  ;;  %1190 = vst [vmem:[%s3159_s3 + $0x48] sm:$0xff] %v1126_v22  ;;  %v1128_v3 = vsel %vm1000_vm14, %v2272_v47, %v2512_v21 }
 0x22b   :  { %3317 = vst [vmem:[#allocation25_spill] sm:$0xff] %v2626_v61  ;;  %v3318_v61 = vld [vmem:[#allocation15_spill] sm:$0xff]  ;;  %v2664_v8 = vmul.f32 0.2, %v2380_v30  ;;  %vm1019_vm12 = vcmp.gt.f32.partialorder %v2348_v6, 0.0  ;;  %1191 = vst [vmem:[%s3159_s3 + $0x50] sm:$0xff] %v1127_v52  ;;  %v1129_v21 = vsel %vm1001_vm15, %v2276_v51, %v2522_v49  ;;  %v1130_v49 = vsel %vm1002_vm0, %v2280_v12, %v2525_v35 }
 0x22c   :  { %v2645_v28 = vmul.f32 0.2, %v3318_v61  ;;  %v2678_v19 = vmul.f32 0.2, %v2384_v38  ;;  %v2684_v43 = vmul.f32 0.2, %v2392_v18 }
 0x22d   :  { %3320 = vst [vmem:[#allocation26_spill] sm:$0xff] %v2664_v8  ;;  %v2681_v8 = vmul.f32 0.2, %v2388_v34  ;;  %vm1023_vm13 = vcmp.gt.f32.partialorder %v2364_v13, 0.0  ;;  %v2698_v22 = vmul.f32 0.2, %v2396_v16 }
 0x22e   :  { %3319 = vst [vmem:[#allocation15_spill] sm:$0xff] %v2645_v28  ;;  %v2661_v28 = vmul.f32 0.2, %v2376_v31  ;;  %3321 = vst [vmem:[#allocation27_spill] sm:$0xff] %v2684_v43  ;;  %v2701_v43 = vmul.f32 0.2, %v2400_v57 }
 0x22f   :  { %v2704_v47 = vmul.f32 0.2, %v2404_v27  ;;  %1192 = vst [vmem:[%s3159_s3 + $0x58] sm:$0xff] %v1128_v3  ;;  %vm1027_vm14 = vcmp.gt.f32.partialorder %v2380_v30, 0.0  ;;  %v2718_v52 = vmul.f32 0.2, %v2408_v11 }
 0x230   :  { %v2724_v51 = vmul.f32 0.2, %v2416_v24  ;;  %1193 = vst [vmem:[%s3159_s3 + $0x60] sm:$0xff] %v1129_v21  ;;  %vm1031_vm15 = vcmp.gt.f32.partialorder %v2396_v16, 0.0  ;;  %v2738_v3 = vmul.f32 0.2, %v2420_v20 }
 0x231   :  { %3322 = vst [vmem:[#allocation28_spill] sm:$0xff] %v2704_v47  ;;  %3323 = vst [vmem:[#allocation29_spill] sm:$0xff] %v2718_v52  ;;  %v2721_v47 = vmul.f32 0.2, %v2412_v36  ;;  %v3329_v52 = vld [vmem:[#allocation19_spill] sm:$0xff]  ;;  %v3331_v35 = vld [vmem:[#allocation20_spill] sm:$0xff] }
 0x232   :  { %3325 = vst [vmem:[#allocation31_spill] sm:$0xff] %v2724_v51  ;;  %3326 = vst [vmem:[#allocation32_spill] sm:$0xff] %v2738_v3  ;;  %v3327_v51 = vld [vmem:[#allocation18_spill] sm:$0xff]  ;;  %v2744_v12 = vmul.f32 0.2, %v3329_v52  ;;  %v1131_v21 = vsel %vm1003_vm1, %v2284_v39, %v3331_v35  ;;  %vm1035_vm0 = vcmp.gt.f32.partialorder %v2412_v36, 0.0 }
 0x233   :  { %3324 = vst [vmem:[#allocation30_spill] sm:$0xff] %v2721_v47  ;;  %v2741_v47 = vmul.f32 0.2, %v3327_v51  ;;  %1194 = vst [vmem:[%s3159_s3 + $0x68] sm:$0xff] %v1130_v49  ;;  %v3336_v27 = vld [vmem:[#allocation4_spill] sm:$0xff]  ;;  %v1132_v49 = vsel %vm1004_vm2, %v2288_v32, %v2538_v25  ;;  %vm1039_vm1 = vcmp.gt.f32.partialorder %v3329_v52, 0.0  ;;  %v1133_v25 = vsel %vm1005_vm3, %v2292_v14, %v2541_v41 }
 0x234   :  { %3330 = vst [vmem:[#allocation19_spill] sm:$0xff] %v2744_v12  ;;  %v3334_v12 = vld [vmem:[#allocation3_spill] sm:$0xff]  ;;  %v2764_v39 = vmul.f32 0.2, %v3336_v27  ;;  %1195 = vst [vmem:[%s3159_s3 + $0x70] sm:$0xff] %v1131_v21  ;;  %v3338_v35 = vld [vmem:[#allocation5_spill] sm:$0xff] }
 0x235   :  { %3328 = vst [vmem:[#allocation33_spill] sm:$0xff] %v2741_v47  ;;  %v3332_v47 = vld [vmem:[#allocation2_spill] sm:$0xff]  ;;  %v2761_v11 = vmul.f32 0.2, %v3334_v12  ;;  %v3342_v51 = vld [vmem:[#allocation7_spill] sm:$0xff]  ;;  %1196 = vst [vmem:[%s3159_s3 + $0x78] sm:$0xff] %v1132_v49 }
 0x236   :  { %v2758_v3 = vmul.f32 0.2, %v3332_v47  ;;  %3337 = vst [vmem:[#allocation3_spill] sm:$0xff] %v2764_v39  ;;  %v3340_v39 = vld [vmem:[#allocation6_spill] sm:$0xff]  ;;  %v2784_v32 = vmul.f32 0.2, %v3342_v51 }
 0x237   :  { %3335 = vst [vmem:[#allocation2_spill] sm:$0xff] %v2761_v11  ;;  %v2778_v11 = vmul.f32 0.2, %v3338_v35  ;;  %vm1043_vm2 = vcmp.gt.f32.partialorder %v3338_v35, 0.0  ;;  %v3344_v21 = vld [vmem:[#allocation8_spill] sm:$0xff]  ;;  %v3348_v27 = vld [vmem:[#allocation10_spill] sm:$0xff] }
 0x238   :  { %3333 = vst [vmem:[#allocation20_spill] sm:$0xff] %v2758_v3  ;;  %v2781_v3 = vmul.f32 0.2, %v3340_v39  ;;  %3343 = vst [vmem:[#allocation34_spill] sm:$0xff] %v2784_v32  ;;  %v3346_v32 = vld [vmem:[#allocation9_spill] sm:$0xff]  ;;  %vm1048_vm7 = vcmp.gt.f32.partialorder %v3348_v27, 0.0 }
 0x239   :  { %3339 = vst [vmem:[#allocation5_spill] sm:$0xff] %v2778_v11  ;;  %v2801_v11 = vmul.f32 0.2, %v3346_v32  ;;  %v2804_v14 = vmul.f32 0.2, %v3348_v27  ;;  %v3350_v41 = vld [vmem:[#allocation21_spill] sm:$0xff] }
 0x23a   :  { %3341 = vst [vmem:[#allocation6_spill] sm:$0xff] %v2781_v3  ;;  %v2798_v3 = vmul.f32 0.2, %v3344_v21  ;;  %v1134_v49 = vsel %vm1006_vm4, %v2296_v37, %v3350_v41  ;;  %1197 = vst [vmem:[%s3159_s3 + $0x80] sm:$0xff] %v1133_v25  ;;  %vm1047_vm3 = vcmp.gt.f32.partialorder %v3346_v32, 0.0  ;;  %v3351_v21 = vld [vmem:[#allocation11_spill] sm:$0xff]  ;;  %v1135_v25 = vsel %vm1007_vm5, %v2300_v29, %v2554_v56 }
 0x23b   :  { %3347 = vst [vmem:[#allocation9_spill] sm:$0xff] %v2801_v11  ;;  %3349 = vst [vmem:[#allocation10_spill] sm:$0xff] %v2804_v14  ;;  %v2818_v11 = vmul.f32 0.2, %v3351_v21  ;;  %v3353_v51 = vld [vmem:[#allocation13_spill] sm:$0xff]  ;;  %v3355_v41 = vld [vmem:[#allocation14_spill] sm:$0xff] }
 0x23c   :  { %3345 = vst [vmem:[#allocation35_spill] sm:$0xff] %v2798_v3  ;;  %v3352_v3 = vld [vmem:[#allocation12_spill] sm:$0xff]  ;;  %v2824_v37 = vmul.f32 0.2, %v3353_v51  ;;  %1198 = vst [vmem:[%s3159_s3 + $0x88] sm:$0xff] %v1134_v49  ;;  %vm1051_vm4 = vcmp.gt.f32.partialorder %v3353_v51, 0.0  ;;  %v1139_v49 = vsel %vm1011_vm9, %v2316_v26, %v2573_v1 }
 0x23d   :  { %v2821_v14 = vmul.f32 0.2, %v3352_v3  ;;  %vm1052_vm10 = vcmp.gt.f32.partialorder %v3355_v41, 0.0  ;;  %v2836_v21 = vmul.f32 0.2, %v3355_v41  ;;  %v3356_v3 = vld [vmem:[#allocation22_spill] sm:$0xff] }
 0x23e   :  { %3354 = vst [vmem:[#allocation21_spill] sm:$0xff] %v2824_v37  ;;  %v1136_v37 = vsel %vm1008_vm6, %v2304_v54, %v2557_v48  ;;  %vm3357_vm5 = vcmp.gt.f32.partialorder %v2308_v46, 0.0  ;;  %vm3358_vm8 = vcmp.gt.f32.partialorder %v2312_v17, 0.0  ;;  %1199 = vst [vmem:[%s3159_s3 + $0x90] sm:$0xff] %v1135_v25  ;;  %v3359_v54 = vld [vmem:[#allocation23_spill] sm:$0xff]  ;;  %vm3360_vm6 = vcmp.gt.f32.partialorder %v2320_v33, 0.0 }
 0x23f   :  { %v1137_v29 = vsel %vm3357_vm5, %v2308_v46, %v3356_v3  ;;  %v1138_v56 = vsel %vm3358_vm8, %v2312_v17, %v2570_v59  ;;  %v1140_v48 = vsel %vm3360_vm6, %v2320_v33, %v3359_v54  ;;  %vm3361_vm5 = vcmp.gt.f32.partialorder %v2324_v5, 0.0  ;;  %1200 = vst [vmem:[%s3159_s3 + $0x98] sm:$0xff] %v1136_v37  ;;  %v3363_v26 = vld [vmem:[#allocation24_spill] sm:$0xff]  ;;  %1203 = vst [vmem:[%s3159_s3 + $0xb0] sm:$0xff] %v1139_v49  ;;  %v3398_v3 = vld [vmem:[#allocation2_spill] sm:$0xff] }
 0x240   :  { %v1141_v46 = vsel %vm3361_vm5, %v2324_v5, %v2586_v45  ;;  %vm3362_vm8 = vcmp.gt.f32.partialorder %v2328_v44, 0.0  ;;  %1201 = vst [vmem:[%s3159_s3 + $0xa0] sm:$0xff] %v1137_v29  ;;  %1202 = vst [vmem:[%s3159_s3 + $0xa8] sm:$0xff] %v1138_v56  ;;  %v1143_v33 = vsel %vm1015_vm11, %v2332_v53, %v3363_v26  ;;  %vm3364_vm9 = vcmp.gt.f32.partialorder %v2336_v55, 0.0  ;;  %v3400_v25 = vld [vmem:[#allocation3_spill] sm:$0xff]  ;;  %v3401_v29 = vld [vmem:[#allocation4_spill] sm:$0xff] }
 0x241   :  { %v1142_v17 = vsel %vm3362_vm8, %v2328_v44, %v2589_v23  ;;  %v1144_v5 = vsel %vm3364_vm9, %v2336_v55, %v2602_v4  ;;  %vm3365_vm6 = vcmp.gt.f32.partialorder %v2340_v63, 0.0  ;;  %vm3366_vm5 = vcmp.gt.f32.partialorder %v2344_v2, 0.0  ;;  %1204 = vst [vmem:[%s3159_s3 + $0xb8] sm:$0xff] %v1140_v48  ;;  %1205 = vst [vmem:[%s3159_s3 + $0xc0] sm:$0xff] %v1141_v46  ;;  %v3378_v4 = vld [vmem:[#allocation27_spill] sm:$0xff]  ;;  %v3406_v54 = vld [vmem:[#allocation34_spill] sm:$0xff] }
 0x242   :  { %v1145_v44 = vsel %vm3365_vm6, %v2340_v63, %v2605_v15  ;;  %v1146_v59 = vsel %vm3366_vm5, %v2344_v2, %v2608_v62  ;;  %1206 = vst [vmem:[%s3159_s3 + $0xc8] sm:$0xff] %v1142_v17  ;;  %v1147_v53 = vsel %vm1019_vm12, %v2348_v6, %v2620_v0  ;;  %vm3367_vm11 = vcmp.gt.f32.partialorder %v2352_v10, 0.0  ;;  %v3368_v63 = vld [vmem:[#allocation25_spill] sm:$0xff]  ;;  %1207 = vst [vmem:[%s3159_s3 + $0xd0] sm:$0xff] %v1143_v33  ;;  %v3407_v48 = vld [vmem:[#allocation7_spill] sm:$0xff] }
 0x243   :  { %v1148_v55 = vsel %vm3367_vm11, %v2352_v10, %v2623_v9  ;;  %vm3369_vm8 = vcmp.gt.f32.partialorder %v2356_v42, 0.0  ;;  %vm3370_vm9 = vcmp.gt.f32.partialorder %v2360_v7, 0.0  ;;  %1208 = vst [vmem:[%s3159_s3 + $0xd8] sm:$0xff] %v1144_v5  ;;  %1209 = vst [vmem:[%s3159_s3 + $0xe0] sm:$0xff] %v1145_v44  ;;  %v1151_v6 = vsel %vm1023_vm13, %v2364_v13, %v2642_v58  ;;  %v3371_v10 = vld [vmem:[#allocation15_spill] sm:$0xff]  ;;  %v3375_v13 = vld [vmem:[#allocation26_spill] sm:$0xff] }
 0x244   :  { %v1149_v2 = vsel %vm3369_vm8, %v2356_v42, %v3368_v63  ;;  %v1150_v1 = vsel %vm3370_vm9, %v2360_v7, %v2639_v50  ;;  %1210 = vst [vmem:[%s3159_s3 + $0xe8] sm:$0xff] %v1146_v59  ;;  %vm3372_vm12 = vcmp.gt.f32.partialorder %v3318_v61, 0.0  ;;  %vm3373_vm6 = vcmp.gt.f32.partialorder %v2372_v60, 0.0  ;;  %1211 = vst [vmem:[%s3159_s3 + $0xf0] sm:$0xff] %v1147_v53  ;;  %v3384_v0 = vld [vmem:[#allocation29_spill] sm:$0xff]  ;;  %v3388_v50 = vld [vmem:[#allocation31_spill] sm:$0xff] }
 0x245   :  { %v1152_v42 = vsel %vm3372_vm12, %v3318_v61, %v3371_v10  ;;  %v1153_v7 = vsel %vm3373_vm6, %v2372_v60, %v2658_v40  ;;  %vm3374_vm5 = vcmp.gt.f32.partialorder %v2376_v31, 0.0  ;;  %1212 = vst [vmem:[%s3159_s3 + $0xf8] sm:$0xff] %v1148_v55  ;;  %1213 = vst [vmem:[%s3159_s3 + $0x100] sm:$0xff] %v1149_v2  ;;  %v1155_v60 = vsel %vm1027_vm14, %v2380_v30, %v3375_v13  ;;  %v3385_v9 = vld [vmem:[#allocation17_spill] sm:$0xff]  ;;  %v3409_v17 = vld [vmem:[#allocation35_spill] sm:$0xff] }
 0x246   :  { %v1154_v45 = vsel %vm3374_vm5, %v2376_v31, %v2661_v28  ;;  %1214 = vst [vmem:[%s3159_s3 + $0x108] sm:$0xff] %v1150_v1  ;;  %vm3376_vm13 = vcmp.gt.f32.partialorder %v2384_v38, 0.0  ;;  %vm3377_vm11 = vcmp.gt.f32.partialorder %v2388_v34, 0.0  ;;  %vm3379_vm8 = vcmp.gt.f32.partialorder %v2392_v18, 0.0  ;;  %1215 = vst [vmem:[%s3159_s3 + $0x110] sm:$0xff] %v1151_v6  ;;  %v3390_v28 = vld [vmem:[#allocation32_spill] sm:$0xff] }
 0x247   :  { %v1156_v31 = vsel %vm3376_vm13, %v2384_v38, %v2678_v19  ;;  %v1157_v23 = vsel %vm3377_vm11, %v2388_v34, %v2681_v8  ;;  %v1158_v15 = vsel %vm3379_vm8, %v2392_v18, %v3378_v4  ;;  %1216 = vst [vmem:[%s3159_s3 + $0x118] sm:$0xff] %v1152_v42  ;;  %1217 = vst [vmem:[%s3159_s3 + $0x120] sm:$0xff] %v1153_v7  ;;  %vm3380_vm14 = vcmp.gt.f32.partialorder %v2400_v57, 0.0  ;;  %v3381_v34 = vld [vmem:[#allocation28_spill] sm:$0xff]  ;;  %v3392_v8 = vld [vmem:[#allocation33_spill] sm:$0xff] }
 0x248   :  { %1218 = vst [vmem:[%s3159_s3 + $0x128] sm:$0xff] %v1154_v45  ;;  %v1159_v30 = vsel %vm1031_vm15, %v2396_v16, %v2698_v22  ;;  %v1160_v38 = vsel %vm3380_vm14, %v2400_v57, %v2701_v43  ;;  %v3382_v18 = vld [vmem:[#allocation16_spill] sm:$0xff]  ;;  %vm3386_vm12 = vcmp.gt.f32.partialorder %v3385_v9, 0.0  ;;  %1219 = vst [vmem:[%s3159_s3 + $0x130] sm:$0xff] %v1155_v60  ;;  %v3387_v16 = vld [vmem:[#allocation30_spill] sm:$0xff]  ;;  %vm3389_vm15 = vcmp.gt.f32.partialorder %v2416_v24, 0.0 }
 0x249   :  { %vm3383_vm9 = vcmp.gt.f32.partialorder %v3382_v18, 0.0  ;;  %v1162_v61 = vsel %vm3386_vm12, %v3385_v9, %v3384_v0  ;;  %1220 = vst [vmem:[%s3159_s3 + $0x138] sm:$0xff] %v1156_v31  ;;  %1221 = vst [vmem:[%s3159_s3 + $0x140] sm:$0xff] %v1157_v23  ;;  %v1163_v57 = vsel %vm1035_vm0, %v2412_v36, %v3387_v16  ;;  %v1164_v58 = vsel %vm3389_vm15, %v2416_v24, %v3388_v50  ;;  %v3393_v19 = vld [vmem:[#allocation18_spill] sm:$0xff]  ;;  %v3395_v36 = vld [vmem:[#allocation19_spill] sm:$0xff] }
 0x24a   :  { %v1161_v62 = vsel %vm3383_vm9, %v3382_v18, %v3381_v34  ;;  %1222 = vst [vmem:[%s3159_s3 + $0x148] sm:$0xff] %v1158_v15  ;;  %vm3391_vm6 = vcmp.gt.f32.partialorder %v2420_v20, 0.0  ;;  %vm3394_vm5 = vcmp.gt.f32.partialorder %v3393_v19, 0.0  ;;  %1223 = vst [vmem:[%s3159_s3 + $0x150] sm:$0xff] %v1159_v30  ;;  %v1167_v24 = vsel %vm1039_vm1, %v3329_v52, %v3395_v36  ;;  %v3410_v26 = vld [vmem:[#allocation8_spill] sm:$0xff]  ;;  %v3413_v5 = vld [vmem:[#allocation10_spill] sm:$0xff] }
 0x24b   :  { %v1165_v40 = vsel %vm3391_vm6, %v2420_v20, %v3390_v28  ;;  %v1166_v43 = vsel %vm3394_vm5, %v3393_v19, %v3392_v8  ;;  %1224 = vst [vmem:[%s3159_s3 + $0x158] sm:$0xff] %v1160_v38  ;;  %1225 = vst [vmem:[%s3159_s3 + $0x160] sm:$0xff] %v1161_v62  ;;  %v3396_v20 = vld [vmem:[#allocation20_spill] sm:$0xff]  ;;  %vm3397_vm0 = vcmp.gt.f32.partialorder %v3332_v47, 0.0  ;;  %vm3399_vm13 = vcmp.gt.f32.partialorder %v3334_v12, 0.0  ;;  %v3414_v59 = vld [vmem:[#allocation11_spill] sm:$0xff] }
 0x24c   :  { %1226 = vst [vmem:[%s3159_s3 + $0x168] sm:$0xff] %v1162_v61  ;;  %v1168_v22 = vsel %vm3397_vm0, %v3332_v47, %v3396_v20  ;;  %v1169_v37 = vsel %vm3399_vm13, %v3334_v12, %v3398_v3  ;;  %vm3402_vm11 = vcmp.gt.f32.partialorder %v3401_v29, 0.0  ;;  %1227 = vst [vmem:[%s3159_s3 + $0x170] sm:$0xff] %v1163_v57  ;;  %v3403_v47 = vld [vmem:[#allocation5_spill] sm:$0xff]  ;;  %v3404_v12 = vld [vmem:[#allocation6_spill] sm:$0xff]  ;;  %vm3405_vm1 = vcmp.gt.f32.partialorder %v3340_v39, 0.0 }
 0x24d   :  { %v1170_v56 = vsel %vm3402_vm11, %v3401_v29, %v3400_v25  ;;  %1228 = vst [vmem:[%s3159_s3 + $0x178] sm:$0xff] %v1164_v58  ;;  %1229 = vst [vmem:[%s3159_s3 + $0x180] sm:$0xff] %v1165_v40  ;;  %v1171_v52 = vsel %vm1043_vm2, %v3338_v35, %v3403_v47  ;;  %v1172_v49 = vsel %vm3405_vm1, %v3340_v39, %v3404_v12  ;;  %vm3408_vm8 = vcmp.gt.f32.partialorder %v3407_v48, 0.0  ;;  %v3412_v39 = vld [vmem:[#allocation9_spill] sm:$0xff]  ;;  %v3416_v55 = vld [vmem:[#allocation12_spill] sm:$0xff] }
 0x24e   :  { %1230 = vst [vmem:[%s3159_s3 + $0x188] sm:$0xff] %v1166_v43  ;;  %v1173_v46 = vsel %vm3408_vm8, %v3407_v48, %v3406_v54  ;;  %vm3411_vm14 = vcmp.gt.f32.partialorder %v3410_v26, 0.0  ;;  %1231 = vst [vmem:[%s3159_s3 + $0x190] sm:$0xff] %v1167_v24  ;;  %v1175_v35 = vsel %vm1047_vm3, %v3346_v32, %v3412_v39  ;;  %v1176_v44 = vsel %vm1048_vm7, %v3348_v27, %v3413_v5  ;;  %v3418_v27 = vld [vmem:[#allocation21_spill] sm:$0xff] }
 0x24f   :  { %v1174_v33 = vsel %vm3411_vm14, %v3410_v26, %v3409_v17  ;;  %1232 = vst [vmem:[%s3159_s3 + $0x198] sm:$0xff] %v1168_v22  ;;  %1233 = vst [vmem:[%s3159_s3 + $0x1a0] sm:$0xff] %v1169_v37  ;;  %vm3415_vm2 = vcmp.gt.f32.partialorder %v3414_v59, 0.0  ;;  %vm3417_vm9 = vcmp.gt.f32.partialorder %v3416_v55, 0.0  ;;  %v1180_v32 = vsel %vm1052_vm10, %v3355_v41, %v2836_v21 }
 0x250   :  { %1234 = vst [vmem:[%s3159_s3 + $0x1a8] sm:$0xff] %v1170_v56  ;;  %v1177_v53 = vsel %vm3415_vm2, %v3414_v59, %v2818_v11  ;;  %v1178_v63 = vsel %vm3417_vm9, %v3416_v55, %v2821_v14  ;;  %1235 = vst [vmem:[%s3159_s3 + $0x1b0] sm:$0xff] %v1171_v52  ;;  %v1179_v11 = vsel %vm1051_vm4, %v3353_v51, %v3418_v27 }
 0x251   :  { %1236 = vst [vmem:[%s3159_s3 + $0x1b8] sm:$0xff] %v1172_v49  ;;  %1237 = vst [vmem:[%s3159_s3 + $0x1c0] sm:$0xff] %v1173_v46 }
 0x252   :  { %1238 = vst [vmem:[%s3159_s3 + $0x1c8] sm:$0xff] %v1174_v33  ;;  %1239 = vst [vmem:[%s3159_s3 + $0x1d0] sm:$0xff] %v1175_v35 }
 0x253   :  { %1240 = vst [vmem:[%s3159_s3 + $0x1d8] sm:$0xff] %v1176_v44  ;;  %1241 = vst [vmem:[%s3159_s3 + $0x1e0] sm:$0xff] %v1177_v53 }
 0x254   :  { %1242 = vst [vmem:[%s3159_s3 + $0x1e8] sm:$0xff] %v1178_v63  ;;  %1243 = vst [vmem:[%s3159_s3 + $0x1f0] sm:$0xff] %v1179_v11 }
 0x255   :  { %1244 = vst [vmem:[%s3159_s3 + $0x1f8] sm:$0xff] %v1180_v32 }

// kernel: diffusion_forward.10
= control target key start
LH: loop header
LB: loop body
LE: loop exit
PB: predicated region body
PF: predicated region fallthrough
CT: control target
= control target key end

     0   :  { %vm139_vm0 = vcmask 1043456   ;;  %vm114_vm1 = vcmask 588800   ;;  %s625_s1 = inlined_call_operand.vmem [shape: bf16[72,128], index: 1, kind: input, shape index: {}]   ;;  %s626_s0 = inlined_call_operand.vmem [shape: bf16[128,72], index: 0, kind: input, shape index: {}]   ;;  %s627_s2 = inlined_call_operand.vmem [shape: f32[1,128], index: 2, kind: input, shape index: {}]   ;;  %s628_s3 = inlined_call_operand.vmem [shape: f32[128,128], index: 3, kind: output, shape index: {}]  }
   0x1   :  { %v476_v0 = vld [vmem:[%s625_s1 + $0x20] ss:$0 sps:$4 sm:$0xff]   ;;  %v477_v1 = vld [vmem:[%s625_s1 + $0x18] sm:$0xff]   ;;  %v478_v3 = vld [vmem:[%s625_s1 + $0x10] sm:$0xff]  }
   0x2   :  { %474 = vmatprep.subr.msk.bf16.mxu0 %vm139_vm0, %v476_v0  ;;  %v141_v2 = vsel %vm139_vm0, %v476_v0, 0  ;;  %475 = vmatprep.subr.msk.bf16.mxu1 %vm139_vm0, %v476_v0  ;;  %v481_v4 = vld [vmem:[%s626_s0] sm:$0xff]   ;;  %v479_v5 = vld [vmem:[%s625_s1 + $0x8] sm:$0xff]   ;;  %v483_v10 = vld [vmem:[%s626_s0 + $0x10] sm:$0xff]  }
   0x3   :  { %439 = vmatpush3.bf16.msra.mxu0 %v141_v2  ;;  %469 = vmatpush3.bf16.msra.mxu1 %v141_v2  ;;  %v485_v6 = vld [vmem:[%s626_s0 + $0x20] sm:$0xff]   ;;  %v482_v8 = vld [vmem:[%s626_s0 + $0x8] sm:$0xff]   ;;  %v487_v11 = vld [vmem:[%s626_s0 + $0x30] sm:$0xff]  }
   0x4   :  { %440 = vmatprep.subr.bf16.mxu0 %v477_v1  ;;  %465 = vmatprep.subr.bf16.mxu1 %v477_v1  ;;  %v480_v7 = vld [vmem:[%s625_s1] sm:$0xff]   ;;  %v486_v9 = vld [vmem:[%s626_s0 + $0x28] sm:$0xff]   ;;  %v484_v12 = vld [vmem:[%s626_s0 + $0x18] sm:$0xff]  }
   0x5   :  { %448 = vmatprep.mubr.msk.bf16.mxu0 %vm114_vm1, %v481_v4  ;;  %456 = vmatprep.mubr.msk.bf16.mxu1 %vm114_vm1, %v485_v6  ;;  %v488_v13 = vld [vmem:[%s626_s0 + $0x38] sm:$0xff]   ;;  %v403_v19 = vld [vmem:[%s627_s2] ss:$0 sm:$0xff] }
   0x7   :  { %441 = vmatpush3.bf16.msra.mxu0 %v477_v1  ;;  %470 = vmatpush3.bf16.msra.mxu1 %v477_v1 }
   0x8   :  { %442 = vmatprep.subr.bf16.mxu0 %v478_v3  ;;  %466 = vmatprep.subr.bf16.mxu1 %v478_v3 }
   0xb   :  { %443 = vmatpush3.bf16.msra.mxu0 %v478_v3  ;;  %471 = vmatpush3.bf16.msra.mxu1 %v478_v3 }
   0xc   :  { %444 = vmatprep.subr.bf16.mxu0 %v479_v5  ;;  %467 = vmatprep.subr.bf16.mxu1 %v479_v5 }
   0xf   :  { %445 = vmatpush3.bf16.msra.mxu0 %v479_v5  ;;  %472 = vmatpush3.bf16.msra.mxu1 %v479_v5 }
  0x10   :  { %446 = vmatprep.subr.bf16.mxu0 %v480_v7  ;;  %468 = vmatprep.subr.bf16.mxu1 %v480_v7 }
  0x13   :  { %447 = vmatpush3.bf16.msra.mxu0 %v480_v7  ;;  %473 = vmatpush3.bf16.msra.mxu1 %v480_v7 }
  0x16   :  { %449 = vmatmul.mubr.msk.bf16.vlgmr.msra.gmra.mxu0 %vm114_vm1, %v482_v8  ;;  %457 = vmatmul.mubr.msk.bf16.vlgmr.msra.gmra.mxu1 %vm114_vm1, %v486_v9 }
  0x17   :  { %452 = vmatprep.mubr.msk.bf16.mxu0 %vm114_vm1, %v483_v10  ;;  %460 = vmatprep.mubr.msk.bf16.mxu1 %vm114_vm1, %v487_v11 }
  0x1e   :  { %453 = vmatmul.mubr.msk.bf16.gmra.mxu0 %vm114_vm1, %v484_v12  ;;  %461 = vmatmul.mubr.msk.bf16.gmra.mxu1 %vm114_vm1, %v488_v13 }
  0xd6   :  { %v450_v14 = vpop.f32.mrf.mxu0  ;;  %v458_v15 = vpop.f32.mrf.mxu1 }
  0xd7   :  { %v186_v25 = vadd.f32 %v450_v14, %v403_v19  ;;  %v218_v48 = vadd.f32 %v458_v15, %v403_v19 }
  0xd8   :  { %v177_v16 = vpop.f32.mrf.mxu0  ;;  %v209_v18 = vpop.f32.mrf.mxu1 }
  0xd9   :  { %v178_v21 = vadd.f32 %v403_v19, %v177_v16  ;;  %v210_v43 = vadd.f32 %v403_v19, %v209_v18 }
  0xda   :  { %v451_v17 = vpop.f32.mrf.mxu0  ;;  %v459_v24 = vpop.f32.mrf.mxu1 }
  0xdb   :  { %v189_v28 = vadd.f32 %v451_v17, %v403_v19  ;;  %v221_v50 = vadd.f32 %v459_v24, %v403_v19 }
  0xdc   :  { %v180_v20 = vpop.f32.mrf.mxu0  ;;  %v212_v31 = vpop.f32.mrf.mxu1 }
  0xdd   :  { %v181_v22 = vadd.f32 %v403_v19, %v180_v20  ;;  %v213_v45 = vadd.f32 %v403_v19, %v212_v31 }
  0xde   :  { %v454_v23 = vpop.f32.mrf.mxu0  ;;  %v462_v37 = vpop.f32.mrf.mxu1 }
  0xdf   :  { %v240_v26 = vadd.f32 %v181_v22, %v178_v21  ;;  %v202_v38 = vadd.f32 %v454_v23, %v403_v19  ;;  %v234_v57 = vadd.f32 %v462_v37, %v403_v19 }
  0xe0   :  { %v193_v27 = vpop.f32.mrf.mxu0  ;;  %v225_v42 = vpop.f32.mrf.mxu1 }
  0xe1   :  { %v241_v29 = vadd.f32 %v240_v26, %v186_v25  ;;  %v194_v32 = vadd.f32 %v403_v19, %v193_v27  ;;  %v226_v53 = vadd.f32 %v403_v19, %v225_v42 }
  0xe2   :  { %v455_v30 = vpop.f32.mrf.mxu0  ;;  %v463_v47 = vpop.f32.mrf.mxu1 }
  0xe3   :  { %v242_v33 = vadd.f32 %v241_v29, %v189_v28  ;;  %v205_v40 = vadd.f32 %v455_v30, %v403_v19  ;;  %v237_v59 = vadd.f32 %v463_v47, %v403_v19 }
  0xe4   :  { %v196_v34 = vpop.f32.mrf.mxu0  ;;  %v228_v52 = vpop.f32.mrf.mxu1 }
  0xe5   :  { %v243_v35 = vadd.f32 %v242_v33, %v194_v32  ;;  %v197_v36 = vadd.f32 %v403_v19, %v196_v34  ;;  %v229_v56 = vadd.f32 %v403_v19, %v228_v52 }
  0xe7   :  { %v244_v39 = vadd.f32 %v243_v35, %v197_v36 }
  0xe9   :  { %v245_v41 = vadd.f32 %v244_v39, %v202_v38 }
  0xeb   :  { %v246_v44 = vadd.f32 %v245_v41, %v205_v40 }
  0xed   :  { %v247_v46 = vadd.f32 %v246_v44, %v210_v43 }
  0xef   :  { %v248_v49 = vadd.f32 %v247_v46, %v213_v45 }
  0xf1   :  { %v249_v51 = vadd.f32 %v248_v49, %v218_v48 }
  0xf3   :  { %v250_v54 = vadd.f32 %v249_v51, %v221_v50 }
  0xf5   :  { %v251_v55 = vadd.f32 %v250_v54, %v226_v53 }
  0xf7   :  { %v252_v58 = vadd.f32 %v251_v55, %v229_v56 }
  0xf9   :  { %v253_v60 = vadd.f32 %v252_v58, %v234_v57 }
  0xfb   :  { %v254_v61 = vadd.f32 %v253_v60, %v237_v59 }
  0xfd   :  { %v255_v62 = vrot.slane %v254_v61, 4 }
  0xff   :  { %v256_v63 = vadd.f32 %v255_v62, %v254_v61 }
 0x101   :  { %v257_v0 = vrot.slane %v256_v63, 2 }
 0x103   :  { %v258_v1 = vadd.f32 %v257_v0, %v256_v63 }
 0x105   :  { %v259_v2 = vrot.slane %v258_v1, 1 }
 0x107   :  { %v260_v3 = vadd.f32 %v259_v2, %v258_v1 }
 0x109   :  { %v262_v4 = vmul.f32 0.0078125, %v260_v3 }
 0x10b   :  { %v263_v5 = vsub.f32 %v178_v21, %v262_v4  ;;  %v264_v6 = vsub.f32 %v181_v22, %v262_v4  ;;  %v265_v7 = vsub.f32 %v186_v25, %v262_v4  ;;  %v266_v10 = vsub.f32 %v189_v28, %v262_v4 }
 0x10c   :  { %v267_v11 = vsub.f32 %v194_v32, %v262_v4  ;;  %v268_v14 = vsub.f32 %v197_v36, %v262_v4  ;;  %v269_v17 = vsub.f32 %v202_v38, %v262_v4  ;;  %v270_v20 = vsub.f32 %v205_v40, %v262_v4 }
 0x10d   :  { %v279_v8 = vmul.f32 %v263_v5, %v263_v5  ;;  %v280_v9 = vmul.f32 %v264_v6, %v264_v6  ;;  %v281_v12 = vmul.f32 %v265_v7, %v265_v7  ;;  %v282_v15 = vmul.f32 %v266_v10, %v266_v10 }
 0x10e   :  { %v283_v18 = vmul.f32 %v267_v11, %v267_v11  ;;  %v284_v23 = vmul.f32 %v268_v14, %v268_v14  ;;  %v271_v26 = vsub.f32 %v210_v43, %v262_v4  ;;  %v285_v27 = vmul.f32 %v269_v17, %v269_v17 }
 0x10f   :  { %v295_v13 = vadd.f32 %v280_v9, %v279_v8  ;;  %v272_v22 = vsub.f32 %v213_v45, %v262_v4  ;;  %v286_v25 = vmul.f32 %v270_v20, %v270_v20  ;;  %v273_v30 = vsub.f32 %v218_v48, %v262_v4 }
 0x110   :  { %v287_v28 = vmul.f32 %v271_v26, %v271_v26  ;;  %v274_v32 = vsub.f32 %v221_v50, %v262_v4  ;;  %v275_v35 = vsub.f32 %v226_v53, %v262_v4  ;;  %v276_v38 = vsub.f32 %v229_v56, %v262_v4 }
 0x111   :  { %v296_v16 = vadd.f32 %v295_v13, %v281_v12  ;;  %v288_v33 = vmul.f32 %v272_v22, %v272_v22  ;;  %v289_v36 = vmul.f32 %v273_v30, %v273_v30  ;;  %v277_v41 = vsub.f32 %v234_v57, %v262_v4 }
 0x112   :  { %v290_v39 = vmul.f32 %v274_v32, %v274_v32  ;;  %v291_v42 = vmul.f32 %v275_v35, %v275_v35  ;;  %v278_v44 = vsub.f32 %v237_v59, %v262_v4  ;;  %v292_v46 = vmul.f32 %v276_v38, %v276_v38 }
 0x113   :  { %v297_v19 = vadd.f32 %v296_v16, %v282_v15  ;;  %v293_v47 = vmul.f32 %v277_v41, %v277_v41 }
 0x114   :  { %v294_v48 = vmul.f32 %v278_v44, %v278_v44 }
 0x115   :  { %v298_v24 = vadd.f32 %v297_v19, %v283_v18 }
 0x117   :  { %v299_v21 = vadd.f32 %v298_v24, %v284_v23 }
 0x119   :  { %v300_v29 = vadd.f32 %v299_v21, %v285_v27 }
 0x11b   :  { %v301_v31 = vadd.f32 %v300_v29, %v286_v25 }
 0x11d   :  { %v302_v34 = vadd.f32 %v301_v31, %v287_v28 }
 0x11f   :  { %v303_v37 = vadd.f32 %v302_v34, %v288_v33 }
 0x121   :  { %v304_v40 = vadd.f32 %v303_v37, %v289_v36 }
 0x123   :  { %v305_v43 = vadd.f32 %v304_v40, %v290_v39 }
 0x125   :  { %v306_v45 = vadd.f32 %v305_v43, %v291_v42 }
 0x127   :  { %v307_v49 = vadd.f32 %v306_v45, %v292_v46 }
 0x129   :  { %v308_v51 = vadd.f32 %v307_v49, %v293_v47 }
 0x12b   :  { %v309_v52 = vadd.f32 %v308_v51, %v294_v48 }
 0x12d   :  { %v310_v50 = vrot.slane %v309_v52, 4 }
 0x12f   :  { %v311_v54 = vadd.f32 %v310_v50, %v309_v52 }
 0x131   :  { %v312_v55 = vrot.slane %v311_v54, 2 }
 0x133   :  { %v313_v53 = vadd.f32 %v312_v55, %v311_v54 }
 0x135   :  { %v314_v58 = vrot.slane %v313_v53, 1 }
 0x137   :  { %v315_v60 = vadd.f32 %v314_v58, %v313_v53 }
 0x139   :  { %v316_v56 = vmul.f32 0.0078125, %v315_v60 }
 0x13b   :  { %v317_v61 = vadd.f32 1e-05, %v316_v56 }
 0x13d   :  { %489 = vrsqrt.f32 %v317_v61 }
 0x14a   :  { %v490_v57 = vpop.eup %489 }
 0x14b   :  { %v319_v62 = vmul.f32 %v490_v57, %v263_v5  ;;  %v320_v63 = vmul.f32 %v490_v57, %v264_v6  ;;  %v321_v59 = vmul.f32 %v490_v57, %v265_v7  ;;  %v322_v0 = vmul.f32 %v490_v57, %v266_v10 }
 0x14c   :  { %v323_v1 = vmul.f32 %v490_v57, %v267_v11  ;;  %v324_v2 = vmul.f32 %v490_v57, %v268_v14  ;;  %v325_v3 = vmul.f32 %v490_v57, %v269_v17  ;;  %v326_v4 = vmul.f32 %v490_v57, %v270_v20 }
 0x14d   :  { %v327_v8 = vmul.f32 %v490_v57, %v271_v26  ;;  %v328_v9 = vmul.f32 %v490_v57, %v272_v22  ;;  %v329_v12 = vmul.f32 %v490_v57, %v273_v30  ;;  %v330_v13 = vmul.f32 %v490_v57, %v274_v32 }
 0x14e   :  { %v331_v15 = vmul.f32 %v490_v57, %v275_v35  ;;  %v332_v16 = vmul.f32 %v490_v57, %v276_v38  ;;  %v333_v18 = vmul.f32 %v490_v57, %v277_v41  ;;  %v334_v19 = vmul.f32 %v490_v57, %v278_v44 }
 0x14f   :  { %vm335_vm2 = vcmp.gt.f32.partialorder %v319_v62, 0.0  ;;  %vm336_vm3 = vcmp.gt.f32.partialorder %v320_v63, 0.0  ;;  %vm337_vm4 = vcmp.gt.f32.partialorder %v321_v59, 0.0  ;;  %vm338_vm5 = vcmp.gt.f32.partialorder %v322_v0, 0.0 }
 0x150   :  { %vm339_vm6 = vcmp.gt.f32.partialorder %v323_v1, 0.0  ;;  %vm340_vm7 = vcmp.gt.f32.partialorder %v324_v2, 0.0  ;;  %vm341_vm8 = vcmp.gt.f32.partialorder %v325_v3, 0.0  ;;  %vm342_vm9 = vcmp.gt.f32.partialorder %v326_v4, 0.0 }
 0x151   :  { %vm343_vm10 = vcmp.gt.f32.partialorder %v327_v8, 0.0  ;;  %vm344_vm11 = vcmp.gt.f32.partialorder %v328_v9, 0.0  ;;  %vm345_vm12 = vcmp.gt.f32.partialorder %v329_v12, 0.0  ;;  %vm346_vm13 = vcmp.gt.f32.partialorder %v330_v13, 0.0 }
 0x152   :  { %vm347_vm14 = vcmp.gt.f32.partialorder %v331_v15, 0.0  ;;  %vm348_vm15 = vcmp.gt.f32.partialorder %v332_v16, 0.0  ;;  %vm349_vm0 = vcmp.gt.f32.partialorder %v333_v18, 0.0  ;;  %vm350_vm1 = vcmp.gt.f32.partialorder %v334_v19, 0.0 }
 0x153   :  { %v351_v5 = vmul.f32 0.2, %v319_v62  ;;  %v352_v6 = vmul.f32 0.2, %v320_v63  ;;  %v353_v7 = vmul.f32 0.2, %v321_v59 }
 0x154   :  { %v354_v10 = vmul.f32 0.2, %v322_v0  ;;  %v355_v11 = vmul.f32 0.2, %v323_v1  ;;  %v356_v14 = vmul.f32 0.2, %v324_v2 }
 0x155   :  { %v357_v17 = vmul.f32 0.2, %v325_v3  ;;  %v358_v20 = vmul.f32 0.2, %v326_v4  ;;  %v359_v23 = vmul.f32 0.2, %v327_v8  ;;  %v367_v24 = vsel %vm335_vm2, %v319_v62, %v351_v5 }
 0x156   :  { %v360_v26 = vmul.f32 0.2, %v328_v9  ;;  %v361_v27 = vmul.f32 0.2, %v329_v12  ;;  %v362_v21 = vmul.f32 0.2, %v330_v13  ;;  %v368_v22 = vsel %vm336_vm3, %v320_v63, %v352_v6  ;;  %383 = vst [vmem:[%s628_s3] sm:$0xff] %v367_v24 }
 0x157   :  { %v363_v25 = vmul.f32 0.2, %v331_v15  ;;  %v364_v29 = vmul.f32 0.2, %v332_v16  ;;  %v365_v30 = vmul.f32 0.2, %v333_v18  ;;  %v369_v28 = vsel %vm337_vm4, %v321_v59, %v353_v7 }
 0x158   :  { %384 = vst [vmem:[%s628_s3 + $0x8] sm:$0xff] %v368_v22  ;;  %v366_v31 = vmul.f32 0.2, %v334_v19  ;;  %v370_v32 = vsel %vm338_vm5, %v322_v0, %v354_v10  ;;  %v371_v33 = vsel %vm339_vm6, %v323_v1, %v355_v11  ;;  %v372_v34 = vsel %vm340_vm7, %v324_v2, %v356_v14  ;;  %385 = vst [vmem:[%s628_s3 + $0x10] sm:$0xff] %v369_v28 }
 0x159   :  { %v373_v35 = vsel %vm341_vm8, %v325_v3, %v357_v17  ;;  %v374_v36 = vsel %vm342_vm9, %v326_v4, %v358_v20  ;;  %v375_v37 = vsel %vm343_vm10, %v327_v8, %v359_v23  ;;  %v376_v38 = vsel %vm344_vm11, %v328_v9, %v360_v26  ;;  %386 = vst [vmem:[%s628_s3 + $0x18] sm:$0xff] %v370_v32 }
 0x15a   :  { %387 = vst [vmem:[%s628_s3 + $0x20] sm:$0xff] %v371_v33  ;;  %388 = vst [vmem:[%s628_s3 + $0x28] sm:$0xff] %v372_v34  ;;  %v377_v39 = vsel %vm345_vm12, %v329_v12, %v361_v27  ;;  %v378_v40 = vsel %vm346_vm13, %v330_v13, %v362_v21  ;;  %v379_v41 = vsel %vm347_vm14, %v331_v15, %v363_v25 }
 0x15b   :  { %v380_v42 = vsel %vm348_vm15, %v332_v16, %v364_v29  ;;  %389 = vst [vmem:[%s628_s3 + $0x30] sm:$0xff] %v373_v35  ;;  %390 = vst [vmem:[%s628_s3 + $0x38] sm:$0xff] %v374_v36  ;;  %v381_v43 = vsel %vm349_vm0, %v333_v18, %v365_v30  ;;  %v382_v44 = vsel %vm350_vm1, %v334_v19, %v366_v31 }
 0x15c   :  { %391 = vst [vmem:[%s628_s3 + $0x40] sm:$0xff] %v375_v37  ;;  %392 = vst [vmem:[%s628_s3 + $0x48] sm:$0xff] %v376_v38 }
 0x15d   :  { %393 = vst [vmem:[%s628_s3 + $0x50] sm:$0xff] %v377_v39  ;;  %394 = vst [vmem:[%s628_s3 + $0x58] sm:$0xff] %v378_v40 }
 0x15e   :  { %395 = vst [vmem:[%s628_s3 + $0x60] sm:$0xff] %v379_v41  ;;  %396 = vst [vmem:[%s628_s3 + $0x68] sm:$0xff] %v380_v42 }
 0x15f   :  { %397 = vst [vmem:[%s628_s3 + $0x70] sm:$0xff] %v381_v43  ;;  %398 = vst [vmem:[%s628_s3 + $0x78] sm:$0xff] %v382_v44 }

// kernel: diffusion_forward.11
= control target key start
LH: loop header
LB: loop body
LE: loop exit
PB: predicated region body
PF: predicated region fallthrough
CT: control target
= control target key end

     0   :  { %v279_v0 = vmov 0   ;;  %vm116_vm0 = vcmask 130048   ;;  %s354_s1 = inlined_call_operand.vmem [shape: bf16[144,128], index: 1, kind: input, shape index: {}]   ;;  %s355_s0 = inlined_call_operand.vmem [shape: bf16[32,144], index: 0, kind: input, shape index: {}]   ;;  %s356_s2 = inlined_call_operand.vmem [shape: f32[1,128], index: 2, kind: input, shape index: {}]   ;;  %s357_s3 = inlined_call_operand.vmem [shape: f32[32,128], index: 3, kind: output, shape index: {}]  }
   0x1   :  { %123 = vmatprep.subr.bf16.mxu0 %v279_v0  ;;  %243 = vmatprep.subr.bf16.mxu1 %v279_v0  ;;  %v262_v1 = vld [vmem:[%s354_s1 + $0x38] sm:$0xff]   ;;  %v263_v2 = vld [vmem:[%s354_s1 + $0x30] sm:$0xff]   ;;  %v264_v3 = vld [vmem:[%s354_s1 + $0x28] sm:$0xff]  }
   0x2   :  { %124 = vmatpush1.bf16.msra.mxu0 %v262_v1  ;;  %252 = vmatpush1.bf16.msra.mxu1 %v262_v1  ;;  %v265_v4 = vld [vmem:[%s354_s1 + $0x20] sm:$0xff]   ;;  %v276_v6 = vld [vmem:[%s355_s0 + $0x14] ss:$8 sps:$4 sm:$0xff]   ;;  %v268_v9 = vld [vmem:[%s354_s1 + $0x8] sm:$0xff]  }
   0x3   :  { %125 = vmatprep.subr.bf16.mxu0 %v279_v0  ;;  %244 = vmatprep.subr.bf16.mxu1 %v279_v0  ;;  %v273_v5 = vld [vmem:[%s355_s0 + $0x4] ss:$8 sps:$4 sm:$0xff]   ;;  %v266_v7 = vld [vmem:[%s354_s1 + $0x18] sm:$0xff]   ;;  %v267_v8 = vld [vmem:[%s354_s1 + $0x10] sm:$0xff]  }
   0x4   :  { %241 = vmatprep.mubr.msk.bf16.mxu0 %vm116_vm0, %v273_v5  ;;  %242 = vmatprep.mubr.msk.bf16.mxu1 %vm116_vm0, %v276_v6  ;;  %v269_v10 = vld [vmem:[%s354_s1] sm:$0xff]   ;;  %v274_v13 = vld [vmem:[%s355_s0 + $0x10] ss:$8 sps:$4 sm:$0xff]  }
   0x5   :  { %v270_v11 = vld [vmem:[%s354_s1 + $0x40] sm:$0xff]  }
   0x6   :  { %126 = vmatpush1.bf16.msra.mxu0 %v263_v2  ;;  %253 = vmatpush1.bf16.msra.mxu1 %v263_v2  ;;  %v271_v12 = vld [vmem:[%s355_s0] ss:$8 sps:$4 sm:$0xff]  }
   0x7   :  { %127 = vmatprep.subr.bf16.mxu0 %v279_v0  ;;  %245 = vmatprep.subr.bf16.mxu1 %v279_v0  ;;  %v227_v16 = vld [vmem:[%s356_s2] ss:$0 sm:$0xff] }
   0xa   :  { %128 = vmatpush1.bf16.msra.mxu0 %v264_v3  ;;  %254 = vmatpush1.bf16.msra.mxu1 %v264_v3 }
   0xb   :  { %129 = vmatprep.subr.bf16.mxu0 %v279_v0  ;;  %246 = vmatprep.subr.bf16.mxu1 %v279_v0 }
   0xe   :  { %130 = vmatpush1.bf16.msra.mxu0 %v265_v4  ;;  %255 = vmatpush1.bf16.msra.mxu1 %v265_v4 }
   0xf   :  { %131 = vmatprep.subr.bf16.mxu0 %v279_v0  ;;  %247 = vmatprep.subr.bf16.mxu1 %v279_v0 }
  0x12   :  { %132 = vmatpush1.bf16.msra.mxu0 %v266_v7  ;;  %256 = vmatpush1.bf16.msra.mxu1 %v266_v7 }
  0x13   :  { %133 = vmatprep.subr.bf16.mxu0 %v279_v0  ;;  %248 = vmatprep.subr.bf16.mxu1 %v279_v0 }
  0x16   :  { %134 = vmatpush1.bf16.msra.mxu0 %v267_v8  ;;  %257 = vmatpush1.bf16.msra.mxu1 %v267_v8 }
  0x17   :  { %135 = vmatprep.subr.bf16.mxu0 %v279_v0  ;;  %249 = vmatprep.subr.bf16.mxu1 %v279_v0 }
  0x1a   :  { %136 = vmatpush1.bf16.msra.mxu0 %v268_v9  ;;  %258 = vmatpush1.bf16.msra.mxu1 %v268_v9 }
  0x1b   :  { %137 = vmatprep.subr.bf16.mxu0 %v279_v0  ;;  %250 = vmatprep.subr.bf16.mxu1 %v279_v0 }
  0x1e   :  { %138 = vmatpush1.bf16.msra.mxu0 %v269_v10  ;;  %259 = vmatpush1.bf16.msra.mxu1 %v269_v10 }
  0x1f   :  { %153 = vmatprep.subr.bf16.mxu0 %v279_v0  ;;  %251 = vmatprep.subr.bf16.mxu1 %v279_v0 }
  0x22   :  { %154 = vmatpush2.bf16.msra.mxu0 %v270_v11  ;;  %260 = vmatpush2.bf16.msra.mxu1 %v270_v11 }
  0x25   :  { %156 = vmatmul.mubr.bf16.vlgmr.msra.gmra.mxu0 %v271_v12  ;;  %164 = vmatmul.mubr.bf16.vlgmr.msra.gmra.mxu1 %v274_v13 }
  0xe5   :  { %v157_v14 = vpop.f32.mrf.mxu0  ;;  %v165_v15 = vpop.f32.mrf.mxu1 }
  0xe6   :  { %v158_v21 = vadd.f32 %v227_v16, %v157_v14  ;;  %v166_v25 = vadd.f32 %v227_v16, %v165_v15 }
  0xe7   :  { %v159_v17 = vpop.f32.mrf.mxu0  ;;  %v167_v18 = vpop.f32.mrf.mxu1 }
  0xe9   :  { %v160_v19 = vpop.f32.mrf.mxu0  ;;  %v168_v20 = vpop.f32.mrf.mxu1 }
  0xea   :  { %v161_v22 = vadd.f32 %v227_v16, %v160_v19  ;;  %v169_v27 = vadd.f32 %v227_v16, %v168_v20 }
  0xeb   :  { %v162_v23 = vpop.f32.mrf.mxu0  ;;  %v170_v24 = vpop.f32.mrf.mxu1 }
  0xec   :  { %v172_v26 = vadd.f32 %v161_v22, %v158_v21 }
  0xee   :  { %v173_v28 = vadd.f32 %v172_v26, %v166_v25 }
  0xf0   :  { %v174_v29 = vadd.f32 %v173_v28, %v169_v27 }
  0xf2   :  { %v175_v30 = vrot.slane %v174_v29, 4 }
  0xf4   :  { %v176_v31 = vadd.f32 %v175_v30, %v174_v29 }
  0xf6   :  { %v177_v32 = vrot.slane %v176_v31, 2 }
  0xf8   :  { %v178_v33 = vadd.f32 %v177_v32, %v176_v31 }
  0xfa   :  { %v179_v34 = vrot.slane %v178_v33, 1 }
  0xfc   :  { %v180_v35 = vadd.f32 %v179_v34, %v178_v33 }
  0xfe   :  { %v182_v36 = vmul.f32 0.03125, %v180_v35 }
 0x100   :  { %v183_v37 = vsub.f32 %v158_v21, %v182_v36  ;;  %v184_v38 = vsub.f32 %v161_v22, %v182_v36  ;;  %v185_v39 = vsub.f32 %v166_v25, %v182_v36  ;;  %v186_v40 = vsub.f32 %v169_v27, %v182_v36 }
 0x102   :  { %v187_v41 = vmul.f32 %v183_v37, %v183_v37  ;;  %v188_v42 = vmul.f32 %v184_v38, %v184_v38  ;;  %v189_v43 = vmul.f32 %v185_v39, %v185_v39  ;;  %v190_v45 = vmul.f32 %v186_v40, %v186_v40 }
 0x104   :  { %v191_v44 = vadd.f32 %v188_v42, %v187_v41 }
 0x106   :  { %v192_v46 = vadd.f32 %v191_v44, %v189_v43 }
 0x108   :  { %v193_v47 = vadd.f32 %v192_v46, %v190_v45 }
 0x10a   :  { %v194_v48 = vrot.slane %v193_v47, 4 }
 0x10c   :  { %v195_v49 = vadd.f32 %v194_v48, %v193_v47 }
 0x10e   :  { %v196_v50 = vrot.slane %v195_v49, 2 }
 0x110   :  { %v197_v51 = vadd.f32 %v196_v50, %v195_v49 }
 0x112   :  { %v198_v52 = vrot.slane %v197_v51, 1 }
 0x114   :  { %v199_v53 = vadd.f32 %v198_v52, %v197_v51 }
 0x116   :  { %v200_v54 = vmul.f32 0.03125, %v199_v53 }
 0x118   :  { %v201_v55 = vadd.f32 1e-05, %v200_v54 }
 0x11a   :  { %277 = vrsqrt.f32 %v201_v55 }
 0x127   :  { %v278_v56 = vpop.eup %277 }
 0x128   :  { %v203_v57 = vmul.f32 %v278_v56, %v183_v37  ;;  %v204_v58 = vmul.f32 %v278_v56, %v184_v38  ;;  %v205_v59 = vmul.f32 %v278_v56, %v185_v39  ;;  %v206_v60 = vmul.f32 %v278_v56, %v186_v40 }
 0x12a   :  { %vm207_vm1 = vcmp.gt.f32.partialorder %v203_v57, 0.0  ;;  %vm208_vm2 = vcmp.gt.f32.partialorder %v204_v58, 0.0  ;;  %vm209_vm3 = vcmp.gt.f32.partialorder %v205_v59, 0.0  ;;  %vm210_vm4 = vcmp.gt.f32.partialorder %v206_v60, 0.0 }
 0x12b   :  { %v211_v61 = vmul.f32 0.2, %v203_v57  ;;  %v212_v62 = vmul.f32 0.2, %v204_v58  ;;  %v213_v63 = vmul.f32 0.2, %v205_v59 }
 0x12c   :  { %v214_v0 = vmul.f32 0.2, %v206_v60 }
 0x12d   :  { %v215_v1 = vsel %vm207_vm1, %v203_v57, %v211_v61  ;;  %v216_v2 = vsel %vm208_vm2, %v204_v58, %v212_v62  ;;  %v217_v3 = vsel %vm209_vm3, %v205_v59, %v213_v63 }
 0x12e   :  { %v218_v4 = vsel %vm210_vm4, %v206_v60, %v214_v0  ;;  %219 = vst [vmem:[%s357_s3] sm:$0xff] %v215_v1  ;;  %220 = vst [vmem:[%s357_s3 + $0x8] sm:$0xff] %v216_v2 }
 0x12f   :  { %221 = vst [vmem:[%s357_s3 + $0x10] sm:$0xff] %v217_v3  ;;  %222 = vst [vmem:[%s357_s3 + $0x18] sm:$0xff] %v218_v4 }

// kernel: diffusion_forward.12
= control target key start
LH: loop header
LB: loop body
LE: loop exit
PB: predicated region body
PF: predicated region fallthrough
CT: control target
= control target key end

     0   :  { %v371_v1 = vmov 0.0   ;;  %vm372_vm0 = vmmov 0   ;;  %vm178_vm1 = vcmask 261120   ;;  %s459_s1 = inlined_call_operand.vmem [shape: bf16[288,128], index: 1, kind: input, shape index: {}]   ;;  %s460_s0 = inlined_call_operand.vmem [shape: bf16[8,288], index: 0, kind: input, shape index: {}]   ;;  %s461_s2 = inlined_call_operand.vmem [shape: f32[1,128], index: 2, kind: input, shape index: {}]   ;;  %s462_s3 = inlined_call_operand.vmem [shape: f32[8,128], index: 3, kind: output, shape index: {}]  }
   0x1   :  { %v348_v0 = vld [vmem:[%s459_s1 + $0x78] sm:$0xff]   ;;  %338 = vmatprep.subr.bf16.mxu1 %v371_v1  ;;  %342 = vmatprep.mubr.msk.bf16.mxu1 %vm372_vm0, %v371_v1  ;;  %v350_v3 = vld [vmem:[%s459_s1 + $0x70] sm:$0xff]   ;;  %v352_v5 = vld [vmem:[%s459_s1 + $0x68] sm:$0xff]  }
   0x2   :  { %v349_v2 = vld [vmem:[%s459_s1 + $0x38] sm:$0xff]   ;;  %313 = vmatprep.subr.bf16.mxu0 %v348_v0  ;;  %v351_v4 = vld [vmem:[%s459_s1 + $0x30] sm:$0xff]   ;;  %v353_v6 = vld [vmem:[%s459_s1 + $0x28] sm:$0xff]  }
   0x3   :  { %314 = vmatpush3.bf16.msra.mxu0 %v349_v2  ;;  %v354_v7 = vld [vmem:[%s459_s1 + $0x60] sm:$0xff]   ;;  %v356_v9 = vld [vmem:[%s459_s1 + $0x58] sm:$0xff]   ;;  %v362_v10 = vld [vmem:[%s459_s1 + $0x88] sm:$0xff]  }
   0x4   :  { %315 = vmatprep.subr.bf16.mxu0 %v350_v3  ;;  %v355_v8 = vld [vmem:[%s459_s1 + $0x20] sm:$0xff]   ;;  %v357_v11 = vld [vmem:[%s459_s1 + $0x18] sm:$0xff]   ;;  %v358_v12 = vld [vmem:[%s459_s1 + $0x50] sm:$0xff]   ;;  %339 = vmatpush3.bf16.msra.mxu1 %v362_v10 }
   0x5   :  { %340 = vmatprep.subr.bf16.mxu1 %v371_v1  ;;  %v365_v13 = vld [vmem:[%s459_s1 + $0x80] sm:$0xff]   ;;  %v359_v15 = vld [vmem:[%s459_s1 + $0x10] sm:$0xff]   ;;  %v368_v17 = vld [vmem:[%s460_s0 + $0x8] ss:$0 sps:$4 sm:$0xff]  }
   0x6   :  { %v15_v14 = vld [vmem:[%s460_s0] sm:$0xff]  ;;  %v360_v18 = vld [vmem:[%s459_s1 + $0x48] sm:$0xff]  }
   0x7   :  { %316 = vmatpush3.bf16.msra.mxu0 %v351_v4  ;;  %v292_v16 = vcombine.high %v15_v14, %v15_v14  ;;  %v361_v19 = vld [vmem:[%s459_s1 + $0x8] sm:$0xff]   ;;  %v363_v20 = vld [vmem:[%s459_s1 + $0x40] sm:$0xff]   ;;  %v291_v22 = vcombine.low %v15_v14, %v15_v14 }
   0x8   :  { %317 = vmatprep.subr.bf16.mxu0 %v352_v5  ;;  %341 = vmatpush3.bf16.msra.mxu1 %v365_v13  ;;  %v364_v21 = vld [vmem:[%s459_s1] sm:$0xff]  }
   0x9   :  { %214 = vmatprep.mubr.bf16.mxu0 %v292_v16  ;;  %v290_v28 = vld [vmem:[%s461_s2] ss:$0 sm:$0xff] }
   0xb   :  { %318 = vmatpush3.bf16.msra.mxu0 %v353_v6  ;;  %343 = vmatmul.mubr.msk.bf16.vlgmr.msra.gmra.mxu1 %vm178_vm1, %v368_v17 }
   0xc   :  { %319 = vmatprep.subr.bf16.mxu0 %v354_v7 }
   0xf   :  { %320 = vmatpush3.bf16.msra.mxu0 %v355_v8 }
  0x10   :  { %321 = vmatprep.subr.bf16.mxu0 %v356_v9 }
  0x13   :  { %322 = vmatpush3.bf16.msra.mxu0 %v357_v11 }
  0x14   :  { %323 = vmatprep.subr.bf16.mxu0 %v358_v12 }
  0x17   :  { %324 = vmatpush3.bf16.msra.mxu0 %v359_v15 }
  0x18   :  { %325 = vmatprep.subr.bf16.mxu0 %v360_v18 }
  0x1b   :  { %326 = vmatpush3.bf16.msra.mxu0 %v361_v19 }
  0x1c   :  { %327 = vmatprep.subr.bf16.mxu0 %v363_v20 }
  0x1f   :  { %328 = vmatpush3.bf16.msra.mxu0 %v364_v21 }
  0x22   :  { %215 = vmatmul.mubr.bf16.vlgmr.msra.gmra.mxu0 %v291_v22 }
  0xcb   :  { %v256_v23 = vpop.f32.mrf.mxu1 }
  0xcd   :  { %v344_v24 = vpop.f32.mrf.mxu1 }
  0xcf   :  { %v259_v25 = vpop.f32.mrf.mxu1 }
  0xd1   :  { %v345_v26 = vpop.f32.mrf.mxu1 }
  0xe2   :  { %v329_v27 = vpop.f32.mrf.mxu0 }
  0xe4   :  { %v330_v29 = vpop.f32.mrf.mxu0 }
  0xe5   :  { %v331_v30 = vadd.f32 %v330_v29, %v329_v27 }
  0xe6   :  { %v332_v31 = vpop.f32.mrf.mxu0 }
  0xe7   :  { %v217_v32 = vadd.f32 %v331_v30, %v290_v28 }
  0xe8   :  { %v333_v33 = vpop.f32.mrf.mxu0 }
  0xe9   :  { %v257_v34 = vadd.f32 %v256_v23, %v217_v32 }
  0xeb   :  { %v262_v35 = vrot.slane %v257_v34, 4 }
  0xed   :  { %v263_v36 = vadd.f32 %v262_v35, %v257_v34 }
  0xef   :  { %v264_v37 = vrot.slane %v263_v36, 2 }
  0xf1   :  { %v265_v38 = vadd.f32 %v264_v37, %v263_v36 }
  0xf3   :  { %v266_v39 = vrot.slane %v265_v38, 1 }
  0xf5   :  { %v267_v40 = vadd.f32 %v266_v39, %v265_v38 }
  0xf7   :  { %v269_v41 = vmul.f32 0.125, %v267_v40 }
  0xf9   :  { %v270_v42 = vsub.f32 %v257_v34, %v269_v41 }
  0xfb   :  { %v271_v43 = vmul.f32 %v270_v42, %v270_v42 }
  0xfd   :  { %v272_v44 = vrot.slane %v271_v43, 4 }
  0xff   :  { %v273_v45 = vadd.f32 %v272_v44, %v271_v43 }
 0x101   :  { %v274_v46 = vrot.slane %v273_v45, 2 }
 0x103   :  { %v275_v47 = vadd.f32 %v274_v46, %v273_v45 }
 0x105   :  { %v276_v48 = vrot.slane %v275_v47, 1 }
 0x107   :  { %v277_v49 = vadd.f32 %v276_v48, %v275_v47 }
 0x109   :  { %v278_v50 = vmul.f32 0.125, %v277_v49 }
 0x10b   :  { %v279_v51 = vadd.f32 1e-05, %v278_v50 }
 0x10d   :  { %369 = vrsqrt.f32 %v279_v51 }
 0x11a   :  { %v370_v52 = vpop.eup %369 }
 0x11b   :  { %v281_v53 = vmul.f32 %v370_v52, %v270_v42 }
 0x11d   :  { %vm282_vm2 = vcmp.gt.f32.partialorder %v281_v53, 0.0  ;;  %v283_v54 = vmul.f32 0.2, %v281_v53 }
 0x11f   :  { %v284_v55 = vsel %vm282_vm2, %v281_v53, %v283_v54 }
 0x120   :  { %285 = vst [vmem:[%s462_s3] sm:$0xff] %v284_v55 }

// kernel: diffusion_forward.13
= control target key start
LH: loop header
LB: loop body
LE: loop exit
PB: predicated region body
PF: predicated region fallthrough
CT: control target
= control target key end

     0   :  { %vm60_vm0 = vcmask 1043456   ;;  %vm56_vm1 = vcmask 31744   ;;  %v4909_v0 = vmov 0.0   ;;  %vm4910_vm2 = vmmov 0   ;;  %s6544_s1 = inlined_call_operand.vmem [shape: f32[4,16], index: 1, kind: input, shape index: {}]   ;;  %s6545_s0 = inlined_call_operand.vmem [shape: f32[2,4], index: 0, kind: input, shape index: {}]   ;;  %s6546_s3 = inlined_call_operand.vmem [shape: f32[16,8], index: 3, kind: input, shape index: {}]   ;;  %s6547_s2 = inlined_call_operand.vmem [shape: f32[1,16], index: 2, kind: input, shape index: {}]   ;;  %s6548_s7 = inlined_call_operand.vmem [shape: f32[2,4,4], index: 7, kind: input, shape index: {}]   ;;  %s6549_s5 = inlined_call_operand.vmem [shape: f32[2,64,4], index: 5, kind: input, shape index: {}]   ;;  %s6550_s6 = inlined_call_operand.vmem [shape: f32[2,4,4], index: 6, kind: input, shape index: {}]   ;;  %s6551_s4 = inlined_call_operand.vmem [shape: f32[1,8], index: 4, kind: input, shape index: {}]   ;;  %s6552_s8 = inlined_call_operand.vmem [shape: f32[2,4,4], index: 8, kind: input, shape index: {}]   ;;  %s6553_s11 = inlined_call_operand.vmem [shape: f32[2,1,4], index: 11, kind: input, shape index: {}]   ;;  %s6554_s12 = inlined_call_operand.vmem [shape: f32[2,1,4], index: 12, kind: input, shape index: {}]   ;;  %s6555_s10 = inlined_call_operand.vmem [shape: f32[2,1,4], index: 10, kind: input, shape index: {}]   ;;  %s6556_s9 = inlined_call_operand.vmem [shape: f32[2,4,4], index: 9, kind: input, shape index: {}]   ;;  %s6557_s13 = inlined_call_operand.vmem [shape: f32[2,1,4], index: 13, kind: input, shape index: {}]   ;;  %s6558_s14 = inlined_call_operand.vmem [shape: f32[2,72,4], index: 14, kind: output, shape index: {}]  }
   0x1   :  { %4139 = vmatprep.subr.mxu0 %v4909_v0  ;;  %v48_v1 = vld [vmem:[%s6544_s1] sm:$0xf]  ;;  %4141 = vmatprep.mubr.msk.f32.mxu0 %vm4910_vm2, %v4909_v0  ;;  %v142_v3 = vld [vmem:[%s6546_s3 + $0x8] sm:$0xff]  ;;  %vm150_vm3 = vcmask 130048   ;;  %v5032_v18 = vld [vmem:[%s6549_s5 + $0x10] sm:$0xff]  ;;  %v224_v24 = vlaneseq  ;;  %vm980_vm4 = vcmask 588800  }
   0x2   :  { %v47_v2 = vld [vmem:[%s6545_s0] sm:$0x3]  ;;  %4140 = vmatpush3.msk.msra.mxu0 %vm60_vm0, %v48_v1  ;;  %4144 = vmatprep.subr.mxu1 %v4909_v0  ;;  %v5027_v17 = vld [vmem:[%s6549_s5 + $0x8] sm:$0xff]  ;;  %v5046_v19 = vld [vmem:[%s6549_s5 + $0x18] sm:$0xff] }
   0x3   :  { %4142 = vmatmul.mubr.msk.f32.vlgmr.msra.gmra.mxu0 %vm56_vm1, %v47_v2  ;;  %4148 = vmatprep.mubr.msk.f32.mxu1 %vm4910_vm2, %v4909_v0  ;;  %v141_v4 = vld [vmem:[%s6546_s3] sm:$0xff]  ;;  %v5065_v21 = vld [vmem:[%s6549_s5 + $0x28] sm:$0xff]  ;;  %v5072_v22 = vld [vmem:[%s6549_s5 + $0x30] sm:$0xff]  ;;  %v225_v25 = vshrl.u32 %v224_v24, 7 }
   0x4   :  { %4145 = vmatpush3.msra.mxu1 %v142_v3  ;;  %v3539_v5 = vld [vmem:[%s6547_s2] ss:$0 sm:$0xff]  ;;  %v245_v23 = vld [vmem:[%s6549_s5 + $0x38] sm:$0xff]  ;;  %v3546_v37 = vld [vmem:[%s6549_s5 + $0x48] sm:$0xff] }
   0x5   :  { %4146 = vmatprep.subr.mxu1 %v4909_v0  ;;  %v475_v14 = vld [vmem:[%s6548_s7] sm:$0xf]  ;;  %v226_v27 = vsub.s32 0, %v225_v25  ;;  %v233_v32 = vsub.s32 1, %v225_v25  ;;  %v3547_v38 = vld [vmem:[%s6549_s5 + $0x50] sm:$0xff]  ;;  %v3548_v39 = vld [vmem:[%s6549_s5 + $0x58] sm:$0xff] }
   0x6   :  { %4147 = vmatpush3.msra.mxu1 %v141_v4  ;;  %v5016_v15 = vld [vmem:[%s6549_s5] sm:$0xff]  ;;  %v3550_v41 = vld [vmem:[%s6549_s5 + $0x68] sm:$0xff]  ;;  %v3551_v42 = vld [vmem:[%s6549_s5 + $0x70] sm:$0xff] }
   0x7   :  { %v255_v16 = vld [vmem:[%s6550_s6] sm:$0xf]  ;;  %4180 = vmatprep.subr.msk.mxu1 %vm60_vm0, %v475_v14  ;;  %4153 = vmatprep.mubr.msk.f32.mxu0 %vm56_vm1, %v5016_v15  ;;  %v3552_v43 = vld [vmem:[%s6549_s5 + $0x78] sm:$0xff] }
   0x8   :  { %4151 = vmatprep.subr.msk.mxu0 %vm60_vm0, %v255_v16  ;;  %v5053_v20 = vld [vmem:[%s6549_s5 + $0x20] sm:$0xff] }
   0x9   :  { %4152 = vmatpush3.msk.msra.mxu0 %vm60_vm0, %v255_v16  ;;  %v3543_v26 = vld [vmem:[%s6551_s4] ss:$0 sm:$0xff] }
   0xa   :  { %4154 = vmatmul.mubr.msk.f32.vlgmr.msra.gmra.mxu0 %vm56_vm1, %v5027_v17  ;;  %v641_v34 = vld [vmem:[%s6552_s8] sm:$0xf] }
   0xb   :  { %4156 = vmatprep.mubr.msk.f32.mxu0 %vm56_vm1, %v5032_v18  ;;  %4209 = vmatprep.subr.msk.mxu0 %vm60_vm0, %v641_v34  ;;  %v3545_v35 = vld [vmem:[%s6549_s5 + $0x40] sm:$0xff] }
   0xc   :  { %4210 = vmatpush3.msk.msra.mxu0 %vm60_vm0, %v641_v34  ;;  %v3549_v40 = vld [vmem:[%s6549_s5 + $0x60] sm:$0xff] }
   0xd   :  { %4283 = vmatprep.subr.mxu0 %v4909_v0  ;;  %v5206_v63 = vld [vmem:[%s6553_s11] ss:$0 sm:$0xff] }
   0xe   :  { %4157 = vmatmul.mubr.msk.f32.gmra.mxu0 %vm56_vm1, %v5046_v19 }
   0xf   :  { %4159 = vmatprep.mubr.msk.f32.mxu0 %vm56_vm1, %v5053_v20 }
  0x12   :  { %4160 = vmatmul.mubr.msk.f32.gmra.mxu0 %vm56_vm1, %v5065_v21 }
  0x13   :  { %4162 = vmatprep.mubr.msk.f32.mxu0 %vm56_vm1, %v5072_v22 }
  0x16   :  { %4163 = vmatmul.mubr.msk.f32.gmra.mxu0 %vm56_vm1, %v245_v23 }
  0xc3   :  { %v130_v6 = vpop.f32.mrf.mxu0 }
  0xc4   :  { %v131_v7 = vadd.f32 %v3539_v5, %v130_v6 }
  0xc5   :  { %v4143_v8 = vpop.f32.mrf.mxu0 }
  0xc6   :  { %v3542_v9 = vmul.f32 -1.442695, %v131_v7 }
  0xc8   :  { %4745 = vpow2.f32 %v3542_v9 }
  0xca   :  { %v5181_v45 = vpop.f32.mrf.mxu0 }
  0xcc   :  { %v5183_v47 = vpop.f32.mrf.mxu0 }
  0xce   :  { %v5187_v49 = vpop.f32.mrf.mxu0 }
  0xd0   :  { %v5189_v51 = vpop.f32.mrf.mxu0 }
  0xd2   :  { %v5191_v53 = vpop.f32.mrf.mxu0 }
  0xd4   :  { %v5193_v55 = vpop.f32.mrf.mxu0 }
  0xd5   :  { %v4746_v10 = vpop.eup %4745 }
  0xd6   :  { %v137_v11 = vadd.f32 1.0, %v4746_v10  ;;  %v5195_v57 = vpop.f32.mrf.mxu0 }
  0xd8   :  { %4747 = vrcp.f32 %v137_v11  ;;  %v5197_v59 = vpop.f32.mrf.mxu0 }
  0xe5   :  { %v4748_v12 = vpop.eup %4747 }
  0xe6   :  { %v140_v13 = vmul.f32 %v4748_v12, %v131_v7 }
  0xe8   :  { %4149 = vmatmul.mubr.msk.f32.vlgmr.msra.gmra.mxu1 %vm150_vm3, %v140_v13 }
  0xe9   :  { %4182 = vmatprep.mubr.msk.f32.mxu1 %vm56_vm1, %v5016_v15  ;;  %4181 = vmatpush3.msk.msra.mxu1 %vm60_vm0, %v475_v14 }
  0xea   :  { %4238 = vmatprep.subr.mxu1 %v4909_v0 }
  0xec   :  { %4183 = vmatmul.mubr.msk.f32.vlgmr.msra.gmra.mxu1 %vm56_vm1, %v5027_v17 }
  0xed   :  { %4185 = vmatprep.mubr.msk.f32.mxu1 %vm56_vm1, %v5032_v18 }
  0xf0   :  { %4186 = vmatmul.mubr.msk.f32.gmra.mxu1 %vm56_vm1, %v5046_v19 }
  0xf1   :  { %4188 = vmatprep.mubr.msk.f32.mxu1 %vm56_vm1, %v5053_v20 }
  0xf4   :  { %4189 = vmatmul.mubr.msk.f32.gmra.mxu1 %vm56_vm1, %v5065_v21 }
  0xf5   :  { %4191 = vmatprep.mubr.msk.f32.mxu1 %vm56_vm1, %v5072_v22 }
  0xf8   :  { %4192 = vmatmul.mubr.msk.f32.gmra.mxu1 %vm56_vm1, %v245_v23 }
 0x1a8   :  { %v220_v28 = vpop.f32.mrf.mxu1 }
 0x1a9   :  { %v221_v29 = vadd.f32 %v3543_v26, %v220_v28 }
 0x1aa   :  { %v4150_v30 = vpop.f32.mrf.mxu1 }
 0x1ab   :  { %v227_v31 = vrot.slane %v221_v29, %v226_v27  ;;  %v234_v33 = vrot.slane %v221_v29, %v233_v32 }
 0x1ac   :  { %v4184_v46 = vpop.f32.mrf.mxu1 }
 0x1ad   :  { %229 = vbcast.lane.b32.xlu0 %v227_v31, 256  ;;  %v558_v29 = vadd.f32 %v4184_v46, %v5206_v63 }
 0x1ae   :  { %v5185_v48 = vpop.f32.mrf.mxu1 }
 0x1b0   :  { %v4187_v50 = vpop.f32.mrf.mxu1 }
 0x1b1   :  { %236 = vbcast.lane.b32.xlu0 %v234_v33, 256  ;;  %v553_v33 = vadd.f32 %v5206_v63, %v5185_v48 }
 0x1b2   :  { %v562_v52 = vpop.f32.mrf.mxu1 }
 0x1b3   :  { %v563_v25 = vadd.f32 %v5206_v63, %v562_v52 }
 0x1b4   :  { %v4190_v54 = vpop.f32.mrf.mxu1 }
 0x1b5   :  { %v578_v13 = vadd.f32 %v4190_v54, %v5206_v63 }
 0x1b6   :  { %v572_v56 = vpop.f32.mrf.mxu1 }
 0x1b8   :  { %v4193_v58 = vpop.f32.mrf.mxu1 }
 0x1b9   :  { %v588_v6 = vadd.f32 %v4193_v58, %v5206_v63 }
 0x1ba   :  { %v582_v60 = vpop.f32.mrf.mxu1 }
 0x1bb   :  { %v583_v9 = vadd.f32 %v5206_v63, %v582_v60 }
 0x21f   :  { %v5101_v36 = vpop.permute.xlu0 %229 }
 0x220   :  { %4165 = vmatprep.mubr.msk.f32.mxu0 %vm56_vm1, %v5101_v36  ;;  %4194 = vmatprep.mubr.msk.f32.mxu1 %vm56_vm1, %v5101_v36 }
 0x221   :  { %4166 = vmatmul.mubr.msk.f32.gmra.mxu0 %vm56_vm1, %v3545_v35  ;;  %4195 = vmatmul.mubr.msk.f32.gmra.mxu1 %vm56_vm1, %v3545_v35 }
 0x222   :  { %4168 = vmatprep.mubr.msk.f32.mxu0 %vm56_vm1, %v3546_v37  ;;  %4197 = vmatprep.mubr.msk.f32.mxu1 %vm56_vm1, %v3546_v37 }
 0x223   :  { %v5144_v44 = vpop.permute.xlu0 %236 }
 0x225   :  { %4169 = vmatmul.mubr.msk.f32.gmra.mxu0 %vm56_vm1, %v3547_v38  ;;  %4198 = vmatmul.mubr.msk.f32.gmra.mxu1 %vm56_vm1, %v3547_v38 }
 0x226   :  { %4171 = vmatprep.mubr.msk.f32.mxu0 %vm56_vm1, %v3548_v39  ;;  %4200 = vmatprep.mubr.msk.f32.mxu1 %vm56_vm1, %v3548_v39 }
 0x229   :  { %4172 = vmatmul.mubr.msk.f32.gmra.mxu0 %vm56_vm1, %v3549_v40  ;;  %4201 = vmatmul.mubr.msk.f32.gmra.mxu1 %vm56_vm1, %v3549_v40 }
 0x22a   :  { %4174 = vmatprep.mubr.msk.f32.mxu0 %vm56_vm1, %v3550_v41  ;;  %4203 = vmatprep.mubr.msk.f32.mxu1 %vm56_vm1, %v3550_v41 }
 0x22d   :  { %4175 = vmatmul.mubr.msk.f32.gmra.mxu0 %vm56_vm1, %v3551_v42  ;;  %4204 = vmatmul.mubr.msk.f32.gmra.mxu1 %vm56_vm1, %v3551_v42 }
 0x22e   :  { %4177 = vmatprep.mubr.msk.f32.mxu0 %vm56_vm1, %v3552_v43  ;;  %4206 = vmatprep.mubr.msk.f32.mxu1 %vm56_vm1, %v3552_v43 }
 0x231   :  { %4178 = vmatmul.mubr.msk.f32.gmra.mxu0 %vm56_vm1, %v5144_v44  ;;  %4207 = vmatmul.mubr.msk.f32.gmra.mxu1 %vm56_vm1, %v5144_v44 }
 0x232   :  { %4211 = vmatprep.mubr.msk.f32.mxu0 %vm56_vm1, %v5016_v15  ;;  %4256 = vmatprep.mubr.msk.f32.mxu1 %vm4910_vm2, %v4909_v0 }
 0x235   :  { %4212 = vmatmul.mubr.msk.f32.vlgmr.msra.gmra.mxu0 %vm56_vm1, %v5027_v17  ;;  %v573_v17 = vadd.f32 %v5206_v63, %v572_v56 }
 0x236   :  { %4214 = vmatprep.mubr.msk.f32.mxu0 %vm56_vm1, %v5032_v18 }
 0x239   :  { %4215 = vmatmul.mubr.msk.f32.gmra.mxu0 %vm56_vm1, %v5046_v19 }
 0x23a   :  { %4217 = vmatprep.mubr.msk.f32.mxu0 %vm56_vm1, %v5053_v20 }
 0x23d   :  { %4218 = vmatmul.mubr.msk.f32.gmra.mxu0 %vm56_vm1, %v5065_v21  ;;  %v568_v21 = vadd.f32 %v4187_v50, %v5206_v63 }
 0x23e   :  { %4220 = vmatprep.mubr.msk.f32.mxu0 %vm56_vm1, %v5072_v22 }
 0x241   :  { %4221 = vmatmul.mubr.msk.f32.gmra.mxu0 %vm56_vm1, %v245_v23 }
 0x242   :  { %4223 = vmatprep.mubr.msk.f32.mxu0 %vm56_vm1, %v5101_v36 }
 0x245   :  { %4224 = vmatmul.mubr.msk.f32.gmra.mxu0 %vm56_vm1, %v3545_v35  ;;  %v5269_v35 = vld [vmem:[%s6554_s12] ss:$0 sm:$0xff] }
 0x246   :  { %4226 = vmatprep.mubr.msk.f32.mxu0 %vm56_vm1, %v3546_v37 }
 0x249   :  { %4227 = vmatmul.mubr.msk.f32.gmra.mxu0 %vm56_vm1, %v3547_v38  ;;  %v5274_v38 = vld [vmem:[%s6555_s10] ss:$0 sm:$0xff] }
 0x24a   :  { %4229 = vmatprep.mubr.msk.f32.mxu0 %vm56_vm1, %v3548_v39 }
 0x24d   :  { %4230 = vmatmul.mubr.msk.f32.gmra.mxu0 %vm56_vm1, %v3549_v40  ;;  %v387_v40 = vadd.f32 %v5274_v38, %v5183_v47  ;;  %v392_v47 = vadd.f32 %v5181_v45, %v5274_v38  ;;  %v397_v45 = vadd.f32 %v5274_v38, %v5189_v51  ;;  %v402_v51 = vadd.f32 %v5187_v49, %v5274_v38 }
 0x24e   :  { %4232 = vmatprep.mubr.msk.f32.mxu0 %vm56_vm1, %v3550_v41  ;;  %v407_v49 = vadd.f32 %v5274_v38, %v5193_v55  ;;  %v412_v55 = vadd.f32 %v5191_v53, %v5274_v38  ;;  %v417_v53 = vadd.f32 %v5274_v38, %v5197_v59  ;;  %v422_v59 = vadd.f32 %v5195_v57, %v5274_v38 }
 0x251   :  { %4233 = vmatmul.mubr.msk.f32.gmra.mxu0 %vm56_vm1, %v3551_v42 }
 0x252   :  { %4235 = vmatprep.mubr.msk.f32.mxu0 %vm56_vm1, %v3552_v43 }
 0x255   :  { %4236 = vmatmul.mubr.msk.f32.gmra.mxu0 %vm56_vm1, %v5144_v44 }
 0x256   :  { %4301 = vmatprep.mubr.msk.f32.mxu0 %vm4910_vm2, %v4909_v0 }
 0x2e1   :  { %v5199_v61 = vpop.f32.mrf.mxu0  ;;  %v5201_v62 = vpop.f32.mrf.mxu1 }
 0x2e2   :  { %v598_v57 = vadd.f32 %v5201_v62, %v5206_v63 }
 0x2e3   :  { %v5208_v1 = vpop.f32.mrf.mxu0  ;;  %v592_v2 = vpop.f32.mrf.mxu1 }
 0x2e4   :  { %v593_v3 = vadd.f32 %v5206_v63, %v592_v2 }
 0x2e5   :  { %v5211_v4 = vpop.f32.mrf.mxu0  ;;  %v5225_v10 = vpop.f32.mrf.mxu1 }
 0x2e6   :  { %4239 = vmatpush3.xpose.msk.msra.mxu1 %vm56_vm1, %v593_v3  ;;  %v442_v62 = vadd.f32 %v5211_v4, %v5274_v38 }
 0x2e7   :  { %v5214_v5 = vpop.f32.mrf.mxu0  ;;  %4240 = vmatprep.subr.mxu1 %v4909_v0  ;;  %v5234_v14 = vpop.f32.mrf.mxu1 }
 0x2e9   :  { %v5218_v7 = vpop.f32.mrf.mxu0  ;;  %v5243_v18 = vpop.f32.mrf.mxu1 }
 0x2ea   :  { %4241 = vmatpush3.xpose.msk.msra.mxu1 %vm56_vm1, %v588_v6  ;;  %v618_v6 = vadd.f32 %v5243_v18, %v5206_v63  ;;  %v608_v18 = vadd.f32 %v5225_v10, %v5206_v63  ;;  %v427_v10 = vadd.f32 %v5274_v38, %v5208_v1 }
 0x2eb   :  { %v5221_v8 = vpop.f32.mrf.mxu0  ;;  %4242 = vmatprep.subr.mxu1 %v4909_v0  ;;  %v5252_v22 = vpop.f32.mrf.mxu1 }
 0x2ed   :  { %v5227_v11 = vpop.f32.mrf.mxu0  ;;  %v4205_v26 = vpop.f32.mrf.mxu1 }
 0x2ee   :  { %4243 = vmatpush3.xpose.msk.msra.mxu1 %vm56_vm1, %v583_v9  ;;  %v628_v56 = vadd.f32 %v4205_v26, %v5206_v63  ;;  %v462_v4 = vadd.f32 %v5227_v11, %v5274_v38 }
 0x2ef   :  { %v5230_v12 = vpop.f32.mrf.mxu0  ;;  %4244 = vmatprep.subr.mxu1 %v4909_v0  ;;  %v622_v30 = vpop.f32.mrf.mxu1 }
 0x2f0   :  { %v623_v60 = vadd.f32 %v5206_v63, %v622_v30  ;;  %v457_v1 = vadd.f32 %v5274_v38, %v5230_v12 }
 0x2f1   :  { %v5236_v15 = vpop.f32.mrf.mxu0  ;;  %v4208_v34 = vpop.f32.mrf.mxu1 }
 0x2f2   :  { %4245 = vmatpush3.xpose.msk.msra.mxu1 %vm56_vm1, %v578_v13  ;;  %v638_v42 = vadd.f32 %v4208_v34, %v5206_v63  ;;  %v613_v13 = vadd.f32 %v5206_v63, %v5252_v22 }
 0x2f3   :  { %v5239_v16 = vpop.f32.mrf.mxu0  ;;  %4246 = vmatprep.subr.mxu1 %v4909_v0  ;;  %v632_v46 = vpop.f32.mrf.mxu1 }
 0x2f4   :  { %v633_v50 = vadd.f32 %v5206_v63, %v632_v46 }
 0x2f5   :  { %v5245_v19 = vpop.f32.mrf.mxu0 }
 0x2f6   :  { %4247 = vmatpush3.xpose.msk.msra.mxu1 %vm56_vm1, %v573_v17  ;;  %v724_v9 = vadd.f32 %v5245_v19, %v5269_v35  ;;  %v603_v19 = vadd.f32 %v5206_v63, %v5234_v14  ;;  %v432_v14 = vadd.f32 %v5199_v61, %v5274_v38  ;;  %v447_v63 = vadd.f32 %v5274_v38, %v5221_v8 }
 0x2f7   :  { %v5248_v20 = vpop.f32.mrf.mxu0  ;;  %4248 = vmatprep.subr.mxu1 %v4909_v0  ;;  %v452_v61 = vadd.f32 %v5218_v7, %v5274_v38  ;;  %v472_v7 = vadd.f32 %v5236_v15, %v5274_v38 }
 0x2f8   :  { %v719_v17 = vadd.f32 %v5269_v35, %v5248_v20  ;;  %v437_v20 = vadd.f32 %v5274_v38, %v5214_v5  ;;  %v467_v5 = vadd.f32 %v5274_v38, %v5239_v16 }
 0x2f9   :  { %v4216_v23 = vpop.f32.mrf.mxu0 }
 0x2fa   :  { %4249 = vmatpush3.xpose.msk.msra.mxu1 %vm56_vm1, %v568_v21  ;;  %v734_v2 = vadd.f32 %v4216_v23, %v5269_v35 }
 0x2fb   :  { %v5255_v24 = vpop.f32.mrf.mxu0  ;;  %4250 = vmatprep.subr.mxu1 %v4909_v0 }
 0x2fc   :  { %v729_v3 = vadd.f32 %v5269_v35, %v5255_v24 }
 0x2fd   :  { %v4219_v27 = vpop.f32.mrf.mxu0 }
 0x2fe   :  { %4251 = vmatpush3.xpose.msk.msra.mxu1 %vm56_vm1, %v563_v25  ;;  %v744_v54 = vadd.f32 %v4219_v27, %v5269_v35 }
 0x2ff   :  { %v738_v28 = vpop.f32.mrf.mxu0  ;;  %4252 = vmatprep.subr.mxu1 %v4909_v0 }
 0x300   :  { %v739_v58 = vadd.f32 %v5269_v35, %v738_v28 }
 0x301   :  { %v4222_v31 = vpop.f32.mrf.mxu0 }
 0x302   :  { %4253 = vmatpush3.xpose.msk.msra.mxu1 %vm56_vm1, %v558_v29  ;;  %v754_v48 = vadd.f32 %v4222_v31, %v5269_v35 }
 0x303   :  { %v748_v32 = vpop.f32.mrf.mxu0  ;;  %4254 = vmatprep.subr.mxu1 %v4909_v0 }
 0x304   :  { %v749_v52 = vadd.f32 %v5269_v35, %v748_v32 }
 0x305   :  { %v4225_v37 = vpop.f32.mrf.mxu0 }
 0x306   :  { %v5277_v39 = vadd.f32 %v4225_v37, %v5269_v35  ;;  %4255 = vmatpush3.xpose.msk.msra.mxu1 %vm56_vm1, %v553_v33 }
 0x307   :  { %v758_v41 = vpop.f32.mrf.mxu0  ;;  %4328 = vmatprep.subr.mxu1 %v4909_v0 }
 0x308   :  { %v759_v43 = vadd.f32 %v5269_v35, %v758_v41 }
 0x309   :  { %4257 = vmatmul.mubr.msk.f32.vlgmr.msra.gmra.mxu1 %vm56_vm1, %v387_v40 }
 0x30a   :  { %4329 = vmatpush3.xpose.msk.msra.mxu1 %vm56_vm1, %v638_v42  ;;  %4259 = vmatprep.mubr.msk.f32.mxu1 %vm4910_vm2, %v4909_v0 }
 0x30b   :  { %4330 = vmatprep.subr.mxu1 %v4909_v0  ;;  %4284 = vmatpush3.msra.mxu0 %v759_v43 }
 0x30c   :  { %4285 = vmatprep.subr.mxu0 %v4909_v0 }
 0x30d   :  { %4260 = vmatmul.mubr.msk.f32.gmra.mxu1 %vm56_vm1, %v392_v47  ;;  %4286 = vmatpush3.msra.mxu0 %v754_v48 }
 0x30e   :  { %4331 = vmatpush3.xpose.msk.msra.mxu1 %vm56_vm1, %v633_v50  ;;  %4262 = vmatprep.mubr.msk.f32.mxu1 %vm4910_vm2, %v4909_v0 }
 0x30f   :  { %4332 = vmatprep.subr.mxu1 %v4909_v0  ;;  %4287 = vmatprep.subr.mxu0 %v4909_v0 }
 0x310   :  { %4288 = vmatpush3.msra.mxu0 %v749_v52 }
 0x311   :  { %4263 = vmatmul.mubr.msk.f32.gmra.mxu1 %vm56_vm1, %v397_v45  ;;  %4289 = vmatprep.subr.mxu0 %v4909_v0 }
 0x312   :  { %4333 = vmatpush3.xpose.msk.msra.mxu1 %vm56_vm1, %v628_v56  ;;  %4265 = vmatprep.mubr.msk.f32.mxu1 %vm4910_vm2, %v4909_v0 }
 0x313   :  { %4334 = vmatprep.subr.mxu1 %v4909_v0  ;;  %4290 = vmatpush3.msra.mxu0 %v744_v54 }
 0x314   :  { %4291 = vmatprep.subr.mxu0 %v4909_v0 }
 0x315   :  { %4266 = vmatmul.mubr.msk.f32.gmra.mxu1 %vm56_vm1, %v402_v51  ;;  %4292 = vmatpush3.msra.mxu0 %v739_v58 }
 0x316   :  { %4335 = vmatpush3.xpose.msk.msra.mxu1 %vm56_vm1, %v623_v60  ;;  %4268 = vmatprep.mubr.msk.f32.mxu1 %vm4910_vm2, %v4909_v0 }
 0x317   :  { %4336 = vmatprep.subr.mxu1 %v4909_v0  ;;  %4293 = vmatprep.subr.mxu0 %v4909_v0 }
 0x318   :  { %4294 = vmatpush3.msra.mxu0 %v734_v2 }
 0x319   :  { %4269 = vmatmul.mubr.msk.f32.gmra.mxu1 %vm56_vm1, %v407_v49  ;;  %4295 = vmatprep.subr.mxu0 %v4909_v0 }
 0x31a   :  { %4337 = vmatpush3.xpose.msk.msra.mxu1 %vm56_vm1, %v618_v6  ;;  %4271 = vmatprep.mubr.msk.f32.mxu1 %vm4910_vm2, %v4909_v0 }
 0x31b   :  { %4338 = vmatprep.subr.mxu1 %v4909_v0  ;;  %4296 = vmatpush3.msra.mxu0 %v729_v3 }
 0x31c   :  { %4297 = vmatprep.subr.mxu0 %v4909_v0 }
 0x31d   :  { %4272 = vmatmul.mubr.msk.f32.gmra.mxu1 %vm56_vm1, %v412_v55  ;;  %4298 = vmatpush3.msra.mxu0 %v724_v9 }
 0x31e   :  { %4339 = vmatpush3.xpose.msk.msra.mxu1 %vm56_vm1, %v613_v13  ;;  %4274 = vmatprep.mubr.msk.f32.mxu1 %vm4910_vm2, %v4909_v0 }
 0x31f   :  { %4340 = vmatprep.subr.mxu1 %v4909_v0  ;;  %4299 = vmatprep.subr.mxu0 %v4909_v0 }
 0x320   :  { %4300 = vmatpush3.msra.mxu0 %v719_v17 }
 0x321   :  { %4275 = vmatmul.mubr.msk.f32.gmra.mxu1 %vm56_vm1, %v417_v53  ;;  %4373 = vmatprep.subr.mxu0 %v4909_v0 }
 0x322   :  { %4341 = vmatpush3.xpose.msk.msra.mxu1 %vm56_vm1, %v608_v18  ;;  %4277 = vmatprep.mubr.msk.f32.mxu1 %vm4910_vm2, %v4909_v0 }
 0x323   :  { %4342 = vmatprep.subr.mxu1 %v4909_v0 }
 0x325   :  { %4278 = vmatmul.mubr.msk.f32.gmra.mxu1 %vm56_vm1, %v422_v59 }
 0x326   :  { %4343 = vmatpush3.xpose.msk.msra.mxu1 %vm56_vm1, %v603_v19  ;;  %4280 = vmatprep.mubr.msk.f32.mxu1 %vm4910_vm2, %v4909_v0 }
 0x327   :  { %4344 = vmatprep.subr.mxu1 %v4909_v0 }
 0x329   :  { %4281 = vmatmul.mubr.msk.f32.gmra.mxu1 %vm56_vm1, %v427_v10 }
 0x32a   :  { %4345 = vmatpush3.xpose.msk.msra.mxu1 %vm56_vm1, %v598_v57  ;;  %4346 = vmatprep.mubr.msk.f32.mxu1 %vm4910_vm2, %v4909_v0 }
 0x32d   :  { %4347 = vmatmul.mubr.msk.f32.vlgmr.msra.gmra.mxu1 %vm56_vm1, %v432_v14 }
 0x32e   :  { %4349 = vmatprep.mubr.msk.f32.mxu1 %vm4910_vm2, %v4909_v0 }
 0x331   :  { %4350 = vmatmul.mubr.msk.f32.gmra.mxu1 %vm56_vm1, %v437_v20 }
 0x332   :  { %4352 = vmatprep.mubr.msk.f32.mxu1 %vm4910_vm2, %v4909_v0 }
 0x335   :  { %4353 = vmatmul.mubr.msk.f32.gmra.mxu1 %vm56_vm1, %v442_v62 }
 0x336   :  { %4355 = vmatprep.mubr.msk.f32.mxu1 %vm4910_vm2, %v4909_v0 }
 0x339   :  { %4356 = vmatmul.mubr.msk.f32.gmra.mxu1 %vm56_vm1, %v447_v63 }
 0x33a   :  { %4358 = vmatprep.mubr.msk.f32.mxu1 %vm4910_vm2, %v4909_v0 }
 0x33d   :  { %4359 = vmatmul.mubr.msk.f32.gmra.mxu1 %vm56_vm1, %v452_v61 }
 0x33e   :  { %4361 = vmatprep.mubr.msk.f32.mxu1 %vm4910_vm2, %v4909_v0 }
 0x341   :  { %4362 = vmatmul.mubr.msk.f32.gmra.mxu1 %vm56_vm1, %v457_v1 }
 0x342   :  { %4364 = vmatprep.mubr.msk.f32.mxu1 %vm4910_vm2, %v4909_v0 }
 0x345   :  { %4365 = vmatmul.mubr.msk.f32.gmra.mxu1 %vm56_vm1, %v462_v4 }
 0x346   :  { %4367 = vmatprep.mubr.msk.f32.mxu1 %vm4910_vm2, %v4909_v0 }
 0x349   :  { %4368 = vmatmul.mubr.msk.f32.gmra.mxu1 %vm56_vm1, %v467_v5 }
 0x34a   :  { %4370 = vmatprep.mubr.msk.f32.mxu1 %vm4910_vm2, %v4909_v0 }
 0x34d   :  { %4371 = vmatmul.mubr.msk.f32.gmra.mxu1 %vm56_vm1, %v472_v7 }
 0x3c9   :  { %v927_v8 = vpop.f32.mrf.mxu1 }
 0x3ca   :  { %v5421_v11 = vmul.f32 0.5, %v927_v8 }
 0x3cb   :  { %v4258_v12 = vpop.f32.mrf.mxu1 }
 0x3cc   :  { %v981_v21 = vsel %vm980_vm4, %v5421_v11, -inf }
 0x3cd   :  { %982 = vmax.xlane.f32.xlu1 %v981_v21  ;;  %v932_v16 = vpop.f32.mrf.mxu1 }
 0x3ce   :  { %v5425_v22 = vmul.f32 0.5, %v932_v16 }
 0x3cf   :  { %v4261_v23 = vpop.f32.mrf.mxu1 }
 0x3d0   :  { %v984_v24 = vsel %vm980_vm4, %v5425_v22, -inf }
 0x3d1   :  { %985 = vmax.xlane.f32.xlu1 %v984_v24  ;;  %v937_v15 = vpop.f32.mrf.mxu1 }
 0x3d2   :  { %v5429_v25 = vmul.f32 0.5, %v937_v15 }
 0x3d3   :  { %v4264_v26 = vpop.f32.mrf.mxu1 }
 0x3d4   :  { %v987_v27 = vsel %vm980_vm4, %v5429_v25, -inf }
 0x3d5   :  { %988 = vmax.xlane.f32.xlu0 %v987_v27  ;;  %v942_v28 = vpop.f32.mrf.mxu1 }
 0x3d6   :  { %v5433_v29 = vmul.f32 0.5, %v942_v28 }
 0x3d7   :  { %v4267_v30 = vpop.f32.mrf.mxu1 }
 0x3d8   :  { %v990_v31 = vsel %vm980_vm4, %v5433_v29, -inf }
 0x3d9   :  { %991 = vmax.xlane.f32.xlu1 %v990_v31  ;;  %v947_v32 = vpop.f32.mrf.mxu1 }
 0x3da   :  { %v5437_v33 = vmul.f32 0.5, %v947_v32 }
 0x3db   :  { %v4270_v34 = vpop.f32.mrf.mxu1 }
 0x3dc   :  { %v993_v37 = vsel %vm980_vm4, %v5437_v33, -inf }
 0x3dd   :  { %994 = vmax.xlane.f32.xlu1 %v993_v37  ;;  %v952_v38 = vpop.f32.mrf.mxu1 }
 0x3de   :  { %v5441_v40 = vmul.f32 0.5, %v952_v38 }
 0x3df   :  { %v4273_v41 = vpop.f32.mrf.mxu1 }
 0x3e0   :  { %v996_v42 = vsel %vm980_vm4, %v5441_v40, -inf }
 0x3e1   :  { %997 = vmax.xlane.f32.xlu1 %v996_v42  ;;  %v957_v43 = vpop.f32.mrf.mxu1 }
 0x3e2   :  { %v5445_v46 = vmul.f32 0.5, %v957_v43 }
 0x3e3   :  { %v4276_v48 = vpop.f32.mrf.mxu1 }
 0x3e4   :  { %v999_v47 = vsel %vm980_vm4, %v5445_v46, -inf }
 0x3e5   :  { %1000 = vmax.xlane.f32.xlu1 %v999_v47  ;;  %v962_v50 = vpop.f32.mrf.mxu1 }
 0x3e6   :  { %v5449_v52 = vmul.f32 0.5, %v962_v50 }
 0x3e7   :  { %v4279_v45 = vpop.f32.mrf.mxu1 }
 0x3e8   :  { %v1002_v54 = vsel %vm980_vm4, %v5449_v52, -inf }
 0x3e9   :  { %1003 = vmax.xlane.f32.xlu1 %v1002_v54  ;;  %v967_v56 = vpop.f32.mrf.mxu1 }
 0x3ea   :  { %v5453_v58 = vmul.f32 0.5, %v967_v56 }
 0x3eb   :  { %v4282_v51 = vpop.f32.mrf.mxu1 }
 0x3ec   :  { %v1005_v60 = vsel %vm980_vm4, %v5453_v58, -inf }
 0x3ed   :  { %1006 = vmax.xlane.f32.xlu1 %v1005_v60  ;;  %v1337_v2 = vpop.f32.mrf.mxu1 }
 0x3ee   :  { %v5457_v49 = vmul.f32 0.5, %v1337_v2 }
 0x3ef   :  { %v4348_v3 = vpop.f32.mrf.mxu1 }
 0x3f0   :  { %v1390_v6 = vsel %vm980_vm4, %v5457_v49, -inf }
 0x3f1   :  { %1391 = vmax.xlane.f32.xlu1 %v1390_v6  ;;  %v1342_v9 = vpop.f32.mrf.mxu1 }
 0x3f2   :  { %v5461_v55 = vmul.f32 0.5, %v1342_v9 }
 0x3f3   :  { %v4351_v13 = vpop.f32.mrf.mxu1 }
 0x3f4   :  { %v1393_v17 = vsel %vm980_vm4, %v5461_v55, -inf }
 0x3f5   :  { %1394 = vmax.xlane.f32.xlu1 %v1393_v17  ;;  %v1347_v53 = vpop.f32.mrf.mxu1 }
 0x3f6   :  { %v5465_v18 = vmul.f32 0.5, %v1347_v53 }
 0x3f7   :  { %v4354_v59 = vpop.f32.mrf.mxu1 }
 0x3f8   :  { %v1396_v19 = vsel %vm980_vm4, %v5465_v18, -inf }
 0x3f9   :  { %1397 = vmax.xlane.f32.xlu0 %v1396_v19  ;;  %v1352_v10 = vpop.f32.mrf.mxu1 }
 0x3fa   :  { %v5469_v57 = vmul.f32 0.5, %v1352_v10 }
 0x3fb   :  { %v4357_v14 = vpop.f32.mrf.mxu1 }
 0x3fc   :  { %v1399_v20 = vsel %vm980_vm4, %v5469_v57, -inf }
 0x3fd   :  { %1400 = vmax.xlane.f32.xlu1 %v1399_v20  ;;  %v1357_v62 = vpop.f32.mrf.mxu1 }
 0x3fe   :  { %v5473_v63 = vmul.f32 0.5, %v1357_v62 }
 0x3ff   :  { %v4360_v61 = vpop.f32.mrf.mxu1 }
 0x400   :  { %v1402_v1 = vsel %vm980_vm4, %v5473_v63, -inf }
 0x401   :  { %1403 = vmax.xlane.f32.xlu0 %v1402_v1  ;;  %v1362_v4 = vpop.f32.mrf.mxu1 }
 0x402   :  { %v5477_v5 = vmul.f32 0.5, %v1362_v4 }
 0x403   :  { %v4363_v7 = vpop.f32.mrf.mxu1 }
 0x404   :  { %v1405_v8 = vsel %vm980_vm4, %v5477_v5, -inf }
 0x405   :  { %1406 = vmax.xlane.f32.xlu1 %v1405_v8  ;;  %v1367_v12 = vpop.f32.mrf.mxu1 }
 0x406   :  { %v5481_v21 = vmul.f32 0.5, %v1367_v12 }
 0x407   :  { %v4366_v16 = vpop.f32.mrf.mxu1 }
 0x408   :  { %v1408_v23 = vsel %vm980_vm4, %v5481_v21, -inf }
 0x409   :  { %1409 = vmax.xlane.f32.xlu0 %v1408_v23  ;;  %v1372_v24 = vpop.f32.mrf.mxu1 }
 0x40a   :  { %v5485_v15 = vmul.f32 0.5, %v1372_v24 }
 0x40b   :  { %v4369_v26 = vpop.f32.mrf.mxu1 }
 0x40c   :  { %v1411_v27 = vsel %vm980_vm4, %v5485_v15, -inf }
 0x40d   :  { %1412 = vmax.xlane.f32.xlu1 %v1411_v27  ;;  %v1377_v28 = vpop.f32.mrf.mxu1 }
 0x40e   :  { %v5489_v30 = vmul.f32 0.5, %v1377_v28 }
 0x40f   :  { %v4372_v31 = vpop.f32.mrf.mxu1 }
 0x410   :  { %v1414_v32 = vsel %vm980_vm4, %v5489_v30, -inf }
 0x411   :  { %1415 = vmax.xlane.f32.xlu0 %v1414_v32 }
 0x456   :  { %v983_v34 = vpop.xlane.xlu1 %982 }
 0x457   :  { %v1008_v37 = vsub.f32 %v5421_v11, %v983_v34 }
 0x459   :  { %v1017_v38 = vmul.f32 1.442695, %v1008_v37 }
 0x45a   :  { %v986_v41 = vpop.xlane.xlu1 %985 }
 0x45b   :  { %4749 = vpow2.f32 %v1017_v38  ;;  %v1009_v42 = vsub.f32 %v5425_v22, %v986_v41 }
 0x45d   :  { %v1019_v43 = vmul.f32 1.442695, %v1009_v42 }
 0x45e   :  { %v989_v48 = vpop.xlane.xlu0 %988 }
 0x45f   :  { %4751 = vpow2.f32 %v1019_v43  ;;  %v1010_v47 = vsub.f32 %v5429_v25, %v989_v48 }
 0x461   :  { %v1021_v50 = vmul.f32 1.442695, %v1010_v47 }
 0x462   :  { %v992_v45 = vpop.xlane.xlu1 %991 }
 0x463   :  { %4753 = vpow2.f32 %v1021_v50  ;;  %v1011_v54 = vsub.f32 %v5433_v29, %v992_v45 }
 0x465   :  { %v1023_v56 = vmul.f32 1.442695, %v1011_v54 }
 0x466   :  { %v995_v51 = vpop.xlane.xlu1 %994 }
 0x467   :  { %4755 = vpow2.f32 %v1023_v56  ;;  %v1012_v11 = vsub.f32 %v5437_v33, %v995_v51 }
 0x468   :  { %v5498_v60 = vpop.eup %4749 }
 0x469   :  { %v1025_v2 = vmul.f32 1.442695, %v1012_v11  ;;  %v1035_v22 = vsel %vm980_vm4, %v5498_v60, 0.0 }
 0x46a   :  { %v998_v3 = vpop.xlane.xlu1 %997  ;;  %1036 = vadd.xlane.f32.xlu1 %v1035_v22 }
 0x46b   :  { %4757 = vpow2.f32 %v1025_v2  ;;  %v1013_v25 = vsub.f32 %v5441_v40, %v998_v3 }
 0x46c   :  { %v5503_v6 = vpop.eup %4751 }
 0x46d   :  { %v1027_v9 = vmul.f32 1.442695, %v1013_v25  ;;  %v1038_v29 = vsel %vm980_vm4, %v5503_v6, 0.0 }
 0x46e   :  { %v1001_v13 = vpop.xlane.xlu1 %1000  ;;  %1039 = vadd.xlane.f32.xlu0 %v1038_v29 }
 0x46f   :  { %4759 = vpow2.f32 %v1027_v9  ;;  %v1014_v33 = vsub.f32 %v5445_v46, %v1001_v13 }
 0x470   :  { %v5508_v17 = vpop.eup %4753 }
 0x471   :  { %v1029_v53 = vmul.f32 1.442695, %v1014_v33  ;;  %v1041_v59 = vsel %vm980_vm4, %v5508_v17, 0.0 }
 0x472   :  { %v1004_v19 = vpop.xlane.xlu1 %1003  ;;  %1042 = vadd.xlane.f32.xlu1 %v1041_v59 }
 0x473   :  { %4761 = vpow2.f32 %v1029_v53  ;;  %v1015_v40 = vsub.f32 %v5449_v52, %v1004_v19 }
 0x474   :  { %v5513_v10 = vpop.eup %4755 }
 0x475   :  { %v1031_v14 = vmul.f32 1.442695, %v1015_v40  ;;  %v1044_v20 = vsel %vm980_vm4, %v5513_v10, 0.0 }
 0x476   :  { %v1007_v62 = vpop.xlane.xlu1 %1006  ;;  %1045 = vadd.xlane.f32.xlu0 %v1044_v20 }
 0x477   :  { %4763 = vpow2.f32 %v1031_v14  ;;  %v1016_v46 = vsub.f32 %v5453_v58, %v1007_v62 }
 0x478   :  { %v5518_v61 = vpop.eup %4757 }
 0x479   :  { %v1033_v1 = vmul.f32 1.442695, %v1016_v46  ;;  %v1047_v4 = vsel %vm980_vm4, %v5518_v61, 0.0 }
 0x47a   :  { %v1392_v7 = vpop.xlane.xlu1 %1391  ;;  %1048 = vadd.xlane.f32.xlu1 %v1047_v4  ;;  %v1626_v4 = vld [vmem:[%s6556_s9] sm:$0xf] }
 0x47b   :  { %4765 = vpow2.f32 %v1033_v1  ;;  %v1417_v52 = vsub.f32 %v5457_v49, %v1392_v7  ;;  %4418 = vmatprep.subr.msk.mxu1 %vm60_vm0, %v1626_v4  ;;  %v4228_v7 = vpop.f32.mrf.mxu0 }
 0x47c   :  { %v5523_v8 = vpop.eup %4759  ;;  %4419 = vmatpush3.msk.msra.mxu1 %vm60_vm0, %v1626_v4 }
 0x47d   :  { %v1426_v12 = vmul.f32 1.442695, %v1417_v52  ;;  %v1050_v16 = vsel %vm980_vm4, %v5523_v8, 0.0  ;;  %v768_v52 = vpop.f32.mrf.mxu0 }
 0x47e   :  { %v1395_v23 = vpop.xlane.xlu1 %1394  ;;  %1051 = vadd.xlane.f32.xlu0 %v1050_v16 }
 0x47f   :  { %4767 = vpow2.f32 %v1426_v12  ;;  %v1418_v58 = vsub.f32 %v5461_v55, %v1395_v23  ;;  %v4231_v12 = vpop.f32.mrf.mxu0 }
 0x480   :  { %v5528_v24 = vpop.eup %4761 }
 0x481   :  { %v1428_v26 = vmul.f32 1.442695, %v1418_v58  ;;  %v1053_v27 = vsel %vm980_vm4, %v5528_v24, 0.0  ;;  %v778_v16 = vpop.f32.mrf.mxu0 }
 0x482   :  { %v1398_v28 = vpop.xlane.xlu0 %1397  ;;  %1054 = vadd.xlane.f32.xlu1 %v1053_v27 }
 0x483   :  { %4769 = vpow2.f32 %v1428_v26  ;;  %v1419_v49 = vsub.f32 %v5465_v18, %v1398_v28  ;;  %v4234_v58 = vpop.f32.mrf.mxu0 }
 0x484   :  { %v5533_v31 = vpop.eup %4763 }
 0x485   :  { %v1430_v32 = vmul.f32 1.442695, %v1419_v49  ;;  %v1056_v34 = vsel %vm980_vm4, %v5533_v31, 0.0  ;;  %v788_v27 = vpop.f32.mrf.mxu0 }
 0x486   :  { %v1401_v37 = vpop.xlane.xlu1 %1400  ;;  %1057 = vadd.xlane.f32.xlu0 %v1056_v34 }
 0x487   :  { %4771 = vpow2.f32 %v1430_v32  ;;  %v1420_v55 = vsub.f32 %v5469_v57, %v1401_v37  ;;  %v4237_v49 = vpop.f32.mrf.mxu0 }
 0x488   :  { %v5538_v38 = vpop.eup %4765 }
 0x489   :  { %v1432_v41 = vmul.f32 1.442695, %v1420_v55  ;;  %v1059_v42 = vsel %vm980_vm4, %v5538_v38, 0.0  ;;  %v798_v37 = vpop.f32.mrf.mxu0 }
 0x48a   :  { %v1404_v43 = vpop.xlane.xlu0 %1403  ;;  %1060 = vadd.xlane.f32.xlu1 %v1059_v42 }
 0x48b   :  { %4773 = vpow2.f32 %v1432_v41  ;;  %v1421_v18 = vsub.f32 %v5473_v63, %v1404_v43  ;;  %v804_v41 = vadd.f32 %v4237_v49, %v5269_v35 }
 0x48c   :  { %v5543_v48 = vpop.eup %4767 }
 0x48d   :  { %v1434_v47 = vmul.f32 1.442695, %v1421_v18  ;;  %v1444_v50 = vsel %vm980_vm4, %v5543_v48, 0.0  ;;  %v794_v18 = vadd.f32 %v4234_v58, %v5269_v35 }
 0x48e   :  { %v1407_v45 = vpop.xlane.xlu1 %1406  ;;  %1445 = vadd.xlane.f32.xlu0 %v1444_v50 }
 0x48f   :  { %4775 = vpow2.f32 %v1434_v47  ;;  %v1422_v57 = vsub.f32 %v5477_v5, %v1407_v45  ;;  %v799_v47 = vadd.f32 %v5269_v35, %v798_v37 }
 0x490   :  { %v5548_v54 = vpop.eup %4769 }
 0x491   :  { %v1436_v56 = vmul.f32 1.442695, %v1422_v57  ;;  %v1447_v51 = vsel %vm980_vm4, %v5548_v54, 0.0 }
 0x492   :  { %v1410_v11 = vpop.xlane.xlu0 %1409  ;;  %1448 = vadd.xlane.f32.xlu1 %v1447_v51  ;;  %v779_v51 = vadd.f32 %v5269_v35, %v778_v16 }
 0x493   :  { %4777 = vpow2.f32 %v1436_v56  ;;  %v1423_v63 = vsub.f32 %v5481_v21, %v1410_v11  ;;  %v784_v56 = vadd.f32 %v4231_v12, %v5269_v35 }
 0x494   :  { %v5553_v2 = vpop.eup %4771 }
 0x495   :  { %v1438_v22 = vmul.f32 1.442695, %v1423_v63  ;;  %v1450_v3 = vsel %vm980_vm4, %v5553_v2, 0.0 }
 0x496   :  { %v1413_v25 = vpop.xlane.xlu1 %1412  ;;  %1451 = vadd.xlane.f32.xlu0 %v1450_v3 }
 0x497   :  { %4779 = vpow2.f32 %v1438_v22  ;;  %v1424_v5 = vsub.f32 %v5485_v15, %v1413_v25 }
 0x498   :  { %v5558_v9 = vpop.eup %4773 }
 0x499   :  { %v1440_v29 = vmul.f32 1.442695, %v1424_v5  ;;  %v1453_v13 = vsel %vm980_vm4, %v5558_v9, 0.0  ;;  %v769_v5 = vadd.f32 %v5269_v35, %v768_v52 }
 0x49a   :  { %1454 = vadd.xlane.f32.xlu1 %v1453_v13  ;;  %v1416_v33 = vpop.xlane.xlu0 %1415 }
 0x49b   :  { %4781 = vpow2.f32 %v1440_v29  ;;  %v1425_v21 = vsub.f32 %v5489_v30, %v1416_v33 }
 0x49c   :  { %v5563_v53 = vpop.eup %4775 }
 0x49d   :  { %v1442_v59 = vmul.f32 1.442695, %v1425_v21  ;;  %v1456_v19 = vsel %vm980_vm4, %v5563_v53, 0.0 }
 0x49e   :  { %1457 = vadd.xlane.f32.xlu0 %v1456_v19 }
 0x49f   :  { %4783 = vpow2.f32 %v1442_v59 }
 0x4a0   :  { %v5567_v15 = vpop.eup %4777 }
 0x4a1   :  { %v1459_v40 = vsel %vm980_vm4, %v5567_v15, 0.0 }
 0x4a2   :  { %1460 = vadd.xlane.f32.xlu1 %v1459_v40 }
 0x4a4   :  { %v5571_v14 = vpop.eup %4779 }
 0x4a5   :  { %v1462_v20 = vsel %vm980_vm4, %v5571_v14, 0.0 }
 0x4a6   :  { %1463 = vadd.xlane.f32.xlu0 %v1462_v20 }
 0x4a8   :  { %v5575_v30 = vpop.eup %4781 }
 0x4a9   :  { %v1465_v62 = vsel %vm980_vm4, %v5575_v30, 0.0 }
 0x4aa   :  { %1466 = vadd.xlane.f32.xlu1 %v1465_v62 }
 0x4ac   :  { %v5579_v46 = vpop.eup %4783 }
 0x4ad   :  { %v1468_v1 = vsel %vm980_vm4, %v5579_v46, 0.0 }
 0x4ae   :  { %1469 = vadd.xlane.f32.xlu0 %v1468_v1 }
 0x4f3   :  { %v1037_v23 = vpop.xlane.xlu1 %1036 }
 0x4f4   :  { %4785 = vrcp.f32 %v1037_v23 }
 0x4f7   :  { %v1040_v26 = vpop.xlane.xlu0 %1039 }
 0x4f8   :  { %4787 = vrcp.f32 %v1040_v26 }
 0x4fb   :  { %v1043_v28 = vpop.xlane.xlu1 %1042 }
 0x4fc   :  { %4789 = vrcp.f32 %v1043_v28 }
 0x4ff   :  { %v1046_v32 = vpop.xlane.xlu0 %1045 }
 0x500   :  { %4791 = vrcp.f32 %v1046_v32 }
 0x501   :  { %v4786_v34 = vpop.eup %4785 }
 0x502   :  { %v1063_v55 = vmul.f32 %v4786_v34, %v5498_v60  ;;  %v789_v60 = vadd.f32 %v5269_v35, %v788_v27 }
 0x503   :  { %v1049_v42 = vpop.xlane.xlu1 %1048 }
 0x504   :  { %4793 = vrcp.f32 %v1049_v42  ;;  %4302 = vmatmul.mubr.msk.f32.vlgmr.msra.gmra.mxu0 %vm980_vm4, %v1063_v55 }
 0x505   :  { %v4788_v43 = vpop.eup %4787  ;;  %4374 = vmatpush3.msra.mxu0 %v804_v41  ;;  %4304 = vmatprep.mubr.msk.f32.mxu0 %vm4910_vm2, %v4909_v0 }
 0x506   :  { %4375 = vmatprep.subr.mxu0 %v4909_v0  ;;  %v1065_v50 = vmul.f32 %v4788_v43, %v5503_v6 }
 0x507   :  { %4376 = vmatpush3.msra.mxu0 %v799_v47  ;;  %v1052_v45 = vpop.xlane.xlu0 %1051 }
 0x508   :  { %4377 = vmatprep.subr.mxu0 %v4909_v0  ;;  %4795 = vrcp.f32 %v1052_v45  ;;  %4305 = vmatmul.mubr.msk.f32.gmra.mxu0 %vm980_vm4, %v1065_v50 }
 0x509   :  { %v4790_v57 = vpop.eup %4789  ;;  %4378 = vmatpush3.msra.mxu0 %v794_v18  ;;  %4307 = vmatprep.mubr.msk.f32.mxu0 %vm4910_vm2, %v4909_v0 }
 0x50a   :  { %4379 = vmatprep.subr.mxu0 %v4909_v0  ;;  %v1067_v6 = vmul.f32 %v4790_v57, %v5508_v17  ;;  %v774_v17 = vadd.f32 %v4228_v7, %v5269_v35 }
 0x50b   :  { %4380 = vmatpush3.msra.mxu0 %v789_v60  ;;  %v1055_v11 = vpop.xlane.xlu1 %1054 }
 0x50c   :  { %4381 = vmatprep.subr.mxu0 %v4909_v0  ;;  %4797 = vrcp.f32 %v1055_v11  ;;  %4308 = vmatmul.mubr.msk.f32.gmra.mxu0 %vm980_vm4, %v1067_v6 }
 0x50d   :  { %v4792_v63 = vpop.eup %4791  ;;  %4382 = vmatpush3.msra.mxu0 %v784_v56  ;;  %4310 = vmatprep.mubr.msk.f32.mxu0 %vm4910_vm2, %v4909_v0 }
 0x50e   :  { %4383 = vmatprep.subr.mxu0 %v4909_v0  ;;  %v1069_v22 = vmul.f32 %v4792_v63, %v5513_v10 }
 0x50f   :  { %4384 = vmatpush3.msra.mxu0 %v779_v51  ;;  %v1058_v3 = vpop.xlane.xlu0 %1057 }
 0x510   :  { %4385 = vmatprep.subr.mxu0 %v4909_v0  ;;  %4799 = vrcp.f32 %v1058_v3  ;;  %4311 = vmatmul.mubr.msk.f32.gmra.mxu0 %vm980_vm4, %v1069_v22 }
 0x511   :  { %v4794_v25 = vpop.eup %4793  ;;  %4386 = vmatpush3.msra.mxu0 %v774_v17  ;;  %4313 = vmatprep.mubr.msk.f32.mxu0 %vm4910_vm2, %v4909_v0 }
 0x512   :  { %4387 = vmatprep.subr.mxu0 %v4909_v0  ;;  %v1071_v10 = vmul.f32 %v4794_v25, %v5518_v61 }
 0x513   :  { %4388 = vmatpush3.msra.mxu0 %v769_v5  ;;  %v1061_v29 = vpop.xlane.xlu1 %1060 }
 0x514   :  { %4389 = vmatprep.subr.mxu0 %v4909_v0  ;;  %4801 = vrcp.f32 %v1061_v29  ;;  %4314 = vmatmul.mubr.msk.f32.gmra.mxu0 %vm980_vm4, %v1071_v10 }
 0x515   :  { %v4796_v13 = vpop.eup %4795  ;;  %4390 = vmatpush3.msra.mxu0 %v5277_v39  ;;  %4316 = vmatprep.mubr.msk.f32.mxu0 %vm4910_vm2, %v4909_v0 }
 0x516   :  { %v1073_v35 = vmul.f32 %v4796_v13, %v5523_v8 }
 0x517   :  { %v1446_v33 = vpop.xlane.xlu0 %1445 }
 0x518   :  { %4803 = vrcp.f32 %v1446_v33  ;;  %4317 = vmatmul.mubr.msk.f32.gmra.mxu0 %vm980_vm4, %v1073_v35 }
 0x519   :  { %v4798_v61 = vpop.eup %4797  ;;  %4319 = vmatprep.mubr.msk.f32.mxu0 %vm4910_vm2, %v4909_v0 }
 0x51a   :  { %v1075_v21 = vmul.f32 %v4798_v61, %v5528_v24 }
 0x51b   :  { %v1449_v59 = vpop.xlane.xlu1 %1448 }
 0x51c   :  { %4805 = vrcp.f32 %v1449_v59  ;;  %4320 = vmatmul.mubr.msk.f32.gmra.mxu0 %vm980_vm4, %v1075_v21 }
 0x51d   :  { %v4800_v39 = vpop.eup %4799  ;;  %4322 = vmatprep.mubr.msk.f32.mxu0 %vm4910_vm2, %v4909_v0 }
 0x51e   :  { %v1077_v8 = vmul.f32 %v4800_v39, %v5533_v31 }
 0x51f   :  { %v1452_v19 = vpop.xlane.xlu0 %1451 }
 0x520   :  { %4807 = vrcp.f32 %v1452_v19  ;;  %4323 = vmatmul.mubr.msk.f32.gmra.mxu0 %vm980_vm4, %v1077_v8 }
 0x521   :  { %v4802_v40 = vpop.eup %4801  ;;  %4325 = vmatprep.mubr.msk.f32.mxu0 %vm4910_vm2, %v4909_v0 }
 0x522   :  { %v1079_v24 = vmul.f32 %v4802_v40, %v5538_v38 }
 0x523   :  { %v1455_v20 = vpop.xlane.xlu1 %1454 }
 0x524   :  { %4809 = vrcp.f32 %v1455_v20  ;;  %4326 = vmatmul.mubr.msk.f32.gmra.mxu0 %vm980_vm4, %v1079_v24  ;;  %v3687_v20 = vld [vmem:[%s6550_s6 + $0x4] sm:$0xf] }
 0x525   :  { %v4804_v62 = vpop.eup %4803  ;;  %4391 = vmatprep.mubr.msk.f32.mxu0 %vm4910_vm2, %v4909_v0  ;;  %4447 = vmatprep.subr.msk.mxu0 %vm60_vm0, %v3687_v20 }
 0x526   :  { %v1472_v31 = vmul.f32 %v4804_v62, %v5543_v48  ;;  %v3731_v62 = vld [vmem:[%s6552_s8 + $0x4] sm:$0xf] }
 0x527   :  { %v1458_v1 = vpop.xlane.xlu0 %1457 }
 0x528   :  { %4811 = vrcp.f32 %v1458_v1  ;;  %4392 = vmatmul.mubr.msk.f32.vlgmr.msra.gmra.mxu0 %vm980_vm4, %v1472_v31  ;;  %v4893_v1 = vld [vmem:[%s6549_s5 + $0x8] sm:$0xff] }
 0x529   :  { %v4806_v4 = vpop.eup %4805  ;;  %4394 = vmatprep.mubr.msk.f32.mxu0 %vm4910_vm2, %v4909_v0  ;;  %4448 = vmatpush3.msk.msra.mxu0 %vm60_vm0, %v3687_v20  ;;  %v4907_v20 = vld [vmem:[%s6549_s5 + $0x68] sm:$0xff] }
 0x52a   :  { %v1474_v38 = vmul.f32 %v4806_v4, %v5548_v54  ;;  %4505 = vmatprep.subr.msk.mxu0 %vm60_vm0, %v3731_v62 }
 0x52b   :  { %v1461_v7 = vpop.xlane.xlu1 %1460 }
 0x52c   :  { %4813 = vrcp.f32 %v1461_v7  ;;  %4395 = vmatmul.mubr.msk.f32.gmra.mxu0 %vm980_vm4, %v1474_v38  ;;  %v5714_v7 = vld [vmem:[%s6557_s13] ss:$0 sm:$0xff] }
 0x52d   :  { %v4808_v52 = vpop.eup %4807  ;;  %4397 = vmatprep.mubr.msk.f32.mxu0 %vm4910_vm2, %v4909_v0 }
 0x52e   :  { %v1476_v48 = vmul.f32 %v4808_v52, %v5553_v2  ;;  %v4894_v52 = vld [vmem:[%s6549_s5] sm:$0xff] }
 0x52f   :  { %v1464_v12 = vpop.xlane.xlu0 %1463 }
 0x530   :  { %4815 = vrcp.f32 %v1464_v12  ;;  %4398 = vmatmul.mubr.msk.f32.gmra.mxu0 %vm980_vm4, %v1476_v48 }
 0x531   :  { %v4810_v16 = vpop.eup %4809  ;;  %4400 = vmatprep.mubr.msk.f32.mxu0 %vm4910_vm2, %v4909_v0 }
 0x532   :  { %v1478_v54 = vmul.f32 %v4810_v16, %v5558_v9 }
 0x533   :  { %v1467_v23 = vpop.xlane.xlu1 %1466 }
 0x534   :  { %4817 = vrcp.f32 %v1467_v23  ;;  %4401 = vmatmul.mubr.msk.f32.gmra.mxu0 %vm980_vm4, %v1478_v54  ;;  %v4895_v23 = vld [vmem:[%s6549_s5 + $0x18] sm:$0xff] }
 0x535   :  { %v4812_v58 = vpop.eup %4811  ;;  %4403 = vmatprep.mubr.msk.f32.mxu0 %vm4910_vm2, %v4909_v0 }
 0x536   :  { %v1480_v2 = vmul.f32 %v4812_v58, %v5563_v53 }
 0x537   :  { %v1470_v26 = vpop.xlane.xlu0 %1469 }
 0x538   :  { %4819 = vrcp.f32 %v1470_v26  ;;  %4404 = vmatmul.mubr.msk.f32.gmra.mxu0 %vm980_vm4, %v1480_v2  ;;  %v4896_v26 = vld [vmem:[%s6549_s5 + $0x10] sm:$0xff] }
 0x539   :  { %v4814_v27 = vpop.eup %4813  ;;  %4406 = vmatprep.mubr.msk.f32.mxu0 %vm4910_vm2, %v4909_v0 }
 0x53a   :  { %v1482_v9 = vmul.f32 %v4814_v27, %v5567_v15 }
 0x53c   :  { %4407 = vmatmul.mubr.msk.f32.gmra.mxu0 %vm980_vm4, %v1482_v9 }
 0x53d   :  { %v4816_v28 = vpop.eup %4815  ;;  %4409 = vmatprep.mubr.msk.f32.mxu0 %vm4910_vm2, %v4909_v0 }
 0x53e   :  { %v1484_v49 = vmul.f32 %v4816_v28, %v5571_v14  ;;  %v3709_v14 = vld [vmem:[%s6548_s7 + $0x4] sm:$0xf] }
 0x53f   :  { %4476 = vmatprep.subr.msk.mxu1 %vm60_vm0, %v3709_v14 }
 0x540   :  { %4410 = vmatmul.mubr.msk.f32.gmra.mxu0 %vm980_vm4, %v1484_v49 }
 0x541   :  { %v4818_v53 = vpop.eup %4817  ;;  %4412 = vmatprep.mubr.msk.f32.mxu0 %vm4910_vm2, %v4909_v0 }
 0x542   :  { %v1486_v32 = vmul.f32 %v4818_v53, %v5575_v30  ;;  %v4897_v53 = vld [vmem:[%s6549_s5 + $0x28] sm:$0xff] }
 0x544   :  { %4413 = vmatmul.mubr.msk.f32.gmra.mxu0 %vm980_vm4, %v1486_v32 }
 0x545   :  { %v4820_v34 = vpop.eup %4819  ;;  %4415 = vmatprep.mubr.msk.f32.mxu0 %vm4910_vm2, %v4909_v0 }
 0x546   :  { %v1488_v15 = vmul.f32 %v4820_v34, %v5579_v46 }
 0x548   :  { %4416 = vmatmul.mubr.msk.f32.gmra.mxu0 %vm980_vm4, %v1488_v15  ;;  %v4898_v15 = vld [vmem:[%s6549_s5 + $0x20] sm:$0xff] }
 0x5c4   :  { %v1173_v37 = vpop.f32.mrf.mxu0 }
 0x5c5   :  { %4420 = vmatprep.mubr.msk.f32.mxu1 %vm56_vm1, %v1173_v37 }
 0x5c6   :  { %v4303_v30 = vpop.f32.mrf.mxu0 }
 0x5c8   :  { %v1178_v55 = vpop.f32.mrf.mxu0 }
 0x5c9   :  { %4421 = vmatmul.mubr.msk.f32.vlgmr.msra.gmra.mxu1 %vm56_vm1, %v1178_v55 }
 0x5ca   :  { %v4306_v41 = vpop.f32.mrf.mxu0  ;;  %4477 = vmatpush3.msk.msra.mxu1 %vm60_vm0, %v3709_v14 }
 0x5cb   :  { %4534 = vmatprep.subr.mxu1 %v4909_v0  ;;  %v4899_v41 = vld [vmem:[%s6549_s5 + $0x38] sm:$0xff] }
 0x5cc   :  { %v1183_v46 = vpop.f32.mrf.mxu0 }
 0x5cd   :  { %4423 = vmatprep.mubr.msk.f32.mxu1 %vm56_vm1, %v1183_v46 }
 0x5ce   :  { %v4309_v42 = vpop.f32.mrf.mxu0 }
 0x5d0   :  { %v1188_v43 = vpop.f32.mrf.mxu0 }
 0x5d1   :  { %4424 = vmatmul.mubr.msk.f32.gmra.mxu1 %vm56_vm1, %v1188_v43  ;;  %v4900_v43 = vld [vmem:[%s6549_s5 + $0x30] sm:$0xff] }
 0x5d2   :  { %v4312_v18 = vpop.f32.mrf.mxu0 }
 0x5d4   :  { %v1193_v47 = vpop.f32.mrf.mxu0 }
 0x5d5   :  { %4426 = vmatprep.mubr.msk.f32.mxu1 %vm56_vm1, %v1193_v47 }
 0x5d6   :  { %v4315_v50 = vpop.f32.mrf.mxu0 }
 0x5d8   :  { %v1198_v60 = vpop.f32.mrf.mxu0 }
 0x5d9   :  { %4427 = vmatmul.mubr.msk.f32.gmra.mxu1 %vm56_vm1, %v1198_v60 }
 0x5da   :  { %v4318_v45 = vpop.f32.mrf.mxu0 }
 0x5db   :  { %v4901_v45 = vld [vmem:[%s6549_s5 + $0x40] sm:$0xff] }
 0x5dc   :  { %v1203_v57 = vpop.f32.mrf.mxu0 }
 0x5dd   :  { %4429 = vmatprep.mubr.msk.f32.mxu1 %vm56_vm1, %v1203_v57 }
 0x5de   :  { %v4321_v56 = vpop.f32.mrf.mxu0 }
 0x5e0   :  { %v1208_v6 = vpop.f32.mrf.mxu0 }
 0x5e1   :  { %4430 = vmatmul.mubr.msk.f32.gmra.mxu1 %vm56_vm1, %v1208_v6 }
 0x5e2   :  { %v4324_v51 = vpop.f32.mrf.mxu0 }
 0x5e4   :  { %v1213_v11 = vpop.f32.mrf.mxu0 }
 0x5e5   :  { %4432 = vmatprep.mubr.msk.f32.mxu1 %vm56_vm1, %v1213_v11 }
 0x5e6   :  { %v4327_v63 = vpop.f32.mrf.mxu0 }
 0x5e8   :  { %v1582_v22 = vpop.f32.mrf.mxu0 }
 0x5e9   :  { %4433 = vmatmul.mubr.msk.f32.gmra.mxu1 %vm56_vm1, %v1582_v22 }
 0x5ea   :  { %v4393_v17 = vpop.f32.mrf.mxu0 }
 0x5ec   :  { %v1587_v3 = vpop.f32.mrf.mxu0 }
 0x5ed   :  { %4435 = vmatprep.mubr.msk.f32.mxu1 %vm56_vm1, %v1587_v3  ;;  %v4903_v3 = vld [vmem:[%s6549_s5 + $0x48] sm:$0xff] }
 0x5ee   :  { %v4396_v25 = vpop.f32.mrf.mxu0 }
 0x5f0   :  { %v1592_v5 = vpop.f32.mrf.mxu0 }
 0x5f1   :  { %4436 = vmatmul.mubr.msk.f32.gmra.mxu1 %vm56_vm1, %v1592_v5 }
 0x5f2   :  { %v4399_v10 = vpop.f32.mrf.mxu0 }
 0x5f4   :  { %v1597_v29 = vpop.f32.mrf.mxu0 }
 0x5f5   :  { %4438 = vmatprep.mubr.msk.f32.mxu1 %vm56_vm1, %v1597_v29 }
 0x5f6   :  { %v4402_v13 = vpop.f32.mrf.mxu0 }
 0x5f7   :  { %v4904_v13 = vld [vmem:[%s6549_s5 + $0x60] sm:$0xff] }
 0x5f8   :  { %v1602_v35 = vpop.f32.mrf.mxu0 }
 0x5f9   :  { %4439 = vmatmul.mubr.msk.f32.gmra.mxu1 %vm56_vm1, %v1602_v35 }
 0x5fa   :  { %v4405_v33 = vpop.f32.mrf.mxu0 }
 0x5fc   :  { %v1607_v61 = vpop.f32.mrf.mxu0 }
 0x5fd   :  { %4441 = vmatprep.mubr.msk.f32.mxu1 %vm56_vm1, %v1607_v61  ;;  %v4905_v61 = vld [vmem:[%s6549_s5 + $0x58] sm:$0xff] }
 0x5fe   :  { %v4408_v21 = vpop.f32.mrf.mxu0 }
 0x600   :  { %v1612_v59 = vpop.f32.mrf.mxu0 }
 0x601   :  { %4442 = vmatmul.mubr.msk.f32.gmra.mxu1 %vm56_vm1, %v1612_v59 }
 0x602   :  { %v4411_v39 = vpop.f32.mrf.mxu0 }
 0x604   :  { %v1617_v8 = vpop.f32.mrf.mxu0 }
 0x605   :  { %4444 = vmatprep.mubr.msk.f32.mxu1 %vm56_vm1, %v1617_v8 }
 0x606   :  { %v4414_v19 = vpop.f32.mrf.mxu0 }
 0x607   :  { %v4906_v19 = vld [vmem:[%s6549_s5 + $0x70] sm:$0xff] }
 0x608   :  { %v1622_v40 = vpop.f32.mrf.mxu0 }
 0x609   :  { %4445 = vmatmul.mubr.msk.f32.gmra.mxu1 %vm56_vm1, %v1622_v40 }
 0x60a   :  { %v4417_v24 = vpop.f32.mrf.mxu0 }
 0x689   :  { %v4422_v31 = vpop.f32.mrf.mxu1 }
 0x68a   :  { %v1840_v4 = vadd.f32 %v4893_v1, %v4422_v31 }
 0x68b   :  { %v1750_v38 = vpop.f32.mrf.mxu1 }
 0x68c   :  { %v1839_v48 = vadd.f32 %v4894_v52, %v1750_v38  ;;  %v5723_v16 = vadd.f32 %v5714_v7, %v1840_v4 }
 0x68e   :  { %v5720_v12 = vadd.f32 %v5714_v7, %v1839_v48  ;;  %v4908_v48 = vld [vmem:[%s6549_s5 + $0x78] sm:$0xff] }
 0x690   :  { %4449 = vmatprep.mubr.msk.f32.mxu0 %vm56_vm1, %v5720_v12  ;;  %4478 = vmatprep.mubr.msk.f32.mxu1 %vm56_vm1, %v5720_v12 }
 0x691   :  { %v4425_v54 = vpop.f32.mrf.mxu1  ;;  %4450 = vmatmul.mubr.msk.f32.vlgmr.msra.gmra.mxu0 %vm56_vm1, %v5723_v16  ;;  %4479 = vmatmul.mubr.msk.f32.vlgmr.msra.gmra.mxu1 %vm56_vm1, %v5723_v16 }
 0x692   :  { %4506 = vmatpush3.msk.msra.mxu0 %vm60_vm0, %v3731_v62  ;;  %v1842_v58 = vadd.f32 %v4895_v23, %v4425_v54 }
 0x693   :  { %v1760_v2 = vpop.f32.mrf.mxu1  ;;  %4579 = vmatprep.subr.mxu0 %v4909_v0 }
 0x694   :  { %v1841_v27 = vadd.f32 %v4896_v26, %v1760_v2  ;;  %v5745_v28 = vadd.f32 %v5714_v7, %v1842_v58 }
 0x696   :  { %v5742_v9 = vadd.f32 %v5714_v7, %v1841_v27 }
 0x698   :  { %4452 = vmatprep.mubr.msk.f32.mxu0 %vm56_vm1, %v5742_v9  ;;  %4481 = vmatprep.mubr.msk.f32.mxu1 %vm56_vm1, %v5742_v9 }
 0x699   :  { %v4428_v49 = vpop.f32.mrf.mxu1  ;;  %4453 = vmatmul.mubr.msk.f32.gmra.mxu0 %vm56_vm1, %v5745_v28  ;;  %4482 = vmatmul.mubr.msk.f32.gmra.mxu1 %vm56_vm1, %v5745_v28 }
 0x69a   :  { %v1844_v32 = vadd.f32 %v4897_v53, %v4428_v49 }
 0x69b   :  { %v1770_v34 = vpop.f32.mrf.mxu1 }
 0x69c   :  { %v1843_v14 = vadd.f32 %v4898_v15, %v1770_v34  ;;  %v5765_v30 = vadd.f32 %v5714_v7, %v1844_v32 }
 0x69e   :  { %v5762_v37 = vadd.f32 %v5714_v7, %v1843_v14 }
 0x6a0   :  { %4455 = vmatprep.mubr.msk.f32.mxu0 %vm56_vm1, %v5762_v37  ;;  %4484 = vmatprep.mubr.msk.f32.mxu1 %vm56_vm1, %v5762_v37 }
 0x6a1   :  { %v4431_v55 = vpop.f32.mrf.mxu1  ;;  %4456 = vmatmul.mubr.msk.f32.gmra.mxu0 %vm56_vm1, %v5765_v30  ;;  %4485 = vmatmul.mubr.msk.f32.gmra.mxu1 %vm56_vm1, %v5765_v30 }
 0x6a2   :  { %v1846_v46 = vadd.f32 %v4899_v41, %v4431_v55 }
 0x6a3   :  { %v1780_v42 = vpop.f32.mrf.mxu1 }
 0x6a4   :  { %v1845_v18 = vadd.f32 %v4900_v43, %v1780_v42  ;;  %v5785_v50 = vadd.f32 %v5714_v7, %v1846_v46  ;;  %v5946_v43 = vld [vmem:[%s6553_s11 + $0x1] ss:$0 sm:$0xff] }
 0x6a6   :  { %v5782_v47 = vadd.f32 %v5714_v7, %v1845_v18 }
 0x6a8   :  { %4458 = vmatprep.mubr.msk.f32.mxu0 %vm56_vm1, %v5782_v47  ;;  %4487 = vmatprep.mubr.msk.f32.mxu1 %vm56_vm1, %v5782_v47 }
 0x6a9   :  { %v4434_v60 = vpop.f32.mrf.mxu1  ;;  %4459 = vmatmul.mubr.msk.f32.gmra.mxu0 %vm56_vm1, %v5785_v50  ;;  %4488 = vmatmul.mubr.msk.f32.gmra.mxu1 %vm56_vm1, %v5785_v50 }
 0x6aa   :  { %v1848_v57 = vadd.f32 %v4901_v45, %v4434_v60 }
 0x6ab   :  { %v1790_v56 = vpop.f32.mrf.mxu1 }
 0x6ac   :  { %v1847_v6 = vadd.f32 %v1790_v56, %v5101_v36  ;;  %v5803_v11 = vadd.f32 %v5714_v7, %v1848_v57  ;;  %v4902_v36 = vld [vmem:[%s6549_s5 + $0x50] sm:$0xff] }
 0x6ae   :  { %v5800_v51 = vadd.f32 %v5714_v7, %v1847_v6 }
 0x6b0   :  { %4461 = vmatprep.mubr.msk.f32.mxu0 %vm56_vm1, %v5800_v51  ;;  %4490 = vmatprep.mubr.msk.f32.mxu1 %vm56_vm1, %v5800_v51 }
 0x6b1   :  { %v4437_v63 = vpop.f32.mrf.mxu1  ;;  %4462 = vmatmul.mubr.msk.f32.gmra.mxu0 %vm56_vm1, %v5803_v11  ;;  %4491 = vmatmul.mubr.msk.f32.gmra.mxu1 %vm56_vm1, %v5803_v11 }
 0x6b2   :  { %v1850_v22 = vadd.f32 %v4902_v36, %v4437_v63 }
 0x6b3   :  { %v1800_v17 = vpop.f32.mrf.mxu1 }
 0x6b4   :  { %v1849_v25 = vadd.f32 %v4903_v3, %v1800_v17  ;;  %v5823_v10 = vadd.f32 %v5714_v7, %v1850_v22 }
 0x6b6   :  { %v5820_v5 = vadd.f32 %v5714_v7, %v1849_v25 }
 0x6b8   :  { %4464 = vmatprep.mubr.msk.f32.mxu0 %vm56_vm1, %v5820_v5  ;;  %4493 = vmatprep.mubr.msk.f32.mxu1 %vm56_vm1, %v5820_v5 }
 0x6b9   :  { %v4440_v29 = vpop.f32.mrf.mxu1  ;;  %4465 = vmatmul.mubr.msk.f32.gmra.mxu0 %vm56_vm1, %v5823_v10  ;;  %4494 = vmatmul.mubr.msk.f32.gmra.mxu1 %vm56_vm1, %v5823_v10 }
 0x6ba   :  { %v1852_v35 = vadd.f32 %v4904_v13, %v4440_v29 }
 0x6bb   :  { %v1810_v33 = vpop.f32.mrf.mxu1 }
 0x6bc   :  { %v1851_v21 = vadd.f32 %v4905_v61, %v1810_v33  ;;  %v5843_v39 = vadd.f32 %v5714_v7, %v1852_v35 }
 0x6be   :  { %v5840_v59 = vadd.f32 %v5714_v7, %v1851_v21 }
 0x6c0   :  { %4467 = vmatprep.mubr.msk.f32.mxu0 %vm56_vm1, %v5840_v59  ;;  %4496 = vmatprep.mubr.msk.f32.mxu1 %vm56_vm1, %v5840_v59 }
 0x6c1   :  { %v4443_v8 = vpop.f32.mrf.mxu1  ;;  %4468 = vmatmul.mubr.msk.f32.gmra.mxu0 %vm56_vm1, %v5843_v39  ;;  %4497 = vmatmul.mubr.msk.f32.gmra.mxu1 %vm56_vm1, %v5843_v39 }
 0x6c2   :  { %v1854_v40 = vadd.f32 %v4906_v19, %v4443_v8 }
 0x6c3   :  { %v1820_v24 = vpop.f32.mrf.mxu1 }
 0x6c4   :  { %v1853_v62 = vadd.f32 %v4907_v20, %v1820_v24  ;;  %v5863_v1 = vadd.f32 %v5714_v7, %v1854_v40 }
 0x6c6   :  { %v5860_v31 = vadd.f32 %v5714_v7, %v1853_v62 }
 0x6c8   :  { %4470 = vmatprep.mubr.msk.f32.mxu0 %vm56_vm1, %v5860_v31  ;;  %4499 = vmatprep.mubr.msk.f32.mxu1 %vm56_vm1, %v5860_v31 }
 0x6c9   :  { %v4446_v4 = vpop.f32.mrf.mxu1  ;;  %4471 = vmatmul.mubr.msk.f32.gmra.mxu0 %vm56_vm1, %v5863_v1  ;;  %4500 = vmatmul.mubr.msk.f32.gmra.mxu1 %vm56_vm1, %v5863_v1 }
 0x6ca   :  { %v1856_v38 = vadd.f32 %v4446_v4, %v5144_v44 }
 0x6cb   :  { %v1830_v52 = vpop.f32.mrf.mxu1 }
 0x6cc   :  { %v1855_v54 = vadd.f32 %v4908_v48, %v1830_v52  ;;  %v5881_v58 = vadd.f32 %v5714_v7, %v1856_v38 }
 0x6ce   :  { %v5878_v23 = vadd.f32 %v5714_v7, %v1855_v54 }
 0x6d0   :  { %4473 = vmatprep.mubr.msk.f32.mxu0 %vm56_vm1, %v5878_v23  ;;  %4502 = vmatprep.mubr.msk.f32.mxu1 %vm56_vm1, %v5878_v23 }
 0x6d1   :  { %4474 = vmatmul.mubr.msk.f32.gmra.mxu0 %vm56_vm1, %v5881_v58  ;;  %4503 = vmatmul.mubr.msk.f32.gmra.mxu1 %vm56_vm1, %v5881_v58 }
 0x6d2   :  { %4507 = vmatprep.mubr.msk.f32.mxu0 %vm56_vm1, %v5720_v12  ;;  %4552 = vmatprep.mubr.msk.f32.mxu1 %vm4910_vm2, %v4909_v0 }
 0x6d5   :  { %4508 = vmatmul.mubr.msk.f32.vlgmr.msra.gmra.mxu0 %vm56_vm1, %v5723_v16 }
 0x6d6   :  { %4510 = vmatprep.mubr.msk.f32.mxu0 %vm56_vm1, %v5742_v9 }
 0x6d9   :  { %4511 = vmatmul.mubr.msk.f32.gmra.mxu0 %vm56_vm1, %v5745_v28 }
 0x6da   :  { %4513 = vmatprep.mubr.msk.f32.mxu0 %vm56_vm1, %v5762_v37 }
 0x6dd   :  { %4514 = vmatmul.mubr.msk.f32.gmra.mxu0 %vm56_vm1, %v5765_v30 }
 0x6de   :  { %4516 = vmatprep.mubr.msk.f32.mxu0 %vm56_vm1, %v5782_v47 }
 0x6e1   :  { %4517 = vmatmul.mubr.msk.f32.gmra.mxu0 %vm56_vm1, %v5785_v50 }
 0x6e2   :  { %4519 = vmatprep.mubr.msk.f32.mxu0 %vm56_vm1, %v5800_v51 }
 0x6e5   :  { %4520 = vmatmul.mubr.msk.f32.gmra.mxu0 %vm56_vm1, %v5803_v11 }
 0x6e6   :  { %4522 = vmatprep.mubr.msk.f32.mxu0 %vm56_vm1, %v5820_v5 }
 0x6e9   :  { %4523 = vmatmul.mubr.msk.f32.gmra.mxu0 %vm56_vm1, %v5823_v10 }
 0x6ea   :  { %4525 = vmatprep.mubr.msk.f32.mxu0 %vm56_vm1, %v5840_v59 }
 0x6ed   :  { %4526 = vmatmul.mubr.msk.f32.gmra.mxu0 %vm56_vm1, %v5843_v39 }
 0x6ee   :  { %4528 = vmatprep.mubr.msk.f32.mxu0 %vm56_vm1, %v5860_v31 }
 0x6f1   :  { %4529 = vmatmul.mubr.msk.f32.gmra.mxu0 %vm56_vm1, %v5863_v1 }
 0x6f2   :  { %4531 = vmatprep.mubr.msk.f32.mxu0 %vm56_vm1, %v5878_v23 }
 0x6f5   :  { %4532 = vmatmul.mubr.msk.f32.gmra.mxu0 %vm56_vm1, %v5881_v58 }
 0x6f6   :  { %4597 = vmatprep.mubr.msk.f32.mxu0 %vm4910_vm2, %v4909_v0 }
 0x751   :  { %v4480_v44 = vpop.f32.mrf.mxu1  ;;  %v5931_v26 = vpop.f32.mrf.mxu0 }
 0x752   :  { %v2189_v62 = vadd.f32 %v4480_v44, %v5946_v43 }
 0x753   :  { %v2183_v7 = vpop.f32.mrf.mxu1  ;;  %v2015_v49 = vpop.f32.mrf.mxu0 }
 0x754   :  { %v2184_v48 = vadd.f32 %v5946_v43, %v2183_v7 }
 0x759   :  { %v4483_v2 = vpop.f32.mrf.mxu1  ;;  %v5933_v32 = vpop.f32.mrf.mxu0 }
 0x75a   :  { %v2199_v33 = vadd.f32 %v4483_v2, %v5946_v43 }
 0x75b   :  { %v2193_v27 = vpop.f32.mrf.mxu1  ;;  %v5935_v15 = vpop.f32.mrf.mxu0 }
 0x75c   :  { %v2194_v19 = vadd.f32 %v5946_v43, %v2193_v27  ;;  %v6008_v27 = vld [vmem:[%s6555_s10 + $0x1] ss:$0 sm:$0xff] }
 0x75d   :  { %v2016_v44 = vadd.f32 %v6008_v27, %v2015_v49 }
 0x761   :  { %v4486_v53 = vpop.f32.mrf.mxu1  ;;  %v5937_v55 = vpop.f32.mrf.mxu0 }
 0x762   :  { %v2209_v17 = vadd.f32 %v4486_v53, %v5946_v43 }
 0x763   :  { %v2203_v34 = vpop.f32.mrf.mxu1  ;;  %v5939_v46 = vpop.f32.mrf.mxu0 }
 0x764   :  { %v2204_v29 = vadd.f32 %v5946_v43, %v2203_v34 }
 0x769   :  { %v4489_v14 = vpop.f32.mrf.mxu1  ;;  %v5948_v18 = vpop.f32.mrf.mxu0 }
 0x76a   :  { %v2219_v56 = vadd.f32 %v4489_v14, %v5946_v43 }
 0x76b   :  { %v2213_v41 = vpop.f32.mrf.mxu1  ;;  %v5952_v57 = vpop.f32.mrf.mxu0 }
 0x76c   :  { %v2214_v63 = vadd.f32 %v5946_v43, %v2213_v41  ;;  %v2021_v41 = vadd.f32 %v5931_v26, %v6008_v27 }
 0x771   :  { %v5941_v42 = vpop.f32.mrf.mxu1  ;;  %v5956_v6 = vpop.f32.mrf.mxu0 }
 0x773   :  { %v2223_v60 = vpop.f32.mrf.mxu1  ;;  %v5961_v36 = vpop.f32.mrf.mxu0 }
 0x774   :  { %v2224_v45 = vadd.f32 %v5946_v43, %v2223_v60 }
 0x776   :  { %4535 = vmatpush3.xpose.msk.msra.mxu1 %vm56_vm1, %v2224_v45 }
 0x777   :  { %4536 = vmatprep.subr.mxu1 %v4909_v0 }
 0x779   :  { %v5964_v22 = vpop.f32.mrf.mxu0  ;;  %v5969_v3 = vpop.f32.mrf.mxu1 }
 0x77a   :  { %4537 = vmatpush3.xpose.msk.msra.mxu1 %vm56_vm1, %v2219_v56  ;;  %v2026_v56 = vadd.f32 %v6008_v27, %v5935_v15 }
 0x77b   :  { %4538 = vmatprep.subr.mxu1 %v4909_v0  ;;  %v5971_v25 = vpop.f32.mrf.mxu0  ;;  %v5978_v35 = vpop.f32.mrf.mxu1 }
 0x77e   :  { %4539 = vmatpush3.xpose.msk.msra.mxu1 %vm56_vm1, %v2214_v63 }
 0x77f   :  { %4540 = vmatprep.subr.mxu1 %v4909_v0 }
 0x781   :  { %v5975_v13 = vpop.f32.mrf.mxu0  ;;  %v4498_v61 = vpop.f32.mrf.mxu1 }
 0x782   :  { %4541 = vmatpush3.xpose.msk.msra.mxu1 %vm56_vm1, %v2209_v17 }
 0x783   :  { %4542 = vmatprep.subr.mxu1 %v4909_v0  ;;  %v5982_v21 = vpop.f32.mrf.mxu0  ;;  %v5989_v40 = vpop.f32.mrf.mxu1 }
 0x786   :  { %4543 = vmatpush3.xpose.msk.msra.mxu1 %vm56_vm1, %v2204_v29  ;;  %v2031_v29 = vadd.f32 %v5933_v32, %v6008_v27  ;;  %v2036_v32 = vadd.f32 %v6008_v27, %v5939_v46  ;;  %v2244_v46 = vadd.f32 %v5946_v43, %v5989_v40  ;;  %v2239_v40 = vadd.f32 %v5969_v3, %v5946_v43 }
 0x787   :  { %4544 = vmatprep.subr.mxu1 %v4909_v0  ;;  %v2234_v3 = vadd.f32 %v5946_v43, %v5978_v35  ;;  %v2229_v35 = vadd.f32 %v5941_v42, %v5946_v43  ;;  %v2066_v42 = vadd.f32 %v6008_v27, %v5971_v25  ;;  %v2081_v25 = vadd.f32 %v5975_v13, %v6008_v27 }
 0x789   :  { %v5985_v8 = vpop.f32.mrf.mxu0  ;;  %v4501_v24 = vpop.f32.mrf.mxu1 }
 0x78a   :  { %4545 = vmatpush3.xpose.msk.msra.mxu1 %vm56_vm1, %v2199_v33  ;;  %v2259_v26 = vadd.f32 %v4501_v24, %v5946_v43 }
 0x78b   :  { %4546 = vmatprep.subr.mxu1 %v4909_v0  ;;  %v5992_v20 = vpop.f32.mrf.mxu0  ;;  %v2253_v38 = vpop.f32.mrf.mxu1 }
 0x78c   :  { %v2254_v15 = vadd.f32 %v5946_v43, %v2253_v38 }
 0x78e   :  { %4547 = vmatpush3.xpose.msk.msra.mxu1 %vm56_vm1, %v2194_v19  ;;  %v6043_v19 = vld [vmem:[%s6554_s12 + $0x1] ss:$0 sm:$0xff] }
 0x78f   :  { %4548 = vmatprep.subr.mxu1 %v4909_v0 }
 0x791   :  { %v5996_v4 = vpop.f32.mrf.mxu0  ;;  %v4504_v54 = vpop.f32.mrf.mxu1 }
 0x792   :  { %4549 = vmatpush3.xpose.msk.msra.mxu1 %vm56_vm1, %v2189_v62  ;;  %v2269_v34 = vadd.f32 %v4504_v54, %v5946_v43 }
 0x793   :  { %v5999_v52 = vpop.f32.mrf.mxu0  ;;  %4550 = vmatprep.subr.mxu1 %v4909_v0  ;;  %v2263_v14 = vpop.f32.mrf.mxu1 }
 0x794   :  { %v2264_v49 = vadd.f32 %v5946_v43, %v2263_v14  ;;  %v2096_v13 = vadd.f32 %v6008_v27, %v5999_v52 }
 0x795   :  { %v6003_v2 = vpop.f32.mrf.mxu0 }
 0x796   :  { %4551 = vmatpush3.xpose.msk.msra.mxu1 %vm56_vm1, %v2184_v48  ;;  %v2249_v48 = vadd.f32 %v4498_v61, %v5946_v43  ;;  %v2071_v43 = vadd.f32 %v5964_v22, %v6008_v27  ;;  %v2086_v22 = vadd.f32 %v6008_v27, %v5992_v20  ;;  %v2101_v20 = vadd.f32 %v5996_v4, %v6008_v27 }
 0x797   :  { %v6012_v53 = vpop.f32.mrf.mxu0  ;;  %4624 = vmatprep.subr.mxu1 %v4909_v0 }
 0x799   :  { %v4512_v7 = vpop.f32.mrf.mxu0  ;;  %4553 = vmatmul.mubr.msk.f32.vlgmr.msra.gmra.mxu1 %vm56_vm1, %v2016_v44 }
 0x79a   :  { %4625 = vmatpush3.xpose.msk.msra.mxu1 %vm56_vm1, %v2269_v34  ;;  %4555 = vmatprep.mubr.msk.f32.mxu1 %vm4910_vm2, %v4909_v0  ;;  %v2041_v34 = vadd.f32 %v5937_v55, %v6008_v27  ;;  %v2046_v55 = vadd.f32 %v6008_v27, %v5952_v57  ;;  %v2051_v57 = vadd.f32 %v5948_v18, %v6008_v27 }
 0x79b   :  { %v2361_v60 = vpop.f32.mrf.mxu0  ;;  %4626 = vmatprep.subr.mxu1 %v4909_v0  ;;  %v2357_v18 = vadd.f32 %v6003_v2, %v6043_v19 }
 0x79d   :  { %v4515_v45 = vpop.f32.mrf.mxu0  ;;  %4556 = vmatmul.mubr.msk.f32.gmra.mxu1 %vm56_vm1, %v2021_v41 }
 0x79e   :  { %4627 = vmatpush3.xpose.msk.msra.mxu1 %vm56_vm1, %v2264_v49  ;;  %4558 = vmatprep.mubr.msk.f32.mxu1 %vm4910_vm2, %v4909_v0  ;;  %v2377_v14 = vadd.f32 %v4515_v45, %v6043_v19  ;;  %v2367_v49 = vadd.f32 %v4512_v7, %v6043_v19  ;;  %v2362_v45 = vadd.f32 %v6043_v19, %v2361_v60 }
 0x79f   :  { %v2371_v63 = vpop.f32.mrf.mxu0  ;;  %4628 = vmatprep.subr.mxu1 %v4909_v0  ;;  %v2056_v7 = vadd.f32 %v6008_v27, %v5961_v36  ;;  %v2352_v60 = vadd.f32 %v6043_v19, %v6012_v53  ;;  %v2061_v36 = vadd.f32 %v5956_v6, %v6008_v27  ;;  %v2076_v6 = vadd.f32 %v6008_v27, %v5982_v21 }
 0x7a0   :  { %v2372_v41 = vadd.f32 %v6043_v19, %v2371_v63  ;;  %v2091_v21 = vadd.f32 %v5985_v8, %v6008_v27 }
 0x7a1   :  { %v4518_v17 = vpop.f32.mrf.mxu0  ;;  %4559 = vmatmul.mubr.msk.f32.gmra.mxu1 %vm56_vm1, %v2026_v56 }
 0x7a2   :  { %4629 = vmatpush3.xpose.msk.msra.mxu1 %vm56_vm1, %v2259_v26  ;;  %4561 = vmatprep.mubr.msk.f32.mxu1 %vm4910_vm2, %v4909_v0  ;;  %v2387_v44 = vadd.f32 %v4518_v17, %v6043_v19 }
 0x7a3   :  { %v2381_v33 = vpop.f32.mrf.mxu0  ;;  %4630 = vmatprep.subr.mxu1 %v4909_v0 }
 0x7a4   :  { %v2382_v61 = vadd.f32 %v6043_v19, %v2381_v33 }
 0x7a5   :  { %v4521_v24 = vpop.f32.mrf.mxu0  ;;  %4562 = vmatmul.mubr.msk.f32.gmra.mxu1 %vm56_vm1, %v2031_v29 }
 0x7a6   :  { %v6047_v62 = vadd.f32 %v4521_v24, %v6043_v19  ;;  %4631 = vmatpush3.xpose.msk.msra.mxu1 %vm56_vm1, %v2254_v15  ;;  %4564 = vmatprep.mubr.msk.f32.mxu1 %vm4910_vm2, %v4909_v0 }
 0x7a7   :  { %v2391_v38 = vpop.f32.mrf.mxu0  ;;  %4632 = vmatprep.subr.mxu1 %v4909_v0 }
 0x7a8   :  { %v2392_v54 = vadd.f32 %v6043_v19, %v2391_v38 }
 0x7a9   :  { %4565 = vmatmul.mubr.msk.f32.gmra.mxu1 %vm56_vm1, %v2036_v32 }
 0x7aa   :  { %4580 = vmatpush3.msra.mxu0 %v2392_v54  ;;  %4633 = vmatpush3.xpose.msk.msra.mxu1 %vm56_vm1, %v2249_v48 }
 0x7ab   :  { %4581 = vmatprep.subr.mxu0 %v4909_v0  ;;  %4567 = vmatprep.mubr.msk.f32.mxu1 %vm4910_vm2, %v4909_v0 }
 0x7ac   :  { %4582 = vmatpush3.msra.mxu0 %v2387_v44  ;;  %4634 = vmatprep.subr.mxu1 %v4909_v0 }
 0x7ad   :  { %4568 = vmatmul.mubr.msk.f32.gmra.mxu1 %vm56_vm1, %v2041_v34  ;;  %4583 = vmatprep.subr.mxu0 %v4909_v0 }
 0x7ae   :  { %4584 = vmatpush3.msra.mxu0 %v2382_v61  ;;  %4635 = vmatpush3.xpose.msk.msra.mxu1 %vm56_vm1, %v2244_v46 }
 0x7af   :  { %4585 = vmatprep.subr.mxu0 %v4909_v0  ;;  %4570 = vmatprep.mubr.msk.f32.mxu1 %vm4910_vm2, %v4909_v0 }
 0x7b0   :  { %4586 = vmatpush3.msra.mxu0 %v2377_v14  ;;  %4636 = vmatprep.subr.mxu1 %v4909_v0 }
 0x7b1   :  { %4571 = vmatmul.mubr.msk.f32.gmra.mxu1 %vm56_vm1, %v2046_v55  ;;  %4587 = vmatprep.subr.mxu0 %v4909_v0 }
 0x7b2   :  { %4588 = vmatpush3.msra.mxu0 %v2372_v41  ;;  %4637 = vmatpush3.xpose.msk.msra.mxu1 %vm56_vm1, %v2239_v40 }
 0x7b3   :  { %4589 = vmatprep.subr.mxu0 %v4909_v0  ;;  %4573 = vmatprep.mubr.msk.f32.mxu1 %vm4910_vm2, %v4909_v0 }
 0x7b4   :  { %4590 = vmatpush3.msra.mxu0 %v2367_v49  ;;  %4638 = vmatprep.subr.mxu1 %v4909_v0 }
 0x7b5   :  { %4574 = vmatmul.mubr.msk.f32.gmra.mxu1 %vm56_vm1, %v2051_v57  ;;  %4591 = vmatprep.subr.mxu0 %v4909_v0 }
 0x7b6   :  { %4592 = vmatpush3.msra.mxu0 %v2362_v45  ;;  %4639 = vmatpush3.xpose.msk.msra.mxu1 %vm56_vm1, %v2234_v3 }
 0x7b7   :  { %4593 = vmatprep.subr.mxu0 %v4909_v0  ;;  %4576 = vmatprep.mubr.msk.f32.mxu1 %vm4910_vm2, %v4909_v0 }
 0x7b8   :  { %4594 = vmatpush3.msra.mxu0 %v2357_v18  ;;  %4640 = vmatprep.subr.mxu1 %v4909_v0 }
 0x7b9   :  { %4577 = vmatmul.mubr.msk.f32.gmra.mxu1 %vm56_vm1, %v2056_v7  ;;  %4595 = vmatprep.subr.mxu0 %v4909_v0 }
 0x7ba   :  { %4596 = vmatpush3.msra.mxu0 %v2352_v60  ;;  %4641 = vmatpush3.xpose.msk.msra.mxu1 %vm56_vm1, %v2229_v35 }
 0x7bb   :  { %4642 = vmatprep.mubr.msk.f32.mxu1 %vm4910_vm2, %v4909_v0  ;;  %4669 = vmatprep.subr.mxu0 %v4909_v0 }
 0x7bd   :  { %4643 = vmatmul.mubr.msk.f32.vlgmr.msra.gmra.mxu1 %vm56_vm1, %v2061_v36 }
 0x7be   :  { %4645 = vmatprep.mubr.msk.f32.mxu1 %vm4910_vm2, %v4909_v0 }
 0x7c1   :  { %4646 = vmatmul.mubr.msk.f32.gmra.mxu1 %vm56_vm1, %v2066_v42 }
 0x7c2   :  { %4648 = vmatprep.mubr.msk.f32.mxu1 %vm4910_vm2, %v4909_v0 }
 0x7c5   :  { %4649 = vmatmul.mubr.msk.f32.gmra.mxu1 %vm56_vm1, %v2071_v43 }
 0x7c6   :  { %4651 = vmatprep.mubr.msk.f32.mxu1 %vm4910_vm2, %v4909_v0 }
 0x7c9   :  { %4652 = vmatmul.mubr.msk.f32.gmra.mxu1 %vm56_vm1, %v2076_v6 }
 0x7ca   :  { %4654 = vmatprep.mubr.msk.f32.mxu1 %vm4910_vm2, %v4909_v0 }
 0x7cd   :  { %4655 = vmatmul.mubr.msk.f32.gmra.mxu1 %vm56_vm1, %v2081_v25 }
 0x7ce   :  { %4657 = vmatprep.mubr.msk.f32.mxu1 %vm4910_vm2, %v4909_v0 }
 0x7d1   :  { %4658 = vmatmul.mubr.msk.f32.gmra.mxu1 %vm56_vm1, %v2086_v22 }
 0x7d2   :  { %4660 = vmatprep.mubr.msk.f32.mxu1 %vm4910_vm2, %v4909_v0 }
 0x7d5   :  { %4661 = vmatmul.mubr.msk.f32.gmra.mxu1 %vm56_vm1, %v2091_v21 }
 0x7d6   :  { %4663 = vmatprep.mubr.msk.f32.mxu1 %vm4910_vm2, %v4909_v0 }
 0x7d9   :  { %4664 = vmatmul.mubr.msk.f32.gmra.mxu1 %vm56_vm1, %v2096_v13 }
 0x7da   :  { %4666 = vmatprep.mubr.msk.f32.mxu1 %vm4910_vm2, %v4909_v0 }
 0x7dd   :  { %4667 = vmatmul.mubr.msk.f32.gmra.mxu1 %vm56_vm1, %v2101_v20 }
 0x859   :  { %v2560_v2 = vpop.f32.mrf.mxu1 }
 0x85a   :  { %v6159_v8 = vmul.f32 0.5, %v2560_v2 }
 0x85b   :  { %v4554_v53 = vpop.f32.mrf.mxu1 }
 0x85c   :  { %v2613_v56 = vsel %vm980_vm4, %v6159_v8, -inf }
 0x85d   :  { %2614 = vmax.xlane.f32.xlu1 %v2613_v56  ;;  %v2565_v63 = vpop.f32.mrf.mxu1 }
 0x85e   :  { %v6163_v52 = vmul.f32 0.5, %v2565_v63 }
 0x85f   :  { %v4557_v26 = vpop.f32.mrf.mxu1 }
 0x860   :  { %v2616_v17 = vsel %vm980_vm4, %v6163_v52, -inf }
 0x861   :  { %2617 = vmax.xlane.f32.xlu0 %v2616_v17  ;;  %v2570_v29 = vpop.f32.mrf.mxu1 }
 0x862   :  { %v6167_v4 = vmul.f32 0.5, %v2570_v29 }
 0x863   :  { %v4560_v27 = vpop.f32.mrf.mxu1 }
 0x864   :  { %v2619_v33 = vsel %vm980_vm4, %v6167_v4, -inf }
 0x865   :  { %2620 = vmax.xlane.f32.xlu1 %v2619_v33  ;;  %v2575_v15 = vpop.f32.mrf.mxu1 }
 0x866   :  { %v6171_v24 = vmul.f32 0.5, %v2575_v15 }
 0x867   :  { %v4563_v32 = vpop.f32.mrf.mxu1 }
 0x868   :  { %v2622_v38 = vsel %vm980_vm4, %v6171_v24, -inf }
 0x869   :  { %2623 = vmax.xlane.f32.xlu0 %v2622_v38  ;;  %v2580_v48 = vpop.f32.mrf.mxu1 }
 0x86a   :  { %v6175_v54 = vmul.f32 0.5, %v2580_v48 }
 0x86b   :  { %v4566_v44 = vpop.f32.mrf.mxu1 }
 0x86c   :  { %v2625_v34 = vsel %vm980_vm4, %v6175_v54, -inf }
 0x86d   :  { %2626 = vmax.xlane.f32.xlu1 %v2625_v34  ;;  %v2585_v46 = vpop.f32.mrf.mxu1 }
 0x86e   :  { %v6179_v61 = vmul.f32 0.5, %v2585_v46 }
 0x86f   :  { %v4569_v14 = vpop.f32.mrf.mxu1 }
 0x870   :  { %v2628_v55 = vsel %vm980_vm4, %v6179_v61, -inf }
 0x871   :  { %2629 = vmax.xlane.f32.xlu0 %v2628_v55  ;;  %v2590_v40 = vpop.f32.mrf.mxu1 }
 0x872   :  { %v6183_v41 = vmul.f32 0.5, %v2590_v40 }
 0x873   :  { %v4572_v49 = vpop.f32.mrf.mxu1 }
 0x874   :  { %v2631_v57 = vsel %vm980_vm4, %v6183_v41, -inf }
 0x875   :  { %2632 = vmax.xlane.f32.xlu1 %v2631_v57  ;;  %v2595_v3 = vpop.f32.mrf.mxu1 }
 0x876   :  { %v6187_v45 = vmul.f32 0.5, %v2595_v3 }
 0x877   :  { %v4575_v18 = vpop.f32.mrf.mxu1 }
 0x878   :  { %v2634_v7 = vsel %vm980_vm4, %v6187_v45, -inf }
 0x879   :  { %2635 = vmax.xlane.f32.xlu0 %v2634_v7  ;;  %v2600_v35 = vpop.f32.mrf.mxu1 }
 0x87a   :  { %v6191_v60 = vmul.f32 0.5, %v2600_v35 }
 0x87b   :  { %v4578_v36 = vpop.f32.mrf.mxu1 }
 0x87c   :  { %v2637_v42 = vsel %vm980_vm4, %v6191_v60, -inf }
 0x87d   :  { %2638 = vmax.xlane.f32.xlu1 %v2637_v42  ;;  %v2969_v43 = vpop.f32.mrf.mxu1 }
 0x87e   :  { %v6195_v6 = vmul.f32 0.5, %v2969_v43 }
 0x87f   :  { %v4644_v25 = vpop.f32.mrf.mxu1 }
 0x880   :  { %v3022_v22 = vsel %vm980_vm4, %v6195_v6, -inf }
 0x881   :  { %3023 = vmax.xlane.f32.xlu0 %v3022_v22  ;;  %v2974_v21 = vpop.f32.mrf.mxu1 }
 0x882   :  { %v6199_v13 = vmul.f32 0.5, %v2974_v21 }
 0x883   :  { %v4647_v20 = vpop.f32.mrf.mxu1 }
 0x884   :  { %v3025_v2 = vsel %vm980_vm4, %v6199_v13, -inf }
 0x885   :  { %3026 = vmax.xlane.f32.xlu1 %v3025_v2  ;;  %v2979_v53 = vpop.f32.mrf.mxu1 }
 0x886   :  { %v6203_v56 = vmul.f32 0.5, %v2979_v53 }
 0x887   :  { %v4650_v63 = vpop.f32.mrf.mxu1 }
 0x888   :  { %v3028_v26 = vsel %vm980_vm4, %v6203_v56, -inf }
 0x889   :  { %3029 = vmax.xlane.f32.xlu0 %v3028_v26  ;;  %v2984_v17 = vpop.f32.mrf.mxu1 }
 0x88a   :  { %v6207_v29 = vmul.f32 0.5, %v2984_v17 }
 0x88b   :  { %v4653_v27 = vpop.f32.mrf.mxu1 }
 0x88c   :  { %v3031_v33 = vsel %vm980_vm4, %v6207_v29, -inf }
 0x88d   :  { %3032 = vmax.xlane.f32.xlu1 %v3031_v33  ;;  %v2989_v15 = vpop.f32.mrf.mxu1 }
 0x88e   :  { %v6211_v32 = vmul.f32 0.5, %v2989_v15 }
 0x88f   :  { %v4656_v38 = vpop.f32.mrf.mxu1 }
 0x890   :  { %v3034_v48 = vsel %vm980_vm4, %v6211_v32, -inf }
 0x891   :  { %3035 = vmax.xlane.f32.xlu0 %v3034_v48  ;;  %v2994_v44 = vpop.f32.mrf.mxu1 }
 0x892   :  { %v6215_v34 = vmul.f32 0.5, %v2994_v44 }
 0x893   :  { %v4659_v46 = vpop.f32.mrf.mxu1 }
 0x894   :  { %v3037_v14 = vsel %vm980_vm4, %v6215_v34, -inf }
 0x895   :  { %3038 = vmax.xlane.f32.xlu1 %v3037_v14  ;;  %v2999_v55 = vpop.f32.mrf.mxu1 }
 0x896   :  { %v6219_v40 = vmul.f32 0.5, %v2999_v55 }
 0x897   :  { %v4662_v49 = vpop.f32.mrf.mxu1 }
 0x898   :  { %v3040_v57 = vsel %vm980_vm4, %v6219_v40, -inf }
 0x899   :  { %3041 = vmax.xlane.f32.xlu0 %v3040_v57  ;;  %v3004_v3 = vpop.f32.mrf.mxu1 }
 0x89a   :  { %v6223_v18 = vmul.f32 0.5, %v3004_v3 }
 0x89b   :  { %v4665_v7 = vpop.f32.mrf.mxu1 }
 0x89c   :  { %v3043_v35 = vsel %vm980_vm4, %v6223_v18, -inf }
 0x89d   :  { %3044 = vmax.xlane.f32.xlu1 %v3043_v35  ;;  %v3009_v36 = vpop.f32.mrf.mxu1 }
 0x89e   :  { %v6227_v42 = vmul.f32 0.5, %v3009_v36 }
 0x89f   :  { %v4668_v43 = vpop.f32.mrf.mxu1 }
 0x8a0   :  { %v3046_v25 = vsel %vm980_vm4, %v6227_v42, -inf }
 0x8a1   :  { %3047 = vmax.xlane.f32.xlu0 %v3046_v25 }
 0x8e6   :  { %v2615_v22 = vpop.xlane.xlu1 %2614 }
 0x8e7   :  { %v2640_v21 = vsub.f32 %v6159_v8, %v2615_v22 }
 0x8e9   :  { %v2649_v20 = vmul.f32 1.442695, %v2640_v21 }
 0x8ea   :  { %v2618_v2 = vpop.xlane.xlu0 %2617 }
 0x8eb   :  { %4821 = vpow2.f32 %v2649_v20  ;;  %v2641_v53 = vsub.f32 %v6163_v52, %v2618_v2 }
 0x8ed   :  { %v2651_v63 = vmul.f32 1.442695, %v2641_v53 }
 0x8ee   :  { %v2621_v26 = vpop.xlane.xlu1 %2620 }
 0x8ef   :  { %4823 = vpow2.f32 %v2651_v63  ;;  %v2642_v17 = vsub.f32 %v6167_v4, %v2621_v26 }
 0x8f1   :  { %v2653_v27 = vmul.f32 1.442695, %v2642_v17 }
 0x8f2   :  { %v2624_v33 = vpop.xlane.xlu0 %2623 }
 0x8f3   :  { %4825 = vpow2.f32 %v2653_v27  ;;  %v2643_v15 = vsub.f32 %v6171_v24, %v2624_v33 }
 0x8f5   :  { %v2655_v38 = vmul.f32 1.442695, %v2643_v15 }
 0x8f6   :  { %v2627_v48 = vpop.xlane.xlu1 %2626 }
 0x8f7   :  { %4827 = vpow2.f32 %v2655_v38  ;;  %v2644_v8 = vsub.f32 %v6175_v54, %v2627_v48 }
 0x8f8   :  { %v6236_v44 = vpop.eup %4821 }
 0x8f9   :  { %v2657_v46 = vmul.f32 1.442695, %v2644_v8  ;;  %v2667_v52 = vsel %vm980_vm4, %v6236_v44, 0.0 }
 0x8fa   :  { %v2630_v14 = vpop.xlane.xlu0 %2629  ;;  %2668 = vadd.xlane.f32.xlu1 %v2667_v52 }
 0x8fb   :  { %4829 = vpow2.f32 %v2657_v46  ;;  %v2645_v4 = vsub.f32 %v6179_v61, %v2630_v14 }
 0x8fc   :  { %v6241_v55 = vpop.eup %4823 }
 0x8fd   :  { %v2659_v49 = vmul.f32 1.442695, %v2645_v4  ;;  %v2670_v24 = vsel %vm980_vm4, %v6241_v55, 0.0 }
 0x8fe   :  { %v2633_v57 = vpop.xlane.xlu1 %2632  ;;  %2671 = vadd.xlane.f32.xlu0 %v2670_v24 }
 0x8ff   :  { %4831 = vpow2.f32 %v2659_v49  ;;  %v2646_v54 = vsub.f32 %v6183_v41, %v2633_v57 }
 0x900   :  { %v6246_v3 = vpop.eup %4825 }
 0x901   :  { %v2661_v7 = vmul.f32 1.442695, %v2646_v54  ;;  %v2673_v35 = vsel %vm980_vm4, %v6246_v3, 0.0 }
 0x902   :  { %v2636_v36 = vpop.xlane.xlu0 %2635  ;;  %2674 = vadd.xlane.f32.xlu1 %v2673_v35 }
 0x903   :  { %4833 = vpow2.f32 %v2661_v7  ;;  %v2647_v61 = vsub.f32 %v6187_v45, %v2636_v36 }
 0x904   :  { %v6251_v43 = vpop.eup %4827 }
 0x905   :  { %v2663_v25 = vmul.f32 1.442695, %v2647_v61  ;;  %v2676_v22 = vsel %vm980_vm4, %v6251_v43, 0.0 }
 0x906   :  { %v2639_v21 = vpop.xlane.xlu1 %2638  ;;  %2677 = vadd.xlane.f32.xlu0 %v2676_v22 }
 0x907   :  { %4835 = vpow2.f32 %v2663_v25  ;;  %v2648_v41 = vsub.f32 %v6191_v60, %v2639_v21 }
 0x908   :  { %v6256_v20 = vpop.eup %4829 }
 0x909   :  { %v2665_v2 = vmul.f32 1.442695, %v2648_v41  ;;  %v2679_v53 = vsel %vm980_vm4, %v6256_v20, 0.0 }
 0x90a   :  { %v3024_v63 = vpop.xlane.xlu0 %3023  ;;  %2680 = vadd.xlane.f32.xlu1 %v2679_v53 }
 0x90b   :  { %4837 = vpow2.f32 %v2665_v2  ;;  %v3049_v45 = vsub.f32 %v6195_v6, %v3024_v63 }
 0x90c   :  { %v6261_v26 = vpop.eup %4831 }
 0x90d   :  { %v3058_v17 = vmul.f32 1.442695, %v3049_v45  ;;  %v2682_v27 = vsel %vm980_vm4, %v6261_v26, 0.0 }
 0x90e   :  { %v3027_v33 = vpop.xlane.xlu1 %3026  ;;  %2683 = vadd.xlane.f32.xlu0 %v2682_v27 }
 0x90f   :  { %4839 = vpow2.f32 %v3058_v17  ;;  %v3050_v60 = vsub.f32 %v6199_v13, %v3027_v33 }
 0x910   :  { %v6266_v15 = vpop.eup %4833 }
 0x911   :  { %v3060_v38 = vmul.f32 1.442695, %v3050_v60  ;;  %v2685_v48 = vsel %vm980_vm4, %v6266_v15, 0.0 }
 0x912   :  { %v3030_v8 = vpop.xlane.xlu0 %3029  ;;  %2686 = vadd.xlane.f32.xlu1 %v2685_v48 }
 0x913   :  { %4841 = vpow2.f32 %v3060_v38  ;;  %v3051_v6 = vsub.f32 %v6203_v56, %v3030_v8 }
 0x914   :  { %v6271_v46 = vpop.eup %4835 }
 0x915   :  { %v3062_v52 = vmul.f32 1.442695, %v3051_v6  ;;  %v2688_v14 = vsel %vm980_vm4, %v6271_v46, 0.0 }
 0x916   :  { %v3033_v4 = vpop.xlane.xlu1 %3032  ;;  %2689 = vadd.xlane.f32.xlu0 %v2688_v14 }
 0x917   :  { %4843 = vpow2.f32 %v3062_v52  ;;  %v3052_v13 = vsub.f32 %v6207_v29, %v3033_v4 }
 0x918   :  { %v6276_v49 = vpop.eup %4837 }
 0x919   :  { %v3064_v24 = vmul.f32 1.442695, %v3052_v13  ;;  %v2691_v57 = vsel %vm980_vm4, %v6276_v49, 0.0 }
 0x91a   :  { %v3036_v54 = vpop.xlane.xlu0 %3035  ;;  %2692 = vadd.xlane.f32.xlu1 %v2691_v57  ;;  %v4524_v57 = vpop.f32.mrf.mxu0 }
 0x91b   :  { %4845 = vpow2.f32 %v3064_v24  ;;  %v3053_v56 = vsub.f32 %v6211_v32, %v3036_v54 }
 0x91c   :  { %v6281_v7 = vpop.eup %4839  ;;  %v2401_v54 = vpop.f32.mrf.mxu0 }
 0x91d   :  { %v3066_v35 = vmul.f32 1.442695, %v3053_v56  ;;  %v3076_v36 = vsel %vm980_vm4, %v6281_v7, 0.0 }
 0x91e   :  { %v3039_v61 = vpop.xlane.xlu1 %3038  ;;  %3077 = vadd.xlane.f32.xlu0 %v3076_v36  ;;  %v4527_v56 = vpop.f32.mrf.mxu0 }
 0x91f   :  { %4847 = vpow2.f32 %v3066_v35  ;;  %v3054_v29 = vsub.f32 %v6215_v34, %v3039_v61 }
 0x920   :  { %v6286_v25 = vpop.eup %4841  ;;  %v2411_v35 = vpop.f32.mrf.mxu0 }
 0x921   :  { %v3068_v22 = vmul.f32 1.442695, %v3054_v29  ;;  %v3079_v21 = vsel %vm980_vm4, %v6286_v25, 0.0 }
 0x922   :  { %v3042_v41 = vpop.xlane.xlu0 %3041  ;;  %3080 = vadd.xlane.f32.xlu1 %v3079_v21  ;;  %v4530_v61 = vpop.f32.mrf.mxu0 }
 0x923   :  { %4849 = vpow2.f32 %v3068_v22  ;;  %v3055_v32 = vsub.f32 %v6219_v40, %v3042_v41 }
 0x924   :  { %v6291_v2 = vpop.eup %4843  ;;  %v2421_v22 = vpop.f32.mrf.mxu0 }
 0x925   :  { %v3070_v53 = vmul.f32 1.442695, %v3055_v32  ;;  %v3082_v63 = vsel %vm980_vm4, %v6291_v2, 0.0 }
 0x926   :  { %v3045_v45 = vpop.xlane.xlu1 %3044  ;;  %3083 = vadd.xlane.f32.xlu0 %v3082_v63  ;;  %v4533_v41 = vpop.f32.mrf.mxu0 }
 0x927   :  { %4851 = vpow2.f32 %v3070_v53  ;;  %v3056_v34 = vsub.f32 %v6223_v18, %v3045_v45 }
 0x928   :  { %v6296_v17 = vpop.eup %4845  ;;  %v2431_v63 = vpop.f32.mrf.mxu0 }
 0x929   :  { %v3072_v27 = vmul.f32 1.442695, %v3056_v34  ;;  %v3085_v33 = vsel %vm980_vm4, %v6296_v17, 0.0  ;;  %v2437_v34 = vadd.f32 %v4533_v41, %v6043_v19 }
 0x92a   :  { %3086 = vadd.xlane.f32.xlu1 %v3085_v33  ;;  %v3048_v60 = vpop.xlane.xlu0 %3047 }
 0x92b   :  { %4853 = vpow2.f32 %v3072_v27  ;;  %v3057_v40 = vsub.f32 %v6227_v42, %v3048_v60  ;;  %v2432_v60 = vadd.f32 %v6043_v19, %v2431_v63 }
 0x92c   :  { %v6301_v38 = vpop.eup %4847 }
 0x92d   :  { %v3074_v48 = vmul.f32 1.442695, %v3057_v40  ;;  %v3088_v8 = vsel %vm980_vm4, %v6301_v38, 0.0 }
 0x92e   :  { %3089 = vadd.xlane.f32.xlu0 %v3088_v8 }
 0x92f   :  { %4855 = vpow2.f32 %v3074_v48  ;;  %v2427_v48 = vadd.f32 %v4530_v61, %v6043_v19 }
 0x930   :  { %v6305_v18 = vpop.eup %4849 }
 0x931   :  { %v3091_v6 = vsel %vm980_vm4, %v6305_v18, 0.0 }
 0x932   :  { %3092 = vadd.xlane.f32.xlu1 %v3091_v6  ;;  %v2422_v6 = vadd.f32 %v6043_v19, %v2421_v22 }
 0x934   :  { %v6309_v52 = vpop.eup %4851 }
 0x935   :  { %v3094_v14 = vsel %vm980_vm4, %v6309_v52, 0.0 }
 0x936   :  { %3095 = vadd.xlane.f32.xlu0 %v3094_v14  ;;  %v2417_v14 = vadd.f32 %v4527_v56, %v6043_v19  ;;  %v2407_v56 = vadd.f32 %v4524_v57, %v6043_v19 }
 0x938   :  { %v6313_v42 = vpop.eup %4853 }
 0x939   :  { %v3097_v4 = vsel %vm980_vm4, %v6313_v42, 0.0 }
 0x93a   :  { %3098 = vadd.xlane.f32.xlu1 %v3097_v4 }
 0x93c   :  { %v6317_v13 = vpop.eup %4855 }
 0x93d   :  { %v3100_v24 = vsel %vm980_vm4, %v6317_v13, 0.0 }
 0x93e   :  { %3101 = vadd.xlane.f32.xlu0 %v3100_v24 }
 0x983   :  { %v2669_v36 = vpop.xlane.xlu1 %2668 }
 0x984   :  { %4857 = vrcp.f32 %v2669_v36  ;;  %v2412_v36 = vadd.f32 %v6043_v19, %v2411_v35  ;;  %v2402_v35 = vadd.f32 %v6043_v19, %v2401_v54 }
 0x987   :  { %v2672_v29 = vpop.xlane.xlu0 %2671 }
 0x988   :  { %4859 = vrcp.f32 %v2672_v29 }
 0x98b   :  { %v2675_v21 = vpop.xlane.xlu1 %2674 }
 0x98c   :  { %4861 = vrcp.f32 %v2675_v21 }
 0x98f   :  { %v2678_v32 = vpop.xlane.xlu0 %2677 }
 0x990   :  { %4863 = vrcp.f32 %v2678_v32 }
 0x991   :  { %v4858_v53 = vpop.eup %4857 }
 0x992   :  { %v2695_v45 = vmul.f32 %v4858_v53, %v6236_v44 }
 0x993   :  { %v2681_v27 = vpop.xlane.xlu1 %2680 }
 0x994   :  { %4865 = vrcp.f32 %v2681_v27  ;;  %4598 = vmatmul.mubr.msk.f32.vlgmr.msra.gmra.mxu0 %vm980_vm4, %v2695_v45 }
 0x995   :  { %v4860_v33 = vpop.eup %4859  ;;  %4670 = vmatpush3.msra.mxu0 %v2437_v34  ;;  %4600 = vmatprep.mubr.msk.f32.mxu0 %vm4910_vm2, %v4909_v0 }
 0x996   :  { %4671 = vmatprep.subr.mxu0 %v4909_v0  ;;  %v2697_v40 = vmul.f32 %v4860_v33, %v6241_v55 }
 0x997   :  { %4672 = vmatpush3.msra.mxu0 %v2432_v60  ;;  %v2684_v44 = vpop.xlane.xlu0 %2683 }
 0x998   :  { %4673 = vmatprep.subr.mxu0 %v4909_v0  ;;  %4867 = vrcp.f32 %v2684_v44  ;;  %4601 = vmatmul.mubr.msk.f32.gmra.mxu0 %vm980_vm4, %v2697_v40 }
 0x999   :  { %v4862_v8 = vpop.eup %4861  ;;  %4674 = vmatpush3.msra.mxu0 %v2427_v48  ;;  %4603 = vmatprep.mubr.msk.f32.mxu0 %vm4910_vm2, %v4909_v0 }
 0x99a   :  { %4675 = vmatprep.subr.mxu0 %v4909_v0  ;;  %v2699_v55 = vmul.f32 %v4862_v8, %v6246_v3 }
 0x99b   :  { %4676 = vmatpush3.msra.mxu0 %v2422_v6  ;;  %v2687_v4 = vpop.xlane.xlu1 %2686 }
 0x99c   :  { %4677 = vmatprep.subr.mxu0 %v4909_v0  ;;  %4869 = vrcp.f32 %v2687_v4  ;;  %4604 = vmatmul.mubr.msk.f32.gmra.mxu0 %vm980_vm4, %v2699_v55 }
 0x99d   :  { %v4864_v24 = vpop.eup %4863  ;;  %4678 = vmatpush3.msra.mxu0 %v2417_v14  ;;  %4606 = vmatprep.mubr.msk.f32.mxu0 %vm4910_vm2, %v4909_v0 }
 0x99e   :  { %4679 = vmatprep.subr.mxu0 %v4909_v0  ;;  %v2701_v3 = vmul.f32 %v4864_v24, %v6251_v43 }
 0x99f   :  { %4680 = vmatpush3.msra.mxu0 %v2412_v36  ;;  %v2690_v61 = vpop.xlane.xlu0 %2689 }
 0x9a0   :  { %4681 = vmatprep.subr.mxu0 %v4909_v0  ;;  %4871 = vrcp.f32 %v2690_v61  ;;  %4607 = vmatmul.mubr.msk.f32.gmra.mxu0 %vm980_vm4, %v2701_v3 }
 0x9a1   :  { %v4866_v29 = vpop.eup %4865  ;;  %4682 = vmatpush3.msra.mxu0 %v2407_v56  ;;  %4609 = vmatprep.mubr.msk.f32.mxu0 %vm4910_vm2, %v4909_v0 }
 0x9a2   :  { %4683 = vmatprep.subr.mxu0 %v4909_v0  ;;  %v2703_v43 = vmul.f32 %v4866_v29, %v6256_v20 }
 0x9a3   :  { %4684 = vmatpush3.msra.mxu0 %v2402_v35  ;;  %v2693_v57 = vpop.xlane.xlu1 %2692 }
 0x9a4   :  { %4685 = vmatprep.subr.mxu0 %v4909_v0  ;;  %4873 = vrcp.f32 %v2693_v57  ;;  %4610 = vmatmul.mubr.msk.f32.gmra.mxu0 %vm980_vm4, %v2703_v43 }
 0x9a5   :  { %v4868_v22 = vpop.eup %4867  ;;  %4686 = vmatpush3.msra.mxu0 %v6047_v62  ;;  %4612 = vmatprep.mubr.msk.f32.mxu0 %vm4910_vm2, %v4909_v0 }
 0x9a6   :  { %v2705_v19 = vmul.f32 %v4868_v22, %v6261_v26 }
 0x9a7   :  { %v3078_v54 = vpop.xlane.xlu0 %3077 }
 0x9a8   :  { %4875 = vrcp.f32 %v3078_v54  ;;  %4613 = vmatmul.mubr.msk.f32.gmra.mxu0 %vm980_vm4, %v2705_v19 }
 0x9a9   :  { %v4870_v20 = vpop.eup %4869  ;;  %4615 = vmatprep.mubr.msk.f32.mxu0 %vm4910_vm2, %v4909_v0 }
 0x9aa   :  { %v2707_v21 = vmul.f32 %v4870_v20, %v6266_v15 }
 0x9ab   :  { %v3081_v41 = vpop.xlane.xlu1 %3080 }
 0x9ac   :  { %4877 = vrcp.f32 %v3081_v41  ;;  %4616 = vmatmul.mubr.msk.f32.gmra.mxu0 %vm980_vm4, %v2707_v21 }
 0x9ad   :  { %v4872_v62 = vpop.eup %4871  ;;  %4618 = vmatprep.mubr.msk.f32.mxu0 %vm4910_vm2, %v4909_v0 }
 0x9ae   :  { %v2709_v26 = vmul.f32 %v4872_v62, %v6271_v46 }
 0x9af   :  { %v3084_v32 = vpop.xlane.xlu0 %3083 }
 0x9b0   :  { %4879 = vrcp.f32 %v3084_v32  ;;  %4619 = vmatmul.mubr.msk.f32.gmra.mxu0 %vm980_vm4, %v2709_v26 }
 0x9b1   :  { %v4874_v53 = vpop.eup %4873  ;;  %4621 = vmatprep.mubr.msk.f32.mxu0 %vm4910_vm2, %v4909_v0 }
 0x9b2   :  { %v2711_v15 = vmul.f32 %v4874_v53, %v6276_v49 }
 0x9b3   :  { %v3087_v63 = vpop.xlane.xlu1 %3086 }
 0x9b4   :  { %4881 = vrcp.f32 %v3087_v63  ;;  %4622 = vmatmul.mubr.msk.f32.gmra.mxu0 %vm980_vm4, %v2711_v15 }
 0x9b5   :  { %v4876_v45 = vpop.eup %4875  ;;  %4687 = vmatprep.mubr.msk.f32.mxu0 %vm4910_vm2, %v4909_v0 }
 0x9b6   :  { %v3104_v46 = vmul.f32 %v4876_v45, %v6281_v7 }
 0x9b7   :  { %v3090_v34 = vpop.xlane.xlu0 %3089 }
 0x9b8   :  { %4883 = vrcp.f32 %v3090_v34  ;;  %4688 = vmatmul.mubr.msk.f32.vlgmr.msra.gmra.mxu0 %vm980_vm4, %v3104_v46 }
 0x9b9   :  { %v4878_v27 = vpop.eup %4877  ;;  %4690 = vmatprep.mubr.msk.f32.mxu0 %vm4910_vm2, %v4909_v0 }
 0x9ba   :  { %v3106_v49 = vmul.f32 %v4878_v27, %v6286_v25 }
 0x9bb   :  { %v3093_v33 = vpop.xlane.xlu1 %3092 }
 0x9bc   :  { %4885 = vrcp.f32 %v3093_v33  ;;  %4691 = vmatmul.mubr.msk.f32.gmra.mxu0 %vm980_vm4, %v3106_v49 }
 0x9bd   :  { %v4880_v60 = vpop.eup %4879  ;;  %4693 = vmatprep.mubr.msk.f32.mxu0 %vm4910_vm2, %v4909_v0 }
 0x9be   :  { %v3108_v7 = vmul.f32 %v4880_v60, %v6291_v2 }
 0x9bf   :  { %v3096_v40 = vpop.xlane.xlu0 %3095 }
 0x9c0   :  { %4887 = vrcp.f32 %v3096_v40  ;;  %4694 = vmatmul.mubr.msk.f32.gmra.mxu0 %vm980_vm4, %v3108_v7 }
 0x9c1   :  { %v4882_v48 = vpop.eup %4881  ;;  %4696 = vmatprep.mubr.msk.f32.mxu0 %vm4910_vm2, %v4909_v0 }
 0x9c2   :  { %v3110_v25 = vmul.f32 %v4882_v48, %v6296_v17 }
 0x9c3   :  { %v3099_v44 = vpop.xlane.xlu1 %3098 }
 0x9c4   :  { %4889 = vrcp.f32 %v3099_v44  ;;  %4697 = vmatmul.mubr.msk.f32.gmra.mxu0 %vm980_vm4, %v3110_v25 }
 0x9c5   :  { %v4884_v8 = vpop.eup %4883  ;;  %4699 = vmatprep.mubr.msk.f32.mxu0 %vm4910_vm2, %v4909_v0 }
 0x9c6   :  { %v3112_v2 = vmul.f32 %v4884_v8, %v6301_v38 }
 0x9c7   :  { %v3102_v6 = vpop.xlane.xlu0 %3101 }
 0x9c8   :  { %4891 = vrcp.f32 %v3102_v6  ;;  %4700 = vmatmul.mubr.msk.f32.gmra.mxu0 %vm980_vm4, %v3112_v2 }
 0x9c9   :  { %v4886_v55 = vpop.eup %4885  ;;  %4702 = vmatprep.mubr.msk.f32.mxu0 %vm4910_vm2, %v4909_v0 }
 0x9ca   :  { %v3114_v17 = vmul.f32 %v4886_v55, %v6305_v18  ;;  %v3807_v18 = vld [vmem:[%s6556_s9 + $0x4] sm:$0xf]  ;;  %v6434_v55 = vld [vmem:[%s6557_s13 + $0x1] ss:$0 sm:$0xff] }
 0x9cb   :  { %4714 = vmatprep.subr.msk.mxu1 %vm60_vm0, %v3807_v18 }
 0x9cc   :  { %4703 = vmatmul.mubr.msk.f32.gmra.mxu0 %vm980_vm4, %v3114_v17  ;;  %4715 = vmatpush3.msk.msra.mxu1 %vm60_vm0, %v3807_v18 }
 0x9cd   :  { %v4888_v14 = vpop.eup %4887  ;;  %4705 = vmatprep.mubr.msk.f32.mxu0 %vm4910_vm2, %v4909_v0 }
 0x9ce   :  { %v3116_v4 = vmul.f32 %v4888_v14, %v6309_v52 }
 0x9d0   :  { %4706 = vmatmul.mubr.msk.f32.gmra.mxu0 %vm980_vm4, %v3116_v4 }
 0x9d1   :  { %v4890_v38 = vpop.eup %4889  ;;  %4708 = vmatprep.mubr.msk.f32.mxu0 %vm4910_vm2, %v4909_v0 }
 0x9d2   :  { %v3118_v24 = vmul.f32 %v4890_v38, %v6313_v42 }
 0x9d4   :  { %4709 = vmatmul.mubr.msk.f32.gmra.mxu0 %vm980_vm4, %v3118_v24 }
 0x9d5   :  { %v4892_v36 = vpop.eup %4891  ;;  %4711 = vmatprep.mubr.msk.f32.mxu0 %vm4910_vm2, %v4909_v0 }
 0x9d6   :  { %v3120_v52 = vmul.f32 %v4892_v36, %v6317_v13 }
 0x9d8   :  { %4712 = vmatmul.mubr.msk.f32.gmra.mxu0 %vm980_vm4, %v3120_v52 }
 0xa54   :  { %v2805_v3 = vpop.f32.mrf.mxu0 }
 0xa55   :  { %4716 = vmatprep.mubr.msk.f32.mxu1 %vm56_vm1, %v2805_v3 }
 0xa56   :  { %v4599_v42 = vpop.f32.mrf.mxu0 }
 0xa58   :  { %v2810_v56 = vpop.f32.mrf.mxu0 }
 0xa59   :  { %4717 = vmatmul.mubr.msk.f32.vlgmr.msra.gmra.mxu1 %vm56_vm1, %v2810_v56 }
 0xa5a   :  { %v4602_v61 = vpop.f32.mrf.mxu0 }
 0xa5c   :  { %v2815_v29 = vpop.f32.mrf.mxu0 }
 0xa5d   :  { %4719 = vmatprep.mubr.msk.f32.mxu1 %vm56_vm1, %v2815_v29 }
 0xa5e   :  { %v4605_v0 = vpop.f32.mrf.mxu0 }
 0xa60   :  { %v2820_v35 = vpop.f32.mrf.mxu0 }
 0xa61   :  { %4720 = vmatmul.mubr.msk.f32.gmra.mxu1 %vm56_vm1, %v2820_v35 }
 0xa62   :  { %v4608_v13 = vpop.f32.mrf.mxu0 }
 0xa64   :  { %v2825_v43 = vpop.f32.mrf.mxu0 }
 0xa65   :  { %4722 = vmatprep.mubr.msk.f32.mxu1 %vm56_vm1, %v2825_v43 }
 0xa66   :  { %v4611_v57 = vpop.f32.mrf.mxu0 }
 0xa68   :  { %v2830_v22 = vpop.f32.mrf.mxu0 }
 0xa69   :  { %4723 = vmatmul.mubr.msk.f32.gmra.mxu1 %vm56_vm1, %v2830_v22 }
 0xa6a   :  { %v4614_v19 = vpop.f32.mrf.mxu0 }
 0xa6c   :  { %v2835_v54 = vpop.f32.mrf.mxu0 }
 0xa6d   :  { %4725 = vmatprep.mubr.msk.f32.mxu1 %vm56_vm1, %v2835_v54 }
 0xa6e   :  { %v4617_v20 = vpop.f32.mrf.mxu0 }
 0xa70   :  { %v2840_v21 = vpop.f32.mrf.mxu0 }
 0xa71   :  { %4726 = vmatmul.mubr.msk.f32.gmra.mxu1 %vm56_vm1, %v2840_v21 }
 0xa72   :  { %v4620_v41 = vpop.f32.mrf.mxu0 }
 0xa74   :  { %v2845_v62 = vpop.f32.mrf.mxu0 }
 0xa75   :  { %4728 = vmatprep.mubr.msk.f32.mxu1 %vm56_vm1, %v2845_v62 }
 0xa76   :  { %v4623_v26 = vpop.f32.mrf.mxu0 }
 0xa78   :  { %v3214_v32 = vpop.f32.mrf.mxu0 }
 0xa79   :  { %4729 = vmatmul.mubr.msk.f32.gmra.mxu1 %vm56_vm1, %v3214_v32 }
 0xa7a   :  { %v4689_v53 = vpop.f32.mrf.mxu0 }
 0xa7c   :  { %v3219_v15 = vpop.f32.mrf.mxu0 }
 0xa7d   :  { %4731 = vmatprep.mubr.msk.f32.mxu1 %vm56_vm1, %v3219_v15 }
 0xa7e   :  { %v4692_v63 = vpop.f32.mrf.mxu0 }
 0xa80   :  { %v3224_v45 = vpop.f32.mrf.mxu0 }
 0xa81   :  { %4732 = vmatmul.mubr.msk.f32.gmra.mxu1 %vm56_vm1, %v3224_v45 }
 0xa82   :  { %v4695_v46 = vpop.f32.mrf.mxu0 }
 0xa84   :  { %v3229_v34 = vpop.f32.mrf.mxu0 }
 0xa85   :  { %4734 = vmatprep.mubr.msk.f32.mxu1 %vm56_vm1, %v3229_v34 }
 0xa86   :  { %v4698_v27 = vpop.f32.mrf.mxu0 }
 0xa88   :  { %v3234_v49 = vpop.f32.mrf.mxu0 }
 0xa89   :  { %4735 = vmatmul.mubr.msk.f32.gmra.mxu1 %vm56_vm1, %v3234_v49 }
 0xa8a   :  { %v4701_v33 = vpop.f32.mrf.mxu0 }
 0xa8c   :  { %v3239_v60 = vpop.f32.mrf.mxu0 }
 0xa8d   :  { %4737 = vmatprep.mubr.msk.f32.mxu1 %vm56_vm1, %v3239_v60 }
 0xa8e   :  { %v4704_v7 = vpop.f32.mrf.mxu0 }
 0xa90   :  { %v3244_v40 = vpop.f32.mrf.mxu0 }
 0xa91   :  { %4738 = vmatmul.mubr.msk.f32.gmra.mxu1 %vm56_vm1, %v3244_v40 }
 0xa92   :  { %v4707_v48 = vpop.f32.mrf.mxu0 }
 0xa94   :  { %v3249_v25 = vpop.f32.mrf.mxu0 }
 0xa95   :  { %4740 = vmatprep.mubr.msk.f32.mxu1 %vm56_vm1, %v3249_v25 }
 0xa96   :  { %v4710_v44 = vpop.f32.mrf.mxu0 }
 0xa98   :  { %v3254_v8 = vpop.f32.mrf.mxu0 }
 0xa99   :  { %4741 = vmatmul.mubr.msk.f32.gmra.mxu1 %vm56_vm1, %v3254_v8 }
 0xa9a   :  { %v4713_v2 = vpop.f32.mrf.mxu0 }
 0xb19   :  { %v4718_v6 = vpop.f32.mrf.mxu1 }
 0xb1a   :  { %v3473_v17 = vadd.f32 %v4718_v6, %v5723_v16 }
 0xb1b   :  { %v3383_v14 = vpop.f32.mrf.mxu1 }
 0xb1c   :  { %v3499_v4 = vadd.f32 %v6434_v55, %v3473_v17  ;;  %v3472_v38 = vadd.f32 %v3383_v14, %v5720_v12 }
 0xb1e   :  { %3517 = vst.msk [vmem:[%s6558_s14 + $0x8] sm:$0xff] %vm56_vm1, %v3499_v4  ;;  %v3498_v24 = vadd.f32 %v6434_v55, %v3472_v38 }
 0xb20   :  { %3516 = vst.msk [vmem:[%s6558_s14] sm:$0xff] %vm56_vm1, %v3498_v24 }
 0xb21   :  { %v4721_v18 = vpop.f32.mrf.mxu1 }
 0xb22   :  { %v3475_v16 = vadd.f32 %v4721_v18, %v5745_v28 }
 0xb23   :  { %v3393_v36 = vpop.f32.mrf.mxu1 }
 0xb24   :  { %v3501_v52 = vadd.f32 %v6434_v55, %v3475_v16  ;;  %v3474_v12 = vadd.f32 %v3393_v36, %v5742_v9 }
 0xb26   :  { %3519 = vst.msk [vmem:[%s6558_s14 + $0x18] sm:$0xff] %vm56_vm1, %v3501_v52  ;;  %v3500_v3 = vadd.f32 %v6434_v55, %v3474_v12 }
 0xb28   :  { %3518 = vst.msk [vmem:[%s6558_s14 + $0x10] sm:$0xff] %vm56_vm1, %v3500_v3 }
 0xb29   :  { %v4724_v42 = vpop.f32.mrf.mxu1 }
 0xb2a   :  { %v3477_v28 = vadd.f32 %v4724_v42, %v5765_v30 }
 0xb2b   :  { %v3403_v56 = vpop.f32.mrf.mxu1 }
 0xb2c   :  { %v3503_v61 = vadd.f32 %v6434_v55, %v3477_v28  ;;  %v3476_v9 = vadd.f32 %v3403_v56, %v5762_v37 }
 0xb2e   :  { %3521 = vst.msk [vmem:[%s6558_s14 + $0x28] sm:$0xff] %vm56_vm1, %v3503_v61  ;;  %v3502_v29 = vadd.f32 %v6434_v55, %v3476_v9 }
 0xb30   :  { %3520 = vst.msk [vmem:[%s6558_s14 + $0x20] sm:$0xff] %vm56_vm1, %v3502_v29 }
 0xb31   :  { %v4727_v0 = vpop.f32.mrf.mxu1 }
 0xb32   :  { %v3479_v30 = vadd.f32 %v4727_v0, %v5785_v50 }
 0xb33   :  { %v3413_v35 = vpop.f32.mrf.mxu1 }
 0xb34   :  { %v3505_v13 = vadd.f32 %v6434_v55, %v3479_v30  ;;  %v3478_v37 = vadd.f32 %v3413_v35, %v5782_v47 }
 0xb36   :  { %3523 = vst.msk [vmem:[%s6558_s14 + $0x38] sm:$0xff] %vm56_vm1, %v3505_v13  ;;  %v3504_v43 = vadd.f32 %v6434_v55, %v3478_v37 }
 0xb38   :  { %3522 = vst.msk [vmem:[%s6558_s14 + $0x30] sm:$0xff] %vm56_vm1, %v3504_v43 }
 0xb39   :  { %v4730_v57 = vpop.f32.mrf.mxu1 }
 0xb3a   :  { %v3481_v50 = vadd.f32 %v4730_v57, %v5803_v11 }
 0xb3b   :  { %v3423_v22 = vpop.f32.mrf.mxu1 }
 0xb3c   :  { %v3507_v19 = vadd.f32 %v6434_v55, %v3481_v50  ;;  %v3480_v47 = vadd.f32 %v3423_v22, %v5800_v51 }
 0xb3e   :  { %3829 = vst.msk [vmem:[%s6558_s14 + $0x48] sm:$0xff] %vm56_vm1, %v3507_v19  ;;  %v3506_v54 = vadd.f32 %v6434_v55, %v3480_v47 }
 0xb40   :  { %3524 = vst.msk [vmem:[%s6558_s14 + $0x40] sm:$0xff] %vm56_vm1, %v3506_v54 }
 0xb41   :  { %v4733_v20 = vpop.f32.mrf.mxu1 }
 0xb42   :  { %v3483_v11 = vadd.f32 %v4733_v20, %v5823_v10 }
 0xb43   :  { %v3433_v21 = vpop.f32.mrf.mxu1 }
 0xb44   :  { %v3509_v41 = vadd.f32 %v6434_v55, %v3483_v11  ;;  %v3482_v51 = vadd.f32 %v3433_v21, %v5820_v5 }
 0xb46   :  { %3831 = vst.msk [vmem:[%s6558_s14 + $0x58] sm:$0xff] %vm56_vm1, %v3509_v41  ;;  %v3508_v62 = vadd.f32 %v6434_v55, %v3482_v51 }
 0xb48   :  { %3830 = vst.msk [vmem:[%s6558_s14 + $0x50] sm:$0xff] %vm56_vm1, %v3508_v62 }
 0xb49   :  { %v4736_v26 = vpop.f32.mrf.mxu1 }
 0xb4a   :  { %v3485_v10 = vadd.f32 %v4736_v26, %v5843_v39 }
 0xb4b   :  { %v3443_v32 = vpop.f32.mrf.mxu1 }
 0xb4c   :  { %v3511_v53 = vadd.f32 %v6434_v55, %v3485_v10  ;;  %v3484_v5 = vadd.f32 %v3443_v32, %v5840_v59 }
 0xb4e   :  { %3833 = vst.msk [vmem:[%s6558_s14 + $0x68] sm:$0xff] %vm56_vm1, %v3511_v53  ;;  %v3510_v15 = vadd.f32 %v6434_v55, %v3484_v5 }
 0xb50   :  { %3832 = vst.msk [vmem:[%s6558_s14 + $0x60] sm:$0xff] %vm56_vm1, %v3510_v15 }
 0xb51   :  { %v4739_v63 = vpop.f32.mrf.mxu1 }
 0xb52   :  { %v3487_v39 = vadd.f32 %v4739_v63, %v5863_v1 }
 0xb53   :  { %v3453_v45 = vpop.f32.mrf.mxu1 }
 0xb54   :  { %v3513_v46 = vadd.f32 %v6434_v55, %v3487_v39  ;;  %v3486_v59 = vadd.f32 %v3453_v45, %v5860_v31 }
 0xb56   :  { %3835 = vst.msk [vmem:[%s6558_s14 + $0x78] sm:$0xff] %vm56_vm1, %v3513_v46  ;;  %v3512_v34 = vadd.f32 %v6434_v55, %v3486_v59 }
 0xb58   :  { %3834 = vst.msk [vmem:[%s6558_s14 + $0x70] sm:$0xff] %vm56_vm1, %v3512_v34 }
 0xb59   :  { %v4742_v27 = vpop.f32.mrf.mxu1 }
 0xb5a   :  { %v3489_v1 = vadd.f32 %v4742_v27, %v5881_v58 }
 0xb5b   :  { %v3463_v49 = vpop.f32.mrf.mxu1 }
 0xb5c   :  { %v3515_v33 = vadd.f32 %v6434_v55, %v3489_v1  ;;  %v3488_v31 = vadd.f32 %v3463_v49, %v5878_v23 }
 0xb5e   :  { %3837 = vst.msk [vmem:[%s6558_s14 + $0x88] sm:$0xff] %vm56_vm1, %v3515_v33  ;;  %v3514_v60 = vadd.f32 %v6434_v55, %v3488_v31 }
 0xb60   :  { %3836 = vst.msk [vmem:[%s6558_s14 + $0x80] sm:$0xff] %vm56_vm1, %v3514_v60 }

// kernel: diffusion_forward.14
= control target key start
LH: loop header
LB: loop body
LE: loop exit
PB: predicated region body
PF: predicated region fallthrough
CT: control target
= control target key end

     0   :  { %v347_v1 = vmov 0.0   ;;  %vm348_vm0 = vmmov 0   ;;  %vm178_vm1 = vcmask 261120   ;;  %s435_s1 = inlined_call_operand.vmem [shape: bf16[288,128], index: 1, kind: input, shape index: {}]   ;;  %s436_s0 = inlined_call_operand.vmem [shape: bf16[8,288], index: 0, kind: input, shape index: {}]   ;;  %s437_s2 = inlined_call_operand.vmem [shape: f32[1,128], index: 2, kind: input, shape index: {}]   ;;  %s438_s3 = inlined_call_operand.vmem [shape: f32[8,128], index: 3, kind: output, shape index: {}]  }
   0x1   :  { %v326_v0 = vld [vmem:[%s435_s1 + $0x78] sm:$0xff]   ;;  %316 = vmatprep.subr.bf16.mxu1 %v347_v1  ;;  %320 = vmatprep.mubr.msk.bf16.mxu1 %vm348_vm0, %v347_v1  ;;  %v328_v3 = vld [vmem:[%s435_s1 + $0x70] sm:$0xff]   ;;  %v330_v5 = vld [vmem:[%s435_s1 + $0x68] sm:$0xff]  }
   0x2   :  { %v327_v2 = vld [vmem:[%s435_s1 + $0x38] sm:$0xff]   ;;  %291 = vmatprep.subr.bf16.mxu0 %v326_v0  ;;  %v329_v4 = vld [vmem:[%s435_s1 + $0x30] sm:$0xff]   ;;  %v331_v6 = vld [vmem:[%s435_s1 + $0x28] sm:$0xff]  }
   0x3   :  { %292 = vmatpush3.bf16.msra.mxu0 %v327_v2  ;;  %v332_v7 = vld [vmem:[%s435_s1 + $0x60] sm:$0xff]   ;;  %v334_v9 = vld [vmem:[%s435_s1 + $0x58] sm:$0xff]   ;;  %v339_v10 = vld [vmem:[%s435_s1 + $0x88] sm:$0xff]  }
   0x4   :  { %293 = vmatprep.subr.bf16.mxu0 %v328_v3  ;;  %v333_v8 = vld [vmem:[%s435_s1 + $0x20] sm:$0xff]   ;;  %v335_v11 = vld [vmem:[%s435_s1 + $0x18] sm:$0xff]   ;;  %v336_v12 = vld [vmem:[%s435_s1 + $0x50] sm:$0xff]   ;;  %317 = vmatpush3.bf16.msra.mxu1 %v339_v10 }
   0x5   :  { %318 = vmatprep.subr.bf16.mxu1 %v347_v1  ;;  %v342_v13 = vld [vmem:[%s435_s1 + $0x80] sm:$0xff]   ;;  %v346_v15 = vld [vmem:[%s436_s0 + $0x8] ss:$0 sps:$4 sm:$0xff]   ;;  %v337_v16 = vld [vmem:[%s435_s1 + $0x10] sm:$0xff]  }
   0x6   :  { %v15_v14 = vld [vmem:[%s436_s0] sm:$0xff]  ;;  %v338_v18 = vld [vmem:[%s435_s1 + $0x48] sm:$0xff]  }
   0x7   :  { %294 = vmatpush3.bf16.msra.mxu0 %v329_v4  ;;  %v270_v17 = vcombine.high %v15_v14, %v15_v14  ;;  %v340_v19 = vld [vmem:[%s435_s1 + $0x8] sm:$0xff]   ;;  %v341_v20 = vld [vmem:[%s435_s1 + $0x40] sm:$0xff]   ;;  %v269_v22 = vcombine.low %v15_v14, %v15_v14 }
   0x8   :  { %295 = vmatprep.subr.bf16.mxu0 %v330_v5  ;;  %319 = vmatpush3.bf16.msra.mxu1 %v342_v13  ;;  %v343_v21 = vld [vmem:[%s435_s1] sm:$0xff]  }
   0x9   :  { %214 = vmatprep.mubr.bf16.mxu0 %v270_v17  ;;  %v268_v28 = vld [vmem:[%s437_s2] ss:$0 sm:$0xff] }
   0xb   :  { %296 = vmatpush3.bf16.msra.mxu0 %v331_v6  ;;  %321 = vmatmul.mubr.msk.bf16.vlgmr.msra.gmra.mxu1 %vm178_vm1, %v346_v15 }
   0xc   :  { %297 = vmatprep.subr.bf16.mxu0 %v332_v7 }
   0xf   :  { %298 = vmatpush3.bf16.msra.mxu0 %v333_v8 }
  0x10   :  { %299 = vmatprep.subr.bf16.mxu0 %v334_v9 }
  0x13   :  { %300 = vmatpush3.bf16.msra.mxu0 %v335_v11 }
  0x14   :  { %301 = vmatprep.subr.bf16.mxu0 %v336_v12 }
  0x17   :  { %302 = vmatpush3.bf16.msra.mxu0 %v337_v16 }
  0x18   :  { %303 = vmatprep.subr.bf16.mxu0 %v338_v18 }
  0x1b   :  { %304 = vmatpush3.bf16.msra.mxu0 %v340_v19 }
  0x1c   :  { %305 = vmatprep.subr.bf16.mxu0 %v341_v20 }
  0x1f   :  { %306 = vmatpush3.bf16.msra.mxu0 %v343_v21 }
  0x22   :  { %215 = vmatmul.mubr.bf16.vlgmr.msra.gmra.mxu0 %v269_v22 }
  0xcb   :  { %v256_v23 = vpop.f32.mrf.mxu1 }
  0xcd   :  { %v322_v24 = vpop.f32.mrf.mxu1 }
  0xcf   :  { %v259_v25 = vpop.f32.mrf.mxu1 }
  0xd1   :  { %v323_v26 = vpop.f32.mrf.mxu1 }
  0xe2   :  { %v307_v27 = vpop.f32.mrf.mxu0 }
  0xe4   :  { %v308_v29 = vpop.f32.mrf.mxu0 }
  0xe5   :  { %v309_v30 = vadd.f32 %v308_v29, %v307_v27 }
  0xe6   :  { %v310_v31 = vpop.f32.mrf.mxu0 }
  0xe7   :  { %v217_v32 = vadd.f32 %v309_v30, %v268_v28 }
  0xe8   :  { %v311_v33 = vpop.f32.mrf.mxu0 }
  0xe9   :  { %v257_v34 = vadd.f32 %v256_v23, %v217_v32 }
  0xeb   :  { %v262_v35 = vmax.f32 %v257_v34, 0.0 }
  0xed   :  { %263 = vst [vmem:[%s438_s3] sm:$0xff] %v262_v35 }

// kernel: diffusion_forward.15
= control target key start
LH: loop header
LB: loop body
LE: loop exit
PB: predicated region body
PF: predicated region fallthrough
CT: control target
= control target key end

     0   :  { %s417_s1 = inlined_call_operand.vmem [shape: bf16[256,128], index: 1, kind: input, shape index: {}]   ;;  %s418_s0 = inlined_call_operand.vmem [shape: bf16[32,256], index: 0, kind: input, shape index: {}]   ;;  %s419_s2 = inlined_call_operand.vmem [shape: f32[1,128], index: 2, kind: input, shape index: {}]   ;;  %s420_s3 = inlined_call_operand.vmem [shape: f32[32,128], index: 3, kind: output, shape index: {}]  }
   0x1   :  { %v300_v0 = vld [vmem:[%s417_s1 + $0x78] sm:$0xff]   ;;  %v302_v2 = vld [vmem:[%s417_s1 + $0x70] sm:$0xff]   ;;  %v304_v4 = vld [vmem:[%s417_s1 + $0x68] sm:$0xff]  }
   0x2   :  { %v301_v1 = vld [vmem:[%s417_s1 + $0x38] sm:$0xff]   ;;  %256 = vmatprep.subr.bf16.mxu0 %v300_v0  ;;  %284 = vmatprep.subr.bf16.mxu1 %v300_v0  ;;  %v303_v3 = vld [vmem:[%s417_s1 + $0x30] sm:$0xff]   ;;  %v305_v5 = vld [vmem:[%s417_s1 + $0x28] sm:$0xff]  }
   0x3   :  { %257 = vmatpush3.bf16.msra.mxu0 %v301_v1  ;;  %292 = vmatpush3.bf16.msra.mxu1 %v301_v1  ;;  %v306_v6 = vld [vmem:[%s417_s1 + $0x60] sm:$0xff]   ;;  %v308_v8 = vld [vmem:[%s417_s1 + $0x58] sm:$0xff]   ;;  %v310_v10 = vld [vmem:[%s417_s1 + $0x50] sm:$0xff]  }
   0x4   :  { %258 = vmatprep.subr.bf16.mxu0 %v302_v2  ;;  %285 = vmatprep.subr.bf16.mxu1 %v302_v2  ;;  %v307_v7 = vld [vmem:[%s417_s1 + $0x20] sm:$0xff]   ;;  %v309_v9 = vld [vmem:[%s417_s1 + $0x18] sm:$0xff]   ;;  %v311_v13 = vld [vmem:[%s417_s1 + $0x10] sm:$0xff]  }
   0x5   :  { %v318_v11 = vld [vmem:[%s418_s0 + $0x4] ss:$8 sps:$4 sm:$0xff]   ;;  %v321_v12 = vld [vmem:[%s418_s0 + $0x14] ss:$8 sps:$4 sm:$0xff]   ;;  %v316_v18 = vld [vmem:[%s418_s0] ss:$8 sps:$4 sm:$0xff]  }
   0x6   :  { %v312_v14 = vld [vmem:[%s417_s1 + $0x48] sm:$0xff]   ;;  %206 = vmatprep.mubr.bf16.mxu0 %v318_v11  ;;  %214 = vmatprep.mubr.bf16.mxu1 %v321_v12  ;;  %v314_v16 = vld [vmem:[%s417_s1 + $0x40] sm:$0xff]   ;;  %v319_v19 = vld [vmem:[%s418_s0 + $0x10] ss:$8 sps:$4 sm:$0xff]  }
   0x7   :  { %259 = vmatpush3.bf16.msra.mxu0 %v303_v3  ;;  %293 = vmatpush3.bf16.msra.mxu1 %v303_v3  ;;  %v313_v15 = vld [vmem:[%s417_s1 + $0x8] sm:$0xff]   ;;  %v315_v17 = vld [vmem:[%s417_s1] sm:$0xff]  }
   0x8   :  { %260 = vmatprep.subr.bf16.mxu0 %v304_v4  ;;  %286 = vmatprep.subr.bf16.mxu1 %v304_v4  ;;  %v235_v22 = vld [vmem:[%s419_s2] ss:$0 sm:$0xff] }
   0xb   :  { %261 = vmatpush3.bf16.msra.mxu0 %v305_v5  ;;  %294 = vmatpush3.bf16.msra.mxu1 %v305_v5 }
   0xc   :  { %262 = vmatprep.subr.bf16.mxu0 %v306_v6  ;;  %287 = vmatprep.subr.bf16.mxu1 %v306_v6 }
   0xf   :  { %263 = vmatpush3.bf16.msra.mxu0 %v307_v7  ;;  %295 = vmatpush3.bf16.msra.mxu1 %v307_v7 }
  0x10   :  { %264 = vmatprep.subr.bf16.mxu0 %v308_v8  ;;  %288 = vmatprep.subr.bf16.mxu1 %v308_v8 }
  0x13   :  { %265 = vmatpush3.bf16.msra.mxu0 %v309_v9  ;;  %296 = vmatpush3.bf16.msra.mxu1 %v309_v9 }
  0x14   :  { %266 = vmatprep.subr.bf16.mxu0 %v310_v10  ;;  %289 = vmatprep.subr.bf16.mxu1 %v310_v10 }
  0x17   :  { %267 = vmatpush3.bf16.msra.mxu0 %v311_v13  ;;  %297 = vmatpush3.bf16.msra.mxu1 %v311_v13 }
  0x18   :  { %268 = vmatprep.subr.bf16.mxu0 %v312_v14  ;;  %290 = vmatprep.subr.bf16.mxu1 %v312_v14 }
  0x1b   :  { %269 = vmatpush3.bf16.msra.mxu0 %v313_v15  ;;  %298 = vmatpush3.bf16.msra.mxu1 %v313_v15 }
  0x1c   :  { %270 = vmatprep.subr.bf16.mxu0 %v314_v16  ;;  %291 = vmatprep.subr.bf16.mxu1 %v314_v16 }
  0x1f   :  { %271 = vmatpush3.bf16.msra.mxu0 %v315_v17  ;;  %299 = vmatpush3.bf16.msra.mxu1 %v315_v17 }
  0x22   :  { %207 = vmatmul.mubr.bf16.vlgmr.msra.gmra.mxu0 %v316_v18  ;;  %215 = vmatmul.mubr.bf16.vlgmr.msra.gmra.mxu1 %v319_v19 }
  0xe2   :  { %v272_v20 = vpop.f32.mrf.mxu0  ;;  %v278_v21 = vpop.f32.mrf.mxu1 }
  0xe4   :  { %v273_v23 = vpop.f32.mrf.mxu0  ;;  %v279_v24 = vpop.f32.mrf.mxu1 }
  0xe5   :  { %v274_v25 = vadd.f32 %v273_v23, %v272_v20  ;;  %v280_v26 = vadd.f32 %v279_v24, %v278_v21 }
  0xe6   :  { %v275_v27 = vpop.f32.mrf.mxu0  ;;  %v281_v28 = vpop.f32.mrf.mxu1 }
  0xe7   :  { %v209_v29 = vadd.f32 %v274_v25, %v235_v22  ;;  %v217_v30 = vadd.f32 %v280_v26, %v235_v22 }
  0xe8   :  { %v276_v31 = vpop.f32.mrf.mxu0  ;;  %v282_v32 = vpop.f32.mrf.mxu1 }
  0xe9   :  { %v223_v33 = vmax.f32 %v209_v29, 0.0  ;;  %v225_v34 = vmax.f32 %v217_v30, 0.0  ;;  %v277_v35 = vadd.f32 %v276_v31, %v275_v27  ;;  %v283_v36 = vadd.f32 %v282_v32, %v281_v28 }
  0xeb   :  { %227 = vst [vmem:[%s420_s3] sm:$0xff] %v223_v33  ;;  %229 = vst [vmem:[%s420_s3 + $0x10] sm:$0xff] %v225_v34  ;;  %v212_v37 = vadd.f32 %v277_v35, %v235_v22  ;;  %v220_v38 = vadd.f32 %v283_v36, %v235_v22 }
  0xed   :  { %v224_v39 = vmax.f32 %v212_v37, 0.0  ;;  %v226_v40 = vmax.f32 %v220_v38, 0.0 }
  0xef   :  { %228 = vst [vmem:[%s420_s3 + $0x8] sm:$0xff] %v224_v39  ;;  %230 = vst [vmem:[%s420_s3 + $0x18] sm:$0xff] %v226_v40 }

// kernel: diffusion_forward.16
= control target key start
LH: loop header
LB: loop body
LE: loop exit
PB: predicated region body
PF: predicated region fallthrough
CT: control target
= control target key end

     0   :  { %s499_s1 = inlined_call_operand.vmem [shape: bf16[128,128], index: 1, kind: input, shape index: {}]   ;;  %s500_s0 = inlined_call_operand.vmem [shape: bf16[128,128], index: 0, kind: input, shape index: {}]   ;;  %s501_s2 = inlined_call_operand.vmem [shape: f32[1,128], index: 2, kind: input, shape index: {}]   ;;  %s502_s3 = inlined_call_operand.vmem [shape: f32[128,128], index: 3, kind: output, shape index: {}]  }
   0x1   :  { %v364_v0 = vld [vmem:[%s499_s1 + $0x38] sm:$0xff]   ;;  %v365_v1 = vld [vmem:[%s499_s1 + $0x30] sm:$0xff]   ;;  %v366_v2 = vld [vmem:[%s499_s1 + $0x28] sm:$0xff]  }
   0x2   :  { %316 = vmatprep.subr.bf16.mxu0 %v364_v0  ;;  %348 = vmatprep.subr.bf16.mxu1 %v364_v0  ;;  %v367_v3 = vld [vmem:[%s499_s1 + $0x20] sm:$0xff]   ;;  %v368_v6 = vld [vmem:[%s499_s1 + $0x18] sm:$0xff]   ;;  %v369_v7 = vld [vmem:[%s499_s1 + $0x10] sm:$0xff]  }
   0x3   :  { %317 = vmatpush3.bf16.msra.mxu0 %v364_v0  ;;  %356 = vmatpush3.bf16.msra.mxu1 %v364_v0  ;;  %v372_v4 = vld [vmem:[%s500_s0] sm:$0xff]   ;;  %v370_v8 = vld [vmem:[%s499_s1 + $0x8] sm:$0xff]   ;;  %v376_v12 = vld [vmem:[%s500_s0 + $0x10] sm:$0xff]  }
   0x4   :  { %318 = vmatprep.subr.bf16.mxu0 %v365_v1  ;;  %349 = vmatprep.subr.bf16.mxu1 %v365_v1  ;;  %v373_v5 = vld [vmem:[%s500_s0 + $0x20] sm:$0xff]   ;;  %v374_v10 = vld [vmem:[%s500_s0 + $0x8] sm:$0xff]   ;;  %v377_v13 = vld [vmem:[%s500_s0 + $0x30] sm:$0xff]  }
   0x5   :  { %332 = vmatprep.mubr.bf16.mxu0 %v372_v4  ;;  %340 = vmatprep.mubr.bf16.mxu1 %v373_v5  ;;  %v371_v9 = vld [vmem:[%s499_s1] sm:$0xff]   ;;  %v375_v11 = vld [vmem:[%s500_s0 + $0x28] sm:$0xff]   ;;  %v378_v14 = vld [vmem:[%s500_s0 + $0x18] sm:$0xff]  }
   0x6   :  { %v379_v15 = vld [vmem:[%s500_s0 + $0x38] sm:$0xff]   ;;  %v283_v16 = vld [vmem:[%s501_s2] ss:$0 sm:$0xff] }
   0x7   :  { %319 = vmatpush3.bf16.msra.mxu0 %v365_v1  ;;  %357 = vmatpush3.bf16.msra.mxu1 %v365_v1 }
   0x8   :  { %320 = vmatprep.subr.bf16.mxu0 %v366_v2  ;;  %350 = vmatprep.subr.bf16.mxu1 %v366_v2 }
   0xb   :  { %321 = vmatpush3.bf16.msra.mxu0 %v366_v2  ;;  %358 = vmatpush3.bf16.msra.mxu1 %v366_v2 }
   0xc   :  { %322 = vmatprep.subr.bf16.mxu0 %v367_v3  ;;  %351 = vmatprep.subr.bf16.mxu1 %v367_v3 }
   0xf   :  { %323 = vmatpush3.bf16.msra.mxu0 %v367_v3  ;;  %359 = vmatpush3.bf16.msra.mxu1 %v367_v3 }
  0x10   :  { %324 = vmatprep.subr.bf16.mxu0 %v368_v6  ;;  %352 = vmatprep.subr.bf16.mxu1 %v368_v6 }
  0x13   :  { %325 = vmatpush3.bf16.msra.mxu0 %v368_v6  ;;  %360 = vmatpush3.bf16.msra.mxu1 %v368_v6 }
  0x14   :  { %326 = vmatprep.subr.bf16.mxu0 %v369_v7  ;;  %353 = vmatprep.subr.bf16.mxu1 %v369_v7 }
  0x17   :  { %327 = vmatpush3.bf16.msra.mxu0 %v369_v7  ;;  %361 = vmatpush3.bf16.msra.mxu1 %v369_v7 }
  0x18   :  { %328 = vmatprep.subr.bf16.mxu0 %v370_v8  ;;  %354 = vmatprep.subr.bf16.mxu1 %v370_v8 }
  0x1b   :  { %329 = vmatpush3.bf16.msra.mxu0 %v370_v8  ;;  %362 = vmatpush3.bf16.msra.mxu1 %v370_v8 }
  0x1c   :  { %330 = vmatprep.subr.bf16.mxu0 %v371_v9  ;;  %355 = vmatprep.subr.bf16.mxu1 %v371_v9 }
  0x1f   :  { %331 = vmatpush3.bf16.msra.mxu0 %v371_v9  ;;  %363 = vmatpush3.bf16.msra.mxu1 %v371_v9 }
  0x22   :  { %333 = vmatmul.mubr.bf16.vlgmr.msra.gmra.mxu0 %v374_v10  ;;  %341 = vmatmul.mubr.bf16.vlgmr.msra.gmra.mxu1 %v375_v11 }
  0x23   :  { %336 = vmatprep.mubr.bf16.mxu0 %v376_v12  ;;  %344 = vmatprep.mubr.bf16.mxu1 %v377_v13 }
  0x2a   :  { %337 = vmatmul.mubr.bf16.gmra.mxu0 %v378_v14  ;;  %345 = vmatmul.mubr.bf16.gmra.mxu1 %v379_v15 }
  0xe2   :  { %v334_v17 = vpop.f32.mrf.mxu0  ;;  %v342_v18 = vpop.f32.mrf.mxu1 }
  0xe3   :  { %v193_v19 = vadd.f32 %v334_v17, %v283_v16  ;;  %v225_v20 = vadd.f32 %v342_v18, %v283_v16 }
  0xe4   :  { %v184_v21 = vpop.f32.mrf.mxu0  ;;  %v216_v22 = vpop.f32.mrf.mxu1 }
  0xe5   :  { %v249_v23 = vmax.f32 %v193_v19, 0.0  ;;  %v257_v24 = vmax.f32 %v225_v20, 0.0  ;;  %v185_v25 = vadd.f32 %v283_v16, %v184_v21  ;;  %v217_v26 = vadd.f32 %v283_v16, %v216_v22 }
  0xe6   :  { %v335_v27 = vpop.f32.mrf.mxu0  ;;  %v343_v28 = vpop.f32.mrf.mxu1 }
  0xe7   :  { %265 = vst [vmem:[%s502_s3 + $0x10] sm:$0xff] %v249_v23  ;;  %273 = vst [vmem:[%s502_s3 + $0x50] sm:$0xff] %v257_v24  ;;  %v247_v29 = vmax.f32 %v185_v25, 0.0  ;;  %v255_v30 = vmax.f32 %v217_v26, 0.0  ;;  %v196_v31 = vadd.f32 %v335_v27, %v283_v16  ;;  %v228_v32 = vadd.f32 %v343_v28, %v283_v16 }
  0xe8   :  { %v187_v33 = vpop.f32.mrf.mxu0  ;;  %v219_v34 = vpop.f32.mrf.mxu1 }
  0xe9   :  { %263 = vst [vmem:[%s502_s3] sm:$0xff] %v247_v29  ;;  %271 = vst [vmem:[%s502_s3 + $0x40] sm:$0xff] %v255_v30  ;;  %v250_v35 = vmax.f32 %v196_v31, 0.0  ;;  %v258_v36 = vmax.f32 %v228_v32, 0.0  ;;  %v188_v37 = vadd.f32 %v283_v16, %v187_v33  ;;  %v220_v38 = vadd.f32 %v283_v16, %v219_v34 }
  0xea   :  { %v338_v39 = vpop.f32.mrf.mxu0  ;;  %v346_v40 = vpop.f32.mrf.mxu1 }
  0xeb   :  { %266 = vst [vmem:[%s502_s3 + $0x18] sm:$0xff] %v250_v35  ;;  %274 = vst [vmem:[%s502_s3 + $0x58] sm:$0xff] %v258_v36  ;;  %v248_v41 = vmax.f32 %v188_v37, 0.0  ;;  %v256_v42 = vmax.f32 %v220_v38, 0.0  ;;  %v209_v43 = vadd.f32 %v338_v39, %v283_v16  ;;  %v241_v44 = vadd.f32 %v346_v40, %v283_v16 }
  0xec   :  { %v200_v45 = vpop.f32.mrf.mxu0  ;;  %v232_v46 = vpop.f32.mrf.mxu1 }
  0xed   :  { %264 = vst [vmem:[%s502_s3 + $0x8] sm:$0xff] %v248_v41  ;;  %272 = vst [vmem:[%s502_s3 + $0x48] sm:$0xff] %v256_v42  ;;  %v253_v47 = vmax.f32 %v209_v43, 0.0  ;;  %v261_v48 = vmax.f32 %v241_v44, 0.0  ;;  %v201_v49 = vadd.f32 %v283_v16, %v200_v45  ;;  %v233_v50 = vadd.f32 %v283_v16, %v232_v46 }
  0xee   :  { %v339_v51 = vpop.f32.mrf.mxu0  ;;  %v347_v52 = vpop.f32.mrf.mxu1 }
  0xef   :  { %269 = vst [vmem:[%s502_s3 + $0x30] sm:$0xff] %v253_v47  ;;  %277 = vst [vmem:[%s502_s3 + $0x70] sm:$0xff] %v261_v48  ;;  %v251_v53 = vmax.f32 %v201_v49, 0.0  ;;  %v259_v54 = vmax.f32 %v233_v50, 0.0  ;;  %v212_v55 = vadd.f32 %v339_v51, %v283_v16  ;;  %v244_v56 = vadd.f32 %v347_v52, %v283_v16 }
  0xf0   :  { %v203_v57 = vpop.f32.mrf.mxu0  ;;  %v235_v58 = vpop.f32.mrf.mxu1 }
  0xf1   :  { %267 = vst [vmem:[%s502_s3 + $0x20] sm:$0xff] %v251_v53  ;;  %275 = vst [vmem:[%s502_s3 + $0x60] sm:$0xff] %v259_v54  ;;  %v254_v59 = vmax.f32 %v212_v55, 0.0  ;;  %v262_v60 = vmax.f32 %v244_v56, 0.0  ;;  %v204_v61 = vadd.f32 %v283_v16, %v203_v57  ;;  %v236_v62 = vadd.f32 %v283_v16, %v235_v58 }
  0xf3   :  { %270 = vst [vmem:[%s502_s3 + $0x38] sm:$0xff] %v254_v59  ;;  %278 = vst [vmem:[%s502_s3 + $0x78] sm:$0xff] %v262_v60  ;;  %v252_v63 = vmax.f32 %v204_v61, 0.0  ;;  %v260_v0 = vmax.f32 %v236_v62, 0.0 }
  0xf5   :  { %268 = vst [vmem:[%s502_s3 + $0x28] sm:$0xff] %v252_v63  ;;  %276 = vst [vmem:[%s502_s3 + $0x68] sm:$0xff] %v260_v0 }

// kernel: diffusion_forward.17
= control target key start
LH: loop header
LB: loop body
LE: loop exit
PB: predicated region body
PF: predicated region fallthrough
CT: control target
= control target key end

     0   :  { %s796_s12 = smov 0   ;;  %s934_s0 = inlined_call_operand.vmem [shape: bf16[512,64], index: 0, kind: input, shape index: {}]   ;;  %s935_s1 = inlined_call_operand.vmem [shape: bf16[64,128], index: 1, kind: input, shape index: {}]   ;;  %s936_s2 = inlined_call_operand.vmem [shape: f32[1,128], index: 2, kind: input, shape index: {}]   ;;  %s937_s3 = inlined_call_operand.vmem [shape: f32[512,128], index: 3, kind: output, shape index: {}]  }
   0x1 LB: > { %s624_s13 = sadd.s32 4294967295, %s774_s12   ;;  %p628_p0 = scmp.ge.s32.totalorder %s774_s12, 1  ;;  %s774_s12 = sphi %s796_s12, %s13_s12  }
   0x2   : > { %p138_p1 = scmp.lt.s32.totalorder %s774_s12, 3 }
   0x4   : > { %p139_p2 = pnand %p628_p0, %p138_p1 }
   0x5   : > { %s629_s16 = sshll.u32 (!%p139_p2), %s624_s13, 5 }
   0x6   : > { %142 = sbr.rel (%p139_p2) target bundleno = 254 (0xfe), region = 32  ;;  %p163_p3 = scmp.lt.s32.totalorder (!%p139_p2), %s629_s16, 63 }
   0xb   : > { %v748_v0 = vld [vmem:[%s935_s1 + $0x18] sm:$0xff]   ;;  %v749_v1 = vld [vmem:[%s935_s1 + $0x10] sm:$0xff]   ;;  %s939_s16 = smov (!%p163_p3, %s629_s16), 63  ;;  %v750_v2 = vld [vmem:[%s935_s1 + $0x8] sm:$0xff]   ;;  %vm326_vm0 = vcmask 523264  }
   0xc   : > { %692 = vmatprep.subr.bf16.mxu0 %v748_v0  ;;  %732 = vmatprep.subr.bf16.mxu1 %v748_v0  ;;  %s630_s21 = sshll.u32 %s939_s16, 2  ;;  %v751_v3 = vld [vmem:[%s935_s1] sm:$0xff]   ;;  %s632_s27 = sshll.u32 %s939_s16, 3 }
   0xd   : > { %693 = vmatpush3.bf16.msra.mxu0 %v748_v0  ;;  %736 = vmatpush3.bf16.msra.mxu1 %v748_v0  ;;  %s822_s26 = scalar_lea.vmem %s934_s0, %s630_s21  ;;  %v860_v20 = vld [vmem:[%s936_s2] ss:$0 sm:$0xff]  ;;  %s865_s5 = scalar_lea.vmem %s937_s3, %s632_s27 }
   0xe   : > { %694 = vmatprep.subr.bf16.mxu0 %v749_v1  ;;  %733 = vmatprep.subr.bf16.mxu1 %v749_v1  ;;  %v752_v4 = vld [vmem:[%s822_s26] sm:$0xff]   ;;  %v754_v6 = vld [vmem:[%s822_s26 + $0x8] sm:$0xff]   ;;  %v756_v8 = vld [vmem:[%s822_s26 + $0x10] sm:$0xff]  }
   0xf   : > { %v753_v5 = vld [vmem:[%s822_s26 + $0x40] sm:$0xff]   ;;  %700 = vmatprep.mubr.msk.bf16.mxu0 %vm326_vm0, %v752_v4  ;;  %v755_v7 = vld [vmem:[%s822_s26 + $0x48] sm:$0xff]   ;;  %v757_v9 = vld [vmem:[%s822_s26 + $0x50] sm:$0xff]  }
  0x10   : > { %716 = vmatprep.mubr.msk.bf16.mxu1 %vm326_vm0, %v753_v5  ;;  %v758_v10 = vld [vmem:[%s822_s26 + $0x18] sm:$0xff]   ;;  %v760_v12 = vld [vmem:[%s822_s26 + $0x20] sm:$0xff]   ;;  %v762_v14 = vld [vmem:[%s822_s26 + $0x28] sm:$0xff]  }
  0x11   : > { %695 = vmatpush3.bf16.msra.mxu0 %v749_v1  ;;  %737 = vmatpush3.bf16.msra.mxu1 %v749_v1  ;;  %v759_v11 = vld [vmem:[%s822_s26 + $0x58] sm:$0xff]   ;;  %v761_v13 = vld [vmem:[%s822_s26 + $0x60] sm:$0xff]   ;;  %v763_v15 = vld [vmem:[%s822_s26 + $0x68] sm:$0xff]  }
  0x12   : > { %696 = vmatprep.subr.bf16.mxu0 %v750_v2  ;;  %734 = vmatprep.subr.bf16.mxu1 %v750_v2  ;;  %v764_v16 = vld [vmem:[%s822_s26 + $0x30] sm:$0xff]   ;;  %v766_v18 = vld [vmem:[%s822_s26 + $0x38] sm:$0xff]  }
  0x13   : > { %v765_v17 = vld [vmem:[%s822_s26 + $0x70] sm:$0xff]   ;;  %v767_v19 = vld [vmem:[%s822_s26 + $0x78] sm:$0xff]  }
  0x15   : > { %697 = vmatpush3.bf16.msra.mxu0 %v750_v2  ;;  %738 = vmatpush3.bf16.msra.mxu1 %v750_v2 }
  0x16   : > { %698 = vmatprep.subr.bf16.mxu0 %v751_v3  ;;  %735 = vmatprep.subr.bf16.mxu1 %v751_v3 }
  0x19   : > { %699 = vmatpush3.bf16.msra.mxu0 %v751_v3  ;;  %739 = vmatpush3.bf16.msra.mxu1 %v751_v3 }
  0x1c   : > { %701 = vmatmul.mubr.msk.bf16.vlgmr.msra.gmra.mxu0 %vm326_vm0, %v754_v6  ;;  %717 = vmatmul.mubr.msk.bf16.vlgmr.msra.gmra.mxu1 %vm326_vm0, %v755_v7 }
  0x1d   : > { %704 = vmatprep.mubr.msk.bf16.mxu0 %vm326_vm0, %v756_v8  ;;  %720 = vmatprep.mubr.msk.bf16.mxu1 %vm326_vm0, %v757_v9 }
  0x24   : > { %705 = vmatmul.mubr.msk.bf16.gmra.mxu0 %vm326_vm0, %v758_v10  ;;  %721 = vmatmul.mubr.msk.bf16.gmra.mxu1 %vm326_vm0, %v759_v11 }
  0x25   : > { %708 = vmatprep.mubr.msk.bf16.mxu0 %vm326_vm0, %v760_v12  ;;  %724 = vmatprep.mubr.msk.bf16.mxu1 %vm326_vm0, %v761_v13 }
  0x2c   : > { %709 = vmatmul.mubr.msk.bf16.gmra.mxu0 %vm326_vm0, %v762_v14  ;;  %725 = vmatmul.mubr.msk.bf16.gmra.mxu1 %vm326_vm0, %v763_v15 }
  0x2d   : > { %712 = vmatprep.mubr.msk.bf16.mxu0 %vm326_vm0, %v764_v16  ;;  %728 = vmatprep.mubr.msk.bf16.mxu1 %vm326_vm0, %v765_v17 }
  0x34   : > { %713 = vmatmul.mubr.msk.bf16.gmra.mxu0 %vm326_vm0, %v766_v18  ;;  %729 = vmatmul.mubr.msk.bf16.gmra.mxu1 %vm326_vm0, %v767_v19 }
  0xdc   : > { %v702_v21 = vpop.f32.mrf.mxu0  ;;  %v718_v22 = vpop.f32.mrf.mxu1 }
  0xdd   : > { %v418_v23 = vadd.f32 %v702_v21, %v860_v20  ;;  %v482_v24 = vadd.f32 %v718_v22, %v860_v20 }
  0xde   : > { %v409_v25 = vpop.f32.mrf.mxu0  ;;  %v473_v26 = vpop.f32.mrf.mxu1 }
  0xdf   : > { %538 = vst [vmem:[%s865_s5 + $0x10] sm:$0xff] %v418_v23  ;;  %554 = vst [vmem:[%s865_s5 + $0x90] sm:$0xff] %v482_v24  ;;  %v410_v27 = vadd.f32 %v860_v20, %v409_v25  ;;  %v474_v28 = vadd.f32 %v860_v20, %v473_v26 }
  0xe0   : > { %v703_v29 = vpop.f32.mrf.mxu0  ;;  %v719_v30 = vpop.f32.mrf.mxu1 }
  0xe1   : > { %536 = vst [vmem:[%s865_s5] sm:$0xff] %v410_v27  ;;  %552 = vst [vmem:[%s865_s5 + $0x80] sm:$0xff] %v474_v28  ;;  %v421_v31 = vadd.f32 %v703_v29, %v860_v20  ;;  %v485_v32 = vadd.f32 %v719_v30, %v860_v20 }
  0xe2   : > { %v412_v33 = vpop.f32.mrf.mxu0  ;;  %v476_v34 = vpop.f32.mrf.mxu1 }
  0xe3   : > { %539 = vst [vmem:[%s865_s5 + $0x18] sm:$0xff] %v421_v31  ;;  %555 = vst [vmem:[%s865_s5 + $0x98] sm:$0xff] %v485_v32  ;;  %v413_v35 = vadd.f32 %v860_v20, %v412_v33  ;;  %v477_v36 = vadd.f32 %v860_v20, %v476_v34 }
  0xe4   : > { %v706_v37 = vpop.f32.mrf.mxu0  ;;  %v722_v38 = vpop.f32.mrf.mxu1 }
  0xe5   : > { %537 = vst [vmem:[%s865_s5 + $0x8] sm:$0xff] %v413_v35  ;;  %553 = vst [vmem:[%s865_s5 + $0x88] sm:$0xff] %v477_v36  ;;  %v434_v39 = vadd.f32 %v706_v37, %v860_v20  ;;  %v498_v40 = vadd.f32 %v722_v38, %v860_v20 }
  0xe6   : > { %v425_v41 = vpop.f32.mrf.mxu0  ;;  %v489_v42 = vpop.f32.mrf.mxu1 }
  0xe7   : > { %542 = vst [vmem:[%s865_s5 + $0x30] sm:$0xff] %v434_v39  ;;  %558 = vst [vmem:[%s865_s5 + $0xb0] sm:$0xff] %v498_v40  ;;  %v426_v43 = vadd.f32 %v860_v20, %v425_v41  ;;  %v490_v44 = vadd.f32 %v860_v20, %v489_v42 }
  0xe8   : > { %v707_v45 = vpop.f32.mrf.mxu0  ;;  %v723_v46 = vpop.f32.mrf.mxu1 }
  0xe9   : > { %540 = vst [vmem:[%s865_s5 + $0x20] sm:$0xff] %v426_v43  ;;  %556 = vst [vmem:[%s865_s5 + $0xa0] sm:$0xff] %v490_v44  ;;  %v437_v47 = vadd.f32 %v707_v45, %v860_v20  ;;  %v501_v48 = vadd.f32 %v723_v46, %v860_v20 }
  0xea   : > { %v428_v49 = vpop.f32.mrf.mxu0  ;;  %v492_v50 = vpop.f32.mrf.mxu1 }
  0xeb   : > { %543 = vst [vmem:[%s865_s5 + $0x38] sm:$0xff] %v437_v47  ;;  %559 = vst [vmem:[%s865_s5 + $0xb8] sm:$0xff] %v501_v48  ;;  %v429_v51 = vadd.f32 %v860_v20, %v428_v49  ;;  %v493_v52 = vadd.f32 %v860_v20, %v492_v50 }
  0xec   : > { %v710_v53 = vpop.f32.mrf.mxu0  ;;  %v726_v54 = vpop.f32.mrf.mxu1 }
  0xed   : > { %541 = vst [vmem:[%s865_s5 + $0x28] sm:$0xff] %v429_v51  ;;  %557 = vst [vmem:[%s865_s5 + $0xa8] sm:$0xff] %v493_v52  ;;  %v450_v55 = vadd.f32 %v710_v53, %v860_v20  ;;  %v514_v56 = vadd.f32 %v726_v54, %v860_v20 }
  0xee   : > { %v441_v57 = vpop.f32.mrf.mxu0  ;;  %v505_v58 = vpop.f32.mrf.mxu1 }
  0xef   : > { %546 = vst [vmem:[%s865_s5 + $0x50] sm:$0xff] %v450_v55  ;;  %562 = vst [vmem:[%s865_s5 + $0xd0] sm:$0xff] %v514_v56  ;;  %v442_v59 = vadd.f32 %v860_v20, %v441_v57  ;;  %v506_v60 = vadd.f32 %v860_v20, %v505_v58 }
  0xf0   : > { %v711_v61 = vpop.f32.mrf.mxu0  ;;  %v727_v62 = vpop.f32.mrf.mxu1 }
  0xf1   : > { %544 = vst [vmem:[%s865_s5 + $0x40] sm:$0xff] %v442_v59  ;;  %560 = vst [vmem:[%s865_s5 + $0xc0] sm:$0xff] %v506_v60  ;;  %v453_v63 = vadd.f32 %v711_v61, %v860_v20  ;;  %v517_v0 = vadd.f32 %v727_v62, %v860_v20 }
  0xf2   : > { %v444_v1 = vpop.f32.mrf.mxu0  ;;  %v508_v2 = vpop.f32.mrf.mxu1 }
  0xf3   : > { %547 = vst [vmem:[%s865_s5 + $0x58] sm:$0xff] %v453_v63  ;;  %563 = vst [vmem:[%s865_s5 + $0xd8] sm:$0xff] %v517_v0  ;;  %v445_v3 = vadd.f32 %v860_v20, %v444_v1  ;;  %v509_v4 = vadd.f32 %v860_v20, %v508_v2 }
  0xf4   : > { %v714_v5 = vpop.f32.mrf.mxu0  ;;  %v730_v6 = vpop.f32.mrf.mxu1 }
  0xf5   : > { %545 = vst [vmem:[%s865_s5 + $0x48] sm:$0xff] %v445_v3  ;;  %561 = vst [vmem:[%s865_s5 + $0xc8] sm:$0xff] %v509_v4  ;;  %v466_v7 = vadd.f32 %v714_v5, %v860_v20  ;;  %v530_v8 = vadd.f32 %v730_v6, %v860_v20 }
  0xf6   : > { %v457_v9 = vpop.f32.mrf.mxu0  ;;  %v521_v10 = vpop.f32.mrf.mxu1 }
  0xf7   : > { %550 = vst [vmem:[%s865_s5 + $0x70] sm:$0xff] %v466_v7  ;;  %566 = vst [vmem:[%s865_s5 + $0xf0] sm:$0xff] %v530_v8  ;;  %v458_v11 = vadd.f32 %v860_v20, %v457_v9  ;;  %v522_v12 = vadd.f32 %v860_v20, %v521_v10 }
  0xf8   : > { %v715_v13 = vpop.f32.mrf.mxu0  ;;  %v731_v14 = vpop.f32.mrf.mxu1 }
  0xf9   : > { %548 = vst [vmem:[%s865_s5 + $0x60] sm:$0xff] %v458_v11  ;;  %564 = vst [vmem:[%s865_s5 + $0xe0] sm:$0xff] %v522_v12  ;;  %v469_v15 = vadd.f32 %v715_v13, %v860_v20  ;;  %v533_v16 = vadd.f32 %v731_v14, %v860_v20 }
  0xfa   : > { %v460_v17 = vpop.f32.mrf.mxu0  ;;  %v524_v18 = vpop.f32.mrf.mxu1 }
  0xfb   : > { %551 = vst [vmem:[%s865_s5 + $0x78] sm:$0xff] %v469_v15  ;;  %567 = vst [vmem:[%s865_s5 + $0xf8] sm:$0xff] %v533_v16  ;;  %v461_v19 = vadd.f32 %v860_v20, %v460_v17  ;;  %v525_v21 = vadd.f32 %v860_v20, %v524_v18 }
  0xfd   : > { %549 = vst [vmem:[%s865_s5 + $0x68] sm:$0xff] %v461_v19  ;;  %565 = vst [vmem:[%s865_s5 + $0xe8] sm:$0xff] %v525_v21 }
  0xfe PF: > { %s13_s12 = sadd.s32 1, %s774_s12  }
  0xff   : > { %p10_p4 = scmp.ge.s32.totalorder %s13_s12, 4  }
 0x101   :  { %12 = sbr.rel (!%p10_p4) target bundleno = 1 (0x1), region = 62 }

</bundles_post_ra>
